<compile_context>
chip_gen: v7x
topology: tpu7x:2x2x1
jax: 0.10.0
libtpu: 0.0.40
codegen_flags: <defaults>
</compile_context>

<pallas_src>
import functools

import jax
import jax.numpy as jnp
from jax.experimental import pallas as pl
from jax.experimental.pallas import tpu as pltpu

BN_EPS = 1e-5                    # PyTorch BatchNorm2d default eps
LANE = 128                       # TPU lane width: channels padded to this
SUBLANE = 8                      # TPU sublane width: conv width padded to this
VMEM_LIMIT = 32 * 1024 * 1024    # explicit scoped-VMEM cap (safe on v5e/v6e/v7x)
ROW_TILE_CAP = 1024              # max rows per block for the BN+ReLU kernel


def _round_up(v, m):
    return ((v + m - 1) // m) * m


def _pick_row_tile(m, cap=ROW_TILE_CAP):
    """Largest row tile <= cap that divides m (m is always a multiple of 8)."""
    if m <= cap:
        return m
    for t in range(cap - cap % SUBLANE, SUBLANE - 1, -SUBLANE):
        if m % t == 0:
            return t
    return m


# ------------------------------ Pallas kernels ----------------------------- #
def _conv_stats_kernel(x_ref, w_ref, y_ref, ssum_ref, ssq_ref):
    """3x3 conv as 9 shifted MXU matmuls + per-channel sum / sum-of-squares.

    x_ref    : [1, H+2, Wp+2, Cp]  bf16  spatially padded input (one image)
    w_ref    : [3, 3, Cp, Cop]     bf16  conv weights (channel padded)
    y_ref    : [1, H, Wp, Cop]     f32   raw (pre-BN) conv output
    ssum_ref : [1, 1, Cop]         f32   per-image partial sum of y
    ssq_ref  : [1, 1, Cop]         f32   per-image partial sum of y*y
    """
    _, H, Wp, Cop = y_ref.shape
    Cp = x_ref.shape[-1]

    acc = jnp.zeros((H * Wp, Cop), jnp.float32)
    for dy in range(3):
        for dx in range(3):
            # In-kernel im2col: strided load of the shifted window, then a
            # lane-dense bf16 MXU matmul with f32 accumulation.
            patch = x_ref[0, dy:dy + H, dx:dx + Wp, :].reshape(H * Wp, Cp)
            acc = acc + jnp.dot(patch, w_ref[dy, dx],
                                preferred_element_type=jnp.float32)

    y_ref[...] = acc.reshape(1, H, Wp, Cop)

    # Single-pass BN statistics (sum / sumsq); reduced across images in the
    # wrapper so the grid axis stays "parallel" (no revisited accumulator).
    ssum_ref[...] = jnp.sum(acc, axis=0, keepdims=True).reshape(1, 1, Cop)
    ssq_ref[...] = jnp.sum(acc * acc, axis=0, keepdims=True).reshape(1, 1, Cop)


def _bn_relu_kernel(y_ref, scale_ref, shift_ref, o_ref):
    """Apply per-channel affine (folded BN mean/var) + ReLU, all in f32."""
    o_ref[...] = jnp.maximum(y_ref[...] * scale_ref[...] + shift_ref[...], 0.0)


# ------------------------- conv + BN + ReLU wrapper ------------------------ #
def _conv_bn_relu(x, w):
    """x: [N, H, W, Cin] f32, w: [3, 3, Cin, Cout] f32 -> [N, H, W, Cout] f32."""
    N, H, W, Cin = x.shape
    Cout = w.shape[-1]
    Cp = _round_up(Cin, LANE)      # lane-dense K dimension
    Cop = _round_up(Cout, LANE)    # lane-dense output stores / MXU columns
    Wp = _round_up(W, SUBLANE)     # sublane-aligned conv width

    # Spatial halo of 1, width padded to Wp, channels padded to a lane
    # multiple, cast to bf16 (MXU inputs); only ~1x activation HBM traffic,
    # no 9x im2col expansion.
    xp = jnp.pad(x, ((0, 0), (1, 1), (1, 1 + Wp - W), (0, Cp - Cin)))
    xp = xp.astype(jnp.bfloat16)
    wp = jnp.pad(w, ((0, 0), (0, 0), (0, Cp - Cin), (0, Cop - Cout)))
    wp = wp.astype(jnp.bfloat16)

    conv_flops = 2 * N * H * Wp * 9 * Cp * Cop
    conv_bytes = (xp.size * 2 + wp.size * 2
                  + N * H * Wp * Cop * 4 + 2 * N * Cop * 4)

    # TODO(synk): for very large spatial extents add H-tiling with halo rows
    # (manual DMA or shifted row views); the current grid tiles per image.
    y, ssum, ssq = pl.pallas_call(
        _conv_stats_kernel,
        out_shape=(
            jax.ShapeDtypeStruct((N, H, Wp, Cop), jnp.float32),
            jax.ShapeDtypeStruct((N, 1, Cop), jnp.float32),
            jax.ShapeDtypeStruct((N, 1, Cop), jnp.float32),
        ),
        grid=(N,),
        in_specs=[
            pl.BlockSpec((1, H + 2, Wp + 2, Cp), lambda n: (n, 0, 0, 0)),
            pl.BlockSpec((3, 3, Cp, Cop), lambda n: (0, 0, 0, 0)),
        ],
        out_specs=[
            pl.BlockSpec((1, H, Wp, Cop), lambda n: (n, 0, 0, 0)),
            pl.BlockSpec((1, 1, Cop), lambda n: (n, 0, 0)),
            pl.BlockSpec((1, 1, Cop), lambda n: (n, 0, 0)),
        ],
        compiler_params=pltpu.CompilerParams(
            dimension_semantics=("parallel",),
            vmem_limit_bytes=VMEM_LIMIT),
        cost_estimate=pl.CostEstimate(
            flops=conv_flops, transcendentals=0, bytes_accessed=conv_bytes),
    )(xp, wp)

    # Tiny per-channel reduction: BatchNorm batch stats (biased variance, as
    # PyTorch uses when normalizing in training mode).  gamma=1, beta=0, and
    # running stats are never updated (forward of a freshly built module).
    total = jnp.sum(ssum, axis=(0, 1))
    total_sq = jnp.sum(ssq, axis=(0, 1))
    if Wp != W:
        # Remove the contribution of the width-padding garbage columns.
        extra = y[:, :, W:, :]
        total = total - jnp.sum(extra, axis=(0, 1, 2))
        total_sq = total_sq - jnp.sum(extra * extra, axis=(0, 1, 2))
    cnt = float(N * H * W)
    mean = total / cnt
    var = jnp.maximum(total_sq / cnt - mean * mean, 0.0)
    scale = jax.lax.rsqrt(var + BN_EPS)       # gamma = 1
    shift = -mean * scale                      # beta = 0

    # Pass 2: M-tiled, pipelined, "parallel" normalize + ReLU (f32 epilogue).
    M = N * H * Wp
    TM = _pick_row_tile(M)
    out2 = pl.pallas_call(
        _bn_relu_kernel,
        out_shape=jax.ShapeDtypeStruct((M, Cop), jnp.float32),
        grid=(M // TM,),
        in_specs=[
            pl.BlockSpec((TM, Cop), lambda i: (i, 0)),
            pl.BlockSpec((1, Cop), lambda i: (0, 0)),
            pl.BlockSpec((1, Cop), lambda i: (0, 0)),
        ],
        out_specs=pl.BlockSpec((TM, Cop), lambda i: (i, 0)),
        compiler_params=pltpu.CompilerParams(
            dimension_semantics=("parallel",),
            vmem_limit_bytes=VMEM_LIMIT),
        cost_estimate=pl.CostEstimate(
            flops=2 * M * Cop, transcendentals=0,
            bytes_accessed=2 * M * Cop * 4 + 2 * Cop * 4),
    )(y.reshape(M, Cop), scale.reshape(1, Cop), shift.reshape(1, Cop))

    return out2.reshape(N, H, Wp, Cop)[:, :, :W, :Cout]


def _conv_block(x_nhwc, block_params):
    # NOTE: the two conv layers cannot be fused into one kernel because the
    # first BN needs global batch statistics before the second conv can run.
    w1, w2 = block_params
    x_nhwc = _conv_bn_relu(x_nhwc, w1)
    x_nhwc = _conv_bn_relu(x_nhwc, w2)
    return x_nhwc


# ------------------------------- glue ops ---------------------------------- #
# TODO(synk): MaxPool2d(2), bilinear 2x upsample and channel concat are
# memory-bound glue kept in plain JAX rather than dedicated Pallas kernels.
def _maxpool2x2(x):  # NHWC
    N, H, W, C = x.shape
    return jnp.max(x.reshape(N, H // 2, 2, W // 2, 2, C), axis=(2, 4))


def _upsample_bilinear_2x(x):  # NHWC, matches torch Upsample(align_corners=False)
    def interp_axis(arr, axis, size):
        out_size = 2 * size
        coords = (jnp.arange(out_size, dtype=jnp.float32) + 0.5) / 2.0 - 0.5
        c0 = jnp.floor(coords)
        frac = coords - c0
        i0 = jnp.clip(c0, 0, size - 1).astype(jnp.int32)
        i1 = jnp.clip(c0 + 1, 0, size - 1).astype(jnp.int32)
        a0 = jnp.take(arr, i0, axis=axis)
        a1 = jnp.take(arr, i1, axis=axis)
        bshape = [1] * arr.ndim
        bshape[axis] = out_size
        frac = frac.reshape(bshape)
        return a0 * (1.0 - frac) + a1 * frac

    N, H, W, C = x.shape
    x = interp_axis(x, 1, H)
    x = interp_axis(x, 2, W)
    return x


# ------------------------------ parameters --------------------------------- #
def _kaiming_conv(key, cin, cout):
    # kaiming_normal_(mode='fan_out', nonlinearity='relu'): std = sqrt(2/(cout*9))
    std = (2.0 / (9.0 * cout)) ** 0.5
    return std * jax.random.normal(key, (3, 3, cin, cout), jnp.float32)


def init_unet_params(key, channels, n_layers):
    def conv_block_params(k, cin, cout):
        k1, k2 = jax.random.split(k)
        return (_kaiming_conv(k1, cin, cout), _kaiming_conv(k2, cout, cout))

    keys = jax.random.split(key, 2 * n_layers + 1)
    params = {"down": [], "up": []}
    for i in range(n_layers):
        params["down"].append(
            conv_block_params(keys[i], channels[i], channels[i + 1]))
    params["bottom"] = conv_block_params(
        keys[n_layers], channels[n_layers], channels[n_layers + 1])
    for i in range(n_layers):
        params["up"].append(
            conv_block_params(keys[n_layers + 1 + i],
                              channels[i + 1] + channels[i + 2],
                              channels[i + 1]))
    return params


# -------------------------------- forward ---------------------------------- #
def unet_forward(params, x_nchw, n_layers):
    x = jnp.transpose(x_nchw, (0, 2, 3, 1))  # NCHW -> NHWC
    feats = []
    for i in range(n_layers):
        x = _conv_block(x, params["down"][i])
        feats.append(x)
        x = _maxpool2x2(x)
    x = _conv_block(x, params["bottom"])
    for i in range(n_layers - 1, -1, -1):
        x = _upsample_bilinear_2x(x)
        x = jnp.concatenate([x, feats[i]], axis=-1)  # torch.cat([x, y], dim=1)
        x = _conv_block(x, params["up"][i])
    return jnp.transpose(x, (0, 3, 1, 2))  # NHWC -> NCHW


# ---------------------------------- main ------------------------------------ #
if __name__ == "__main__":
    key = jax.random.PRNGKey(0)
    pkey, xkey = jax.random.split(key)

    channels = [4, 8, 16, 32]   # len == n_layers + 2
    n_layers = 2
    params = init_unet_params(pkey, channels, n_layers)

    x = jax.random.normal(xkey, (2, channels[0], 16, 16), jnp.float32)

    fwd = jax.jit(functools.partial(unet_forward, n_layers=n_layers))
    out = fwd(params, x)
    jax.block_until_ready(out)

    assert out.shape == (2, channels[1], 16, 16), out.shape
    assert bool(jnp.all(jnp.isfinite(out)))
    print("KERNEL_OK")
</pallas_src>

<mosaic_0001>
module attributes {stable_mosaic.version = 11 : i64} {
  func.func @_conv_stats_kernel(%arg0: i32, %arg1: memref<1x18x18x128xbf16, #tpu.memory_space<vmem>>, %arg2: memref<3x3x128x128xbf16, #tpu.memory_space<vmem>>, %arg3: memref<1x16x16x128xf32, #tpu.memory_space<vmem>>, %arg4: memref<1x1x128xf32, #tpu.memory_space<vmem>>, %arg5: memref<1x1x128xf32, #tpu.memory_space<vmem>>) attributes {dimension_semantics = [#tpu.dimension_semantics<parallel>], iteration_bounds = array<i64: 2>, scalar_prefetch = 0 : i64, scratch_operands = 0 : i64, tpu.core_type = #tpu.core_type<tc>, window_params = [{transform_indices = @transform_0, window_bounds = array<i64: 1, 18, 18, 128>}, {pipeline_mode = #tpu.pipeline_mode<synchronous>, transform_indices = @transform_1, window_bounds = array<i64: 3, 3, 128, 128>}, {transform_indices = @transform_2, window_bounds = array<i64: 1, 16, 16, 128>}, {transform_indices = @transform_3, window_bounds = array<i64: 1, 1, 128>}, {transform_indices = @transform_4, window_bounds = array<i64: 1, 1, 128>}]} {
    %cst = arith.constant 0.000000e+00 : f32
    %0 = vector.broadcast %cst : f32 to vector<256x128xf32>
    %c0 = arith.constant 0 : index
    %c0_0 = arith.constant 0 : index
    %c0_1 = arith.constant 0 : index
    %c0_2 = arith.constant 0 : index
    %1 = vector.load %arg1[%c0, %c0_0, %c0_1, %c0_2] : memref<1x18x18x128xbf16, #tpu.memory_space<vmem>>, vector<1x16x16x128xbf16>
    %2 = vector.shape_cast %1 : vector<1x16x16x128xbf16> to vector<16x16x128xbf16>
    %3 = vector.shape_cast %2 : vector<16x16x128xbf16> to vector<256x128xbf16>
    %c0_3 = arith.constant 0 : index
    %c0_4 = arith.constant 0 : index
    %c0_5 = arith.constant 0 : index
    %c0_6 = arith.constant 0 : index
    %4 = vector.load %arg2[%c0_3, %c0_4, %c0_5, %c0_6] : memref<3x3x128x128xbf16, #tpu.memory_space<vmem>>, vector<1x1x128x128xbf16>
    %5 = vector.shape_cast %4 : vector<1x1x128x128xbf16> to vector<128x128xbf16>
    %cst_7 = arith.constant dense<0.000000e+00> : vector<256x128xf32>
    %6 = tpu.matmul %3, %5, %cst_7 {dimension_numbers = #tpu.dot_dimension_numbers<[1], [0], [0], [1], [0, 0, 1, 1], [], []>} : vector<256x128xbf16>, vector<128x128xbf16>, vector<256x128xf32> -> vector<256x128xf32>
    %7 = arith.addf %0, %6 : vector<256x128xf32>
    %c0_8 = arith.constant 0 : index
    %c0_9 = arith.constant 0 : index
    %c1 = arith.constant 1 : index
    %c0_10 = arith.constant 0 : index
    %8 = vector.load %arg1[%c0_8, %c0_9, %c1, %c0_10] : memref<1x18x18x128xbf16, #tpu.memory_space<vmem>>, vector<1x16x16x128xbf16>
    %9 = vector.shape_cast %8 : vector<1x16x16x128xbf16> to vector<16x16x128xbf16>
    %10 = vector.shape_cast %9 : vector<16x16x128xbf16> to vector<256x128xbf16>
    %c0_11 = arith.constant 0 : index
    %c1_12 = arith.constant 1 : index
    %c0_13 = arith.constant 0 : index
    %c0_14 = arith.constant 0 : index
    %11 = vector.load %arg2[%c0_11, %c1_12, %c0_13, %c0_14] : memref<3x3x128x128xbf16, #tpu.memory_space<vmem>>, vector<1x1x128x128xbf16>
    %12 = vector.shape_cast %11 : vector<1x1x128x128xbf16> to vector<128x128xbf16>
    %cst_15 = arith.constant dense<0.000000e+00> : vector<256x128xf32>
    %13 = tpu.matmul %10, %12, %cst_15 {dimension_numbers = #tpu.dot_dimension_numbers<[1], [0], [0], [1], [0, 0, 1, 1], [], []>} : vector<256x128xbf16>, vector<128x128xbf16>, vector<256x128xf32> -> vector<256x128xf32>
    %14 = arith.addf %7, %13 : vector<256x128xf32>
    %c0_16 = arith.constant 0 : index
    %c0_17 = arith.constant 0 : index
    %c2 = arith.constant 2 : index
    %c0_18 = arith.constant 0 : index
    %15 = vector.load %arg1[%c0_16, %c0_17, %c2, %c0_18] : memref<1x18x18x128xbf16, #tpu.memory_space<vmem>>, vector<1x16x16x128xbf16>
    %16 = vector.shape_cast %15 : vector<1x16x16x128xbf16> to vector<16x16x128xbf16>
    %17 = vector.shape_cast %16 : vector<16x16x128xbf16> to vector<256x128xbf16>
    %c0_19 = arith.constant 0 : index
    %c2_20 = arith.constant 2 : index
    %c0_21 = arith.constant 0 : index
    %c0_22 = arith.constant 0 : index
    %18 = vector.load %arg2[%c0_19, %c2_20, %c0_21, %c0_22] : memref<3x3x128x128xbf16, #tpu.memory_space<vmem>>, vector<1x1x128x128xbf16>
    %19 = vector.shape_cast %18 : vector<1x1x128x128xbf16> to vector<128x128xbf16>
    %cst_23 = arith.constant dense<0.000000e+00> : vector<256x128xf32>
    %20 = tpu.matmul %17, %19, %cst_23 {dimension_numbers = #tpu.dot_dimension_numbers<[1], [0], [0], [1], [0, 0, 1, 1], [], []>} : vector<256x128xbf16>, vector<128x128xbf16>, vector<256x128xf32> -> vector<256x128xf32>
    %21 = arith.addf %14, %20 : vector<256x128xf32>
    %c0_24 = arith.constant 0 : index
    %c1_25 = arith.constant 1 : index
    %c0_26 = arith.constant 0 : index
    %c0_27 = arith.constant 0 : index
    %22 = vector.load %arg1[%c0_24, %c1_25, %c0_26, %c0_27] : memref<1x18x18x128xbf16, #tpu.memory_space<vmem>>, vector<1x16x16x128xbf16>
    %23 = vector.shape_cast %22 : vector<1x16x16x128xbf16> to vector<16x16x128xbf16>
    %24 = vector.shape_cast %23 : vector<16x16x128xbf16> to vector<256x128xbf16>
    %c1_28 = arith.constant 1 : index
    %c0_29 = arith.constant 0 : index
    %c0_30 = arith.constant 0 : index
    %c0_31 = arith.constant 0 : index
    %25 = vector.load %arg2[%c1_28, %c0_29, %c0_30, %c0_31] : memref<3x3x128x128xbf16, #tpu.memory_space<vmem>>, vector<1x1x128x128xbf16>
    %26 = vector.shape_cast %25 : vector<1x1x128x128xbf16> to vector<128x128xbf16>
    %cst_32 = arith.constant dense<0.000000e+00> : vector<256x128xf32>
    %27 = tpu.matmul %24, %26, %cst_32 {dimension_numbers = #tpu.dot_dimension_numbers<[1], [0], [0], [1], [0, 0, 1, 1], [], []>} : vector<256x128xbf16>, vector<128x128xbf16>, vector<256x128xf32> -> vector<256x128xf32>
    %28 = arith.addf %21, %27 : vector<256x128xf32>
    %c0_33 = arith.constant 0 : index
    %c1_34 = arith.constant 1 : index
    %c1_35 = arith.constant 1 : index
    %c0_36 = arith.constant 0 : index
    %29 = vector.load %arg1[%c0_33, %c1_34, %c1_35, %c0_36] : memref<1x18x18x128xbf16, #tpu.memory_space<vmem>>, vector<1x16x16x128xbf16>
    %30 = vector.shape_cast %29 : vector<1x16x16x128xbf16> to vector<16x16x128xbf16>
    %31 = vector.shape_cast %30 : vector<16x16x128xbf16> to vector<256x128xbf16>
    %c1_37 = arith.constant 1 : index
    %c1_38 = arith.constant 1 : index
    %c0_39 = arith.constant 0 : index
    %c0_40 = arith.constant 0 : index
    %32 = vector.load %arg2[%c1_37, %c1_38, %c0_39, %c0_40] : memref<3x3x128x128xbf16, #tpu.memory_space<vmem>>, vector<1x1x128x128xbf16>
    %33 = vector.shape_cast %32 : vector<1x1x128x128xbf16> to vector<128x128xbf16>
    %cst_41 = arith.constant dense<0.000000e+00> : vector<256x128xf32>
    %34 = tpu.matmul %31, %33, %cst_41 {dimension_numbers = #tpu.dot_dimension_numbers<[1], [0], [0], [1], [0, 0, 1, 1], [], []>} : vector<256x128xbf16>, vector<128x128xbf16>, vector<256x128xf32> -> vector<256x128xf32>
    %35 = arith.addf %28, %34 : vector<256x128xf32>
    %c0_42 = arith.constant 0 : index
    %c1_43 = arith.constant 1 : index
    %c2_44 = arith.constant 2 : index
    %c0_45 = arith.constant 0 : index
    %36 = vector.load %arg1[%c0_42, %c1_43, %c2_44, %c0_45] : memref<1x18x18x128xbf16, #tpu.memory_space<vmem>>, vector<1x16x16x128xbf16>
    %37 = vector.shape_cast %36 : vector<1x16x16x128xbf16> to vector<16x16x128xbf16>
    %38 = vector.shape_cast %37 : vector<16x16x128xbf16> to vector<256x128xbf16>
    %c1_46 = arith.constant 1 : index
    %c2_47 = arith.constant 2 : index
    %c0_48 = arith.constant 0 : index
    %c0_49 = arith.constant 0 : index
    %39 = vector.load %arg2[%c1_46, %c2_47, %c0_48, %c0_49] : memref<3x3x128x128xbf16, #tpu.memory_space<vmem>>, vector<1x1x128x128xbf16>
    %40 = vector.shape_cast %39 : vector<1x1x128x128xbf16> to vector<128x128xbf16>
    %cst_50 = arith.constant dense<0.000000e+00> : vector<256x128xf32>
    %41 = tpu.matmul %38, %40, %cst_50 {dimension_numbers = #tpu.dot_dimension_numbers<[1], [0], [0], [1], [0, 0, 1, 1], [], []>} : vector<256x128xbf16>, vector<128x128xbf16>, vector<256x128xf32> -> vector<256x128xf32>
    %42 = arith.addf %35, %41 : vector<256x128xf32>
    %c0_51 = arith.constant 0 : index
    %c2_52 = arith.constant 2 : index
    %c0_53 = arith.constant 0 : index
    %c0_54 = arith.constant 0 : index
    %43 = vector.load %arg1[%c0_51, %c2_52, %c0_53, %c0_54] : memref<1x18x18x128xbf16, #tpu.memory_space<vmem>>, vector<1x16x16x128xbf16>
    %44 = vector.shape_cast %43 : vector<1x16x16x128xbf16> to vector<16x16x128xbf16>
    %45 = vector.shape_cast %44 : vector<16x16x128xbf16> to vector<256x128xbf16>
    %c2_55 = arith.constant 2 : index
    %c0_56 = arith.constant 0 : index
    %c0_57 = arith.constant 0 : index
    %c0_58 = arith.constant 0 : index
    %46 = vector.load %arg2[%c2_55, %c0_56, %c0_57, %c0_58] : memref<3x3x128x128xbf16, #tpu.memory_space<vmem>>, vector<1x1x128x128xbf16>
    %47 = vector.shape_cast %46 : vector<1x1x128x128xbf16> to vector<128x128xbf16>
    %cst_59 = arith.constant dense<0.000000e+00> : vector<256x128xf32>
    %48 = tpu.matmul %45, %47, %cst_59 {dimension_numbers = #tpu.dot_dimension_numbers<[1], [0], [0], [1], [0, 0, 1, 1], [], []>} : vector<256x128xbf16>, vector<128x128xbf16>, vector<256x128xf32> -> vector<256x128xf32>
    %49 = arith.addf %42, %48 : vector<256x128xf32>
    %c0_60 = arith.constant 0 : index
    %c2_61 = arith.constant 2 : index
    %c1_62 = arith.constant 1 : index
    %c0_63 = arith.constant 0 : index
    %50 = vector.load %arg1[%c0_60, %c2_61, %c1_62, %c0_63] : memref<1x18x18x128xbf16, #tpu.memory_space<vmem>>, vector<1x16x16x128xbf16>
    %51 = vector.shape_cast %50 : vector<1x16x16x128xbf16> to vector<16x16x128xbf16>
    %52 = vector.shape_cast %51 : vector<16x16x128xbf16> to vector<256x128xbf16>
    %c2_64 = arith.constant 2 : index
    %c1_65 = arith.constant 1 : index
    %c0_66 = arith.constant 0 : index
    %c0_67 = arith.constant 0 : index
    %53 = vector.load %arg2[%c2_64, %c1_65, %c0_66, %c0_67] : memref<3x3x128x128xbf16, #tpu.memory_space<vmem>>, vector<1x1x128x128xbf16>
    %54 = vector.shape_cast %53 : vector<1x1x128x128xbf16> to vector<128x128xbf16>
    %cst_68 = arith.constant dense<0.000000e+00> : vector<256x128xf32>
    %55 = tpu.matmul %52, %54, %cst_68 {dimension_numbers = #tpu.dot_dimension_numbers<[1], [0], [0], [1], [0, 0, 1, 1], [], []>} : vector<256x128xbf16>, vector<128x128xbf16>, vector<256x128xf32> -> vector<256x128xf32>
    %56 = arith.addf %49, %55 : vector<256x128xf32>
    %c0_69 = arith.constant 0 : index
    %c2_70 = arith.constant 2 : index
    %c2_71 = arith.constant 2 : index
    %c0_72 = arith.constant 0 : index
    %57 = vector.load %arg1[%c0_69, %c2_70, %c2_71, %c0_72] : memref<1x18x18x128xbf16, #tpu.memory_space<vmem>>, vector<1x16x16x128xbf16>
    %58 = vector.shape_cast %57 : vector<1x16x16x128xbf16> to vector<16x16x128xbf16>
    %59 = vector.shape_cast %58 : vector<16x16x128xbf16> to vector<256x128xbf16>
    %c2_73 = arith.constant 2 : index
    %c2_74 = arith.constant 2 : index
    %c0_75 = arith.constant 0 : index
    %c0_76 = arith.constant 0 : index
    %60 = vector.load %arg2[%c2_73, %c2_74, %c0_75, %c0_76] : memref<3x3x128x128xbf16, #tpu.memory_space<vmem>>, vector<1x1x128x128xbf16>
    %61 = vector.shape_cast %60 : vector<1x1x128x128xbf16> to vector<128x128xbf16>
    %cst_77 = arith.constant dense<0.000000e+00> : vector<256x128xf32>
    %62 = tpu.matmul %59, %61, %cst_77 {dimension_numbers = #tpu.dot_dimension_numbers<[1], [0], [0], [1], [0, 0, 1, 1], [], []>} : vector<256x128xbf16>, vector<128x128xbf16>, vector<256x128xf32> -> vector<256x128xf32>
    %63 = arith.addf %56, %62 : vector<256x128xf32>
    %64 = vector.shape_cast %63 : vector<256x128xf32> to vector<1x16x16x128xf32>
    %c0_78 = arith.constant 0 : index
    %c0_79 = arith.constant 0 : index
    %c0_80 = arith.constant 0 : index
    %c0_81 = arith.constant 0 : index
    %65 = vector.load %arg3[%c0_78, %c0_79, %c0_80, %c0_81] : memref<1x16x16x128xf32, #tpu.memory_space<vmem>>, vector<1x16x16x128xf32>
    tpu.vector_store %arg3[%c0_78, %c0_79, %c0_80, %c0_81], %64 {strides = array<i32>} : memref<1x16x16x128xf32, #tpu.memory_space<vmem>>, vector<1x16x16x128xf32>,
    %cst_82 = arith.constant dense<0.000000e+00> : vector<128xf32>
    %66 = vector.multi_reduction <add>, %63, %cst_82 [0] : vector<256x128xf32> to vector<128xf32>
    %67 = vector.shape_cast %66 : vector<128xf32> to vector<1x128xf32>
    %68 = vector.shape_cast %67 : vector<1x128xf32> to vector<1x1x128xf32>
    %c0_83 = arith.constant 0 : index
    %c0_84 = arith.constant 0 : index
    %c0_85 = arith.constant 0 : index
    %69 = vector.load %arg4[%c0_83, %c0_84, %c0_85] : memref<1x1x128xf32, #tpu.memory_space<vmem>>, vector<1x1x128xf32>
    tpu.vector_store %arg4[%c0_83, %c0_84, %c0_85], %68 {strides = array<i32>} : memref<1x1x128xf32, #tpu.memory_space<vmem>>, vector<1x1x128xf32>,
    %70 = arith.mulf %63, %63 : vector<256x128xf32>
    %cst_86 = arith.constant dense<0.000000e+00> : vector<128xf32>
    %71 = vector.multi_reduction <add>, %70, %cst_86 [0] : vector<256x128xf32> to vector<128xf32>
    %72 = vector.shape_cast %71 : vector<128xf32> to vector<1x128xf32>
    %73 = vector.shape_cast %72 : vector<1x128xf32> to vector<1x1x128xf32>
    %c0_87 = arith.constant 0 : index
    %c0_88 = arith.constant 0 : index
    %c0_89 = arith.constant 0 : index
    %74 = vector.load %arg5[%c0_87, %c0_88, %c0_89] : memref<1x1x128xf32, #tpu.memory_space<vmem>>, vector<1x1x128xf32>
    tpu.vector_store %arg5[%c0_87, %c0_88, %c0_89], %73 {strides = array<i32>} : memref<1x1x128xf32, #tpu.memory_space<vmem>>, vector<1x1x128xf32>,
    return
  }
  func.func @transform_0(%arg0: i32) -> (i32, i32, i32, i32) {
    %c0_i32 = arith.constant 0 : i32
    %c0_i32_0 = arith.constant 0 : i32
    %c0_i32_1 = arith.constant 0 : i32
    %c0_i32_2 = arith.constant 0 : i32
    return %arg0, %c0_i32, %c0_i32_0, %c0_i32_1 : i32, i32, i32, i32
  }
  func.func @transform_1(%arg0: i32) -> (i32, i32, i32, i32) {
    %c0_i32 = arith.constant 0 : i32
    %c0_i32_0 = arith.constant 0 : i32
    %c0_i32_1 = arith.constant 0 : i32
    %c0_i32_2 = arith.constant 0 : i32
    %c0_i32_3 = arith.constant 0 : i32
    return %c0_i32, %c0_i32_0, %c0_i32_1, %c0_i32_2 : i32, i32, i32, i32
  }
  func.func @transform_2(%arg0: i32) -> (i32, i32, i32, i32) {
    %c0_i32 = arith.constant 0 : i32
    %c0_i32_0 = arith.constant 0 : i32
    %c0_i32_1 = arith.constant 0 : i32
    %c0_i32_2 = arith.constant 0 : i32
    return %arg0, %c0_i32, %c0_i32_0, %c0_i32_1 : i32, i32, i32, i32
  }
  func.func @transform_3(%arg0: i32) -> (i32, i32, i32) {
    %c0_i32 = arith.constant 0 : i32
    %c0_i32_0 = arith.constant 0 : i32
    %c0_i32_1 = arith.constant 0 : i32
    return %arg0, %c0_i32, %c0_i32_0 : i32, i32, i32
  }
  func.func @transform_4(%arg0: i32) -> (i32, i32, i32) {
    %c0_i32 = arith.constant 0 : i32
    %c0_i32_0 = arith.constant 0 : i32
    %c0_i32_1 = arith.constant 0 : i32
    return %arg0, %c0_i32, %c0_i32_0 : i32, i32, i32
  }
}

module attributes {stable_mosaic.version = 11 : i64} {
  func.func @_bn_relu_kernel(%arg0: i32, %arg1: memref<512x128xf32, #tpu.memory_space<vmem>>, %arg2: memref<1x128xf32, #tpu.memory_space<vmem>>, %arg3: memref<1x128xf32, #tpu.memory_space<vmem>>, %arg4: memref<512x128xf32, #tpu.memory_space<vmem>>) attributes {dimension_semantics = [#tpu.dimension_semantics<parallel>], iteration_bounds = array<i64: 1>, scalar_prefetch = 0 : i64, scratch_operands = 0 : i64, tpu.core_type = #tpu.core_type<tc>, window_params = [{transform_indices = @transform_0, window_bounds = array<i64: 512, 128>}, {pipeline_mode = #tpu.pipeline_mode<synchronous>, transform_indices = @transform_1, window_bounds = array<i64: 1, 128>}, {pipeline_mode = #tpu.pipeline_mode<synchronous>, transform_indices = @transform_2, window_bounds = array<i64: 1, 128>}, {transform_indices = @transform_3, window_bounds = array<i64: 512, 128>}]} {
    %c0 = arith.constant 0 : index
    %c0_0 = arith.constant 0 : index
    %0 = vector.load %arg1[%c0, %c0_0] : memref<512x128xf32, #tpu.memory_space<vmem>>, vector<512x128xf32>
    %c0_1 = arith.constant 0 : index
    %c0_2 = arith.constant 0 : index
    %1 = vector.load %arg2[%c0_1, %c0_2] : memref<1x128xf32, #tpu.memory_space<vmem>>, vector<1x128xf32>
    %2 = vector.broadcast %1 : vector<1x128xf32> to vector<512x128xf32>
    %3 = arith.mulf %0, %2 : vector<512x128xf32>
    %c0_3 = arith.constant 0 : index
    %c0_4 = arith.constant 0 : index
    %4 = vector.load %arg3[%c0_3, %c0_4] : memref<1x128xf32, #tpu.memory_space<vmem>>, vector<1x128xf32>
    %5 = vector.broadcast %4 : vector<1x128xf32> to vector<512x128xf32>
    %6 = arith.addf %3, %5 : vector<512x128xf32>
    %cst = arith.constant 0.000000e+00 : f32
    %7 = vector.broadcast %cst : f32 to vector<512x128xf32>
    %8 = arith.maximumf %6, %7 : vector<512x128xf32>
    %c0_5 = arith.constant 0 : index
    %c0_6 = arith.constant 0 : index
    %9 = vector.load %arg4[%c0_5, %c0_6] : memref<512x128xf32, #tpu.memory_space<vmem>>, vector<512x128xf32>
    tpu.vector_store %arg4[%c0_5, %c0_6], %8 {strides = array<i32>} : memref<512x128xf32, #tpu.memory_space<vmem>>, vector<512x128xf32>,
    return
  }
  func.func @transform_0(%arg0: i32) -> (i32, i32) {
    %c0_i32 = arith.constant 0 : i32
    %c0_i32_0 = arith.constant 0 : i32
    return %arg0, %c0_i32 : i32, i32
  }
  func.func @transform_1(%arg0: i32) -> (i32, i32) {
    %c0_i32 = arith.constant 0 : i32
    %c0_i32_0 = arith.constant 0 : i32
    %c0_i32_1 = arith.constant 0 : i32
    return %c0_i32, %c0_i32_0 : i32, i32
  }
  func.func @transform_2(%arg0: i32) -> (i32, i32) {
    %c0_i32 = arith.constant 0 : i32
    %c0_i32_0 = arith.constant 0 : i32
    %c0_i32_1 = arith.constant 0 : i32
    return %c0_i32, %c0_i32_0 : i32, i32
  }
  func.func @transform_3(%arg0: i32) -> (i32, i32) {
    %c0_i32 = arith.constant 0 : i32
    %c0_i32_0 = arith.constant 0 : i32
    return %arg0, %c0_i32 : i32, i32
  }
}

module attributes {stable_mosaic.version = 11 : i64} {
  func.func @_conv_stats_kernel(%arg0: i32, %arg1: memref<1x10x10x128xbf16, #tpu.memory_space<vmem>>, %arg2: memref<3x3x128x128xbf16, #tpu.memory_space<vmem>>, %arg3: memref<1x8x8x128xf32, #tpu.memory_space<vmem>>, %arg4: memref<1x1x128xf32, #tpu.memory_space<vmem>>, %arg5: memref<1x1x128xf32, #tpu.memory_space<vmem>>) attributes {dimension_semantics = [#tpu.dimension_semantics<parallel>], iteration_bounds = array<i64: 2>, scalar_prefetch = 0 : i64, scratch_operands = 0 : i64, tpu.core_type = #tpu.core_type<tc>, window_params = [{transform_indices = @transform_0, window_bounds = array<i64: 1, 10, 10, 128>}, {pipeline_mode = #tpu.pipeline_mode<synchronous>, transform_indices = @transform_1, window_bounds = array<i64: 3, 3, 128, 128>}, {transform_indices = @transform_2, window_bounds = array<i64: 1, 8, 8, 128>}, {transform_indices = @transform_3, window_bounds = array<i64: 1, 1, 128>}, {transform_indices = @transform_4, window_bounds = array<i64: 1, 1, 128>}]} {
    %cst = arith.constant 0.000000e+00 : f32
    %0 = vector.broadcast %cst : f32 to vector<64x128xf32>
    %c0 = arith.constant 0 : index
    %c0_0 = arith.constant 0 : index
    %c0_1 = arith.constant 0 : index
    %c0_2 = arith.constant 0 : index
    %1 = vector.load %arg1[%c0, %c0_0, %c0_1, %c0_2] : memref<1x10x10x128xbf16, #tpu.memory_space<vmem>>, vector<1x8x8x128xbf16>
    %2 = vector.shape_cast %1 : vector<1x8x8x128xbf16> to vector<8x8x128xbf16>
    %3 = vector.shape_cast %2 : vector<8x8x128xbf16> to vector<64x128xbf16>
    %c0_3 = arith.constant 0 : index
    %c0_4 = arith.constant 0 : index
    %c0_5 = arith.constant 0 : index
    %c0_6 = arith.constant 0 : index
    %4 = vector.load %arg2[%c0_3, %c0_4, %c0_5, %c0_6] : memref<3x3x128x128xbf16, #tpu.memory_space<vmem>>, vector<1x1x128x128xbf16>
    %5 = vector.shape_cast %4 : vector<1x1x128x128xbf16> to vector<128x128xbf16>
    %cst_7 = arith.constant dense<0.000000e+00> : vector<64x128xf32>
    %6 = tpu.matmul %3, %5, %cst_7 {dimension_numbers = #tpu.dot_dimension_numbers<[1], [0], [0], [1], [0, 0, 1, 1], [], []>} : vector<64x128xbf16>, vector<128x128xbf16>, vector<64x128xf32> -> vector<64x128xf32>
    %7 = arith.addf %0, %6 : vector<64x128xf32>
    %c0_8 = arith.constant 0 : index
    %c0_9 = arith.constant 0 : index
    %c1 = arith.constant 1 : index
    %c0_10 = arith.constant 0 : index
    %8 = vector.load %arg1[%c0_8, %c0_9, %c1, %c0_10] : memref<1x10x10x128xbf16, #tpu.memory_space<vmem>>, vector<1x8x8x128xbf16>
    %9 = vector.shape_cast %8 : vector<1x8x8x128xbf16> to vector<8x8x128xbf16>
    %10 = vector.shape_cast %9 : vector<8x8x128xbf16> to vector<64x128xbf16>
    %c0_11 = arith.constant 0 : index
    %c1_12 = arith.constant 1 : index
    %c0_13 = arith.constant 0 : index
    %c0_14 = arith.constant 0 : index
    %11 = vector.load %arg2[%c0_11, %c1_12, %c0_13, %c0_14] : memref<3x3x128x128xbf16, #tpu.memory_space<vmem>>, vector<1x1x128x128xbf16>
    %12 = vector.shape_cast %11 : vector<1x1x128x128xbf16> to vector<128x128xbf16>
    %cst_15 = arith.constant dense<0.000000e+00> : vector<64x128xf32>
    %13 = tpu.matmul %10, %12, %cst_15 {dimension_numbers = #tpu.dot_dimension_numbers<[1], [0], [0], [1], [0, 0, 1, 1], [], []>} : vector<64x128xbf16>, vector<128x128xbf16>, vector<64x128xf32> -> vector<64x128xf32>
    %14 = arith.addf %7, %13 : vector<64x128xf32>
    %c0_16 = arith.constant 0 : index
    %c0_17 = arith.constant 0 : index
    %c2 = arith.constant 2 : index
    %c0_18 = arith.constant 0 : index
    %15 = vector.load %arg1[%c0_16, %c0_17, %c2, %c0_18] : memref<1x10x10x128xbf16, #tpu.memory_space<vmem>>, vector<1x8x8x128xbf16>
    %16 = vector.shape_cast %15 : vector<1x8x8x128xbf16> to vector<8x8x128xbf16>
    %17 = vector.shape_cast %16 : vector<8x8x128xbf16> to vector<64x128xbf16>
    %c0_19 = arith.constant 0 : index
    %c2_20 = arith.constant 2 : index
    %c0_21 = arith.constant 0 : index
    %c0_22 = arith.constant 0 : index
    %18 = vector.load %arg2[%c0_19, %c2_20, %c0_21, %c0_22] : memref<3x3x128x128xbf16, #tpu.memory_space<vmem>>, vector<1x1x128x128xbf16>
    %19 = vector.shape_cast %18 : vector<1x1x128x128xbf16> to vector<128x128xbf16>
    %cst_23 = arith.constant dense<0.000000e+00> : vector<64x128xf32>
    %20 = tpu.matmul %17, %19, %cst_23 {dimension_numbers = #tpu.dot_dimension_numbers<[1], [0], [0], [1], [0, 0, 1, 1], [], []>} : vector<64x128xbf16>, vector<128x128xbf16>, vector<64x128xf32> -> vector<64x128xf32>
    %21 = arith.addf %14, %20 : vector<64x128xf32>
    %c0_24 = arith.constant 0 : index
    %c1_25 = arith.constant 1 : index
    %c0_26 = arith.constant 0 : index
    %c0_27 = arith.constant 0 : index
    %22 = vector.load %arg1[%c0_24, %c1_25, %c0_26, %c0_27] : memref<1x10x10x128xbf16, #tpu.memory_space<vmem>>, vector<1x8x8x128xbf16>
    %23 = vector.shape_cast %22 : vector<1x8x8x128xbf16> to vector<8x8x128xbf16>
    %24 = vector.shape_cast %23 : vector<8x8x128xbf16> to vector<64x128xbf16>
    %c1_28 = arith.constant 1 : index
    %c0_29 = arith.constant 0 : index
    %c0_30 = arith.constant 0 : index
    %c0_31 = arith.constant 0 : index
    %25 = vector.load %arg2[%c1_28, %c0_29, %c0_30, %c0_31] : memref<3x3x128x128xbf16, #tpu.memory_space<vmem>>, vector<1x1x128x128xbf16>
    %26 = vector.shape_cast %25 : vector<1x1x128x128xbf16> to vector<128x128xbf16>
    %cst_32 = arith.constant dense<0.000000e+00> : vector<64x128xf32>
    %27 = tpu.matmul %24, %26, %cst_32 {dimension_numbers = #tpu.dot_dimension_numbers<[1], [0], [0], [1], [0, 0, 1, 1], [], []>} : vector<64x128xbf16>, vector<128x128xbf16>, vector<64x128xf32> -> vector<64x128xf32>
    %28 = arith.addf %21, %27 : vector<64x128xf32>
    %c0_33 = arith.constant 0 : index
    %c1_34 = arith.constant 1 : index
    %c1_35 = arith.constant 1 : index
    %c0_36 = arith.constant 0 : index
    %29 = vector.load %arg1[%c0_33, %c1_34, %c1_35, %c0_36] : memref<1x10x10x128xbf16, #tpu.memory_space<vmem>>, vector<1x8x8x128xbf16>
    %30 = vector.shape_cast %29 : vector<1x8x8x128xbf16> to vector<8x8x128xbf16>
    %31 = vector.shape_cast %30 : vector<8x8x128xbf16> to vector<64x128xbf16>
    %c1_37 = arith.constant 1 : index
    %c1_38 = arith.constant 1 : index
    %c0_39 = arith.constant 0 : index
    %c0_40 = arith.constant 0 : index
    %32 = vector.load %arg2[%c1_37, %c1_38, %c0_39, %c0_40] : memref<3x3x128x128xbf16, #tpu.memory_space<vmem>>, vector<1x1x128x128xbf16>
    %33 = vector.shape_cast %32 : vector<1x1x128x128xbf16> to vector<128x128xbf16>
    %cst_41 = arith.constant dense<0.000000e+00> : vector<64x128xf32>
    %34 = tpu.matmul %31, %33, %cst_41 {dimension_numbers = #tpu.dot_dimension_numbers<[1], [0], [0], [1], [0, 0, 1, 1], [], []>} : vector<64x128xbf16>, vector<128x128xbf16>, vector<64x128xf32> -> vector<64x128xf32>
    %35 = arith.addf %28, %34 : vector<64x128xf32>
    %c0_42 = arith.constant 0 : index
    %c1_43 = arith.constant 1 : index
    %c2_44 = arith.constant 2 : index
    %c0_45 = arith.constant 0 : index
    %36 = vector.load %arg1[%c0_42, %c1_43, %c2_44, %c0_45] : memref<1x10x10x128xbf16, #tpu.memory_space<vmem>>, vector<1x8x8x128xbf16>
    %37 = vector.shape_cast %36 : vector<1x8x8x128xbf16> to vector<8x8x128xbf16>
    %38 = vector.shape_cast %37 : vector<8x8x128xbf16> to vector<64x128xbf16>
    %c1_46 = arith.constant 1 : index
    %c2_47 = arith.constant 2 : index
    %c0_48 = arith.constant 0 : index
    %c0_49 = arith.constant 0 : index
    %39 = vector.load %arg2[%c1_46, %c2_47, %c0_48, %c0_49] : memref<3x3x128x128xbf16, #tpu.memory_space<vmem>>, vector<1x1x128x128xbf16>
    %40 = vector.shape_cast %39 : vector<1x1x128x128xbf16> to vector<128x128xbf16>
    %cst_50 = arith.constant dense<0.000000e+00> : vector<64x128xf32>
    %41 = tpu.matmul %38, %40, %cst_50 {dimension_numbers = #tpu.dot_dimension_numbers<[1], [0], [0], [1], [0, 0, 1, 1], [], []>} : vector<64x128xbf16>, vector<128x128xbf16>, vector<64x128xf32> -> vector<64x128xf32>
    %42 = arith.addf %35, %41 : vector<64x128xf32>
    %c0_51 = arith.constant 0 : index
    %c2_52 = arith.constant 2 : index
    %c0_53 = arith.constant 0 : index
    %c0_54 = arith.constant 0 : index
    %43 = vector.load %arg1[%c0_51, %c2_52, %c0_53, %c0_54] : memref<1x10x10x128xbf16, #tpu.memory_space<vmem>>, vector<1x8x8x128xbf16>
    %44 = vector.shape_cast %43 : vector<1x8x8x128xbf16> to vector<8x8x128xbf16>
    %45 = vector.shape_cast %44 : vector<8x8x128xbf16> to vector<64x128xbf16>
    %c2_55 = arith.constant 2 : index
    %c0_56 = arith.constant 0 : index
    %c0_57 = arith.constant 0 : index
    %c0_58 = arith.constant 0 : index
    %46 = vector.load %arg2[%c2_55, %c0_56, %c0_57, %c0_58] : memref<3x3x128x128xbf16, #tpu.memory_space<vmem>>, vector<1x1x128x128xbf16>
    %47 = vector.shape_cast %46 : vector<1x1x128x128xbf16> to vector<128x128xbf16>
    %cst_59 = arith.constant dense<0.000000e+00> : vector<64x128xf32>
    %48 = tpu.matmul %45, %47, %cst_59 {dimension_numbers = #tpu.dot_dimension_numbers<[1], [0], [0], [1], [0, 0, 1, 1], [], []>} : vector<64x128xbf16>, vector<128x128xbf16>, vector<64x128xf32> -> vector<64x128xf32>
    %49 = arith.addf %42, %48 : vector<64x128xf32>
    %c0_60 = arith.constant 0 : index
    %c2_61 = arith.constant 2 : index
    %c1_62 = arith.constant 1 : index
    %c0_63 = arith.constant 0 : index
    %50 = vector.load %arg1[%c0_60, %c2_61, %c1_62, %c0_63] : memref<1x10x10x128xbf16, #tpu.memory_space<vmem>>, vector<1x8x8x128xbf16>
    %51 = vector.shape_cast %50 : vector<1x8x8x128xbf16> to vector<8x8x128xbf16>
    %52 = vector.shape_cast %51 : vector<8x8x128xbf16> to vector<64x128xbf16>
    %c2_64 = arith.constant 2 : index
    %c1_65 = arith.constant 1 : index
    %c0_66 = arith.constant 0 : index
    %c0_67 = arith.constant 0 : index
    %53 = vector.load %arg2[%c2_64, %c1_65, %c0_66, %c0_67] : memref<3x3x128x128xbf16, #tpu.memory_space<vmem>>, vector<1x1x128x128xbf16>
    %54 = vector.shape_cast %53 : vector<1x1x128x128xbf16> to vector<128x128xbf16>
    %cst_68 = arith.constant dense<0.000000e+00> : vector<64x128xf32>
    %55 = tpu.matmul %52, %54, %cst_68 {dimension_numbers = #tpu.dot_dimension_numbers<[1], [0], [0], [1], [0, 0, 1, 1], [], []>} : vector<64x128xbf16>, vector<128x128xbf16>, vector<64x128xf32> -> vector<64x128xf32>
    %56 = arith.addf %49, %55 : vector<64x128xf32>
    %c0_69 = arith.constant 0 : index
    %c2_70 = arith.constant 2 : index
    %c2_71 = arith.constant 2 : index
    %c0_72 = arith.constant 0 : index
    %57 = vector.load %arg1[%c0_69, %c2_70, %c2_71, %c0_72] : memref<1x10x10x128xbf16, #tpu.memory_space<vmem>>, vector<1x8x8x128xbf16>
    %58 = vector.shape_cast %57 : vector<1x8x8x128xbf16> to vector<8x8x128xbf16>
    %59 = vector.shape_cast %58 : vector<8x8x128xbf16> to vector<64x128xbf16>
    %c2_73 = arith.constant 2 : index
    %c2_74 = arith.constant 2 : index
    %c0_75 = arith.constant 0 : index
    %c0_76 = arith.constant 0 : index
    %60 = vector.load %arg2[%c2_73, %c2_74, %c0_75, %c0_76] : memref<3x3x128x128xbf16, #tpu.memory_space<vmem>>, vector<1x1x128x128xbf16>
    %61 = vector.shape_cast %60 : vector<1x1x128x128xbf16> to vector<128x128xbf16>
    %cst_77 = arith.constant dense<0.000000e+00> : vector<64x128xf32>
    %62 = tpu.matmul %59, %61, %cst_77 {dimension_numbers = #tpu.dot_dimension_numbers<[1], [0], [0], [1], [0, 0, 1, 1], [], []>} : vector<64x128xbf16>, vector<128x128xbf16>, vector<64x128xf32> -> vector<64x128xf32>
    %63 = arith.addf %56, %62 : vector<64x128xf32>
    %64 = vector.shape_cast %63 : vector<64x128xf32> to vector<1x8x8x128xf32>
    %c0_78 = arith.constant 0 : index
    %c0_79 = arith.constant 0 : index
    %c0_80 = arith.constant 0 : index
    %c0_81 = arith.constant 0 : index
    %65 = vector.load %arg3[%c0_78, %c0_79, %c0_80, %c0_81] : memref<1x8x8x128xf32, #tpu.memory_space<vmem>>, vector<1x8x8x128xf32>
    tpu.vector_store %arg3[%c0_78, %c0_79, %c0_80, %c0_81], %64 {strides = array<i32>} : memref<1x8x8x128xf32, #tpu.memory_space<vmem>>, vector<1x8x8x128xf32>,
    %cst_82 = arith.constant dense<0.000000e+00> : vector<128xf32>
    %66 = vector.multi_reduction <add>, %63, %cst_82 [0] : vector<64x128xf32> to vector<128xf32>
    %67 = vector.shape_cast %66 : vector<128xf32> to vector<1x128xf32>
    %68 = vector.shape_cast %67 : vector<1x128xf32> to vector<1x1x128xf32>
    %c0_83 = arith.constant 0 : index
    %c0_84 = arith.constant 0 : index
    %c0_85 = arith.constant 0 : index
    %69 = vector.load %arg4[%c0_83, %c0_84, %c0_85] : memref<1x1x128xf32, #tpu.memory_space<vmem>>, vector<1x1x128xf32>
    tpu.vector_store %arg4[%c0_83, %c0_84, %c0_85], %68 {strides = array<i32>} : memref<1x1x128xf32, #tpu.memory_space<vmem>>, vector<1x1x128xf32>,
    %70 = arith.mulf %63, %63 : vector<64x128xf32>
    %cst_86 = arith.constant dense<0.000000e+00> : vector<128xf32>
    %71 = vector.multi_reduction <add>, %70, %cst_86 [0] : vector<64x128xf32> to vector<128xf32>
    %72 = vector.shape_cast %71 : vector<128xf32> to vector<1x128xf32>
    %73 = vector.shape_cast %72 : vector<1x128xf32> to vector<1x1x128xf32>
    %c0_87 = arith.constant 0 : index
    %c0_88 = arith.constant 0 : index
    %c0_89 = arith.constant 0 : index
    %74 = vector.load %arg5[%c0_87, %c0_88, %c0_89] : memref<1x1x128xf32, #tpu.memory_space<vmem>>, vector<1x1x128xf32>
    tpu.vector_store %arg5[%c0_87, %c0_88, %c0_89], %73 {strides = array<i32>} : memref<1x1x128xf32, #tpu.memory_space<vmem>>, vector<1x1x128xf32>,
    return
  }
  func.func @transform_0(%arg0: i32) -> (i32, i32, i32, i32) {
    %c0_i32 = arith.constant 0 : i32
    %c0_i32_0 = arith.constant 0 : i32
    %c0_i32_1 = arith.constant 0 : i32
    %c0_i32_2 = arith.constant 0 : i32
    return %arg0, %c0_i32, %c0_i32_0, %c0_i32_1 : i32, i32, i32, i32
  }
  func.func @transform_1(%arg0: i32) -> (i32, i32, i32, i32) {
    %c0_i32 = arith.constant 0 : i32
    %c0_i32_0 = arith.constant 0 : i32
    %c0_i32_1 = arith.constant 0 : i32
    %c0_i32_2 = arith.constant 0 : i32
    %c0_i32_3 = arith.constant 0 : i32
    return %c0_i32, %c0_i32_0, %c0_i32_1, %c0_i32_2 : i32, i32, i32, i32
  }
  func.func @transform_2(%arg0: i32) -> (i32, i32, i32, i32) {
    %c0_i32 = arith.constant 0 : i32
    %c0_i32_0 = arith.constant 0 : i32
    %c0_i32_1 = arith.constant 0 : i32
    %c0_i32_2 = arith.constant 0 : i32
    return %arg0, %c0_i32, %c0_i32_0, %c0_i32_1 : i32, i32, i32, i32
  }
  func.func @transform_3(%arg0: i32) -> (i32, i32, i32) {
    %c0_i32 = arith.constant 0 : i32
    %c0_i32_0 = arith.constant 0 : i32
    %c0_i32_1 = arith.constant 0 : i32
    return %arg0, %c0_i32, %c0_i32_0 : i32, i32, i32
  }
  func.func @transform_4(%arg0: i32) -> (i32, i32, i32) {
    %c0_i32 = arith.constant 0 : i32
    %c0_i32_0 = arith.constant 0 : i32
    %c0_i32_1 = arith.constant 0 : i32
    return %arg0, %c0_i32, %c0_i32_0 : i32, i32, i32
  }
}

module attributes {stable_mosaic.version = 11 : i64} {
  func.func @_bn_relu_kernel(%arg0: i32, %arg1: memref<128x128xf32, #tpu.memory_space<vmem>>, %arg2: memref<1x128xf32, #tpu.memory_space<vmem>>, %arg3: memref<1x128xf32, #tpu.memory_space<vmem>>, %arg4: memref<128x128xf32, #tpu.memory_space<vmem>>) attributes {dimension_semantics = [#tpu.dimension_semantics<parallel>], iteration_bounds = array<i64: 1>, scalar_prefetch = 0 : i64, scratch_operands = 0 : i64, tpu.core_type = #tpu.core_type<tc>, window_params = [{transform_indices = @transform_0, window_bounds = array<i64: 128, 128>}, {pipeline_mode = #tpu.pipeline_mode<synchronous>, transform_indices = @transform_1, window_bounds = array<i64: 1, 128>}, {pipeline_mode = #tpu.pipeline_mode<synchronous>, transform_indices = @transform_2, window_bounds = array<i64: 1, 128>}, {transform_indices = @transform_3, window_bounds = array<i64: 128, 128>}]} {
    %c0 = arith.constant 0 : index
    %c0_0 = arith.constant 0 : index
    %0 = vector.load %arg1[%c0, %c0_0] : memref<128x128xf32, #tpu.memory_space<vmem>>, vector<128x128xf32>
    %c0_1 = arith.constant 0 : index
    %c0_2 = arith.constant 0 : index
    %1 = vector.load %arg2[%c0_1, %c0_2] : memref<1x128xf32, #tpu.memory_space<vmem>>, vector<1x128xf32>
    %2 = vector.broadcast %1 : vector<1x128xf32> to vector<128x128xf32>
    %3 = arith.mulf %0, %2 : vector<128x128xf32>
    %c0_3 = arith.constant 0 : index
    %c0_4 = arith.constant 0 : index
    %4 = vector.load %arg3[%c0_3, %c0_4] : memref<1x128xf32, #tpu.memory_space<vmem>>, vector<1x128xf32>
    %5 = vector.broadcast %4 : vector<1x128xf32> to vector<128x128xf32>
    %6 = arith.addf %3, %5 : vector<128x128xf32>
    %cst = arith.constant 0.000000e+00 : f32
    %7 = vector.broadcast %cst : f32 to vector<128x128xf32>
    %8 = arith.maximumf %6, %7 : vector<128x128xf32>
    %c0_5 = arith.constant 0 : index
    %c0_6 = arith.constant 0 : index
    %9 = vector.load %arg4[%c0_5, %c0_6] : memref<128x128xf32, #tpu.memory_space<vmem>>, vector<128x128xf32>
    tpu.vector_store %arg4[%c0_5, %c0_6], %8 {strides = array<i32>} : memref<128x128xf32, #tpu.memory_space<vmem>>, vector<128x128xf32>,
    return
  }
  func.func @transform_0(%arg0: i32) -> (i32, i32) {
    %c0_i32 = arith.constant 0 : i32
    %c0_i32_0 = arith.constant 0 : i32
    return %arg0, %c0_i32 : i32, i32
  }
  func.func @transform_1(%arg0: i32) -> (i32, i32) {
    %c0_i32 = arith.constant 0 : i32
    %c0_i32_0 = arith.constant 0 : i32
    %c0_i32_1 = arith.constant 0 : i32
    return %c0_i32, %c0_i32_0 : i32, i32
  }
  func.func @transform_2(%arg0: i32) -> (i32, i32) {
    %c0_i32 = arith.constant 0 : i32
    %c0_i32_0 = arith.constant 0 : i32
    %c0_i32_1 = arith.constant 0 : i32
    return %c0_i32, %c0_i32_0 : i32, i32
  }
  func.func @transform_3(%arg0: i32) -> (i32, i32) {
    %c0_i32 = arith.constant 0 : i32
    %c0_i32_0 = arith.constant 0 : i32
    return %arg0, %c0_i32 : i32, i32
  }
}

module attributes {stable_mosaic.version = 11 : i64} {
  func.func @_conv_stats_kernel(%arg0: i32, %arg1: memref<1x6x10x128xbf16, #tpu.memory_space<vmem>>, %arg2: memref<3x3x128x128xbf16, #tpu.memory_space<vmem>>, %arg3: memref<1x4x8x128xf32, #tpu.memory_space<vmem>>, %arg4: memref<1x1x128xf32, #tpu.memory_space<vmem>>, %arg5: memref<1x1x128xf32, #tpu.memory_space<vmem>>) attributes {dimension_semantics = [#tpu.dimension_semantics<parallel>], iteration_bounds = array<i64: 2>, scalar_prefetch = 0 : i64, scratch_operands = 0 : i64, tpu.core_type = #tpu.core_type<tc>, window_params = [{transform_indices = @transform_0, window_bounds = array<i64: 1, 6, 10, 128>}, {pipeline_mode = #tpu.pipeline_mode<synchronous>, transform_indices = @transform_1, window_bounds = array<i64: 3, 3, 128, 128>}, {transform_indices = @transform_2, window_bounds = array<i64: 1, 4, 8, 128>}, {transform_indices = @transform_3, window_bounds = array<i64: 1, 1, 128>}, {transform_indices = @transform_4, window_bounds = array<i64: 1, 1, 128>}]} {
    %cst = arith.constant 0.000000e+00 : f32
    %0 = vector.broadcast %cst : f32 to vector<32x128xf32>
    %c0 = arith.constant 0 : index
    %c0_0 = arith.constant 0 : index
    %c0_1 = arith.constant 0 : index
    %c0_2 = arith.constant 0 : index
    %1 = vector.load %arg1[%c0, %c0_0, %c0_1, %c0_2] : memref<1x6x10x128xbf16, #tpu.memory_space<vmem>>, vector<1x4x8x128xbf16>
    %2 = vector.shape_cast %1 : vector<1x4x8x128xbf16> to vector<4x8x128xbf16>
    %3 = vector.shape_cast %2 : vector<4x8x128xbf16> to vector<32x128xbf16>
    %c0_3 = arith.constant 0 : index
    %c0_4 = arith.constant 0 : index
    %c0_5 = arith.constant 0 : index
    %c0_6 = arith.constant 0 : index
    %4 = vector.load %arg2[%c0_3, %c0_4, %c0_5, %c0_6] : memref<3x3x128x128xbf16, #tpu.memory_space<vmem>>, vector<1x1x128x128xbf16>
    %5 = vector.shape_cast %4 : vector<1x1x128x128xbf16> to vector<128x128xbf16>
    %cst_7 = arith.constant dense<0.000000e+00> : vector<32x128xf32>
    %6 = tpu.matmul %3, %5, %cst_7 {dimension_numbers = #tpu.dot_dimension_numbers<[1], [0], [0], [1], [0, 0, 1, 1], [], []>} : vector<32x128xbf16>, vector<128x128xbf16>, vector<32x128xf32> -> vector<32x128xf32>
    %7 = arith.addf %0, %6 : vector<32x128xf32>
    %c0_8 = arith.constant 0 : index
    %c0_9 = arith.constant 0 : index
    %c1 = arith.constant 1 : index
    %c0_10 = arith.constant 0 : index
    %8 = vector.load %arg1[%c0_8, %c0_9, %c1, %c0_10] : memref<1x6x10x128xbf16, #tpu.memory_space<vmem>>, vector<1x4x8x128xbf16>
    %9 = vector.shape_cast %8 : vector<1x4x8x128xbf16> to vector<4x8x128xbf16>
    %10 = vector.shape_cast %9 : vector<4x8x128xbf16> to vector<32x128xbf16>
    %c0_11 = arith.constant 0 : index
    %c1_12 = arith.constant 1 : index
    %c0_13 = arith.constant 0 : index
    %c0_14 = arith.constant 0 : index
    %11 = vector.load %arg2[%c0_11, %c1_12, %c0_13, %c0_14] : memref<3x3x128x128xbf16, #tpu.memory_space<vmem>>, vector<1x1x128x128xbf16>
    %12 = vector.shape_cast %11 : vector<1x1x128x128xbf16> to vector<128x128xbf16>
    %cst_15 = arith.constant dense<0.000000e+00> : vector<32x128xf32>
    %13 = tpu.matmul %10, %12, %cst_15 {dimension_numbers = #tpu.dot_dimension_numbers<[1], [0], [0], [1], [0, 0, 1, 1], [], []>} : vector<32x128xbf16>, vector<128x128xbf16>, vector<32x128xf32> -> vector<32x128xf32>
    %14 = arith.addf %7, %13 : vector<32x128xf32>
    %c0_16 = arith.constant 0 : index
    %c0_17 = arith.constant 0 : index
    %c2 = arith.constant 2 : index
    %c0_18 = arith.constant 0 : index
    %15 = vector.load %arg1[%c0_16, %c0_17, %c2, %c0_18] : memref<1x6x10x128xbf16, #tpu.memory_space<vmem>>, vector<1x4x8x128xbf16>
    %16 = vector.shape_cast %15 : vector<1x4x8x128xbf16> to vector<4x8x128xbf16>
    %17 = vector.shape_cast %16 : vector<4x8x128xbf16> to vector<32x128xbf16>
    %c0_19 = arith.constant 0 : index
    %c2_20 = arith.constant 2 : index
    %c0_21 = arith.constant 0 : index
    %c0_22 = arith.constant 0 : index
    %18 = vector.load %arg2[%c0_19, %c2_20, %c0_21, %c0_22] : memref<3x3x128x128xbf16, #tpu.memory_space<vmem>>, vector<1x1x128x128xbf16>
    %19 = vector.shape_cast %18 : vector<1x1x128x128xbf16> to vector<128x128xbf16>
    %cst_23 = arith.constant dense<0.000000e+00> : vector<32x128xf32>
    %20 = tpu.matmul %17, %19, %cst_23 {dimension_numbers = #tpu.dot_dimension_numbers<[1], [0], [0], [1], [0, 0, 1, 1], [], []>} : vector<32x128xbf16>, vector<128x128xbf16>, vector<32x128xf32> -> vector<32x128xf32>
    %21 = arith.addf %14, %20 : vector<32x128xf32>
    %c0_24 = arith.constant 0 : index
    %c1_25 = arith.constant 1 : index
    %c0_26 = arith.constant 0 : index
    %c0_27 = arith.constant 0 : index
    %22 = vector.load %arg1[%c0_24, %c1_25, %c0_26, %c0_27] : memref<1x6x10x128xbf16, #tpu.memory_space<vmem>>, vector<1x4x8x128xbf16>
    %23 = vector.shape_cast %22 : vector<1x4x8x128xbf16> to vector<4x8x128xbf16>
    %24 = vector.shape_cast %23 : vector<4x8x128xbf16> to vector<32x128xbf16>
    %c1_28 = arith.constant 1 : index
    %c0_29 = arith.constant 0 : index
    %c0_30 = arith.constant 0 : index
    %c0_31 = arith.constant 0 : index
    %25 = vector.load %arg2[%c1_28, %c0_29, %c0_30, %c0_31] : memref<3x3x128x128xbf16, #tpu.memory_space<vmem>>, vector<1x1x128x128xbf16>
    %26 = vector.shape_cast %25 : vector<1x1x128x128xbf16> to vector<128x128xbf16>
    %cst_32 = arith.constant dense<0.000000e+00> : vector<32x128xf32>
    %27 = tpu.matmul %24, %26, %cst_32 {dimension_numbers = #tpu.dot_dimension_numbers<[1], [0], [0], [1], [0, 0, 1, 1], [], []>} : vector<32x128xbf16>, vector<128x128xbf16>, vector<32x128xf32> -> vector<32x128xf32>
    %28 = arith.addf %21, %27 : vector<32x128xf32>
    %c0_33 = arith.constant 0 : index
    %c1_34 = arith.constant 1 : index
    %c1_35 = arith.constant 1 : index
    %c0_36 = arith.constant 0 : index
    %29 = vector.load %arg1[%c0_33, %c1_34, %c1_35, %c0_36] : memref<1x6x10x128xbf16, #tpu.memory_space<vmem>>, vector<1x4x8x128xbf16>
    %30 = vector.shape_cast %29 : vector<1x4x8x128xbf16> to vector<4x8x128xbf16>
    %31 = vector.shape_cast %30 : vector<4x8x128xbf16> to vector<32x128xbf16>
    %c1_37 = arith.constant 1 : index
    %c1_38 = arith.constant 1 : index
    %c0_39 = arith.constant 0 : index
    %c0_40 = arith.constant 0 : index
    %32 = vector.load %arg2[%c1_37, %c1_38, %c0_39, %c0_40] : memref<3x3x128x128xbf16, #tpu.memory_space<vmem>>, vector<1x1x128x128xbf16>
    %33 = vector.shape_cast %32 : vector<1x1x128x128xbf16> to vector<128x128xbf16>
    %cst_41 = arith.constant dense<0.000000e+00> : vector<32x128xf32>
    %34 = tpu.matmul %31, %33, %cst_41 {dimension_numbers = #tpu.dot_dimension_numbers<[1], [0], [0], [1], [0, 0, 1, 1], [], []>} : vector<32x128xbf16>, vector<128x128xbf16>, vector<32x128xf32> -> vector<32x128xf32>
    %35 = arith.addf %28, %34 : vector<32x128xf32>
    %c0_42 = arith.constant 0 : index
    %c1_43 = arith.constant 1 : index
    %c2_44 = arith.constant 2 : index
    %c0_45 = arith.constant 0 : index
    %36 = vector.load %arg1[%c0_42, %c1_43, %c2_44, %c0_45] : memref<1x6x10x128xbf16, #tpu.memory_space<vmem>>, vector<1x4x8x128xbf16>
    %37 = vector.shape_cast %36 : vector<1x4x8x128xbf16> to vector<4x8x128xbf16>
    %38 = vector.shape_cast %37 : vector<4x8x128xbf16> to vector<32x128xbf16>
    %c1_46 = arith.constant 1 : index
    %c2_47 = arith.constant 2 : index
    %c0_48 = arith.constant 0 : index
    %c0_49 = arith.constant 0 : index
    %39 = vector.load %arg2[%c1_46, %c2_47, %c0_48, %c0_49] : memref<3x3x128x128xbf16, #tpu.memory_space<vmem>>, vector<1x1x128x128xbf16>
    %40 = vector.shape_cast %39 : vector<1x1x128x128xbf16> to vector<128x128xbf16>
    %cst_50 = arith.constant dense<0.000000e+00> : vector<32x128xf32>
    %41 = tpu.matmul %38, %40, %cst_50 {dimension_numbers = #tpu.dot_dimension_numbers<[1], [0], [0], [1], [0, 0, 1, 1], [], []>} : vector<32x128xbf16>, vector<128x128xbf16>, vector<32x128xf32> -> vector<32x128xf32>
    %42 = arith.addf %35, %41 : vector<32x128xf32>
    %c0_51 = arith.constant 0 : index
    %c2_52 = arith.constant 2 : index
    %c0_53 = arith.constant 0 : index
    %c0_54 = arith.constant 0 : index
    %43 = vector.load %arg1[%c0_51, %c2_52, %c0_53, %c0_54] : memref<1x6x10x128xbf16, #tpu.memory_space<vmem>>, vector<1x4x8x128xbf16>
    %44 = vector.shape_cast %43 : vector<1x4x8x128xbf16> to vector<4x8x128xbf16>
    %45 = vector.shape_cast %44 : vector<4x8x128xbf16> to vector<32x128xbf16>
    %c2_55 = arith.constant 2 : index
    %c0_56 = arith.constant 0 : index
    %c0_57 = arith.constant 0 : index
    %c0_58 = arith.constant 0 : index
    %46 = vector.load %arg2[%c2_55, %c0_56, %c0_57, %c0_58] : memref<3x3x128x128xbf16, #tpu.memory_space<vmem>>, vector<1x1x128x128xbf16>
    %47 = vector.shape_cast %46 : vector<1x1x128x128xbf16> to vector<128x128xbf16>
    %cst_59 = arith.constant dense<0.000000e+00> : vector<32x128xf32>
    %48 = tpu.matmul %45, %47, %cst_59 {dimension_numbers = #tpu.dot_dimension_numbers<[1], [0], [0], [1], [0, 0, 1, 1], [], []>} : vector<32x128xbf16>, vector<128x128xbf16>, vector<32x128xf32> -> vector<32x128xf32>
    %49 = arith.addf %42, %48 : vector<32x128xf32>
    %c0_60 = arith.constant 0 : index
    %c2_61 = arith.constant 2 : index
    %c1_62 = arith.constant 1 : index
    %c0_63 = arith.constant 0 : index
    %50 = vector.load %arg1[%c0_60, %c2_61, %c1_62, %c0_63] : memref<1x6x10x128xbf16, #tpu.memory_space<vmem>>, vector<1x4x8x128xbf16>
    %51 = vector.shape_cast %50 : vector<1x4x8x128xbf16> to vector<4x8x128xbf16>
    %52 = vector.shape_cast %51 : vector<4x8x128xbf16> to vector<32x128xbf16>
    %c2_64 = arith.constant 2 : index
    %c1_65 = arith.constant 1 : index
    %c0_66 = arith.constant 0 : index
    %c0_67 = arith.constant 0 : index
    %53 = vector.load %arg2[%c2_64, %c1_65, %c0_66, %c0_67] : memref<3x3x128x128xbf16, #tpu.memory_space<vmem>>, vector<1x1x128x128xbf16>
    %54 = vector.shape_cast %53 : vector<1x1x128x128xbf16> to vector<128x128xbf16>
    %cst_68 = arith.constant dense<0.000000e+00> : vector<32x128xf32>
    %55 = tpu.matmul %52, %54, %cst_68 {dimension_numbers = #tpu.dot_dimension_numbers<[1], [0], [0], [1], [0, 0, 1, 1], [], []>} : vector<32x128xbf16>, vector<128x128xbf16>, vector<32x128xf32> -> vector<32x128xf32>
    %56 = arith.addf %49, %55 : vector<32x128xf32>
    %c0_69 = arith.constant 0 : index
    %c2_70 = arith.constant 2 : index
    %c2_71 = arith.constant 2 : index
    %c0_72 = arith.constant 0 : index
    %57 = vector.load %arg1[%c0_69, %c2_70, %c2_71, %c0_72] : memref<1x6x10x128xbf16, #tpu.memory_space<vmem>>, vector<1x4x8x128xbf16>
    %58 = vector.shape_cast %57 : vector<1x4x8x128xbf16> to vector<4x8x128xbf16>
    %59 = vector.shape_cast %58 : vector<4x8x128xbf16> to vector<32x128xbf16>
    %c2_73 = arith.constant 2 : index
    %c2_74 = arith.constant 2 : index
    %c0_75 = arith.constant 0 : index
    %c0_76 = arith.constant 0 : index
    %60 = vector.load %arg2[%c2_73, %c2_74, %c0_75, %c0_76] : memref<3x3x128x128xbf16, #tpu.memory_space<vmem>>, vector<1x1x128x128xbf16>
    %61 = vector.shape_cast %60 : vector<1x1x128x128xbf16> to vector<128x128xbf16>
    %cst_77 = arith.constant dense<0.000000e+00> : vector<32x128xf32>
    %62 = tpu.matmul %59, %61, %cst_77 {dimension_numbers = #tpu.dot_dimension_numbers<[1], [0], [0], [1], [0, 0, 1, 1], [], []>} : vector<32x128xbf16>, vector<128x128xbf16>, vector<32x128xf32> -> vector<32x128xf32>
    %63 = arith.addf %56, %62 : vector<32x128xf32>
    %64 = vector.shape_cast %63 : vector<32x128xf32> to vector<1x4x8x128xf32>
    %c0_78 = arith.constant 0 : index
    %c0_79 = arith.constant 0 : index
    %c0_80 = arith.constant 0 : index
    %c0_81 = arith.constant 0 : index
    %65 = vector.load %arg3[%c0_78, %c0_79, %c0_80, %c0_81] : memref<1x4x8x128xf32, #tpu.memory_space<vmem>>, vector<1x4x8x128xf32>
    tpu.vector_store %arg3[%c0_78, %c0_79, %c0_80, %c0_81], %64 {strides = array<i32>} : memref<1x4x8x128xf32, #tpu.memory_space<vmem>>, vector<1x4x8x128xf32>,
    %cst_82 = arith.constant dense<0.000000e+00> : vector<128xf32>
    %66 = vector.multi_reduction <add>, %63, %cst_82 [0] : vector<32x128xf32> to vector<128xf32>
    %67 = vector.shape_cast %66 : vector<128xf32> to vector<1x128xf32>
    %68 = vector.shape_cast %67 : vector<1x128xf32> to vector<1x1x128xf32>
    %c0_83 = arith.constant 0 : index
    %c0_84 = arith.constant 0 : index
    %c0_85 = arith.constant 0 : index
    %69 = vector.load %arg4[%c0_83, %c0_84, %c0_85] : memref<1x1x128xf32, #tpu.memory_space<vmem>>, vector<1x1x128xf32>
    tpu.vector_store %arg4[%c0_83, %c0_84, %c0_85], %68 {strides = array<i32>} : memref<1x1x128xf32, #tpu.memory_space<vmem>>, vector<1x1x128xf32>,
    %70 = arith.mulf %63, %63 : vector<32x128xf32>
    %cst_86 = arith.constant dense<0.000000e+00> : vector<128xf32>
    %71 = vector.multi_reduction <add>, %70, %cst_86 [0] : vector<32x128xf32> to vector<128xf32>
    %72 = vector.shape_cast %71 : vector<128xf32> to vector<1x128xf32>
    %73 = vector.shape_cast %72 : vector<1x128xf32> to vector<1x1x128xf32>
    %c0_87 = arith.constant 0 : index
    %c0_88 = arith.constant 0 : index
    %c0_89 = arith.constant 0 : index
    %74 = vector.load %arg5[%c0_87, %c0_88, %c0_89] : memref<1x1x128xf32, #tpu.memory_space<vmem>>, vector<1x1x128xf32>
    tpu.vector_store %arg5[%c0_87, %c0_88, %c0_89], %73 {strides = array<i32>} : memref<1x1x128xf32, #tpu.memory_space<vmem>>, vector<1x1x128xf32>,
    return
  }
  func.func @transform_0(%arg0: i32) -> (i32, i32, i32, i32) {
    %c0_i32 = arith.constant 0 : i32
    %c0_i32_0 = arith.constant 0 : i32
    %c0_i32_1 = arith.constant 0 : i32
    %c0_i32_2 = arith.constant 0 : i32
    return %arg0, %c0_i32, %c0_i32_0, %c0_i32_1 : i32, i32, i32, i32
  }
  func.func @transform_1(%arg0: i32) -> (i32, i32, i32, i32) {
    %c0_i32 = arith.constant 0 : i32
    %c0_i32_0 = arith.constant 0 : i32
    %c0_i32_1 = arith.constant 0 : i32
    %c0_i32_2 = arith.constant 0 : i32
    %c0_i32_3 = arith.constant 0 : i32
    return %c0_i32, %c0_i32_0, %c0_i32_1, %c0_i32_2 : i32, i32, i32, i32
  }
  func.func @transform_2(%arg0: i32) -> (i32, i32, i32, i32) {
    %c0_i32 = arith.constant 0 : i32
    %c0_i32_0 = arith.constant 0 : i32
    %c0_i32_1 = arith.constant 0 : i32
    %c0_i32_2 = arith.constant 0 : i32
    return %arg0, %c0_i32, %c0_i32_0, %c0_i32_1 : i32, i32, i32, i32
  }
  func.func @transform_3(%arg0: i32) -> (i32, i32, i32) {
    %c0_i32 = arith.constant 0 : i32
    %c0_i32_0 = arith.constant 0 : i32
    %c0_i32_1 = arith.constant 0 : i32
    return %arg0, %c0_i32, %c0_i32_0 : i32, i32, i32
  }
  func.func @transform_4(%arg0: i32) -> (i32, i32, i32) {
    %c0_i32 = arith.constant 0 : i32
    %c0_i32_0 = arith.constant 0 : i32
    %c0_i32_1 = arith.constant 0 : i32
    return %arg0, %c0_i32, %c0_i32_0 : i32, i32, i32
  }
}

module attributes {stable_mosaic.version = 11 : i64} {
  func.func @_bn_relu_kernel(%arg0: i32, %arg1: memref<64x128xf32, #tpu.memory_space<vmem>>, %arg2: memref<1x128xf32, #tpu.memory_space<vmem>>, %arg3: memref<1x128xf32, #tpu.memory_space<vmem>>, %arg4: memref<64x128xf32, #tpu.memory_space<vmem>>) attributes {dimension_semantics = [#tpu.dimension_semantics<parallel>], iteration_bounds = array<i64: 1>, scalar_prefetch = 0 : i64, scratch_operands = 0 : i64, tpu.core_type = #tpu.core_type<tc>, window_params = [{transform_indices = @transform_0, window_bounds = array<i64: 64, 128>}, {pipeline_mode = #tpu.pipeline_mode<synchronous>, transform_indices = @transform_1, window_bounds = array<i64: 1, 128>}, {pipeline_mode = #tpu.pipeline_mode<synchronous>, transform_indices = @transform_2, window_bounds = array<i64: 1, 128>}, {transform_indices = @transform_3, window_bounds = array<i64: 64, 128>}]} {
    %c0 = arith.constant 0 : index
    %c0_0 = arith.constant 0 : index
    %0 = vector.load %arg1[%c0, %c0_0] : memref<64x128xf32, #tpu.memory_space<vmem>>, vector<64x128xf32>
    %c0_1 = arith.constant 0 : index
    %c0_2 = arith.constant 0 : index
    %1 = vector.load %arg2[%c0_1, %c0_2] : memref<1x128xf32, #tpu.memory_space<vmem>>, vector<1x128xf32>
    %2 = vector.broadcast %1 : vector<1x128xf32> to vector<64x128xf32>
    %3 = arith.mulf %0, %2 : vector<64x128xf32>
    %c0_3 = arith.constant 0 : index
    %c0_4 = arith.constant 0 : index
    %4 = vector.load %arg3[%c0_3, %c0_4] : memref<1x128xf32, #tpu.memory_space<vmem>>, vector<1x128xf32>
    %5 = vector.broadcast %4 : vector<1x128xf32> to vector<64x128xf32>
    %6 = arith.addf %3, %5 : vector<64x128xf32>
    %cst = arith.constant 0.000000e+00 : f32
    %7 = vector.broadcast %cst : f32 to vector<64x128xf32>
    %8 = arith.maximumf %6, %7 : vector<64x128xf32>
    %c0_5 = arith.constant 0 : index
    %c0_6 = arith.constant 0 : index
    %9 = vector.load %arg4[%c0_5, %c0_6] : memref<64x128xf32, #tpu.memory_space<vmem>>, vector<64x128xf32>
    tpu.vector_store %arg4[%c0_5, %c0_6], %8 {strides = array<i32>} : memref<64x128xf32, #tpu.memory_space<vmem>>, vector<64x128xf32>,
    return
  }
  func.func @transform_0(%arg0: i32) -> (i32, i32) {
    %c0_i32 = arith.constant 0 : i32
    %c0_i32_0 = arith.constant 0 : i32
    return %arg0, %c0_i32 : i32, i32
  }
  func.func @transform_1(%arg0: i32) -> (i32, i32) {
    %c0_i32 = arith.constant 0 : i32
    %c0_i32_0 = arith.constant 0 : i32
    %c0_i32_1 = arith.constant 0 : i32
    return %c0_i32, %c0_i32_0 : i32, i32
  }
  func.func @transform_2(%arg0: i32) -> (i32, i32) {
    %c0_i32 = arith.constant 0 : i32
    %c0_i32_0 = arith.constant 0 : i32
    %c0_i32_1 = arith.constant 0 : i32
    return %c0_i32, %c0_i32_0 : i32, i32
  }
  func.func @transform_3(%arg0: i32) -> (i32, i32) {
    %c0_i32 = arith.constant 0 : i32
    %c0_i32_0 = arith.constant 0 : i32
    return %arg0, %c0_i32 : i32, i32
  }
}

</mosaic_0001>

<bundles_post_ra>
// kernel: unet_forward.21
= control target key start
LH: loop header
LB: loop body
LE: loop exit
PB: predicated region body
PF: predicated region fallthrough
CT: control target
= control target key end

     0   :  { %s896_s0 = inlined_call_operand.vmem [shape: f32[512,128], index: 0, kind: input, shape index: {}]   ;;  %s897_s1 = inlined_call_operand.vmem [shape: f32[1,128], index: 1, kind: input, shape index: {}]   ;;  %s898_s2 = inlined_call_operand.vmem [shape: f32[1,128], index: 2, kind: input, shape index: {}]   ;;  %s899_s3 = inlined_call_operand.vmem [shape: f32[512,128], index: 3, kind: output, shape index: {}]  }
   0x1   :  { %v14_v0 = vld [vmem:[%s896_s0] sm:$0xff]  ;;  %v15_v4 = vld [vmem:[%s896_s0 + $0x8] sm:$0xff]  ;;  %v16_v5 = vld [vmem:[%s896_s0 + $0x10] sm:$0xff] }
   0x2   :  { %v380_v1 = vld [vmem:[%s897_s1] ss:$0 sm:$0xff]  ;;  %v17_v6 = vld [vmem:[%s896_s0 + $0x18] sm:$0xff]  ;;  %v19_v11 = vld [vmem:[%s896_s0 + $0x28] sm:$0xff] }
   0x3   :  { %v385_v2 = vld [vmem:[%s898_s2] ss:$0 sm:$0xff]  ;;  %v85_v3 = vmul.f32 %v380_v1, %v14_v0  ;;  %v86_v7 = vmul.f32 %v380_v1, %v15_v4  ;;  %v87_v8 = vmul.f32 %v380_v1, %v16_v5  ;;  %v88_v9 = vmul.f32 %v380_v1, %v17_v6  ;;  %v20_v12 = vld [vmem:[%s896_s0 + $0x30] sm:$0xff]  ;;  %v21_v17 = vld [vmem:[%s896_s0 + $0x38] sm:$0xff] }
   0x4   :  { %v18_v10 = vld [vmem:[%s896_s0 + $0x20] sm:$0xff]  ;;  %v90_v15 = vmul.f32 %v380_v1, %v19_v11  ;;  %v91_v16 = vmul.f32 %v380_v1, %v20_v12  ;;  %v92_v21 = vmul.f32 %v380_v1, %v21_v17  ;;  %v23_v27 = vld [vmem:[%s896_s0 + $0x48] sm:$0xff]  ;;  %v24_v28 = vld [vmem:[%s896_s0 + $0x50] sm:$0xff] }
   0x5   :  { %v156_v13 = vadd.f32 %v385_v2, %v85_v3  ;;  %v89_v14 = vmul.f32 %v380_v1, %v18_v10  ;;  %v157_v18 = vadd.f32 %v385_v2, %v86_v7  ;;  %v158_v19 = vadd.f32 %v385_v2, %v87_v8  ;;  %v22_v22 = vld [vmem:[%s896_s0 + $0x40] sm:$0xff]  ;;  %v25_v29 = vld [vmem:[%s896_s0 + $0x58] sm:$0xff]  ;;  %v27_v35 = vld [vmem:[%s896_s0 + $0x68] sm:$0xff] }
   0x6   :  { %v159_v20 = vadd.f32 %v385_v2, %v88_v9  ;;  %v161_v25 = vadd.f32 %v385_v2, %v90_v15  ;;  %v162_v26 = vadd.f32 %v385_v2, %v91_v16  ;;  %v163_v33 = vadd.f32 %v385_v2, %v92_v21  ;;  %v26_v34 = vld [vmem:[%s896_s0 + $0x60] sm:$0xff]  ;;  %v28_v36 = vld [vmem:[%s896_s0 + $0x70] sm:$0xff]  ;;  %v29_v41 = vld [vmem:[%s896_s0 + $0x78] sm:$0xff] }
   0x7   :  { %v220_v23 = vmax.f32 %v156_v13, 0.0  ;;  %v160_v24 = vadd.f32 %v385_v2, %v89_v14  ;;  %v221_v30 = vmax.f32 %v157_v18, 0.0  ;;  %v222_v31 = vmax.f32 %v158_v19, 0.0  ;;  %v30_v54 = vld [vmem:[%s896_s0 + $0x80] sm:$0xff]  ;;  %v31_v59 = vld [vmem:[%s896_s0 + $0x88] sm:$0xff]  ;;  %v32_v60 = vld [vmem:[%s896_s0 + $0x90] sm:$0xff] }
   0x8   :  { %v223_v32 = vmax.f32 %v159_v20, 0.0  ;;  %v225_v38 = vmax.f32 %v161_v25, 0.0  ;;  %v226_v39 = vmax.f32 %v162_v26, 0.0  ;;  %v93_v40 = vmul.f32 %v380_v1, %v22_v22  ;;  %v33_v61 = vld [vmem:[%s896_s0 + $0x98] sm:$0xff]  ;;  %v34_v4 = vld [vmem:[%s896_s0 + $0xa0] sm:$0xff]  ;;  %v35_v5 = vld [vmem:[%s896_s0 + $0xa8] sm:$0xff] }
   0x9   :  { %284 = vst [vmem:[%s899_s3] sm:$0xff] %v220_v23  ;;  %v224_v37 = vmax.f32 %v160_v24, 0.0  ;;  %285 = vst [vmem:[%s899_s3 + $0x8] sm:$0xff] %v221_v30  ;;  %v227_v42 = vmax.f32 %v163_v33, 0.0  ;;  %v94_v43 = vmul.f32 %v380_v1, %v23_v27  ;;  %v95_v44 = vmul.f32 %v380_v1, %v24_v28  ;;  %v36_v6 = vld [vmem:[%s896_s0 + $0xb0] sm:$0xff]  ;;  %v37_v11 = vld [vmem:[%s896_s0 + $0xb8] sm:$0xff] }
   0xa   :  { %286 = vst [vmem:[%s899_s3 + $0x10] sm:$0xff] %v222_v31  ;;  %287 = vst [vmem:[%s899_s3 + $0x18] sm:$0xff] %v223_v32  ;;  %v96_v45 = vmul.f32 %v380_v1, %v25_v29  ;;  %v164_v46 = vadd.f32 %v385_v2, %v93_v40  ;;  %v97_v47 = vmul.f32 %v380_v1, %v26_v34  ;;  %v38_v24 = vld [vmem:[%s896_s0 + $0xc0] sm:$0xff]  ;;  %v39_v29 = vld [vmem:[%s896_s0 + $0xc8] sm:$0xff] }
   0xb   :  { %288 = vst [vmem:[%s899_s3 + $0x20] sm:$0xff] %v224_v37  ;;  %289 = vst [vmem:[%s899_s3 + $0x28] sm:$0xff] %v225_v38  ;;  %v98_v48 = vmul.f32 %v380_v1, %v27_v35  ;;  %v99_v49 = vmul.f32 %v380_v1, %v28_v36  ;;  %v165_v50 = vadd.f32 %v385_v2, %v94_v43  ;;  %v40_v30 = vld [vmem:[%s896_s0 + $0xd0] sm:$0xff]  ;;  %v41_v31 = vld [vmem:[%s896_s0 + $0xd8] sm:$0xff] }
   0xc   :  { %290 = vst [vmem:[%s899_s3 + $0x30] sm:$0xff] %v226_v39  ;;  %291 = vst [vmem:[%s899_s3 + $0x38] sm:$0xff] %v227_v42  ;;  %v166_v51 = vadd.f32 %v385_v2, %v95_v44  ;;  %v167_v52 = vadd.f32 %v385_v2, %v96_v45  ;;  %v100_v53 = vmul.f32 %v380_v1, %v29_v41  ;;  %v228_v55 = vmax.f32 %v164_v46, 0.0  ;;  %v42_v36 = vld [vmem:[%s896_s0 + $0xe0] sm:$0xff]  ;;  %v43_v37 = vld [vmem:[%s896_s0 + $0xe8] sm:$0xff] }
   0xd   :  { %v168_v56 = vadd.f32 %v385_v2, %v97_v47  ;;  %v169_v57 = vadd.f32 %v385_v2, %v98_v48  ;;  %v170_v58 = vadd.f32 %v385_v2, %v99_v49  ;;  %v229_v62 = vmax.f32 %v165_v50, 0.0  ;;  %v44_v38 = vld [vmem:[%s896_s0 + $0xf0] sm:$0xff]  ;;  %v45_v43 = vld [vmem:[%s896_s0 + $0xf8] sm:$0xff] }
   0xe   :  { %v230_v63 = vmax.f32 %v166_v51, 0.0  ;;  %v231_v0 = vmax.f32 %v167_v52, 0.0  ;;  %v171_v3 = vadd.f32 %v385_v2, %v100_v53  ;;  %292 = vst [vmem:[%s899_s3 + $0x40] sm:$0xff] %v228_v55  ;;  %v101_v10 = vmul.f32 %v380_v1, %v30_v54 }
   0xf   :  { %v232_v7 = vmax.f32 %v168_v56, 0.0  ;;  %v233_v8 = vmax.f32 %v169_v57, 0.0  ;;  %v234_v9 = vmax.f32 %v170_v58, 0.0  ;;  %293 = vst [vmem:[%s899_s3 + $0x48] sm:$0xff] %v229_v62  ;;  %v102_v13 = vmul.f32 %v380_v1, %v31_v59  ;;  %v46_v56 = vld [vmem:[%s896_s0 + $0x100] sm:$0xff]  ;;  %v48_v62 = vld [vmem:[%s896_s0 + $0x110] sm:$0xff] }
  0x10   :  { %294 = vst [vmem:[%s899_s3 + $0x50] sm:$0xff] %v230_v63  ;;  %295 = vst [vmem:[%s899_s3 + $0x58] sm:$0xff] %v231_v0  ;;  %v235_v12 = vmax.f32 %v171_v3, 0.0  ;;  %v103_v14 = vmul.f32 %v380_v1, %v32_v60  ;;  %v104_v15 = vmul.f32 %v380_v1, %v33_v61  ;;  %v172_v16 = vadd.f32 %v385_v2, %v101_v10  ;;  %v47_v61 = vld [vmem:[%s896_s0 + $0x108] sm:$0xff]  ;;  %v49_v63 = vld [vmem:[%s896_s0 + $0x118] sm:$0xff] }
  0x11   :  { %296 = vst [vmem:[%s899_s3 + $0x60] sm:$0xff] %v232_v7  ;;  %297 = vst [vmem:[%s899_s3 + $0x68] sm:$0xff] %v233_v8  ;;  %v105_v17 = vmul.f32 %v380_v1, %v34_v4  ;;  %v106_v18 = vmul.f32 %v380_v1, %v35_v5  ;;  %v107_v19 = vmul.f32 %v380_v1, %v36_v6  ;;  %v50_v6 = vld [vmem:[%s896_s0 + $0x120] sm:$0xff]  ;;  %v51_v7 = vld [vmem:[%s896_s0 + $0x128] sm:$0xff] }
  0x12   :  { %298 = vst [vmem:[%s899_s3 + $0x70] sm:$0xff] %v234_v9  ;;  %299 = vst [vmem:[%s899_s3 + $0x78] sm:$0xff] %v235_v12  ;;  %v173_v20 = vadd.f32 %v385_v2, %v102_v13  ;;  %v174_v21 = vadd.f32 %v385_v2, %v103_v14  ;;  %v175_v22 = vadd.f32 %v385_v2, %v104_v15  ;;  %v236_v25 = vmax.f32 %v172_v16, 0.0  ;;  %v52_v8 = vld [vmem:[%s896_s0 + $0x130] sm:$0xff]  ;;  %v53_v13 = vld [vmem:[%s896_s0 + $0x138] sm:$0xff] }
  0x13   :  { %v108_v23 = vmul.f32 %v380_v1, %v37_v11  ;;  %v176_v26 = vadd.f32 %v385_v2, %v105_v17  ;;  %v177_v27 = vadd.f32 %v385_v2, %v106_v18  ;;  %v178_v28 = vadd.f32 %v385_v2, %v107_v19 }
  0x14   :  { %v237_v32 = vmax.f32 %v173_v20, 0.0  ;;  %v238_v33 = vmax.f32 %v174_v21, 0.0  ;;  %v239_v34 = vmax.f32 %v175_v22, 0.0  ;;  %300 = vst [vmem:[%s899_s3 + $0x80] sm:$0xff] %v236_v25  ;;  %v109_v42 = vmul.f32 %v380_v1, %v38_v24 }
  0x15   :  { %v179_v35 = vadd.f32 %v385_v2, %v108_v23  ;;  %v240_v39 = vmax.f32 %v176_v26, 0.0  ;;  %v241_v40 = vmax.f32 %v177_v27, 0.0  ;;  %v242_v41 = vmax.f32 %v178_v28, 0.0  ;;  %v54_v26 = vld [vmem:[%s896_s0 + $0x140] sm:$0xff] }
  0x16   :  { %301 = vst [vmem:[%s899_s3 + $0x88] sm:$0xff] %v237_v32  ;;  %302 = vst [vmem:[%s899_s3 + $0x90] sm:$0xff] %v238_v33  ;;  %v110_v45 = vmul.f32 %v380_v1, %v39_v29  ;;  %v111_v46 = vmul.f32 %v380_v1, %v40_v30  ;;  %v112_v47 = vmul.f32 %v380_v1, %v41_v31  ;;  %v55_v31 = vld [vmem:[%s896_s0 + $0x148] sm:$0xff]  ;;  %v56_v32 = vld [vmem:[%s896_s0 + $0x150] sm:$0xff] }
  0x17   :  { %303 = vst [vmem:[%s899_s3 + $0x98] sm:$0xff] %v239_v34  ;;  %v243_v44 = vmax.f32 %v179_v35, 0.0  ;;  %304 = vst [vmem:[%s899_s3 + $0xa0] sm:$0xff] %v240_v39  ;;  %v180_v48 = vadd.f32 %v385_v2, %v109_v42  ;;  %v113_v49 = vmul.f32 %v380_v1, %v42_v36  ;;  %v114_v50 = vmul.f32 %v380_v1, %v43_v37  ;;  %v57_v33 = vld [vmem:[%s896_s0 + $0x158] sm:$0xff]  ;;  %v59_v39 = vld [vmem:[%s896_s0 + $0x168] sm:$0xff] }
  0x18   :  { %305 = vst [vmem:[%s899_s3 + $0xa8] sm:$0xff] %v241_v40  ;;  %306 = vst [vmem:[%s899_s3 + $0xb0] sm:$0xff] %v242_v41  ;;  %v115_v51 = vmul.f32 %v380_v1, %v44_v38  ;;  %v181_v52 = vadd.f32 %v385_v2, %v110_v45  ;;  %v182_v53 = vadd.f32 %v385_v2, %v111_v46  ;;  %v58_v38 = vld [vmem:[%s896_s0 + $0x160] sm:$0xff]  ;;  %v60_v40 = vld [vmem:[%s896_s0 + $0x170] sm:$0xff] }
  0x19   :  { %307 = vst [vmem:[%s899_s3 + $0xb8] sm:$0xff] %v243_v44  ;;  %v183_v54 = vadd.f32 %v385_v2, %v112_v47  ;;  %v116_v55 = vmul.f32 %v380_v1, %v45_v43  ;;  %v244_v57 = vmax.f32 %v180_v48, 0.0  ;;  %v184_v58 = vadd.f32 %v385_v2, %v113_v49  ;;  %v61_v45 = vld [vmem:[%s896_s0 + $0x178] sm:$0xff] }
  0x1a   :  { %v185_v59 = vadd.f32 %v385_v2, %v114_v50  ;;  %v186_v60 = vadd.f32 %v385_v2, %v115_v51  ;;  %v245_v0 = vmax.f32 %v181_v52, 0.0  ;;  %v246_v3 = vmax.f32 %v182_v53, 0.0 }
  0x1b   :  { %v247_v4 = vmax.f32 %v183_v54, 0.0  ;;  %v187_v5 = vadd.f32 %v385_v2, %v116_v55  ;;  %308 = vst [vmem:[%s899_s3 + $0xc0] sm:$0xff] %v244_v57  ;;  %v248_v9 = vmax.f32 %v184_v58, 0.0  ;;  %v117_v12 = vmul.f32 %v380_v1, %v46_v56  ;;  %v62_v58 = vld [vmem:[%s896_s0 + $0x180] sm:$0xff] }
  0x1c   :  { %v249_v10 = vmax.f32 %v185_v59, 0.0  ;;  %v250_v11 = vmax.f32 %v186_v60, 0.0  ;;  %309 = vst [vmem:[%s899_s3 + $0xc8] sm:$0xff] %v245_v0  ;;  %310 = vst [vmem:[%s899_s3 + $0xd0] sm:$0xff] %v246_v3  ;;  %v118_v15 = vmul.f32 %v380_v1, %v47_v61  ;;  %v119_v16 = vmul.f32 %v380_v1, %v48_v62  ;;  %v64_v0 = vld [vmem:[%s896_s0 + $0x190] sm:$0xff]  ;;  %v65_v3 = vld [vmem:[%s896_s0 + $0x198] sm:$0xff] }
  0x1d   :  { %311 = vst [vmem:[%s899_s3 + $0xd8] sm:$0xff] %v247_v4  ;;  %v251_v14 = vmax.f32 %v187_v5, 0.0  ;;  %v120_v17 = vmul.f32 %v380_v1, %v49_v63  ;;  %312 = vst [vmem:[%s899_s3 + $0xe0] sm:$0xff] %v248_v9  ;;  %v188_v18 = vadd.f32 %v385_v2, %v117_v12  ;;  %v121_v19 = vmul.f32 %v380_v1, %v50_v6  ;;  %v63_v63 = vld [vmem:[%s896_s0 + $0x188] sm:$0xff] }
  0x1e   :  { %313 = vst [vmem:[%s899_s3 + $0xe8] sm:$0xff] %v249_v10  ;;  %314 = vst [vmem:[%s899_s3 + $0xf0] sm:$0xff] %v250_v11  ;;  %v122_v20 = vmul.f32 %v380_v1, %v51_v7  ;;  %v123_v21 = vmul.f32 %v380_v1, %v52_v8  ;;  %v189_v22 = vadd.f32 %v385_v2, %v118_v15  ;;  %v66_v8 = vld [vmem:[%s896_s0 + $0x1a0] sm:$0xff]  ;;  %v67_v9 = vld [vmem:[%s896_s0 + $0x1a8] sm:$0xff] }
  0x1f   :  { %315 = vst [vmem:[%s899_s3 + $0xf8] sm:$0xff] %v251_v14  ;;  %v190_v23 = vadd.f32 %v385_v2, %v119_v16  ;;  %v191_v24 = vadd.f32 %v385_v2, %v120_v17  ;;  %v124_v25 = vmul.f32 %v380_v1, %v53_v13  ;;  %v252_v27 = vmax.f32 %v188_v18, 0.0  ;;  %v68_v10 = vld [vmem:[%s896_s0 + $0x1b0] sm:$0xff]  ;;  %v69_v15 = vld [vmem:[%s896_s0 + $0x1b8] sm:$0xff] }
  0x20   :  { %v192_v28 = vadd.f32 %v385_v2, %v121_v19  ;;  %v193_v29 = vadd.f32 %v385_v2, %v122_v20  ;;  %v194_v30 = vadd.f32 %v385_v2, %v123_v21  ;;  %v253_v34 = vmax.f32 %v189_v22, 0.0 }
  0x21   :  { %v254_v35 = vmax.f32 %v190_v23, 0.0  ;;  %v255_v36 = vmax.f32 %v191_v24, 0.0  ;;  %v195_v37 = vadd.f32 %v385_v2, %v124_v25  ;;  %316 = vst [vmem:[%s899_s3 + $0x100] sm:$0xff] %v252_v27  ;;  %v125_v44 = vmul.f32 %v380_v1, %v54_v26 }
  0x22   :  { %v256_v41 = vmax.f32 %v192_v28, 0.0  ;;  %v257_v42 = vmax.f32 %v193_v29, 0.0  ;;  %v258_v43 = vmax.f32 %v194_v30, 0.0  ;;  %317 = vst [vmem:[%s899_s3 + $0x108] sm:$0xff] %v253_v34  ;;  %v126_v47 = vmul.f32 %v380_v1, %v55_v31  ;;  %v70_v28 = vld [vmem:[%s896_s0 + $0x1c0] sm:$0xff]  ;;  %v72_v34 = vld [vmem:[%s896_s0 + $0x1d0] sm:$0xff] }
  0x23   :  { %318 = vst [vmem:[%s899_s3 + $0x110] sm:$0xff] %v254_v35  ;;  %319 = vst [vmem:[%s899_s3 + $0x118] sm:$0xff] %v255_v36  ;;  %v259_v46 = vmax.f32 %v195_v37, 0.0  ;;  %v127_v48 = vmul.f32 %v380_v1, %v56_v32  ;;  %v128_v49 = vmul.f32 %v380_v1, %v57_v33  ;;  %v196_v50 = vadd.f32 %v385_v2, %v125_v44  ;;  %v71_v33 = vld [vmem:[%s896_s0 + $0x1c8] sm:$0xff]  ;;  %v73_v35 = vld [vmem:[%s896_s0 + $0x1d8] sm:$0xff] }
  0x24   :  { %320 = vst [vmem:[%s899_s3 + $0x120] sm:$0xff] %v256_v41  ;;  %321 = vst [vmem:[%s899_s3 + $0x128] sm:$0xff] %v257_v42  ;;  %v129_v51 = vmul.f32 %v380_v1, %v58_v38  ;;  %v130_v52 = vmul.f32 %v380_v1, %v59_v39  ;;  %v131_v53 = vmul.f32 %v380_v1, %v60_v40  ;;  %v74_v40 = vld [vmem:[%s896_s0 + $0x1e0] sm:$0xff]  ;;  %v75_v41 = vld [vmem:[%s896_s0 + $0x1e8] sm:$0xff] }
  0x25   :  { %322 = vst [vmem:[%s899_s3 + $0x130] sm:$0xff] %v258_v43  ;;  %323 = vst [vmem:[%s899_s3 + $0x138] sm:$0xff] %v259_v46  ;;  %v197_v54 = vadd.f32 %v385_v2, %v126_v47  ;;  %v198_v55 = vadd.f32 %v385_v2, %v127_v48  ;;  %v199_v56 = vadd.f32 %v385_v2, %v128_v49  ;;  %v260_v59 = vmax.f32 %v196_v50, 0.0  ;;  %v76_v42 = vld [vmem:[%s896_s0 + $0x1f0] sm:$0xff]  ;;  %v77_v47 = vld [vmem:[%s896_s0 + $0x1f8] sm:$0xff] }
  0x26   :  { %v132_v57 = vmul.f32 %v380_v1, %v61_v45  ;;  %v200_v60 = vadd.f32 %v385_v2, %v129_v51  ;;  %v201_v61 = vadd.f32 %v385_v2, %v130_v52  ;;  %v202_v62 = vadd.f32 %v385_v2, %v131_v53 }
  0x27   :  { %v261_v4 = vmax.f32 %v197_v54, 0.0  ;;  %v262_v5 = vmax.f32 %v198_v55, 0.0  ;;  %v263_v6 = vmax.f32 %v199_v56, 0.0  ;;  %324 = vst [vmem:[%s899_s3 + $0x140] sm:$0xff] %v260_v59  ;;  %v133_v14 = vmul.f32 %v380_v1, %v62_v58 }
  0x28   :  { %v203_v7 = vadd.f32 %v385_v2, %v132_v57  ;;  %v264_v11 = vmax.f32 %v200_v60, 0.0  ;;  %v265_v12 = vmax.f32 %v201_v61, 0.0  ;;  %v266_v13 = vmax.f32 %v202_v62, 0.0 }
  0x29   :  { %325 = vst [vmem:[%s899_s3 + $0x148] sm:$0xff] %v261_v4  ;;  %326 = vst [vmem:[%s899_s3 + $0x150] sm:$0xff] %v262_v5  ;;  %v134_v17 = vmul.f32 %v380_v1, %v63_v63  ;;  %v135_v18 = vmul.f32 %v380_v1, %v64_v0  ;;  %v136_v19 = vmul.f32 %v380_v1, %v65_v3 }
  0x2a   :  { %327 = vst [vmem:[%s899_s3 + $0x158] sm:$0xff] %v263_v6  ;;  %v267_v16 = vmax.f32 %v203_v7, 0.0  ;;  %328 = vst [vmem:[%s899_s3 + $0x160] sm:$0xff] %v264_v11  ;;  %v204_v20 = vadd.f32 %v385_v2, %v133_v14  ;;  %v137_v21 = vmul.f32 %v380_v1, %v66_v8  ;;  %v138_v22 = vmul.f32 %v380_v1, %v67_v9 }
  0x2b   :  { %329 = vst [vmem:[%s899_s3 + $0x168] sm:$0xff] %v265_v12  ;;  %330 = vst [vmem:[%s899_s3 + $0x170] sm:$0xff] %v266_v13  ;;  %v139_v23 = vmul.f32 %v380_v1, %v68_v10  ;;  %v205_v24 = vadd.f32 %v385_v2, %v134_v17  ;;  %v206_v25 = vadd.f32 %v385_v2, %v135_v18 }
  0x2c   :  { %331 = vst [vmem:[%s899_s3 + $0x178] sm:$0xff] %v267_v16  ;;  %v207_v26 = vadd.f32 %v385_v2, %v136_v19  ;;  %v140_v27 = vmul.f32 %v380_v1, %v69_v15  ;;  %v268_v29 = vmax.f32 %v204_v20, 0.0  ;;  %v208_v30 = vadd.f32 %v385_v2, %v137_v21 }
  0x2d   :  { %v209_v31 = vadd.f32 %v385_v2, %v138_v22  ;;  %v210_v32 = vadd.f32 %v385_v2, %v139_v23  ;;  %v269_v36 = vmax.f32 %v205_v24, 0.0  ;;  %v270_v37 = vmax.f32 %v206_v25, 0.0 }
  0x2e   :  { %v271_v38 = vmax.f32 %v207_v26, 0.0  ;;  %v211_v39 = vadd.f32 %v385_v2, %v140_v27  ;;  %332 = vst [vmem:[%s899_s3 + $0x180] sm:$0xff] %v268_v29  ;;  %v272_v43 = vmax.f32 %v208_v30, 0.0  ;;  %v141_v46 = vmul.f32 %v380_v1, %v70_v28 }
  0x2f   :  { %v273_v44 = vmax.f32 %v209_v31, 0.0  ;;  %v274_v45 = vmax.f32 %v210_v32, 0.0  ;;  %333 = vst [vmem:[%s899_s3 + $0x188] sm:$0xff] %v269_v36  ;;  %334 = vst [vmem:[%s899_s3 + $0x190] sm:$0xff] %v270_v37  ;;  %v142_v49 = vmul.f32 %v380_v1, %v71_v33  ;;  %v143_v50 = vmul.f32 %v380_v1, %v72_v34 }
  0x30   :  { %335 = vst [vmem:[%s899_s3 + $0x198] sm:$0xff] %v271_v38  ;;  %v275_v48 = vmax.f32 %v211_v39, 0.0  ;;  %v144_v51 = vmul.f32 %v380_v1, %v73_v35  ;;  %336 = vst [vmem:[%s899_s3 + $0x1a0] sm:$0xff] %v272_v43  ;;  %v212_v52 = vadd.f32 %v385_v2, %v141_v46  ;;  %v145_v53 = vmul.f32 %v380_v1, %v74_v40 }
  0x31   :  { %337 = vst [vmem:[%s899_s3 + $0x1a8] sm:$0xff] %v273_v44  ;;  %338 = vst [vmem:[%s899_s3 + $0x1b0] sm:$0xff] %v274_v45  ;;  %v146_v54 = vmul.f32 %v380_v1, %v75_v41  ;;  %v147_v55 = vmul.f32 %v380_v1, %v76_v42  ;;  %v213_v56 = vadd.f32 %v385_v2, %v142_v49 }
  0x32   :  { %339 = vst [vmem:[%s899_s3 + $0x1b8] sm:$0xff] %v275_v48  ;;  %v214_v57 = vadd.f32 %v385_v2, %v143_v50  ;;  %v215_v58 = vadd.f32 %v385_v2, %v144_v51  ;;  %v148_v59 = vmul.f32 %v380_v1, %v77_v47  ;;  %v276_v60 = vmax.f32 %v212_v52, 0.0 }
  0x33   :  { %v216_v61 = vadd.f32 %v385_v2, %v145_v53  ;;  %v217_v62 = vadd.f32 %v385_v2, %v146_v54  ;;  %v218_v63 = vadd.f32 %v385_v2, %v147_v55  ;;  %v277_v0 = vmax.f32 %v213_v56, 0.0 }
  0x34   :  { %v278_v3 = vmax.f32 %v214_v57, 0.0  ;;  %v279_v4 = vmax.f32 %v215_v58, 0.0  ;;  %v219_v5 = vadd.f32 %v385_v2, %v148_v59  ;;  %340 = vst [vmem:[%s899_s3 + $0x1c0] sm:$0xff] %v276_v60 }
  0x35   :  { %v280_v6 = vmax.f32 %v216_v61, 0.0  ;;  %v281_v7 = vmax.f32 %v217_v62, 0.0  ;;  %v282_v8 = vmax.f32 %v218_v63, 0.0  ;;  %341 = vst [vmem:[%s899_s3 + $0x1c8] sm:$0xff] %v277_v0 }
  0x36   :  { %342 = vst [vmem:[%s899_s3 + $0x1d0] sm:$0xff] %v278_v3  ;;  %343 = vst [vmem:[%s899_s3 + $0x1d8] sm:$0xff] %v279_v4  ;;  %v283_v1 = vmax.f32 %v219_v5, 0.0 }
  0x37   :  { %344 = vst [vmem:[%s899_s3 + $0x1e0] sm:$0xff] %v280_v6  ;;  %345 = vst [vmem:[%s899_s3 + $0x1e8] sm:$0xff] %v281_v7 }
  0x38   :  { %346 = vst [vmem:[%s899_s3 + $0x1f0] sm:$0xff] %v282_v8  ;;  %347 = vst [vmem:[%s899_s3 + $0x1f8] sm:$0xff] %v283_v1 }

// kernel: unet_forward.25
= control target key start
LH: loop header
LB: loop body
LE: loop exit
PB: predicated region body
PF: predicated region fallthrough
CT: control target
= control target key end

     0   :  { %s254_s0 = inlined_call_operand.vmem [shape: f32[128,128], index: 0, kind: input, shape index: {}]   ;;  %s255_s1 = inlined_call_operand.vmem [shape: f32[1,128], index: 1, kind: input, shape index: {}]   ;;  %s256_s2 = inlined_call_operand.vmem [shape: f32[1,128], index: 2, kind: input, shape index: {}]   ;;  %s257_s3 = inlined_call_operand.vmem [shape: f32[128,128], index: 3, kind: output, shape index: {}]  }
   0x1   :  { %v14_v0 = vld [vmem:[%s254_s0] sm:$0xff]  ;;  %v15_v4 = vld [vmem:[%s254_s0 + $0x8] sm:$0xff]  ;;  %v16_v5 = vld [vmem:[%s254_s0 + $0x10] sm:$0xff] }
   0x2   :  { %v112_v1 = vld [vmem:[%s255_s1] ss:$0 sm:$0xff]  ;;  %v17_v6 = vld [vmem:[%s254_s0 + $0x18] sm:$0xff]  ;;  %v19_v11 = vld [vmem:[%s254_s0 + $0x28] sm:$0xff] }
   0x3   :  { %v143_v2 = vld [vmem:[%s256_s2] ss:$0 sm:$0xff]  ;;  %v37_v3 = vmul.f32 %v112_v1, %v14_v0  ;;  %v38_v7 = vmul.f32 %v112_v1, %v15_v4  ;;  %v39_v8 = vmul.f32 %v112_v1, %v16_v5  ;;  %v40_v9 = vmul.f32 %v112_v1, %v17_v6  ;;  %v20_v12 = vld [vmem:[%s254_s0 + $0x30] sm:$0xff]  ;;  %v21_v17 = vld [vmem:[%s254_s0 + $0x38] sm:$0xff] }
   0x4   :  { %v18_v10 = vld [vmem:[%s254_s0 + $0x20] sm:$0xff]  ;;  %v42_v15 = vmul.f32 %v112_v1, %v19_v11  ;;  %v43_v16 = vmul.f32 %v112_v1, %v20_v12  ;;  %v44_v21 = vmul.f32 %v112_v1, %v21_v17  ;;  %v23_v27 = vld [vmem:[%s254_s0 + $0x48] sm:$0xff]  ;;  %v24_v28 = vld [vmem:[%s254_s0 + $0x50] sm:$0xff] }
   0x5   :  { %v60_v13 = vadd.f32 %v143_v2, %v37_v3  ;;  %v41_v14 = vmul.f32 %v112_v1, %v18_v10  ;;  %v61_v18 = vadd.f32 %v143_v2, %v38_v7  ;;  %v62_v19 = vadd.f32 %v143_v2, %v39_v8  ;;  %v22_v22 = vld [vmem:[%s254_s0 + $0x40] sm:$0xff]  ;;  %v25_v29 = vld [vmem:[%s254_s0 + $0x58] sm:$0xff]  ;;  %v27_v35 = vld [vmem:[%s254_s0 + $0x68] sm:$0xff] }
   0x6   :  { %v63_v20 = vadd.f32 %v143_v2, %v40_v9  ;;  %v65_v25 = vadd.f32 %v143_v2, %v42_v15  ;;  %v66_v26 = vadd.f32 %v143_v2, %v43_v16  ;;  %v67_v33 = vadd.f32 %v143_v2, %v44_v21  ;;  %v26_v34 = vld [vmem:[%s254_s0 + $0x60] sm:$0xff]  ;;  %v28_v36 = vld [vmem:[%s254_s0 + $0x70] sm:$0xff]  ;;  %v29_v41 = vld [vmem:[%s254_s0 + $0x78] sm:$0xff] }
   0x7   :  { %v76_v23 = vmax.f32 %v60_v13, 0.0  ;;  %v64_v24 = vadd.f32 %v143_v2, %v41_v14  ;;  %v77_v30 = vmax.f32 %v61_v18, 0.0  ;;  %v78_v31 = vmax.f32 %v62_v19, 0.0 }
   0x8   :  { %v79_v32 = vmax.f32 %v63_v20, 0.0  ;;  %v81_v38 = vmax.f32 %v65_v25, 0.0  ;;  %v82_v39 = vmax.f32 %v66_v26, 0.0  ;;  %v45_v40 = vmul.f32 %v112_v1, %v22_v22 }
   0x9   :  { %92 = vst [vmem:[%s257_s3] sm:$0xff] %v76_v23  ;;  %v80_v37 = vmax.f32 %v64_v24, 0.0  ;;  %93 = vst [vmem:[%s257_s3 + $0x8] sm:$0xff] %v77_v30  ;;  %v83_v42 = vmax.f32 %v67_v33, 0.0  ;;  %v46_v43 = vmul.f32 %v112_v1, %v23_v27  ;;  %v47_v44 = vmul.f32 %v112_v1, %v24_v28 }
   0xa   :  { %94 = vst [vmem:[%s257_s3 + $0x10] sm:$0xff] %v78_v31  ;;  %95 = vst [vmem:[%s257_s3 + $0x18] sm:$0xff] %v79_v32  ;;  %v48_v45 = vmul.f32 %v112_v1, %v25_v29  ;;  %v68_v46 = vadd.f32 %v143_v2, %v45_v40  ;;  %v49_v47 = vmul.f32 %v112_v1, %v26_v34 }
   0xb   :  { %96 = vst [vmem:[%s257_s3 + $0x20] sm:$0xff] %v80_v37  ;;  %97 = vst [vmem:[%s257_s3 + $0x28] sm:$0xff] %v81_v38  ;;  %v50_v48 = vmul.f32 %v112_v1, %v27_v35  ;;  %v51_v49 = vmul.f32 %v112_v1, %v28_v36  ;;  %v69_v50 = vadd.f32 %v143_v2, %v46_v43 }
   0xc   :  { %98 = vst [vmem:[%s257_s3 + $0x30] sm:$0xff] %v82_v39  ;;  %99 = vst [vmem:[%s257_s3 + $0x38] sm:$0xff] %v83_v42  ;;  %v70_v51 = vadd.f32 %v143_v2, %v47_v44  ;;  %v71_v52 = vadd.f32 %v143_v2, %v48_v45  ;;  %v52_v53 = vmul.f32 %v112_v1, %v29_v41  ;;  %v84_v54 = vmax.f32 %v68_v46, 0.0 }
   0xd   :  { %v72_v55 = vadd.f32 %v143_v2, %v49_v47  ;;  %v73_v56 = vadd.f32 %v143_v2, %v50_v48  ;;  %v74_v57 = vadd.f32 %v143_v2, %v51_v49  ;;  %v85_v58 = vmax.f32 %v69_v50, 0.0 }
   0xe   :  { %v86_v59 = vmax.f32 %v70_v51, 0.0  ;;  %v87_v60 = vmax.f32 %v71_v52, 0.0  ;;  %v75_v61 = vadd.f32 %v143_v2, %v52_v53  ;;  %100 = vst [vmem:[%s257_s3 + $0x40] sm:$0xff] %v84_v54 }
   0xf   :  { %v88_v62 = vmax.f32 %v72_v55, 0.0  ;;  %v89_v63 = vmax.f32 %v73_v56, 0.0  ;;  %v90_v0 = vmax.f32 %v74_v57, 0.0  ;;  %101 = vst [vmem:[%s257_s3 + $0x48] sm:$0xff] %v85_v58 }
  0x10   :  { %102 = vst [vmem:[%s257_s3 + $0x50] sm:$0xff] %v86_v59  ;;  %103 = vst [vmem:[%s257_s3 + $0x58] sm:$0xff] %v87_v60  ;;  %v91_v1 = vmax.f32 %v75_v61, 0.0 }
  0x11   :  { %104 = vst [vmem:[%s257_s3 + $0x60] sm:$0xff] %v88_v62  ;;  %105 = vst [vmem:[%s257_s3 + $0x68] sm:$0xff] %v89_v63 }
  0x12   :  { %106 = vst [vmem:[%s257_s3 + $0x70] sm:$0xff] %v90_v0  ;;  %107 = vst [vmem:[%s257_s3 + $0x78] sm:$0xff] %v91_v1 }

// kernel: unet_forward.24
= control target key start
LH: loop header
LB: loop body
LE: loop exit
PB: predicated region body
PF: predicated region fallthrough
CT: control target
= control target key end

     0   :  { %s3199_s15 = smov 0   ;;  %s3776_s0 = inlined_call_operand.vmem [shape: bf16[2,10,10,128], index: 0, kind: input, shape index: {}]   ;;  %s3777_s1 = inlined_call_operand.vmem [shape: bf16[3,3,128,128], index: 1, kind: input, shape index: {}]   ;;  %s3778_s2 = inlined_call_operand.vmem [shape: f32[2,8,8,128], index: 2, kind: output, shape index: {0}]   ;;  %s3779_s3 = inlined_call_operand.vmem [shape: f32[2,1,128], index: 3, kind: output, shape index: {1}]   ;;  %s3780_s4 = inlined_call_operand.vmem [shape: f32[2,1,128], index: 4, kind: output, shape index: {2}]  }
   0x1 LB: > { %s2334_s16 = sadd.s32 4294967295, %s3172_s15   ;;  %p2338_p0 = scmp.ge.s32.totalorder %s3172_s15, 1  ;;  %s3172_s15 = sphi %s3199_s15, %s15_s15  }
   0x2   : > { %p167_p1 = scmp.lt.s32.totalorder %s3172_s15, 3 }
   0x4   : > { %p168_p2 = pnand %p2338_p0, %p167_p1 }
   0x5   : > { %v3082_v0 = vld [vmem:[%s3777_s1 + $0x40] sm:$0xff] (!%p168_p2)   ;;  %p199_p3 = scmp.lt.s32.totalorder (!%p168_p2), %s2334_s16, 1  ;;  %v3084_v2 = vld [vmem:[%s3777_s1 + $0x48] sm:$0xff] (!%p168_p2)   ;;  %v3086_v4 = vld [vmem:[%s3777_s1 + $0x50] sm:$0xff] (!%p168_p2)   ;;  %vm248_vm0 = vsmask.f32 (!%p168_p2), 3328 }
   0x6   : > { %171 = sbr.rel (%p168_p2) target bundleno = 418 (0x1a2), region = 28  ;;  %v3083_v1 = vld [vmem:[%s3777_s1 + $0x100] sm:$0xff] (!%p168_p2)   ;;  %2777 = vmatprep.subr.bf16.mxu1 (!%p168_p2), %v3082_v0  ;;  %v3085_v3 = vld [vmem:[%s3777_s1 + $0x108] sm:$0xff] (!%p168_p2)   ;;  %v3087_v5 = vld [vmem:[%s3777_s1 + $0x110] sm:$0xff] (!%p168_p2)   ;;  %vm249_vm1 = vsmask.f32 (!%p168_p2), 7440 }
   0x7   : > { %2873 = vmatprep.subr.bf16.mxu0 (!%p168_p2), %v3083_v1  ;;  %2778 = vmatpush3.bf16.msra.mxu1 (!%p168_p2), %v3082_v0  ;;  %v3088_v6 = vld [vmem:[%s3777_s1 + $0x58] sm:$0xff] (!%p168_p2)   ;;  %v3090_v8 = vld [vmem:[%s3777_s1 + $0x60] sm:$0xff] (!%p168_p2)   ;;  %v3092_v10 = vld [vmem:[%s3777_s1 + $0x68] sm:$0xff] (!%p168_p2)   ;;  %vm670_vm3 = vcmask (!%p168_p2), 1042432   ;;  %vm671_vm4 = vcmask (!%p168_p2), 1046532  }
   0x8   : > { %2874 = vmatpush3.bf16.msra.mxu0 (!%p168_p2), %v3083_v1  ;;  %2779 = vmatprep.subr.bf16.mxu1 (!%p168_p2), %v3084_v2  ;;  %v3089_v7 = vld [vmem:[%s3777_s1 + $0x118] sm:$0xff] (!%p168_p2)   ;;  %v3091_v9 = vld [vmem:[%s3777_s1 + $0x120] sm:$0xff] (!%p168_p2)   ;;  %v3093_v14 = vld [vmem:[%s3777_s1 + $0x128] sm:$0xff] (!%p168_p2)  }
   0x9   : > { %2875 = vmatprep.subr.bf16.mxu0 (!%p168_p2), %v3085_v3  ;;  %v3094_v22 = vld [vmem:[%s3777_s1 + $0x70] sm:$0xff] (!%p168_p2)   ;;  %v3096_v37 = vld [vmem:[%s3777_s1 + $0x78] sm:$0xff] (!%p168_p2)   ;;  %vm3288_vm2 = vmor (!%p168_p2), %vm248_vm0, %vm249_vm1 }
   0xa   : > { %v3095_v23 = vld [vmem:[%s3777_s1 + $0x130] sm:$0xff] (!%p168_p2)   ;;  %v3097_v47 = vld [vmem:[%s3777_s1 + $0x138] sm:$0xff] (!%p168_p2)   ;;  %v3098_v63 = vld [vmem:[%s3777_s1] sm:$0xff] (!%p168_p2)  }
   0xb   : > { %2780 = vmatpush3.bf16.msra.mxu1 (!%p168_p2), %v3084_v2  ;;  %v3320_v1 = vld [vmem:[%s3777_s1 + $0x140] sm:$0xff] (!%p168_p2)   ;;  %vm3462_vm5 = vmor (!%p168_p2), %vm670_vm3, %vm671_vm4 }
   0xc   : > { %2876 = vmatpush3.bf16.msra.mxu0 (!%p168_p2), %v3085_v3  ;;  %2781 = vmatprep.subr.bf16.mxu1 (!%p168_p2), %v3086_v4  ;;  %v3162_v38 = vld [vmem:[%s3777_s1 + $0x220] sm:$0xff] (!%p168_p2)  }
   0xd   : > { %s3786_s16 = smov (!%p199_p3, %s2334_s16), 1  ;;  %2877 = vmatprep.subr.bf16.mxu0 %v3087_v5 }
   0xe   : > { %s3073_s7 = smul.u32 80, %s3786_s16  ;;  %s211_s5 = scalar_lea.vmem %s3779_s3, %s3786_s16 }
   0xf   : > { %2782 = vmatpush3.bf16.msra.mxu1 %v3086_v4  ;;  %s214_s8 = scalar_lea.vmem %s3780_s4, %s3786_s16 }
  0x10   : > { %2878 = vmatpush3.bf16.msra.mxu0 %v3087_v5  ;;  %2783 = vmatprep.subr.bf16.mxu1 %v3088_v6  ;;  %s3243_s14 = scalar_lea.vmem %s3776_s0, %s3073_s7 }
  0x11   : > { %2879 = vmatprep.subr.bf16.mxu0 %v3089_v7  ;;  %v3249_v11 = vld [vmem:[%s3243_s14] sm:$0xf]  ;;  %v3252_v12 = vld [vmem:[%s3243_s14 + $0x8] sm:$0xf]  ;;  %v3255_v13 = vld [vmem:[%s3243_s14 + $0x4] sm:$0x1] }
  0x12   : > { %v3261_v15 = vld [vmem:[%s3243_s14 + $0xc] sm:$0x1]  ;;  %v252_v16 = vshrl.u32 %v3249_v11, 16  ;;  %v255_v17 = vshll.u32 %v3249_v11, 16  ;;  %v261_v18 = vshll.u32 %v3255_v13, 16  ;;  %v266_v19 = vshrl.u32 %v3252_v12, 16 }
  0x13   : > { %2784 = vmatpush3.bf16.msra.mxu1 %v3088_v6  ;;  %v269_v20 = vshll.u32 %v3252_v12, 16  ;;  %v275_v21 = vshll.u32 %v3261_v15, 16  ;;  %v2454_v30 = vld [vmem:[%s3243_s14 + $0x8] sm:$0xf]  ;;  %v3277_v31 = vld [vmem:[%s3243_s14 + $0xc] sm:$0x1] }
  0x14   : > { %2880 = vmatpush3.bf16.msra.mxu0 %v3089_v7  ;;  %2785 = vmatprep.subr.bf16.mxu1 %v3090_v8  ;;  %v254_v24 = vrot.slane %v252_v16, 4  ;;  %v257_v25 = vrot.slane %v255_v17, 5  ;;  %v263_v26 = vrot.slane %v261_v18, 5  ;;  %v268_v27 = vrot.slane %v266_v19, 4  ;;  %v2456_v33 = vld [vmem:[%s3243_s14 + $0x10] sm:$0xf] }
  0x15   : > { %2881 = vmatprep.subr.bf16.mxu0 %v3091_v9  ;;  %v271_v28 = vrot.slane %v269_v20, 5  ;;  %v277_v29 = vrot.slane %v275_v21, 5  ;;  %v3281_v34 = vld [vmem:[%s3243_s14 + $0x14] sm:$0x1]  ;;  %v1047_v35 = vshrl.u32 %v2454_v30, 16  ;;  %v1050_v36 = vshll.u32 %v2454_v30, 16 }
  0x16   : > { %v258_v32 = vor.u32 %v257_v25, %v254_v24  ;;  %v1056_v40 = vshll.u32 %v3277_v31, 16  ;;  %v1061_v41 = vshrl.u32 %v2456_v33, 16  ;;  %v1064_v42 = vshll.u32 %v2456_v33, 16  ;;  %v3298_v51 = vld [vmem:[%s3243_s14 + $0x10] sm:$0xf] }
  0x17   : > { %2786 = vmatpush3.bf16.msra.mxu1 %v3090_v8  ;;  %v272_v39 = vor.u32 %v271_v28, %v268_v27  ;;  %v1049_v44 = vrot.slane %v1047_v35, 4  ;;  %v1052_v45 = vrot.slane %v1050_v36, 5  ;;  %v1070_v46 = vshll.u32 %v3281_v34, 16  ;;  %v3303_v55 = vld [vmem:[%s3243_s14 + $0x18] sm:$0xf] }
  0x18   : > { %2882 = vmatpush3.bf16.msra.mxu0 %v3091_v9  ;;  %2787 = vmatprep.subr.bf16.mxu1 %v3092_v10  ;;  %v259_v43 = vrot.slane %v258_v32, 4  ;;  %v1063_v49 = vrot.slane %v1061_v41, 4  ;;  %v1066_v50 = vrot.slane %v1064_v42, 5  ;;  %v1058_v54 = vrot.slane %v1056_v40, 5  ;;  %v3306_v56 = vld [vmem:[%s3243_s14 + $0x14] sm:$0x1] }
  0x19   : > { %2883 = vmatprep.subr.bf16.mxu0 %v3093_v14  ;;  %v273_v48 = vrot.slane %v272_v39, 4  ;;  %v1053_v53 = vor.u32 %v1052_v45, %v1049_v44  ;;  %v1072_v59 = vrot.slane %v1070_v46, 5  ;;  %v3311_v60 = vld [vmem:[%s3243_s14 + $0x1c] sm:$0x1]  ;;  %v280_v61 = vshrl.u32 %v3298_v51, 16 }
  0x1a   : > { %v264_v52 = vsel %vm3288_vm2, %v259_v43, %v263_v26  ;;  %v1067_v58 = vor.u32 %v1066_v50, %v1063_v49  ;;  %v283_v2 = vshll.u32 %v3298_v51, 16  ;;  %v289_v3 = vshll.u32 %v3306_v56, 16  ;;  %v2458_v8 = vld [vmem:[%s3243_s14 + $0x18] sm:$0xf]  ;;  %v3331_v16 = vld [vmem:[%s3243_s14 + $0x1c] sm:$0x1] }
  0x1b   : > { %2788 = vmatpush3.bf16.msra.mxu1 %v3092_v10  ;;  %v278_v57 = vsel %vm3288_vm2, %v273_v48, %v277_v29  ;;  %v1054_v0 = vrot.slane %v1053_v53, 4  ;;  %v282_v5 = vrot.slane %v280_v61, 4  ;;  %v294_v6 = vshrl.u32 %v3303_v55, 16  ;;  %v2460_v17 = vld [vmem:[%s3243_s14 + $0x20] sm:$0xf]  ;;  %v3100_v43 = vld [vmem:[%s3777_s1 + $0x8] sm:$0xff]  }
  0x1c   : > { %2884 = vmatpush3.bf16.msra.mxu0 %v3093_v14  ;;  %2789 = vmatprep.subr.bf16.mxu1 %v3094_v22  ;;  %v2358_v62 = vcombine.low %v264_v52, %v278_v57  ;;  %v1068_v4 = vrot.slane %v1067_v58, 4  ;;  %v297_v7 = vshll.u32 %v3303_v55, 16  ;;  %v285_v10 = vrot.slane %v283_v2, 5  ;;  %v3337_v21 = vld [vmem:[%s3243_s14 + $0x24] sm:$0x1] }
  0x1d   : > { %2885 = vmatprep.subr.bf16.mxu0 %v3095_v23  ;;  %v1059_v9 = vsel %vm3288_vm2, %v1054_v0, %v1058_v54  ;;  %v303_v14 = vshll.u32 %v3311_v60, 16  ;;  %v296_v19 = vrot.slane %v294_v6, 4  ;;  %v291_v24 = vrot.slane %v289_v3, 5  ;;  %v3101_v54 = vld [vmem:[%s3777_s1 + $0x148] sm:$0xff]   ;;  %v3367_v0 = vld [vmem:[%s3243_s14 + $0x24] sm:$0x1] }
  0x1e   : > { %2793 = vmatprep.mubr.bf16.mxu1 %v2358_v62  ;;  %v1073_v18 = vsel %vm3288_vm2, %v1068_v4, %v1072_v59  ;;  %v299_v20 = vrot.slane %v297_v7, 5  ;;  %v1075_v27 = vshrl.u32 %v2458_v8, 16  ;;  %v1078_v28 = vshll.u32 %v2458_v8, 16  ;;  %v3102_v59 = vld [vmem:[%s3777_s1 + $0x10] sm:$0xff]   ;;  %v3361_v62 = vld [vmem:[%s3243_s14 + $0x20] sm:$0xf] }
  0x1f   : > { %2790 = vmatpush3.bf16.msra.mxu1 %v3094_v22  ;;  %v2486_v22 = vcombine.low %v1059_v9, %v1073_v18  ;;  %v305_v25 = vrot.slane %v303_v14, 5  ;;  %v1084_v29 = vshll.u32 %v3331_v16, 16  ;;  %v1089_v32 = vshrl.u32 %v2460_v17, 16  ;;  %v3370_v2 = vld [vmem:[%s3243_s14 + $0x2c] sm:$0x1]  ;;  %v3103_v9 = vld [vmem:[%s3777_s1 + $0x150] sm:$0xff]  }
  0x20   : > { %2886 = vmatpush3.bf16.msra.mxu0 %v3095_v23  ;;  %2791 = vmatprep.subr.bf16.mxu1 %v3096_v37  ;;  %v286_v23 = vor.u32 %v285_v10, %v282_v5  ;;  %v300_v26 = vor.u32 %v299_v20, %v296_v19  ;;  %v1092_v33 = vshll.u32 %v2460_v17, 16  ;;  %v1098_v35 = vshll.u32 %v3337_v21, 16  ;;  %v3104_v10 = vld [vmem:[%s3777_s1 + $0x18] sm:$0xff]  }
  0x21   : > { %2887 = vmatprep.subr.bf16.mxu0 %v3097_v47  ;;  %2889 = vmatprep.mubr.bf16.mxu0 %v2486_v22  ;;  %v1080_v39 = vrot.slane %v1078_v28, 5  ;;  %v1091_v41 = vrot.slane %v1089_v32, 4  ;;  %v1086_v46 = vrot.slane %v1084_v29, 5  ;;  %v1338_v57 = vrot.slane %v3277_v31, 5  ;;  %v3105_v29 = vld [vmem:[%s3777_s1 + $0x158] sm:$0xff]  }
  0x22   : > { %v287_v30 = vrot.slane %v286_v23, 4  ;;  %v301_v36 = vrot.slane %v300_v26, 4  ;;  %v1094_v42 = vrot.slane %v1092_v33, 5  ;;  %v308_v3 = vshrl.u32 %v3361_v62, 16  ;;  %v2462_v23 = vld [vmem:[%s3243_s14 + $0x28] sm:$0xf] }
  0x23   : > { %2792 = vmatpush3.bf16.msra.mxu1 %v3096_v37  ;;  %v1077_v37 = vrot.slane %v1075_v27, 4  ;;  %v311_v4 = vshll.u32 %v3361_v62, 16  ;;  %v317_v5 = vshll.u32 %v3367_v0, 16  ;;  %v331_v8 = vshll.u32 %v3370_v2, 16  ;;  %v3391_v26 = vld [vmem:[%s3243_s14 + $0x34] sm:$0x1] }
  0x24   : > { %2888 = vmatpush3.bf16.msra.mxu0 %v3097_v47  ;;  %2801 = vmatprep.subr.bf16.mxu1 %v3098_v63  ;;  %v292_v40 = vsel %vm3288_vm2, %v287_v30, %v291_v24  ;;  %v306_v44 = vsel %vm3288_vm2, %v301_v36, %v305_v25  ;;  %v1100_v47 = vrot.slane %v1098_v35, 5  ;;  %v1095_v49 = vor.u32 %v1094_v42, %v1091_v41  ;;  %v3387_v24 = vld [vmem:[%s3243_s14 + $0x2c] sm:$0x1]  ;;  %v2464_v25 = vld [vmem:[%s3243_s14 + $0x30] sm:$0xf]  ;;  %v3106_v30 = vld [vmem:[%s3777_s1 + $0x20] sm:$0xff]  }
  0x25   : > { %2897 = vmatprep.subr.bf16.mxu0 %v3320_v1  ;;  %v1081_v45 = vor.u32 %v1080_v39, %v1077_v37  ;;  %v2359_v48 = vcombine.low %v292_v40, %v306_v44  ;;  %v310_v14 = vrot.slane %v308_v3, 4  ;;  %v313_v17 = vrot.slane %v311_v4, 5 }
  0x26   : > { %v1096_v52 = vrot.slane %v1095_v49, 4  ;;  %v319_v18 = vrot.slane %v317_v5, 5  ;;  %v333_v22 = vrot.slane %v331_v8, 5  ;;  %v1103_v27 = vshrl.u32 %v2462_v23, 16  ;;  %v2466_v5 = vld [vmem:[%s3243_s14 + $0x38] sm:$0xf] }
  0x27   : > { %v1082_v50 = vrot.slane %v1081_v45, 4  ;;  %2794 = vmatmul.mubr.bf16.vlgmr.msra.gmra.mrb[0].mxu1 %v2359_v48  ;;  %v1106_v28 = vshll.u32 %v2462_v23, 16  ;;  %v1112_v33 = vshll.u32 %v3387_v24, 16  ;;  %v1117_v35 = vshrl.u32 %v2464_v25, 16 }
  0x28   : > { %2802 = vmatpush3.bf16.msra.mxu1 %v3098_v63  ;;  %v1101_v58 = vsel %vm3288_vm2, %v1096_v52, %v1100_v47  ;;  %v3364_v63 = vld [vmem:[%s3243_s14 + $0x28] sm:$0xf]  ;;  %v1120_v36 = vshll.u32 %v2464_v25, 16  ;;  %v1105_v39 = vrot.slane %v1103_v27, 4  ;;  %v1126_v41 = vshll.u32 %v3391_v26, 16 }
  0x29   : > { %v1087_v53 = vsel %vm3288_vm2, %v1082_v50, %v1086_v46  ;;  %2803 = vmatprep.subr.bf16.mxu1 %v3100_v43  ;;  %v322_v6 = vshrl.u32 %v3364_v63, 16  ;;  %v325_v7 = vshll.u32 %v3364_v63, 16  ;;  %v1108_v40 = vrot.slane %v1106_v28, 5  ;;  %v3402_v46 = vld [vmem:[%s3243_s14 + $0x30] sm:$0xf] }
  0x2a   : > { %v2487_v61 = vcombine.low %v1087_v53, %v1101_v58  ;;  %v1119_v44 = vrot.slane %v1117_v35, 4  ;;  %v1122_v45 = vrot.slane %v1120_v36, 5  ;;  %v1128_v49 = vrot.slane %v1126_v41, 5  ;;  %v3407_v50 = vld [vmem:[%s3243_s14 + $0x38] sm:$0xf] }
  0x2b   : > { %v324_v19 = vrot.slane %v322_v6, 4  ;;  %v327_v20 = vrot.slane %v325_v7, 5  ;;  %v1109_v48 = vor.u32 %v1108_v40, %v1105_v39  ;;  %v3410_v52 = vld [vmem:[%s3243_s14 + $0x34] sm:$0x1]  ;;  %v336_v53 = vshrl.u32 %v3402_v46, 16  ;;  %v3108_v6 = vld [vmem:[%s3777_s1 + $0x28] sm:$0xff]  }
  0x2c   : > { %2890 = vmatmul.mubr.bf16.vlgmr.msra.gmra.mrb[0].mxu0 %v2487_v61  ;;  %2804 = vmatpush3.bf16.msra.mxu1 %v3100_v43  ;;  %v1114_v43 = vrot.slane %v1112_v33, 5  ;;  %v3419_v61 = vld [vmem:[%s3243_s14 + $0x3c] sm:$0x1]  ;;  %v339_v3 = vshll.u32 %v3402_v46, 16  ;;  %v345_v4 = vshll.u32 %v3410_v52, 16  ;;  %v1131_v28 = vshrl.u32 %v2466_v5, 16 }
  0x2d   : > { %2898 = vmatpush3.bf16.msra.mxu0 %v3320_v1  ;;  %2805 = vmatprep.subr.bf16.mxu1 %v3102_v59  ;;  %v314_v1 = vor.u32 %v313_v17, %v310_v14  ;;  %v328_v32 = vor.u32 %v327_v20, %v324_v19  ;;  %v1110_v8 = vrot.slane %v1109_v48, 4  ;;  %v350_v14 = vshrl.u32 %v3407_v50, 16  ;;  %v3429_v17 = vld [vmem:[%s3243_s14 + $0x3c] sm:$0x1]  ;;  %v3437_v27 = vld [vmem:[%s3243_s14 + $0x44] sm:$0x1] }
  0x2e   : > { %2899 = vmatprep.subr.bf16.mxu0 %v3101_v54  ;;  %v341_v19 = vrot.slane %v339_v3, 5  ;;  %v347_v20 = vrot.slane %v345_v4, 5  ;;  %v359_v25 = vshll.u32 %v3419_v61, 16  ;;  %v1134_v36 = vshll.u32 %v2466_v5, 16 }
  0x2f   : > { %v315_v37 = vrot.slane %v314_v1, 4  ;;  %v329_v42 = vrot.slane %v328_v32, 4  ;;  %v1115_v23 = vsel %vm3288_vm2, %v1110_v8, %v1114_v43  ;;  %v352_v1 = vrot.slane %v350_v14, 4 }
  0x30   : > { %2806 = vmatpush3.bf16.msra.mxu1 %v3102_v59  ;;  %v1123_v59 = vor.u32 %v1122_v45, %v1119_v44  ;;  %v361_v40 = vrot.slane %v359_v25, 5  ;;  %v1133_v41 = vrot.slane %v1131_v28, 4  ;;  %v1136_v45 = vrot.slane %v1134_v36, 5  ;;  %v2500_v25 = vld [vmem:[%s3243_s14 + $0x18] sm:$0xe] }
  0x31   : > { %2900 = vmatpush3.bf16.msra.mxu0 %v3101_v54  ;;  %2807 = vmatprep.subr.bf16.mxu1 %v3104_v10  ;;  %v320_v47 = vsel %vm3288_vm2, %v315_v37, %v319_v18  ;;  %v3107_v54 = vld [vmem:[%s3777_s1 + $0x160] sm:$0xff]   ;;  %v334_v58 = vsel %vm3288_vm2, %v329_v42, %v333_v22  ;;  %v353_v22 = vshll.u32 %v3407_v50, 16  ;;  %v3110_v37 = vld [vmem:[%s3777_s1 + $0x30] sm:$0xff]   ;;  %v1140_v42 = vshll.u32 %v3429_v17, 16  ;;  %v3113_v28 = vld [vmem:[%s3777_s1 + $0x178] sm:$0xff]  }
  0x32   : > { %2901 = vmatprep.subr.bf16.mxu0 %v3103_v9  ;;  %v2360_v7 = vcombine.low %v320_v47, %v334_v58  ;;  %v1124_v18 = vrot.slane %v1123_v59, 4  ;;  %v1342_v47 = vrot.slane %v3281_v34, 5  ;;  %v1346_v48 = vrot.slane %v3331_v16, 5  ;;  %v3111_v58 = vld [vmem:[%s3777_s1 + $0x170] sm:$0xff]  }
  0x33   : > { %v355_v35 = vrot.slane %v353_v22, 5  ;;  %v1137_v4 = vor.u32 %v1136_v45, %v1133_v41  ;;  %v1142_v34 = vrot.slane %v1140_v42, 5  ;;  %v1350_v22 = vrot.slane %v3337_v21, 5  ;;  %v3116_v41 = vld [vmem:[%s3777_s1 + $0x180] sm:$0xff]  }
  0x34   : > { %2808 = vmatpush3.bf16.msra.mxu1 %v3104_v10  ;;  %v338_v10 = vrot.slane %v336_v53, 4  ;;  %2797 = vmatprep.mubr.bf16.mxu1 %v2360_v7  ;;  %v1129_v32 = vsel %vm3288_vm2, %v1124_v18, %v1128_v49  ;;  %v1154_v53 = vshll.u32 %v3437_v27, 16  ;;  %v2498_v7 = vld [vmem:[%s3243_s14 + $0x8] sm:$0xe]  ;;  %v2508_v36 = vrot.slane %v2500_v25, 9 }
  0x35   : > { %2902 = vmatpush3.bf16.msra.mxu0 %v3103_v9  ;;  %2809 = vmatprep.subr.bf16.mxu1 %v3106_v30  ;;  %v2468_v9 = vld [vmem:[%s3243_s14 + $0x40] sm:$0xf]  ;;  %v2488_v39 = vcombine.low %v1115_v23, %v1129_v32  ;;  %v356_v44 = vor.u32 %v355_v35, %v352_v1  ;;  %v2506_v14 = vrot.slane %v2498_v7, 9  ;;  %v1138_v18 = vrot.slane %v1137_v4, 4 }
  0x36   : > { %2903 = vmatprep.subr.bf16.mxu0 %v3105_v29  ;;  %v342_v33 = vor.u32 %v341_v19, %v338_v10  ;;  %v1148_v49 = vshll.u32 %v2468_v9, 16  ;;  %v2499_v10 = vld [vmem:[%s3243_s14 + $0x10] sm:$0xe]  ;;  %v2370_v19 = vcombine.low %v3249_v11, %v3252_v12  ;;  %v1156_v1 = vrot.slane %v1154_v53, 5  ;;  %v2501_v12 = vld [vmem:[%s3243_s14 + $0x20] sm:$0xe] }
  0x37   : > { %2893 = vmatprep.mubr.bf16.mxu0 %v2488_v39  ;;  %v357_v3 = vrot.slane %v356_v44, 4  ;;  %v1339_v32 = vsel %vm3462_vm5, %v2506_v14, %v1338_v57  ;;  %v1143_v21 = vsel %vm3288_vm2, %v1138_v18, %v1142_v34  ;;  %v3115_v35 = vld [vmem:[%s3777_s1 + $0x80] sm:$0xff]   ;;  %v1347_v42 = vsel %vm3462_vm5, %v2508_v36, %v1346_v48  ;;  %v3120_v44 = vld [vmem:[%s3777_s1 + $0x90] sm:$0xff]  }
  0x38   : > { %2810 = vmatpush3.bf16.msra.mxu1 %v3106_v30  ;;  %v3109_v30 = vld [vmem:[%s3777_s1 + $0x168] sm:$0xff]   ;;  %v343_v43 = vrot.slane %v342_v33, 4  ;;  %v1150_v16 = vrot.slane %v1148_v49, 5  ;;  %v1354_v45 = vrot.slane %v3387_v24, 5  ;;  %v1362_v53 = vrot.slane %v3429_v17, 5  ;;  %v3124_v18 = vld [vmem:[%s3777_s1 + $0xa0] sm:$0xff]  }
  0x39   : > { %2904 = vmatpush3.bf16.msra.mxu0 %v3105_v29  ;;  %2811 = vmatprep.subr.bf16.mxu1 %v3108_v6  ;;  %v1145_v29 = vshrl.u32 %v2468_v9, 16  ;;  %v1366_v24 = vrot.slane %v3437_v27, 5  ;;  %v679_v34 = vrot.slane %v3261_v15, 5  ;;  %v683_v17 = vrot.slane %v3306_v56, 5  ;;  %v647_v15 = vld [vmem:[%s3243_s14 + $0x8] sm:$0xe] }
  0x3a   : > { %2905 = vmatprep.subr.bf16.mxu0 %v3107_v54  ;;  %v348_v59 = vsel %vm3288_vm2, %v343_v43, %v347_v20  ;;  %v2507_v20 = vrot.slane %v2499_v10, 9  ;;  %v3118_v43 = vld [vmem:[%s3777_s1 + $0x88] sm:$0xff]   ;;  %v3121_v10 = vld [vmem:[%s3777_s1 + $0x190] sm:$0xff]   ;;  %v2383_v14 = vrot.slane %v647_v15, 9  ;;  %v691_v36 = vrot.slane %v3367_v0, 5  ;;  %v3134_v0 = vld [vmem:[%s3777_s1 + $0xc0] sm:$0xff]  }
  0x3b   : > { %v1147_v5 = vrot.slane %v1145_v29, 4  ;;  %v1358_v29 = vrot.slane %v3391_v26, 5  ;;  %v2373_v26 = vcombine.low %v3402_v46, %v3407_v50  ;;  %v3122_v46 = vld [vmem:[%s3777_s1 + $0x98] sm:$0xff]   ;;  %v3139_v15 = vld [vmem:[%s3777_s1 + $0x1c8] sm:$0xff]  }
  0x3c   : > { %2812 = vmatpush3.bf16.msra.mxu1 %v3108_v6  ;;  %v3112_v6 = vld [vmem:[%s3777_s1 + $0x38] sm:$0xff]   ;;  %v1343_v11 = vsel %vm3462_vm5, %v2507_v20, %v1342_v47 }
  0x3d   : > { %2906 = vmatpush3.bf16.msra.mxu0 %v3107_v54  ;;  %2813 = vmatprep.subr.bf16.mxu1 %v3110_v37  ;;  %v362_v54 = vsel %vm3288_vm2, %v357_v3, %v361_v40  ;;  %v1151_v23 = vor.u32 %v1150_v16, %v1147_v5  ;;  %v2530_v57 = vcombine.low %v1339_v32, %v1343_v11  ;;  %v646_v16 = vld [vmem:[%s3243_s14] sm:$0xe]  ;;  %v3123_v20 = vld [vmem:[%s3777_s1 + $0x198] sm:$0xff]  }
  0x3e   : > { %2907 = vmatprep.subr.bf16.mxu0 %v3109_v30  ;;  %v2361_v9 = vcombine.low %v348_v59, %v362_v54  ;;  %v2371_v40 = vcombine.low %v3298_v51, %v3303_v55  ;;  %v2372_v51 = vcombine.low %v3361_v62, %v3364_v63  ;;  %v675_v55 = vrot.slane %v3255_v13, 5  ;;  %v3119_v62 = vld [vmem:[%s3777_s1 + $0x188] sm:$0xff]   ;;  %v2503_v63 = vld [vmem:[%s3243_s14 + $0x30] sm:$0xe]  ;;  %v2505_v59 = vld [vmem:[%s3243_s14 + $0x40] sm:$0xe] }
  0x3f   : > { %v1152_v33 = vrot.slane %v1151_v23, 4  ;;  %v2502_v13 = vld [vmem:[%s3243_s14 + $0x28] sm:$0xe]  ;;  %v2511_v49 = vrot.slane %v2503_v63, 9  ;;  %v2513_v7 = vrot.slane %v2505_v59, 9  ;;  %v2382_v56 = vrot.slane %v646_v16, 9 }
  0x40   : > { %2814 = vmatpush3.bf16.msra.mxu1 %v3110_v37  ;;  %v2509_v37 = vrot.slane %v2501_v12, 9  ;;  %v2510_v48 = vrot.slane %v2502_v13, 9  ;;  %v687_v54 = vrot.slane %v3311_v60, 5  ;;  %v648_v23 = vld [vmem:[%s3243_s14 + $0x10] sm:$0xe] }
  0x41   : > { %2908 = vmatpush3.bf16.msra.mxu0 %v3109_v30  ;;  %2798 = vmatmul.mubr.bf16.gmra.mrb[4].mxu1 %v2361_v9  ;;  %v1157_v31 = vsel %vm3288_vm2, %v1152_v33, %v1156_v1  ;;  %v1359_v4 = vsel %vm3462_vm5, %v2511_v49, %v1358_v29  ;;  %v680_v9 = vsel %vm3462_vm5, %v2383_v14, %v679_v34  ;;  %v649_v60 = vld [vmem:[%s3243_s14 + $0x18] sm:$0xe]  ;;  %v2384_v25 = vrot.slane %v648_v23, 9  ;;  %v3126_v33 = vld [vmem:[%s3777_s1 + $0xa8] sm:$0xff]  }
  0x42   : > { %2909 = vmatprep.subr.bf16.mxu0 %v3111_v58  ;;  %2815 = vmatprep.subr.bf16.mxu1 %v3112_v6  ;;  %v2489_v39 = vcombine.low %v1143_v21, %v1157_v31  ;;  %v1351_v30 = vsel %vm3462_vm5, %v2509_v37, %v1350_v22  ;;  %v1355_v3 = vsel %vm3462_vm5, %v2510_v48, %v1354_v45  ;;  %v3135_v32 = vld [vmem:[%s3243_s14 + $0x10] ss:$8 sps:$4 sm:$0xff]   ;;  %v699_v29 = vrot.slane %v3410_v52, 5  ;;  %v3138_v49 = vld [vmem:[%s3777_s1 + $0xc8] sm:$0xff]  }
  0x43   : > { %2817 = vmatprep.mubr.bf16.mxu1 %v2370_v19  ;;  %v2531_v47 = vcombine.low %v1347_v42, %v1351_v30  ;;  %v2532_v27 = vcombine.low %v1355_v3, %v1359_v4  ;;  %v676_v19 = vsel %vm3462_vm5, %v2382_v56, %v675_v55  ;;  %v684_v11 = vsel %vm3462_vm5, %v2384_v25, %v683_v17  ;;  %v3129_v31 = vld [vmem:[%s3777_s1 + $0xb0] sm:$0xff]   ;;  %v3132_v37 = vld [vmem:[%s3777_s1 + $0xb8] sm:$0xff]   ;;  %v2584_v25 = vld [vmem:[%s3243_s14 + $0x28] sm:$0xf] }
  0x44   : > { %2816 = vmatpush3.bf16.msra.mxu1 %v3112_v6  ;;  %2894 = vmatmul.mubr.bf16.gmra.mrb[4].mxu0 %v2489_v39  ;;  %v1367_v6 = vsel %vm3462_vm5, %v2513_v7, %v1366_v24  ;;  %v2406_v1 = vcombine.low %v676_v19, %v680_v9  ;;  %v650_v39 = vld [vmem:[%s3243_s14 + $0x20] sm:$0xe]  ;;  %v3133_v45 = vld [vmem:[%s3777_s1 + $0x1b8] sm:$0xff]   ;;  %v3601_v24 = vld [vmem:[%s3243_s14 + $0x14] sm:$0x1] }
  0x45   : > { %2910 = vmatpush3.bf16.msra.mxu0 %v3111_v58  ;;  %2825 = vmatprep.subr.bf16.mxu1 %v3115_v35  ;;  %v2504_v58 = vld [vmem:[%s3243_s14 + $0x38] sm:$0xe]  ;;  %v2386_v42 = vrot.slane %v650_v39, 9  ;;  %v1719_v59 = vshll.u32 %v3601_v24, 16  ;;  %v3137_v7 = vld [vmem:[%s3243_s14 + $0x20] ss:$8 sps:$4 sm:$0xff]  }
  0x46   : > { %2911 = vmatprep.subr.bf16.mxu0 %v3113_v28  ;;  %2913 = vmatprep.mubr.bf16.mxu0 %v2530_v57  ;;  %v2512_v5 = vrot.slane %v2504_v58, 9  ;;  %v3127_v57 = vld [vmem:[%s3777_s1 + $0x1a8] sm:$0xff]   ;;  %v2580_v52 = vld [vmem:[%s3243_s14 + $0x18] sm:$0xf]  ;;  %v3141_v9 = vld [vmem:[%s3777_s1 + $0x1d0] sm:$0xff]  }
  0x47   : > { %v1724_v3 = vshrl.u32 %v2580_v52, 16  ;;  %v1727_v4 = vshll.u32 %v2580_v52, 16  ;;  %v3148_v56 = vld [vmem:[%s3243_s14 + $0x30] ss:$8 sps:$4 sm:$0xff]   ;;  %v3147_v52 = vld [vmem:[%s3777_s1 + $0x1e8] sm:$0xff]  }
  0x48   : > { %v1363_v50 = vsel %vm3462_vm5, %v2512_v5, %v1362_v53  ;;  %v2578_v53 = vld [vmem:[%s3243_s14 + $0x10] sm:$0xf]  ;;  %v3142_v23 = vld [vmem:[%s3777_s1 + $0xd8] sm:$0xff]  }
  0x49   : > { %2912 = vmatpush3.bf16.msra.mxu0 %v3113_v28  ;;  %2818 = vmatmul.mubr.bf16.vlgmr.msra.gmra.mrb[0].mxu1 %v2371_v40  ;;  %v2533_v22 = vcombine.low %v1363_v50, %v1367_v6  ;;  %v2385_v28 = vrot.slane %v649_v60, 9  ;;  %v651_v40 = vld [vmem:[%s3243_s14 + $0x28] sm:$0xe]  ;;  %v1713_v58 = vshll.u32 %v2578_v53, 16  ;;  %v1726_v50 = vrot.slane %v1724_v3, 4 }
  0x4a   : > { %2921 = vmatprep.subr.bf16.mxu0 %v3116_v41  ;;  %2826 = vmatpush3.bf16.msra.mxu1 %v3115_v35  ;;  %v3125_v35 = vld [vmem:[%s3777_s1 + $0x1a0] sm:$0xff]   ;;  %v2387_v30 = vrot.slane %v651_v40, 9  ;;  %v1729_v6 = vrot.slane %v1727_v4, 5 }
  0x4b   : > { %2827 = vmatprep.subr.bf16.mxu1 %v3118_v43  ;;  %2821 = vmatprep.mubr.bf16.mxu1 %v2372_v51  ;;  %v688_v12 = vsel %vm3462_vm5, %v2385_v28, %v687_v54  ;;  %v652_v51 = vld [vmem:[%s3243_s14 + $0x30] sm:$0xe]  ;;  %v1715_v16 = vrot.slane %v1713_v58, 5  ;;  %v1721_v54 = vrot.slane %v1719_v59, 5 }
  0x4c   : > { %2914 = vmatmul.mubr.bf16.vlgmr.msra.gmra.mrb[0].mxu0 %v2531_v47  ;;  %v2407_v21 = vcombine.low %v684_v11, %v688_v12  ;;  %v703_v47 = vrot.slane %v3419_v61, 5  ;;  %v2388_v63 = vrot.slane %v652_v51, 9  ;;  %v3605_v61 = vld [vmem:[%s3243_s14 + $0x1c] sm:$0x1]  ;;  %v3150_v11 = vld [vmem:[%s3243_s14 + $0x40] ss:$8 sps:$4 sm:$0xff]  }
  0x4d   : > { %2922 = vmatpush3.bf16.msra.mxu0 %v3116_v41  ;;  %2917 = vmatprep.mubr.bf16.mxu0 %v2532_v27  ;;  %v695_v41 = vrot.slane %v3370_v2, 5  ;;  %v692_v2 = vsel %vm3462_vm5, %v2386_v42, %v691_v36  ;;  %v1733_v5 = vshll.u32 %v3605_v61, 16  ;;  %v2586_v12 = vld [vmem:[%s3243_s14 + $0x30] sm:$0xf]  ;;  %v1755_v36 = vshll.u32 %v2584_v25, 16 }
  0x4e   : > { %2828 = vmatpush3.bf16.msra.mxu1 %v3118_v43  ;;  %2923 = vmatprep.subr.bf16.mxu0 %v3119_v62  ;;  %v3130_v43 = vld [vmem:[%s3777_s1 + $0x1b0] sm:$0xff]   ;;  %v700_v34 = vsel %vm3462_vm5, %v2388_v63, %v699_v29  ;;  %v1766_v40 = vshrl.u32 %v2586_v12, 16  ;;  %v3650_v51 = vld [vmem:[%s3243_s14 + $0x24] sm:$0x1] }
  0x4f   : > { %2829 = vmatprep.subr.bf16.mxu1 %v3120_v44  ;;  %v696_v55 = vsel %vm3462_vm5, %v2387_v30, %v695_v41  ;;  %v1735_v19 = vrot.slane %v1733_v5, 5  ;;  %v1769_v41 = vshll.u32 %v2586_v12, 16  ;;  %v1757_v29 = vrot.slane %v1755_v36, 5  ;;  %v2592_v5 = vld [vmem:[%s3243_s14 + $0x48] sm:$0xf]  ;;  %v3153_v12 = vld [vmem:[%s3777_s1 + $0x1f8] sm:$0xff]  }
  0x50   : > { %v2408_v13 = vcombine.low %v692_v2, %v696_v55  ;;  %v3653_v2 = vld [vmem:[%s3243_s14 + $0x2c] sm:$0x1]  ;;  %v1747_v58 = vshll.u32 %v3650_v51, 16 }
  0x51   : > { %2822 = vmatmul.mubr.bf16.gmra.mrb[4].mxu1 %v2373_v26  ;;  %2924 = vmatpush3.bf16.msra.mxu0 %v3119_v62  ;;  %v3136_v62 = vld [vmem:[%s3777_s1 + $0x1c0] sm:$0xff]   ;;  %v1710_v26 = vshrl.u32 %v2578_v53, 16  ;;  %v1771_v63 = vrot.slane %v1769_v41, 5  ;;  %v1761_v59 = vshll.u32 %v3653_v2, 16 }
  0x52   : > { %2830 = vmatpush3.bf16.msra.mxu1 %v3120_v44  ;;  %2925 = vmatprep.subr.bf16.mxu0 %v3121_v10  ;;  %v653_v44 = vld [vmem:[%s3243_s14 + $0x38] sm:$0xe]  ;;  %v2590_v53 = vld [vmem:[%s3243_s14 + $0x40] sm:$0xf] }
  0x53   : > { %2831 = vmatprep.subr.bf16.mxu1 %v3122_v46  ;;  %2841 = vmatprep.mubr.bf16.mxu1 %v2406_v1  ;;  %v2389_v48 = vrot.slane %v653_v44, 9  ;;  %v1712_v27 = vrot.slane %v1710_v26, 4  ;;  %v2582_v1 = vld [vmem:[%s3243_s14 + $0x20] sm:$0xf]  ;;  %v3149_v26 = vld [vmem:[%s3777_s1 + $0xf0] sm:$0xff]  }
  0x54   : > { %2918 = vmatmul.mubr.bf16.gmra.mrb[4].mxu0 %v2533_v22 }
  0x55   : > { %2926 = vmatpush3.bf16.msra.mxu0 %v3121_v10  ;;  %2937 = vmatprep.mubr.bf16.mxu0 %v3135_v32  ;;  %v704_v17 = vsel %vm3462_vm5, %v2389_v48, %v703_v47  ;;  %v1716_v10 = vor.u32 %v1715_v16, %v1712_v27  ;;  %v3656_v47 = vld [vmem:[%s3243_s14 + $0x34] sm:$0x1]  ;;  %v1797_v27 = vshll.u32 %v2590_v53, 16 }
  0x56   : > { %2832 = vmatpush3.bf16.msra.mxu1 %v3122_v46  ;;  %2927 = vmatprep.subr.bf16.mxu0 %v3123_v20  ;;  %v3140_v46 = vld [vmem:[%s3777_s1 + $0xd0] sm:$0xff]   ;;  %v2409_v14 = vcombine.low %v700_v34, %v704_v17  ;;  %v1775_v3 = vshll.u32 %v3656_v47, 16  ;;  %v1794_v17 = vshrl.u32 %v2590_v53, 16  ;;  %v2623_v53 = vld [vmem:[%s3243_s14 + $0x18] sm:$0xe] }
  0x57   : > { %2833 = vmatprep.subr.bf16.mxu1 %v3124_v18  ;;  %v1717_v22 = vrot.slane %v1716_v10, 4 }
  0x59   : > { %2928 = vmatpush3.bf16.msra.mxu0 %v3123_v20  ;;  %v3154_v20 = vld [vmem:[%s3243_s14 + $0x8] ss:$8 sps:$4 sm:$0xff]   ;;  %v1722_v28 = vsel %vm3288_vm2, %v1717_v22, %v1721_v54 }
  0x5a   : > { %2834 = vmatpush3.bf16.msra.mxu1 %v3124_v18  ;;  %2929 = vmatprep.subr.bf16.mxu0 %v3125_v35  ;;  %v1730_v18 = vor.u32 %v1729_v6, %v1726_v50  ;;  %v1808_v50 = vshrl.u32 %v2592_v5, 16  ;;  %v1811_v6 = vshll.u32 %v2592_v5, 16  ;;  %v2631_v5 = vrot.slane %v2623_v53, 9 }
  0x5b   : > { %2835 = vmatprep.subr.bf16.mxu1 %v3126_v33 }
  0x5c   : > { %v1731_v60 = vrot.slane %v1730_v18, 4  ;;  %v1763_v18 = vrot.slane %v1761_v59, 5  ;;  %v3159_v59 = vld [vmem:[%s3243_s14 + $0x38] ss:$8 sps:$4 sm:$0xff]  }
  0x5d   : > { %2930 = vmatpush3.bf16.msra.mxu0 %v3125_v35  ;;  %v1738_v35 = vshrl.u32 %v2582_v1, 16 }
  0x5e   : > { %2836 = vmatpush3.bf16.msra.mxu1 %v3126_v33  ;;  %2931 = vmatprep.subr.bf16.mxu0 %v3127_v57  ;;  %v1736_v32 = vsel %vm3288_vm2, %v1731_v60, %v1735_v19  ;;  %v3144_v33 = vld [vmem:[%s3777_s1 + $0xe0] sm:$0xff]   ;;  %v3683_v60 = vld [vmem:[%s3243_s14 + $0x4c] sm:$0x1] }
  0x5f   : > { %2837 = vmatprep.subr.bf16.mxu1 %v3129_v31  ;;  %v2610_v39 = vcombine.low %v1722_v28, %v1736_v32  ;;  %v1740_v55 = vrot.slane %v1738_v35, 4  ;;  %v1810_v28 = vrot.slane %v1808_v50, 4  ;;  %v1813_v32 = vrot.slane %v1811_v6, 5  ;;  %v3155_v35 = vld [vmem:[%s3243_s14 + $0x18] ss:$8 sps:$4 sm:$0xff]   ;;  %v3163_v6 = vld [vmem:[%s3777_s1 + $0x228] sm:$0xff]  }
  0x61   : > { %2932 = vmatpush3.bf16.msra.mxu0 %v3127_v57  ;;  %v1752_v57 = vshrl.u32 %v2584_v25, 16  ;;  %v1799_v25 = vrot.slane %v1797_v27, 5 }
  0x62   : > { %2838 = vmatpush3.bf16.msra.mxu1 %v3129_v31  ;;  %2933 = vmatprep.subr.bf16.mxu0 %v3130_v43  ;;  %v1741_v31 = vshll.u32 %v2582_v1, 16  ;;  %v1796_v1 = vrot.slane %v1794_v17, 4 }
  0x63   : > { %2839 = vmatprep.subr.bf16.mxu1 %v3132_v37 }
  0x64   : > { %v1743_v44 = vrot.slane %v1741_v31, 5 }
  0x65   : > { %2934 = vmatpush3.bf16.msra.mxu0 %v3130_v43  ;;  %v3145_v43 = vld [vmem:[%s3777_s1 + $0x1e0] sm:$0xff]  }
  0x66   : > { %2840 = vmatpush3.bf16.msra.mxu1 %v3132_v37  ;;  %2935 = vmatprep.subr.bf16.mxu0 %v3133_v45  ;;  %v3143_v37 = vld [vmem:[%s3777_s1 + $0x1d8] sm:$0xff]  }
  0x67   : > { %2849 = vmatprep.subr.bf16.mxu1 %v3134_v0 }
  0x69   : > { %2842 = vmatmul.mubr.bf16.vlgmr.msra.gmra.mrb[0].mxu1 %v2407_v21  ;;  %2936 = vmatpush3.bf16.msra.mxu0 %v3133_v45  ;;  %v2588_v21 = vld [vmem:[%s3243_s14 + $0x38] sm:$0xf]  ;;  %v1754_v45 = vrot.slane %v1752_v57, 4 }
  0x6a   : > { %2850 = vmatpush3.bf16.msra.mxu1 %v3134_v0  ;;  %2845 = vmatprep.mubr.bf16.mxu1 %v2408_v13  ;;  %v1780_v42 = vshrl.u32 %v2588_v21, 16  ;;  %v1783_v30 = vshll.u32 %v2588_v21, 16  ;;  %v3146_v0 = vld [vmem:[%s3777_s1 + $0xe8] sm:$0xff]   ;;  %v1768_v13 = vrot.slane %v1766_v40, 4  ;;  %v2626_v21 = vld [vmem:[%s3243_s14 + $0x30] sm:$0xe] }
  0x6b   : > { %2851 = vmatprep.subr.bf16.mxu1 %v3138_v49  ;;  %2945 = vmatprep.subr.bf16.mxu0 %v3136_v62  ;;  %v1758_v34 = vor.u32 %v1757_v29, %v1754_v45 }
  0x6c   : > { %2938 = vmatmul.mubr.bf16.vlgmr.msra.gmra.mrb[0].mxu0 %v3137_v7  ;;  %v1782_v48 = vrot.slane %v1780_v42, 4  ;;  %v1744_v7 = vor.u32 %v1743_v44, %v1740_v55  ;;  %v1772_v16 = vor.u32 %v1771_v63, %v1768_v13  ;;  %v1800_v42 = vor.u32 %v1799_v25, %v1796_v1 }
  0x6d   : > { %2946 = vmatpush3.bf16.msra.mxu0 %v3136_v62  ;;  %2941 = vmatprep.mubr.bf16.mxu0 %v3148_v56  ;;  %v3659_v62 = vld [vmem:[%s3243_s14 + $0x3c] sm:$0x1]  ;;  %v3151_v56 = vld [vmem:[%s3777_s1 + $0x1f0] sm:$0xff]   ;;  %v1759_v54 = vrot.slane %v1758_v34, 4  ;;  %v2017_v55 = vrot.slane %v3656_v47, 5  ;;  %v2009_v25 = vrot.slane %v3650_v51, 5 }
  0x6e   : > { %2852 = vmatpush3.bf16.msra.mxu1 %v3138_v49  ;;  %2947 = vmatprep.subr.bf16.mxu0 %v3139_v15  ;;  %v1785_v49 = vrot.slane %v1783_v30, 5  ;;  %v1789_v4 = vshll.u32 %v3659_v62, 16  ;;  %v1745_v10 = vrot.slane %v1744_v7, 4  ;;  %v1773_v19 = vrot.slane %v1772_v16, 4  ;;  %v3161_v16 = vld [vmem:[%s3777_s1 + $0x218] sm:$0xff]  }
  0x6f   : > { %2853 = vmatprep.subr.bf16.mxu1 %v3140_v46  ;;  %v1764_v57 = vsel %vm3288_vm2, %v1759_v54, %v1763_v18  ;;  %v1814_v30 = vor.u32 %v1813_v32, %v1810_v28  ;;  %v2021_v45 = vrot.slane %v3659_v62, 5  ;;  %v2005_v7 = vrot.slane %v3605_v61, 5 }
  0x70   : > { %v2029_v54 = vrot.slane %v3683_v60, 5  ;;  %v2013_v32 = vrot.slane %v3653_v2, 5 }
  0x71   : > { %2846 = vmatmul.mubr.bf16.gmra.mrb[4].mxu1 %v2409_v14  ;;  %2948 = vmatpush3.bf16.msra.mxu0 %v3139_v15  ;;  %v3152_v15 = vld [vmem:[%s3777_s1 + $0xf8] sm:$0xff]   ;;  %v1749_v14 = vrot.slane %v1747_v58, 5  ;;  %v3160_v58 = vld [vmem:[%s3777_s1 + $0x210] sm:$0xff]   ;;  %v2006_v61 = vsel %vm3462_vm5, %v2631_v5, %v2005_v7 }
  0x72   : > { %2854 = vmatpush3.bf16.msra.mxu1 %v3140_v46  ;;  %2865 = vmatprep.mubr.bf16.mxu1 %v3154_v20  ;;  %v1786_v46 = vor.u32 %v1785_v49, %v1782_v48  ;;  %v1777_v20 = vrot.slane %v1775_v3, 5  ;;  %v2622_v49 = vld [vmem:[%s3243_s14 + $0x10] sm:$0xe] }
  0x73   : > { %2855 = vmatprep.subr.bf16.mxu1 %v3142_v23  ;;  %2949 = vmatprep.subr.bf16.mxu0 %v3141_v9  ;;  %v1750_v31 = vsel %vm3288_vm2, %v1745_v10, %v1749_v14  ;;  %v2630_v3 = vrot.slane %v2622_v49, 9  ;;  %v2629_v10 = vld [vmem:[%s3243_s14 + $0x48] sm:$0xe] }
  0x74   : > { %2942 = vmatmul.mubr.bf16.gmra.mrb[4].mxu0 %v3150_v11  ;;  %v1787_v22 = vrot.slane %v1786_v46, 4  ;;  %v3156_v11 = vld [vmem:[%s3777_s1 + $0x200] sm:$0xff]   ;;  %v1778_v40 = vsel %vm3288_vm2, %v1773_v19, %v1777_v20  ;;  %v2611_v29 = vcombine.low %v1750_v31, %v1764_v57  ;;  %v2637_v19 = vrot.slane %v2629_v10, 9  ;;  %v3165_v20 = vld [vmem:[%s3777_s1 + $0x238] sm:$0xff]  }
  0x75   : > { %2950 = vmatpush3.bf16.msra.mxu0 %v3141_v9  ;;  %2961 = vmatprep.mubr.bf16.mxu0 %v2610_v39  ;;  %v1791_v9 = vrot.slane %v1789_v4, 5  ;;  %v3158_v39 = vld [vmem:[%s3243_s14 + $0x28] ss:$8 sps:$4 sm:$0xff]   ;;  %v2001_v4 = vrot.slane %v3601_v24, 5 }
  0x76   : > { %2856 = vmatpush3.bf16.msra.mxu1 %v3142_v23  ;;  %2951 = vmatprep.subr.bf16.mxu0 %v3143_v37  ;;  %v3680_v23 = vld [vmem:[%s3243_s14 + $0x44] sm:$0x1] }
  0x77   : > { %2857 = vmatprep.subr.bf16.mxu1 %v3144_v33  ;;  %v1803_v36 = vshll.u32 %v3680_v23, 16  ;;  %v1792_v41 = vsel %vm3288_vm2, %v1787_v22, %v1791_v9  ;;  %v2002_v24 = vsel %vm3462_vm5, %v2630_v3, %v2001_v4  ;;  %v2025_v14 = vrot.slane %v3680_v23, 5  ;;  %v2624_v22 = vld [vmem:[%s3243_s14 + $0x20] sm:$0xe]  ;;  %v2625_v9 = vld [vmem:[%s3243_s14 + $0x28] sm:$0xe] }
  0x78   : > { %v2612_v13 = vcombine.low %v1778_v40, %v1792_v41  ;;  %v2654_v50 = vcombine.low %v2002_v24, %v2006_v61  ;;  %v2030_v23 = vsel %vm3462_vm5, %v2637_v19, %v2029_v54  ;;  %v2633_v28 = vrot.slane %v2625_v9, 9 }
  0x79   : > { %2952 = vmatpush3.bf16.msra.mxu0 %v3143_v37  ;;  %v1817_v37 = vshll.u32 %v3683_v60, 16  ;;  %v1805_v63 = vrot.slane %v1803_v36, 5  ;;  %v2632_v60 = vrot.slane %v2624_v22, 9 }
  0x7a   : > { %2858 = vmatpush3.bf16.msra.mxu1 %v3144_v33  ;;  %2953 = vmatprep.subr.bf16.mxu0 %v3145_v43  ;;  %v2627_v33 = vld [vmem:[%s3243_s14 + $0x38] sm:$0xe] }
  0x7b   : > { %2859 = vmatprep.subr.bf16.mxu1 %v3146_v0  ;;  %v2635_v44 = vrot.slane %v2627_v33, 9  ;;  %v1819_v48 = vrot.slane %v1817_v37, 5 }
  0x7d   : > { %2954 = vmatpush3.bf16.msra.mxu0 %v3145_v43  ;;  %v3157_v43 = vld [vmem:[%s3777_s1 + $0x208] sm:$0xff]   ;;  %v2022_v62 = vsel %vm3462_vm5, %v2635_v44, %v2021_v45 }
  0x7e   : > { %2860 = vmatpush3.bf16.msra.mxu1 %v3146_v0  ;;  %2955 = vmatprep.subr.bf16.mxu0 %v3147_v52  ;;  %v2634_v0 = vrot.slane %v2626_v21, 9  ;;  %v2014_v21 = vsel %vm3462_vm5, %v2633_v28, %v2013_v32 }
  0x7f   : > { %2861 = vmatprep.subr.bf16.mxu1 %v3149_v26 }
  0x80   : > { %v2018_v47 = vsel %vm3462_vm5, %v2634_v0, %v2017_v55 }
  0x81   : > { %2956 = vmatpush3.bf16.msra.mxu0 %v3147_v52  ;;  %v1801_v52 = vrot.slane %v1800_v42, 4  ;;  %v2656_v34 = vcombine.low %v2018_v47, %v2022_v62 }
  0x82   : > { %2862 = vmatpush3.bf16.msra.mxu1 %v3149_v26  ;;  %2957 = vmatprep.subr.bf16.mxu0 %v3151_v56  ;;  %v1815_v26 = vrot.slane %v1814_v30, 4 }
  0x83   : > { %2863 = vmatprep.subr.bf16.mxu1 %v3152_v15  ;;  %v1806_v17 = vsel %vm3288_vm2, %v1801_v52, %v1805_v63 }
  0x84   : > { %v1820_v27 = vsel %vm3288_vm2, %v1815_v26, %v1819_v48 }
  0x85   : > { %2958 = vmatpush3.bf16.msra.mxu0 %v3151_v56  ;;  %v2613_v46 = vcombine.low %v1806_v17, %v1820_v27  ;;  %v2628_v56 = vld [vmem:[%s3243_s14 + $0x40] sm:$0xe]  ;;  %s2668_s14 = sshll.u32 %s3786_s16, 6 }
  0x86   : > { %2864 = vmatpush3.bf16.msra.mxu1 %v3152_v15  ;;  %2959 = vmatprep.subr.bf16.mxu0 %v3153_v12  ;;  %v3164_v15 = vld [vmem:[%s3777_s1 + $0x230] sm:$0xff]   ;;  %v2636_v18 = vrot.slane %v2628_v56, 9  ;;  %s208_s28 = scalar_lea.vmem %s3778_s2, %s2668_s14 }
  0x87   : > { %2993 = vmatprep.subr.bf16.mxu1 %v3156_v11 }
  0x88   : > { %v2026_v1 = vsel %vm3462_vm5, %v2636_v18, %v2025_v14 }
  0x89   : > { %2866 = vmatmul.mubr.bf16.vlgmr.msra.gmra.mrb[0].mxu1 %v3155_v35  ;;  %2960 = vmatpush3.bf16.msra.mxu0 %v3153_v12  ;;  %v2010_v12 = vsel %vm3462_vm5, %v2632_v60, %v2009_v25 }
  0x8a   : > { %3001 = vmatpush3.bf16.msra.mxu1 %v3156_v11  ;;  %2869 = vmatprep.mubr.bf16.mxu1 %v3158_v39  ;;  %v2655_v33 = vcombine.low %v2010_v12, %v2014_v21 }
  0x8b   : > { %2994 = vmatprep.subr.bf16.mxu1 %v3157_v43  ;;  %2969 = vmatprep.subr.bf16.mxu0 %v3156_v11 }
  0x8c   : > { %2962 = vmatmul.mubr.bf16.vlgmr.msra.gmra.mrb[0].mxu0 %v2611_v29 }
  0x8d   : > { %2970 = vmatpush3.bf16.msra.mxu0 %v3156_v11  ;;  %2965 = vmatprep.mubr.bf16.mxu0 %v2612_v13  ;;  %v2657_v11 = vcombine.low %v2026_v1, %v2030_v23 }
  0x8e   : > { %3002 = vmatpush3.bf16.msra.mxu1 %v3157_v43  ;;  %2971 = vmatprep.subr.bf16.mxu0 %v3157_v43 }
  0x8f   : > { %2995 = vmatprep.subr.bf16.mxu1 %v3160_v58 }
  0x91   : > { %2870 = vmatmul.mubr.bf16.gmra.mrb[4].mxu1 %v3159_v59  ;;  %2972 = vmatpush3.bf16.msra.mxu0 %v3157_v43 }
  0x92   : > { %3003 = vmatpush3.bf16.msra.mxu1 %v3160_v58  ;;  %2989 = vmatprep.mubr.bf16.mxu1 %v2656_v34 }
  0x93   : > { %2996 = vmatprep.subr.bf16.mxu1 %v3161_v16  ;;  %2973 = vmatprep.subr.bf16.mxu0 %v3160_v58 }
  0x94   : > { %2966 = vmatmul.mubr.bf16.gmra.mrb[4].mxu0 %v2613_v46 }
  0x95   : > { %2974 = vmatpush3.bf16.msra.mxu0 %v3160_v58  ;;  %2985 = vmatprep.mubr.bf16.mxu0 %v2654_v50 }
  0x96   : > { %3004 = vmatpush3.bf16.msra.mxu1 %v3161_v16  ;;  %2975 = vmatprep.subr.bf16.mxu0 %v3161_v16 }
  0x97   : > { %2997 = vmatprep.subr.bf16.mxu1 %v3162_v38 }
  0x99   : > { %2976 = vmatpush3.bf16.msra.mxu0 %v3161_v16 }
  0x9a   : > { %3005 = vmatpush3.bf16.msra.mxu1 %v3162_v38  ;;  %2977 = vmatprep.subr.bf16.mxu0 %v3162_v38 }
  0x9b   : > { %2998 = vmatprep.subr.bf16.mxu1 %v3163_v6 }
  0x9d   : > { %2978 = vmatpush3.bf16.msra.mxu0 %v3162_v38 }
  0x9e   : > { %3006 = vmatpush3.bf16.msra.mxu1 %v3163_v6  ;;  %2979 = vmatprep.subr.bf16.mxu0 %v3163_v6 }
  0x9f   : > { %2999 = vmatprep.subr.bf16.mxu1 %v3164_v15 }
  0xa1   : > { %2980 = vmatpush3.bf16.msra.mxu0 %v3163_v6 }
  0xa2   : > { %3007 = vmatpush3.bf16.msra.mxu1 %v3164_v15  ;;  %2981 = vmatprep.subr.bf16.mxu0 %v3164_v15 }
  0xa3   : > { %3000 = vmatprep.subr.bf16.mxu1 %v3165_v20 }
  0xa5   : > { %2982 = vmatpush3.bf16.msra.mxu0 %v3164_v15 }
  0xa6   : > { %3008 = vmatpush3.bf16.msra.mxu1 %v3165_v20  ;;  %2983 = vmatprep.subr.bf16.mxu0 %v3165_v20 }
  0xa9   : > { %2990 = vmatmul.mubr.bf16.vlgmr.msra.gmra.mrb[8].mxu1 %v2657_v11  ;;  %2984 = vmatpush3.bf16.msra.mxu0 %v3165_v20 }
  0xac   : > { %2986 = vmatmul.mubr.bf16.vlgmr.msra.gmra.mrb[0].mxu0 %v2655_v33 }
 0x15c   : > { %v2867_v35 = vpop.f32.mrb[0].mxu1 }
 0x15d   : > { %v991_v51 = vpop.f32.mrb[1].mxu1 }
 0x15e   : > { %v2868_v31 = vpop.f32.mrb[2].mxu1 }
 0x15f   : > { %v994_v2 = vpop.f32.mrb[3].mxu1 }
 0x164   : > { %v2871_v57 = vpop.f32.mrb[4].mxu1 }
 0x165   : > { %v1007_v36 = vpop.f32.mrb[5].mxu1 }
 0x166   : > { %v2872_v37 = vpop.f32.mrb[6].mxu1 }
 0x167   : > { %v1010_v39 = vpop.f32.mrb[7].mxu1  ;;  %v2967_v40 = vpop.f32.mrb[4].mxu0 }
 0x168   : > { %v3013_v41 = vadd.f32 %v2967_v40, %v2871_v57  ;;  %v1952_v42 = vpop.f32.mrb[5].mxu0 }
 0x169   : > { %v3015_v30 = vadd.f32 %v1952_v42, %v1007_v36  ;;  %v2968_v8 = vpop.f32.mrb[6].mxu0 }
 0x16a   : > { %v3017_v43 = vadd.f32 %v2968_v8, %v2872_v37  ;;  %v1955_v0 = vpop.f32.mrb[7].mxu0 }
 0x16b   : > { %v3019_v55 = vadd.f32 %v1955_v0, %v1010_v39 }
 0x17c   : > { %v2991_v44 = vpop.f32.mrb[8].mxu1 }
 0x17d   : > { %v3014_v45 = vadd.f32 %v3013_v41, %v2991_v44  ;;  %v2162_v29 = vpop.f32.mrb[9].mxu1 }
 0x17e   : > { %v3016_v13 = vadd.f32 %v3015_v30, %v2162_v29  ;;  %v2992_v63 = vpop.f32.mrb[10].mxu1 }
 0x17f   : > { %2191 = vst [vmem:[%s208_s28 + $0x30] sm:$0xff] %v3014_v45  ;;  %v3018_v48 = vadd.f32 %v3017_v43, %v2992_v63  ;;  %v2165_v49 = vpop.f32.mrb[11].mxu1  ;;  %v2987_v52 = vpop.f32.mrb[0].mxu0  ;;  %v2213_v14 = vmul.f32 %v3014_v45, %v3014_v45 }
 0x180   : > { %2189 = vst [vmem:[%s208_s28 + $0x20] sm:$0xff] %v3016_v13  ;;  %v3020_v53 = vadd.f32 %v3019_v55, %v2165_v49  ;;  %v3009_v26 = vadd.f32 %v2987_v52, %v2867_v35  ;;  %v2146_v47 = vpop.f32.mrb[1].mxu0  ;;  %v2211_v38 = vmul.f32 %v3016_v13, %v3016_v13 }
 0x181   : > { %2192 = vst [vmem:[%s208_s28 + $0x38] sm:$0xff] %v3018_v48  ;;  %v3010_v62 = vadd.f32 %v2146_v47, %v991_v51  ;;  %v2988_v58 = vpop.f32.mrb[2].mxu0  ;;  %v2214_v19 = vmul.f32 %v3018_v48, %v3018_v48 }
 0x182   : > { %2190 = vst [vmem:[%s208_s28 + $0x28] sm:$0xff] %v3020_v53  ;;  %2187 = vst [vmem:[%s208_s28 + $0x10] sm:$0xff] %v3009_v26  ;;  %v3011_v59 = vadd.f32 %v2988_v58, %v2868_v31  ;;  %v2149_v3 = vpop.f32.mrb[3].mxu0  ;;  %v2209_v17 = vmul.f32 %v3009_v26, %v3009_v26  ;;  %v2212_v56 = vmul.f32 %v3020_v53, %v3020_v53 }
 0x183   : > { %2185 = vst [vmem:[%s208_s28] sm:$0xff] %v3010_v62  ;;  %v3012_v4 = vadd.f32 %v2149_v3, %v994_v2  ;;  %v2207_v5 = vmul.f32 %v3010_v62, %v3010_v62 }
 0x184   : > { %2188 = vst [vmem:[%s208_s28 + $0x18] sm:$0xff] %v3011_v59  ;;  %v2210_v24 = vmul.f32 %v3011_v59, %v3011_v59 }
 0x185   : > { %2186 = vst [vmem:[%s208_s28 + $0x8] sm:$0xff] %v3012_v4  ;;  %v2193_v7 = vadd.f32 %v3012_v4, %v3010_v62  ;;  %v2208_v34 = vmul.f32 %v3012_v4, %v3012_v4 }
 0x187   : > { %v2194_v27 = vadd.f32 %v3009_v26, %v2193_v7  ;;  %v2215_v16 = vadd.f32 %v2208_v34, %v2207_v5 }
 0x189   : > { %v2216_v61 = vadd.f32 %v2215_v16, %v2209_v17  ;;  %v2195_v46 = vadd.f32 %v3011_v59, %v2194_v27 }
 0x18b   : > { %v2196_v50 = vadd.f32 %v3016_v13, %v2195_v46  ;;  %v2217_v6 = vadd.f32 %v2216_v61, %v2210_v24 }
 0x18d   : > { %v2197_v15 = vadd.f32 %v3020_v53, %v2196_v50  ;;  %v2218_v10 = vadd.f32 %v2217_v6, %v2211_v38 }
 0x18f   : > { %v2198_v54 = vadd.f32 %v3014_v45, %v2197_v15  ;;  %v2219_v18 = vadd.f32 %v2218_v10, %v2212_v56 }
 0x191   : > { %v2199_v20 = vadd.f32 %v3018_v48, %v2198_v54  ;;  %v2220_v22 = vadd.f32 %v2219_v18, %v2213_v14 }
 0x193   : > { %v2200_v9 = vrot.slane %v2199_v20, 4  ;;  %v2221_v1 = vadd.f32 %v2220_v22, %v2214_v19 }
 0x195   : > { %v2201_v23 = vadd.f32 %v2200_v9, %v2199_v20  ;;  %v2222_v60 = vrot.slane %v2221_v1, 4 }
 0x197   : > { %v2202_v25 = vrot.slane %v2201_v23, 2  ;;  %v2223_v28 = vadd.f32 %v2222_v60, %v2221_v1 }
 0x199   : > { %v2203_v32 = vadd.f32 %v2202_v25, %v2201_v23  ;;  %v2224_v11 = vrot.slane %v2223_v28, 2 }
 0x19b   : > { %v2204_v12 = vrot.slane %v2203_v32, 1  ;;  %v2225_v21 = vadd.f32 %v2224_v11, %v2223_v28 }
 0x19d   : > { %v2205_v33 = vadd.f32 %v2204_v12, %v2203_v32  ;;  %v2226_v35 = vrot.slane %v2225_v21, 1 }
 0x19f   : > { %2206 = vst [vmem:[%s211_s5] sm:$0x1] %v2205_v33  ;;  %v2227_v51 = vadd.f32 %v2226_v35, %v2225_v21 }
 0x1a1   : > { %2228 = vst [vmem:[%s214_s8] sm:$0x1] %v2227_v51 }
 0x1a2 PF: > { %s15_s15 = sadd.s32 1, %s3172_s15  }
 0x1a3   : > { %p12_p4 = scmp.ge.s32.totalorder %s15_s15, 4  }
 0x1a5   :  { %14 = sbr.rel (!%p12_p4) target bundleno = 1 (0x1), region = 92 }

// kernel: unet_forward.29
= control target key start
LH: loop header
LB: loop body
LE: loop exit
PB: predicated region body
PF: predicated region fallthrough
CT: control target
= control target key end

     0   :  { %s148_s0 = inlined_call_operand.vmem [shape: f32[64,128], index: 0, kind: input, shape index: {}]   ;;  %s149_s1 = inlined_call_operand.vmem [shape: f32[1,128], index: 1, kind: input, shape index: {}]   ;;  %s150_s2 = inlined_call_operand.vmem [shape: f32[1,128], index: 2, kind: input, shape index: {}]   ;;  %s151_s3 = inlined_call_operand.vmem [shape: f32[64,128], index: 3, kind: output, shape index: {}]  }
   0x1   :  { %v14_v0 = vld [vmem:[%s148_s0] sm:$0xff]  ;;  %v15_v4 = vld [vmem:[%s148_s0 + $0x8] sm:$0xff]  ;;  %v16_v5 = vld [vmem:[%s148_s0 + $0x10] sm:$0xff] }
   0x2   :  { %v72_v1 = vld [vmem:[%s149_s1] ss:$0 sm:$0xff]  ;;  %v17_v6 = vld [vmem:[%s148_s0 + $0x18] sm:$0xff]  ;;  %v19_v11 = vld [vmem:[%s148_s0 + $0x28] sm:$0xff] }
   0x3   :  { %v73_v2 = vld [vmem:[%s150_s2] ss:$0 sm:$0xff]  ;;  %v29_v3 = vmul.f32 %v72_v1, %v14_v0  ;;  %v30_v7 = vmul.f32 %v72_v1, %v15_v4  ;;  %v31_v8 = vmul.f32 %v72_v1, %v16_v5  ;;  %v32_v9 = vmul.f32 %v72_v1, %v17_v6  ;;  %v20_v12 = vld [vmem:[%s148_s0 + $0x30] sm:$0xff]  ;;  %v21_v17 = vld [vmem:[%s148_s0 + $0x38] sm:$0xff] }
   0x4   :  { %v18_v10 = vld [vmem:[%s148_s0 + $0x20] sm:$0xff]  ;;  %v34_v15 = vmul.f32 %v72_v1, %v19_v11  ;;  %v35_v16 = vmul.f32 %v72_v1, %v20_v12  ;;  %v36_v21 = vmul.f32 %v72_v1, %v21_v17 }
   0x5   :  { %v44_v13 = vadd.f32 %v73_v2, %v29_v3  ;;  %v33_v14 = vmul.f32 %v72_v1, %v18_v10  ;;  %v45_v18 = vadd.f32 %v73_v2, %v30_v7  ;;  %v46_v19 = vadd.f32 %v73_v2, %v31_v8 }
   0x6   :  { %v47_v20 = vadd.f32 %v73_v2, %v32_v9  ;;  %v49_v24 = vadd.f32 %v73_v2, %v34_v15  ;;  %v50_v25 = vadd.f32 %v73_v2, %v35_v16  ;;  %v51_v29 = vadd.f32 %v73_v2, %v36_v21 }
   0x7   :  { %v52_v22 = vmax.f32 %v44_v13, 0.0  ;;  %v48_v23 = vadd.f32 %v73_v2, %v33_v14  ;;  %v53_v26 = vmax.f32 %v45_v18, 0.0  ;;  %v54_v27 = vmax.f32 %v46_v19, 0.0 }
   0x8   :  { %v55_v28 = vmax.f32 %v47_v20, 0.0  ;;  %v57_v31 = vmax.f32 %v49_v24, 0.0  ;;  %v58_v32 = vmax.f32 %v50_v25, 0.0  ;;  %v59_v33 = vmax.f32 %v51_v29, 0.0 }
   0x9   :  { %60 = vst [vmem:[%s151_s3] sm:$0xff] %v52_v22  ;;  %v56_v30 = vmax.f32 %v48_v23, 0.0  ;;  %61 = vst [vmem:[%s151_s3 + $0x8] sm:$0xff] %v53_v26 }
   0xa   :  { %62 = vst [vmem:[%s151_s3 + $0x10] sm:$0xff] %v54_v27  ;;  %63 = vst [vmem:[%s151_s3 + $0x18] sm:$0xff] %v55_v28 }
   0xb   :  { %64 = vst [vmem:[%s151_s3 + $0x20] sm:$0xff] %v56_v30  ;;  %65 = vst [vmem:[%s151_s3 + $0x28] sm:$0xff] %v57_v31 }
   0xc   :  { %66 = vst [vmem:[%s151_s3 + $0x30] sm:$0xff] %v58_v32  ;;  %67 = vst [vmem:[%s151_s3 + $0x38] sm:$0xff] %v59_v33 }

// kernel: unet_forward.20
= control target key start
LH: loop header
LB: loop body
LE: loop exit
PB: predicated region body
PF: predicated region fallthrough
CT: control target
= control target key end

     0   :  { %s7017_s15 = smov 0   ;;  %s8853_s0 = inlined_call_operand.vmem [shape: bf16[2,18,18,128], index: 0, kind: input, shape index: {}]   ;;  %s8854_s1 = inlined_call_operand.vmem [shape: bf16[3,3,128,128], index: 1, kind: input, shape index: {}]   ;;  %s8855_s2 = inlined_call_operand.vmem [shape: f32[2,16,16,128], index: 2, kind: output, shape index: {0}]   ;;  %s8856_s3 = inlined_call_operand.vmem [shape: f32[2,1,128], index: 3, kind: output, shape index: {1}]   ;;  %s8857_s4 = inlined_call_operand.vmem [shape: f32[2,1,128], index: 4, kind: output, shape index: {2}]  }
   0x1 LB: > { %s5270_s16 = sadd.s32 4294967295, %s6990_s15   ;;  %p5274_p0 = scmp.ge.s32.totalorder %s6990_s15, 1  ;;  %s6990_s15 = sphi %s7017_s15, %s15_s15  }
   0x2   : > { %p167_p1 = scmp.lt.s32.totalorder %s6990_s15, 3 }
   0x4   : > { %p168_p2 = pnand %p5274_p0, %p167_p1 }
   0x6   : > { %171 = sbr.rel (%p168_p2) target bundleno = 603 (0x25b), region = 28 }
   0xd   : > { %v6794_v0 = vld [vmem:[%s8854_s1 + $0x40] sm:$0xff]   ;;  %p199_p3 = scmp.lt.s32.totalorder %s5270_s16, 1  ;;  %v6796_v2 = vld [vmem:[%s8854_s1 + $0x48] sm:$0xff]   ;;  %v6798_v4 = vld [vmem:[%s8854_s1 + $0x50] sm:$0xff]   ;;  %vm280_vm0 = vsmask.f32 3328 }
   0xe   : > { %v6795_v1 = vld [vmem:[%s8854_s1 + $0x100] sm:$0xff]   ;;  %6081 = vmatprep.subr.bf16.mxu1 %v6794_v0  ;;  %v6797_v3 = vld [vmem:[%s8854_s1 + $0x108] sm:$0xff]   ;;  %v6799_v5 = vld [vmem:[%s8854_s1 + $0x110] sm:$0xff]   ;;  %vm281_vm1 = vsmask.f32 7440  ;;  %vm1310_vm3 = vcmask 1042432  }
   0xf   : > { %6273 = vmatprep.subr.bf16.mxu0 %v6795_v1  ;;  %6082 = vmatpush3.bf16.msra.mxu1 %v6794_v0  ;;  %s8925_s16 = smov (!%p199_p3, %s5270_s16), 1  ;;  %v6800_v6 = vld [vmem:[%s8854_s1 + $0x58] sm:$0xff]   ;;  %v6802_v8 = vld [vmem:[%s8854_s1 + $0x60] sm:$0xff]   ;;  %v6804_v10 = vld [vmem:[%s8854_s1 + $0x68] sm:$0xff]   ;;  %vm1311_vm4 = vcmask 1046532  }
  0x10   : > { %6274 = vmatpush3.bf16.msra.mxu0 %v6795_v1  ;;  %6083 = vmatprep.subr.bf16.mxu1 %v6796_v2  ;;  %v6801_v7 = vld [vmem:[%s8854_s1 + $0x118] sm:$0xff]   ;;  %s6785_s7 = smul.u32 216, %s8925_s16  ;;  %v6803_v9 = vld [vmem:[%s8854_s1 + $0x120] sm:$0xff]   ;;  %v6805_v11 = vld [vmem:[%s8854_s1 + $0x128] sm:$0xff]   ;;  %s211_s24 = scalar_lea.vmem %s8856_s3, %s8925_s16 }
  0x11   : > { %6275 = vmatprep.subr.bf16.mxu0 %v6797_v3  ;;  %v6806_v25 = vld [vmem:[%s8854_s1 + $0x70] sm:$0xff]   ;;  %v6808_v36 = vld [vmem:[%s8854_s1 + $0x78] sm:$0xff]   ;;  %vm7093_vm2 = vmor %vm280_vm0, %vm281_vm1  ;;  %s214_s27 = scalar_lea.vmem %s8857_s4, %s8925_s16 }
  0x12   : > { %s7061_s14 = scalar_lea.vmem %s8853_s0, %s6785_s7  ;;  %v6807_v30 = vld [vmem:[%s8854_s1 + $0x130] sm:$0xff]   ;;  %v6809_v51 = vld [vmem:[%s8854_s1 + $0x138] sm:$0xff]   ;;  %vm7339_vm5 = vmor %vm1310_vm3, %vm1311_vm4 }
  0x13   : > { %6084 = vmatpush3.bf16.msra.mxu1 %v6796_v2  ;;  %v216_v12 = vld [vmem:[%s7061_s14] sm:$0xf]  ;;  %v217_v13 = vld [vmem:[%s7061_s14 + $0x4] sm:$0xf]  ;;  %v264_v14 = vld [vmem:[%s7061_s14 + $0x8] sm:$0x1] }
  0x14   : > { %6276 = vmatpush3.bf16.msra.mxu0 %v6797_v3  ;;  %6085 = vmatprep.subr.bf16.mxu1 %v6798_v4  ;;  %v284_v15 = vshrl.u32 %v216_v12, 16  ;;  %v287_v16 = vshll.u32 %v216_v12, 16  ;;  %v293_v17 = vshll.u32 %v217_v13, 16  ;;  %v297_v18 = vshrl.u32 %v217_v13, 16  ;;  %v5470_v20 = vld [vmem:[%s7061_s14 + $0xc] sm:$0xf] }
  0x15   : > { %6277 = vmatprep.subr.bf16.mxu0 %v6799_v5  ;;  %v303_v19 = vshll.u32 %v264_v14, 16  ;;  %v7074_v23 = vld [vmem:[%s7061_s14 + $0x10] sm:$0xf]  ;;  %v7077_v24 = vld [vmem:[%s7061_s14 + $0x14] sm:$0x1]  ;;  %v2183_v29 = vshrl.u32 %v5470_v20, 16 }
  0x16   : > { %v286_v21 = vrot.slane %v284_v15, 4  ;;  %v289_v22 = vrot.slane %v287_v16, 5  ;;  %v295_v26 = vrot.slane %v293_v17, 5  ;;  %v299_v27 = vrot.slane %v297_v18, 4  ;;  %v218_v35 = vld [vmem:[%s7061_s14 + $0xc] sm:$0xf] }
  0x17   : > { %6086 = vmatpush3.bf16.msra.mxu1 %v6798_v4  ;;  %v305_v28 = vrot.slane %v303_v19, 5  ;;  %v2186_v32 = vshll.u32 %v5470_v20, 16  ;;  %v2192_v33 = vshll.u32 %v7074_v23, 16  ;;  %v2196_v34 = vshrl.u32 %v7074_v23, 16  ;;  %v219_v42 = vld [vmem:[%s7061_s14 + $0x10] sm:$0xf] }
  0x18   : > { %6278 = vmatpush3.bf16.msra.mxu0 %v6799_v5  ;;  %6087 = vmatprep.subr.bf16.mxu1 %v6800_v6  ;;  %v290_v31 = vor.u32 %v289_v22, %v286_v21  ;;  %v300_v38 = vor.u32 %v299_v27, %v295_v26  ;;  %v2185_v39 = vrot.slane %v2183_v29, 4  ;;  %v2202_v40 = vshll.u32 %v7077_v24, 16  ;;  %v265_v55 = vld [vmem:[%s7061_s14 + $0x14] sm:$0x1]  ;;  %v5473_v57 = vld [vmem:[%s7061_s14 + $0x18] sm:$0xf] }
  0x19   : > { %6279 = vmatprep.subr.bf16.mxu0 %v6801_v7  ;;  %v2957_v41 = vrot.slane %v7077_v24, 5  ;;  %v2188_v44 = vrot.slane %v2186_v32, 5  ;;  %v2194_v45 = vrot.slane %v2192_v33, 5  ;;  %v2198_v46 = vrot.slane %v2196_v34, 4  ;;  %v7110_v62 = vld [vmem:[%s7061_s14 + $0x1c] sm:$0xf] }
  0x1a   : > { %v291_v43 = vrot.slane %v290_v31, 4  ;;  %v301_v47 = vrot.slane %v300_v38, 4  ;;  %v2204_v48 = vrot.slane %v2202_v40, 5  ;;  %v308_v49 = vshrl.u32 %v218_v35, 16  ;;  %v6810_v3 = vld [vmem:[%s8854_s1] sm:$0xff]  }
  0x1b   : > { %6088 = vmatpush3.bf16.msra.mxu1 %v6800_v6  ;;  %v311_v50 = vshll.u32 %v218_v35, 16  ;;  %v2189_v53 = vor.u32 %v2188_v44, %v2185_v39  ;;  %v2199_v54 = vor.u32 %v2198_v46, %v2194_v45  ;;  %v317_v56 = vshll.u32 %v219_v42, 16  ;;  %v7118_v4 = vld [vmem:[%s8854_s1 + $0x140] sm:$0xff]   ;;  %v220_v21 = vld [vmem:[%s7061_s14 + $0x18] sm:$0xf]  ;;  %v6813_v46 = vld [vmem:[%s8854_s1 + $0x8] sm:$0xff]  }
  0x1c   : > { %6280 = vmatpush3.bf16.msra.mxu0 %v6801_v7  ;;  %6089 = vmatprep.subr.bf16.mxu1 %v6802_v8  ;;  %v296_v52 = vsel %vm7093_vm2, %v291_v43, %v295_v26  ;;  %v306_v58 = vsel %vm7093_vm2, %v301_v47, %v305_v28  ;;  %v310_v59 = vrot.slane %v308_v49, 4  ;;  %v321_v61 = vshrl.u32 %v219_v42, 16  ;;  %v221_v28 = vld [vmem:[%s7061_s14 + $0x1c] sm:$0xf]  ;;  %v266_v33 = vld [vmem:[%s7061_s14 + $0x20] sm:$0x1] }
  0x1d   : > { %6281 = vmatprep.subr.bf16.mxu0 %v6803_v9  ;;  %v313_v60 = vrot.slane %v311_v50, 5  ;;  %v5294_v63 = vcombine.low %v296_v52, %v306_v58  ;;  %v2190_v0 = vrot.slane %v2189_v53, 4  ;;  %v2200_v1 = vrot.slane %v2199_v54, 4  ;;  %v5476_v39 = vld [vmem:[%s7061_s14 + $0x24] sm:$0xf] }
  0x1e   : > { %v319_v2 = vrot.slane %v317_v56, 5  ;;  %v323_v6 = vrot.slane %v321_v61, 4  ;;  %v327_v7 = vshll.u32 %v265_v55, 16  ;;  %v2210_v12 = vshll.u32 %v5473_v57, 16  ;;  %v222_v52 = vld [vmem:[%s7061_s14 + $0x24] sm:$0xf] }
  0x1f   : > { %6090 = vmatpush3.bf16.msra.mxu1 %v6802_v8  ;;  %v314_v5 = vor.u32 %v313_v60, %v310_v59  ;;  %v7121_v8 = vld [vmem:[%s7061_s14 + $0x20] sm:$0x1]  ;;  %6097 = vmatprep.mubr.bf16.mxu1 %v5294_v63  ;;  %v2216_v19 = vshll.u32 %v7110_v62, 16  ;;  %v2220_v20 = vshrl.u32 %v7110_v62, 16  ;;  %v2961_v27 = vrot.slane %v7110_v62, 5  ;;  %v6812_v63 = vld [vmem:[%s8854_s1 + $0x148] sm:$0xff]  }
  0x20   : > { %6282 = vmatpush3.bf16.msra.mxu0 %v6803_v9  ;;  %6091 = vmatprep.subr.bf16.mxu1 %v6804_v10  ;;  %v2195_v9 = vsel %vm7093_vm2, %v2190_v0, %v2194_v45  ;;  %v324_v15 = vor.u32 %v323_v6, %v319_v2  ;;  %v329_v16 = vrot.slane %v327_v7, 5  ;;  %v2212_v18 = vrot.slane %v2210_v12, 5  ;;  %v7146_v45 = vld [vmem:[%s7061_s14 + $0x28] sm:$0xf] }
  0x21   : > { %6283 = vmatprep.subr.bf16.mxu0 %v6805_v11  ;;  %v315_v14 = vrot.slane %v314_v5, 4  ;;  %v2226_v26 = vshll.u32 %v7121_v8, 16  ;;  %v2222_v31 = vrot.slane %v2220_v20, 4  ;;  %v2964_v32 = vrot.slane %v7121_v8, 5  ;;  %v223_v5 = vld [vmem:[%s7061_s14 + $0x28] sm:$0xf] }
  0x22   : > { %v332_v38 = vshrl.u32 %v220_v21, 16  ;;  %v335_v44 = vshll.u32 %v220_v21, 16  ;;  %v345_v49 = vshrl.u32 %v221_v28, 16  ;;  %v351_v50 = vshll.u32 %v266_v33, 16  ;;  %v7177_v33 = vld [vmem:[%s7061_s14 + $0x34] sm:$0xf] }
  0x23   : > { %6092 = vmatpush3.bf16.msra.mxu1 %v6804_v10  ;;  %v2205_v10 = vsel %vm7093_vm2, %v2200_v1, %v2204_v48  ;;  %v320_v22 = vsel %vm7093_vm2, %v315_v14, %v319_v2  ;;  %v2228_v35 = vrot.slane %v2226_v26, 5  ;;  %v341_v48 = vshll.u32 %v221_v28, 16 }
  0x24   : > { %6284 = vmatpush3.bf16.msra.mxu0 %v6805_v11  ;;  %6093 = vmatprep.subr.bf16.mxu1 %v6806_v25  ;;  %v2207_v11 = vshrl.u32 %v5473_v57, 16  ;;  %v5534_v13 = vcombine.low %v2195_v9, %v2205_v10  ;;  %v334_v47 = vrot.slane %v332_v38, 4  ;;  %v337_v55 = vrot.slane %v335_v44, 5 }
  0x25   : > { %6285 = vmatprep.subr.bf16.mxu0 %v6807_v30  ;;  %v2231_v56 = vshrl.u32 %v5476_v39, 16  ;;  %v343_v57 = vrot.slane %v341_v48, 5  ;;  %v347_v58 = vrot.slane %v345_v49, 4  ;;  %v353_v59 = vrot.slane %v351_v50, 5  ;;  %v6815_v48 = vld [vmem:[%s8854_s1 + $0x158] sm:$0xff]  }
  0x26   : > { %v2209_v17 = vrot.slane %v2207_v11, 4  ;;  %6289 = vmatprep.mubr.bf16.mxu0 %v5534_v13  ;;  %v2234_v60 = vshll.u32 %v5476_v39, 16  ;;  %v338_v0 = vor.u32 %v337_v55, %v334_v47  ;;  %v2240_v2 = vshll.u32 %v7146_v45, 16  ;;  %v267_v11 = vld [vmem:[%s7061_s14 + $0x2c] sm:$0x1] }
  0x27   : > { %6094 = vmatpush3.bf16.msra.mxu1 %v6806_v25  ;;  %v325_v25 = vrot.slane %v324_v15, 4  ;;  %v2233_v1 = vrot.slane %v2231_v56, 4  ;;  %v348_v7 = vor.u32 %v347_v58, %v343_v57  ;;  %v2244_v10 = vshrl.u32 %v7146_v45, 16 }
  0x28   : > { %6286 = vmatpush3.bf16.msra.mxu0 %v6807_v30  ;;  %6095 = vmatprep.subr.bf16.mxu1 %v6808_v36  ;;  %v2213_v29 = vor.u32 %v2212_v18, %v2209_v17  ;;  %v2218_v30 = vrot.slane %v2216_v19, 5  ;;  %v2236_v9 = vrot.slane %v2234_v60, 5  ;;  %v339_v12 = vrot.slane %v338_v0, 4  ;;  %v6822_v60 = vld [vmem:[%s8854_s1 + $0x20] sm:$0xff]  }
  0x29   : > { %6287 = vmatprep.subr.bf16.mxu0 %v6809_v51  ;;  %v330_v34 = vsel %vm7093_vm2, %v325_v25, %v329_v16  ;;  %v2242_v13 = vrot.slane %v2240_v2, 5  ;;  %v356_v15 = vshrl.u32 %v222_v52, 16  ;;  %v5479_v16 = vld [vmem:[%s7061_s14 + $0x30] sm:$0xf]  ;;  %v349_v17 = vrot.slane %v348_v7, 4 }
  0x2a   : > { %v5295_v40 = vcombine.low %v320_v22, %v330_v34  ;;  %v2214_v42 = vrot.slane %v2213_v29, 4  ;;  %v2223_v43 = vor.u32 %v2222_v31, %v2218_v30  ;;  %v2237_v18 = vor.u32 %v2236_v9, %v2233_v1  ;;  %v6819_v34 = vld [vmem:[%s8854_s1 + $0x18] sm:$0xff]  }
  0x2b   : > { %6096 = vmatpush3.bf16.msra.mxu1 %v6808_v36  ;;  %v7142_v36 = vrot.slane %v2961_v27, 4  ;;  %v2246_v19 = vrot.slane %v2244_v10, 4  ;;  %v359_v20 = vshll.u32 %v222_v52, 16  ;;  %v344_v21 = vsel %vm7093_vm2, %v339_v12, %v343_v57  ;;  %v268_v2 = vld [vmem:[%s7061_s14 + $0x38] sm:$0x1] }
  0x2c   : > { %6288 = vmatpush3.bf16.msra.mxu0 %v6809_v51  ;;  %6129 = vmatprep.subr.bf16.mxu1 %v6810_v3  ;;  %v7152_v51 = vld [vmem:[%s7061_s14 + $0x2c] sm:$0x1]  ;;  %v2219_v53 = vsel %vm7093_vm2, %v2214_v42, %v2218_v30  ;;  %v2224_v54 = vrot.slane %v2223_v43, 4  ;;  %v358_v25 = vrot.slane %v356_v15, 4  ;;  %v365_v26 = vshll.u32 %v223_v5, 16 }
  0x2d   : > { %6321 = vmatprep.subr.bf16.mxu0 %v7118_v4  ;;  %v2250_v14 = vshll.u32 %v7152_v51, 16  ;;  %v354_v28 = vsel %vm7093_vm2, %v349_v17, %v353_v59  ;;  %v2238_v29 = vrot.slane %v2237_v18, 4  ;;  %v2247_v30 = vor.u32 %v2246_v19, %v2242_v13  ;;  %v225_v59 = vld [vmem:[%s7061_s14 + $0x34] sm:$0xf]  ;;  %v5482_v9 = vld [vmem:[%s7061_s14 + $0x3c] sm:$0xf] }
  0x2e   : > { %6098 = vmatmul.mubr.bf16.vlgmr.msra.gmra.mrb[0].mxu1 %v5295_v40  ;;  %v2229_v61 = vsel %vm7093_vm2, %v2224_v54, %v2228_v35  ;;  %v361_v31 = vrot.slane %v359_v20, 5  ;;  %v5296_v35 = vcombine.low %v344_v21, %v354_v28  ;;  %v367_v38 = vrot.slane %v365_v26, 5  ;;  %v224_v54 = vld [vmem:[%s7061_s14 + $0x30] sm:$0xf]  ;;  %v7211_v19 = vld [vmem:[%s7061_s14 + $0x40] sm:$0xf] }
  0x2f   : > { %6130 = vmatpush3.bf16.msra.mxu1 %v6810_v3  ;;  %v6816_v3 = vld [vmem:[%s8854_s1 + $0x10] sm:$0xff]   ;;  %v5535_v6 = vcombine.low %v2219_v53, %v2229_v61  ;;  %v2252_v22 = vrot.slane %v2250_v14, 5  ;;  %v369_v39 = vshrl.u32 %v223_v5, 16  ;;  %v375_v40 = vshll.u32 %v267_v11, 16  ;;  %v6824_v14 = vld [vmem:[%s8854_s1 + $0x28] sm:$0xff]   ;;  %v6817_v20 = vld [vmem:[%s8854_s1 + $0x160] sm:$0xff]  }
  0x30   : > { %6131 = vmatprep.subr.bf16.mxu1 %v6813_v46  ;;  %v2243_v42 = vsel %vm7093_vm2, %v2238_v29, %v2242_v13  ;;  %v2248_v43 = vrot.slane %v2247_v30, 4  ;;  %v362_v44 = vor.u32 %v361_v31, %v358_v25  ;;  %v2255_v47 = vshrl.u32 %v5479_v16, 16  ;;  %6101 = vmatprep.mubr.bf16.mxu1 %v5296_v35  ;;  %v7219_v28 = vld [vmem:[%s7061_s14 + $0x44] sm:$0x1]  ;;  %v6826_v35 = vld [vmem:[%s8854_s1 + $0x30] sm:$0xff]  }
  0x31   : > { %6290 = vmatmul.mubr.bf16.vlgmr.msra.gmra.mrb[0].mxu0 %v5535_v6  ;;  %v371_v49 = vrot.slane %v369_v39, 4  ;;  %v377_v50 = vrot.slane %v375_v40, 5  ;;  %v2258_v52 = vshll.u32 %v5479_v16, 16  ;;  %v2264_v53 = vshll.u32 %v7177_v33, 16 }
  0x32   : > { %6322 = vmatpush3.bf16.msra.mxu0 %v7118_v4  ;;  %v6814_v4 = vld [vmem:[%s8854_s1 + $0x150] sm:$0xff]   ;;  %v2253_v55 = vsel %vm7093_vm2, %v2248_v43, %v2252_v22  ;;  %v363_v56 = vrot.slane %v362_v44, 4  ;;  %v2257_v57 = vrot.slane %v2255_v47, 4  ;;  %v2268_v58 = vshrl.u32 %v7177_v33, 16 }
  0x33   : > { %6132 = vmatpush3.bf16.msra.mxu1 %v6813_v46  ;;  %6323 = vmatprep.subr.bf16.mxu0 %v6812_v63  ;;  %v7188_v46 = vld [vmem:[%s7061_s14 + $0x38] sm:$0x1]  ;;  %v5536_v61 = vcombine.low %v2243_v42, %v2253_v55  ;;  %v2260_v0 = vrot.slane %v2258_v52, 5  ;;  %v2266_v1 = vrot.slane %v2264_v53, 5  ;;  %v380_v7 = vshrl.u32 %v224_v54, 16 }
  0x34   : > { %6133 = vmatprep.subr.bf16.mxu1 %v6816_v3  ;;  %v368_v5 = vsel %vm7093_vm2, %v363_v56, %v367_v38  ;;  %v2274_v6 = vshll.u32 %v7188_v46, 16  ;;  %v383_v12 = vshll.u32 %v224_v54, 16  ;;  %v389_v13 = vshll.u32 %v225_v59, 16  ;;  %v227_v55 = vld [vmem:[%s7061_s14 + $0x40] sm:$0xf] }
  0x35   : > { %6293 = vmatprep.mubr.bf16.mxu0 %v5536_v61  ;;  %v2261_v11 = vor.u32 %v2260_v0, %v2257_v57  ;;  %v382_v17 = vrot.slane %v380_v7, 4  ;;  %v393_v18 = vshrl.u32 %v225_v59, 16  ;;  %v2279_v40 = vshrl.u32 %v5482_v9, 16 }
  0x36   : > { %6324 = vmatpush3.bf16.msra.mxu0 %v6812_v63  ;;  %v372_v63 = vor.u32 %v371_v49, %v367_v38  ;;  %v2276_v16 = vrot.slane %v2274_v6, 5  ;;  %v385_v25 = vrot.slane %v383_v12, 5  ;;  %v391_v26 = vrot.slane %v389_v13, 5 }
  0x37   : > { %6134 = vmatpush3.bf16.msra.mxu1 %v6816_v3  ;;  %6325 = vmatprep.subr.bf16.mxu0 %v6814_v4  ;;  %v2270_v3 = vrot.slane %v2268_v58, 4  ;;  %v2262_v22 = vrot.slane %v2261_v11, 4  ;;  %v395_v31 = vrot.slane %v393_v18, 4  ;;  %v2282_v42 = vshll.u32 %v5482_v9, 16  ;;  %v5485_v9 = vld [vmem:[%s7061_s14 + $0x48] sm:$0xf] }
  0x38   : > { %6135 = vmatprep.subr.bf16.mxu1 %v6819_v34  ;;  %v373_v10 = vrot.slane %v372_v63, 4  ;;  %v386_v39 = vor.u32 %v385_v25, %v382_v17  ;;  %v2288_v49 = vshll.u32 %v7211_v19, 16  ;;  %v2281_v53 = vrot.slane %v2279_v40, 4  ;;  %v269_v63 = vld [vmem:[%s7061_s14 + $0x44] sm:$0x1] }
  0x39   : > { %v2271_v15 = vor.u32 %v2270_v3, %v2266_v1  ;;  %v2267_v38 = vsel %vm7093_vm2, %v2262_v22, %v2266_v1  ;;  %v396_v44 = vor.u32 %v395_v31, %v391_v26  ;;  %v2284_v54 = vrot.slane %v2282_v42, 5  ;;  %v7252_v22 = vld [vmem:[%s7061_s14 + $0x50] sm:$0x1]  ;;  %v6821_v31 = vld [vmem:[%s8854_s1 + $0x178] sm:$0xff]  }
  0x3a   : > { %6326 = vmatpush3.bf16.msra.mxu0 %v6814_v4  ;;  %v378_v21 = vsel %vm7093_vm2, %v373_v10, %v377_v50  ;;  %v399_v4 = vshll.u32 %v268_v2, 16  ;;  %v387_v52 = vrot.slane %v386_v39, 4  ;;  %v2290_v57 = vrot.slane %v2288_v49, 5  ;;  %v6828_v2 = vld [vmem:[%s8854_s1 + $0x38] sm:$0xff]  }
  0x3b   : > { %6136 = vmatpush3.bf16.msra.mxu1 %v6819_v34  ;;  %6327 = vmatprep.subr.bf16.mxu0 %v6815_v48  ;;  %v5297_v29 = vcombine.low %v368_v5, %v378_v21  ;;  %v2272_v30 = vrot.slane %v2271_v15, 4  ;;  %v226_v34 = vld [vmem:[%s7061_s14 + $0x3c] sm:$0xf]  ;;  %v397_v56 = vrot.slane %v396_v44, 4  ;;  %v2292_v58 = vshrl.u32 %v7211_v19, 16  ;;  %v6820_v15 = vld [vmem:[%s8854_s1 + $0x170] sm:$0xff]  }
  0x3c   : > { %6137 = vmatprep.subr.bf16.mxu1 %v6822_v60  ;;  %v401_v47 = vrot.slane %v399_v4, 5  ;;  %v2298_v59 = vshll.u32 %v7219_v28, 16  ;;  %v2285_v61 = vor.u32 %v2284_v54, %v2281_v53  ;;  %v404_v0 = vshrl.u32 %v226_v34, 16  ;;  %v7263_v4 = vld [vmem:[%s8854_s1 + $0x80] sm:$0xff]   ;;  %v229_v53 = vld [vmem:[%s7061_s14 + $0x4c] sm:$0xf] }
  0x3d   : > { %6102 = vmatmul.mubr.bf16.gmra.mrb[4].mxu1 %v5297_v29  ;;  %v2277_v43 = vsel %vm7093_vm2, %v2272_v30, %v2276_v16  ;;  %v407_v1 = vshll.u32 %v226_v34, 16  ;;  %v2294_v3 = vrot.slane %v2292_v58, 4  ;;  %v413_v7 = vshll.u32 %v227_v55, 16  ;;  %v228_v30 = vld [vmem:[%s7061_s14 + $0x48] sm:$0xf] }
  0x3e   : > { %6328 = vmatpush3.bf16.msra.mxu0 %v6815_v48  ;;  %v5537_v50 = vcombine.low %v2267_v38, %v2277_v43  ;;  %v6818_v48 = vld [vmem:[%s8854_s1 + $0x168] sm:$0xff]   ;;  %v402_v5 = vsel %vm7093_vm2, %v397_v56, %v401_v47  ;;  %v2300_v6 = vrot.slane %v2298_v59, 5  ;;  %v2286_v11 = vrot.slane %v2285_v61, 4  ;;  %v270_v54 = vld [vmem:[%s7061_s14 + $0x50] sm:$0x1] }
  0x3f   : > { %6138 = vmatpush3.bf16.msra.mxu1 %v6822_v60  ;;  %6329 = vmatprep.subr.bf16.mxu0 %v6817_v20  ;;  %v392_v60 = vsel %vm7093_vm2, %v387_v52, %v391_v26  ;;  %v406_v12 = vrot.slane %v404_v0, 4  ;;  %v409_v13 = vrot.slane %v407_v1, 5  ;;  %v2295_v16 = vor.u32 %v2294_v3, %v2290_v57  ;;  %v5488_v58 = vld [vmem:[%s7061_s14 + $0x54] sm:$0xf]  ;;  %v7277_v0 = vld [vmem:[%s7061_s14 + $0x58] sm:$0xf] }
  0x40   : > { %6139 = vmatprep.subr.bf16.mxu1 %v6824_v14  ;;  %6294 = vmatmul.mubr.bf16.gmra.mrb[4].mxu0 %v5537_v50  ;;  %v5298_v10 = vcombine.low %v392_v60, %v402_v5  ;;  %v415_v17 = vrot.slane %v413_v7, 5  ;;  %v417_v18 = vshrl.u32 %v227_v55, 16  ;;  %v423_v21 = vshll.u32 %v269_v63, 16 }
  0x41   : > { %v410_v25 = vor.u32 %v409_v13, %v406_v12  ;;  %v2303_v26 = vshrl.u32 %v5485_v9, 16  ;;  %v2306_v29 = vshll.u32 %v5485_v9, 16  ;;  %v2296_v34 = vrot.slane %v2295_v16, 4 }
  0x42   : > { %6330 = vmatpush3.bf16.msra.mxu0 %v6817_v20  ;;  %6105 = vmatprep.mubr.bf16.mxu1 %v5298_v10  ;;  %v2291_v20 = vsel %vm7093_vm2, %v2286_v11, %v2290_v57  ;;  %v425_v38 = vrot.slane %v423_v21, 5  ;;  %v2322_v52 = vshll.u32 %v7252_v22, 16  ;;  %v428_v61 = vshrl.u32 %v228_v30, 16 }
  0x43   : > { %6140 = vmatpush3.bf16.msra.mxu1 %v6824_v14  ;;  %v7246_v14 = vld [vmem:[%s7061_s14 + $0x4c] sm:$0xf]  ;;  %6331 = vmatprep.subr.bf16.mxu0 %v6818_v48  ;;  %v411_v40 = vrot.slane %v410_v25, 4  ;;  %v2305_v42 = vrot.slane %v2303_v26, 4  ;;  %v2308_v43 = vrot.slane %v2306_v29, 5  ;;  %v2301_v47 = vsel %vm7093_vm2, %v2296_v34, %v2300_v6  ;;  %v7282_v6 = vld [vmem:[%s8854_s1 + $0x180] sm:$0xff]  }
  0x44   : > { %6141 = vmatprep.subr.bf16.mxu1 %v6826_v35  ;;  %v2312_v39 = vshll.u32 %v7246_v14, 16  ;;  %v2316_v44 = vshrl.u32 %v7246_v14, 16  ;;  %v5538_v55 = vcombine.low %v2291_v20, %v2301_v47  ;;  %v2324_v60 = vrot.slane %v2322_v52, 5  ;;  %v7289_v20 = vld [vmem:[%s7061_s14 + $0x5c] sm:$0x1] }
  0x45   : > { %v2309_v56 = vor.u32 %v2308_v43, %v2305_v42  ;;  %v431_v63 = vshll.u32 %v228_v30, 16  ;;  %v441_v3 = vshrl.u32 %v229_v53, 16  ;;  %v430_v9 = vrot.slane %v428_v61, 4  ;;  %v231_v43 = vld [vmem:[%s7061_s14 + $0x58] sm:$0xf] }
  0x46   : > { %6332 = vmatpush3.bf16.msra.mxu0 %v6818_v48  ;;  %v2314_v50 = vrot.slane %v2312_v39, 5  ;;  %v416_v48 = vsel %vm7093_vm2, %v411_v40, %v415_v17  ;;  %v2318_v57 = vrot.slane %v2316_v44, 4  ;;  %6297 = vmatprep.mubr.bf16.mxu0 %v5538_v55  ;;  %v447_v11 = vshll.u32 %v270_v54, 16  ;;  %v5491_v52 = vld [vmem:[%s7061_s14 + $0x60] sm:$0xf] }
  0x47   : > { %6142 = vmatpush3.bf16.msra.mxu1 %v6826_v35  ;;  %v419_v35 = vrot.slane %v417_v18, 4  ;;  %6333 = vmatprep.subr.bf16.mxu0 %v6820_v15  ;;  %v2310_v1 = vrot.slane %v2309_v56, 4  ;;  %v433_v10 = vrot.slane %v431_v63, 5  ;;  %v443_v18 = vrot.slane %v441_v3, 4 }
  0x48   : > { %6143 = vmatprep.subr.bf16.mxu1 %v6828_v2  ;;  %v2319_v5 = vor.u32 %v2318_v57, %v2314_v50  ;;  %v449_v21 = vrot.slane %v447_v11, 5  ;;  %v2327_v25 = vshrl.u32 %v5488_v58, 16  ;;  %v2330_v29 = vshll.u32 %v5488_v58, 16 }
  0x49   : > { %v420_v49 = vor.u32 %v419_v35, %v415_v17  ;;  %v2315_v13 = vsel %vm7093_vm2, %v2310_v1, %v2314_v50  ;;  %v434_v17 = vor.u32 %v433_v10, %v430_v9  ;;  %v2336_v30 = vshll.u32 %v7277_v0, 16  ;;  %v230_v35 = vld [vmem:[%s7061_s14 + $0x54] sm:$0xf]  ;;  %v271_v50 = vld [vmem:[%s7061_s14 + $0x5c] sm:$0x1] }
  0x4a   : > { %6334 = vmatpush3.bf16.msra.mxu0 %v6820_v15  ;;  %v2320_v15 = vrot.slane %v2319_v5, 4  ;;  %v2340_v34 = vshrl.u32 %v7277_v0, 16  ;;  %v2329_v42 = vrot.slane %v2327_v25, 4  ;;  %v452_v55 = vshrl.u32 %v230_v35, 16  ;;  %v7317_v25 = vld [vmem:[%s7061_s14 + $0x60] sm:$0xf] }
  0x4b   : > { %6144 = vmatpush3.bf16.msra.mxu1 %v6828_v2  ;;  %v421_v59 = vrot.slane %v420_v49, 4  ;;  %v437_v2 = vshll.u32 %v229_v53, 16  ;;  %6335 = vmatprep.subr.bf16.mxu0 %v6821_v31  ;;  %v435_v39 = vrot.slane %v434_v17, 4  ;;  %v2338_v44 = vrot.slane %v2336_v30, 5  ;;  %v7313_v17 = vld [vmem:[%s7061_s14 + $0x68] sm:$0x1] }
  0x4c   : > { %6177 = vmatprep.subr.bf16.mxu1 %v7263_v4  ;;  %v2325_v26 = vsel %vm7093_vm2, %v2320_v15, %v2324_v60  ;;  %v2342_v47 = vrot.slane %v2340_v34, 4  ;;  %v2346_v49 = vshll.u32 %v7289_v20, 16  ;;  %v7304_v60 = vld [vmem:[%s7061_s14 + $0x64] sm:$0xf]  ;;  %v454_v63 = vrot.slane %v452_v55, 4 }
  0x4d   : > { %v426_v7 = vsel %vm7093_vm2, %v421_v59, %v425_v38  ;;  %v439_v16 = vrot.slane %v437_v2, 5  ;;  %v5539_v38 = vcombine.low %v2315_v13, %v2325_v26  ;;  %v461_v59 = vshll.u32 %v231_v43, 16 }
  0x4e   : > { %v5299_v12 = vcombine.low %v416_v48, %v426_v7  ;;  %6336 = vmatpush3.bf16.msra.mxu0 %v6821_v31  ;;  %v2332_v31 = vrot.slane %v2330_v29, 5  ;;  %v455_v48 = vshll.u32 %v230_v35, 16  ;;  %v2343_v57 = vor.u32 %v2342_v47, %v2338_v44  ;;  %v7320_v35 = vld [vmem:[%s7061_s14 + $0x64] sm:$0xf] }
  0x4f   : > { %6369 = vmatprep.subr.bf16.mxu0 %v7282_v6  ;;  %v444_v40 = vor.u32 %v443_v18, %v439_v16  ;;  %6298 = vmatmul.mubr.bf16.gmra.mrb[8].mxu0 %v5539_v38  ;;  %v440_v53 = vsel %vm7093_vm2, %v435_v39, %v439_v16  ;;  %v2348_v58 = vrot.slane %v2346_v49, 5  ;;  %v465_v5 = vshrl.u32 %v231_v43, 16  ;;  %v272_v43 = vld [vmem:[%s7061_s14 + $0x68] sm:$0x1] }
  0x50   : > { %6106 = vmatmul.mubr.bf16.gmra.mrb[8].mxu1 %v5299_v12  ;;  %v2333_v56 = vor.u32 %v2332_v31, %v2329_v42  ;;  %v457_v1 = vrot.slane %v455_v48, 5  ;;  %v2344_v7 = vrot.slane %v2343_v57, 4  ;;  %v463_v9 = vrot.slane %v461_v59, 5 }
  0x51   : > { %v445_v54 = vrot.slane %v444_v40, 4  ;;  %v467_v11 = vrot.slane %v465_v5, 4  ;;  %v471_v12 = vshll.u32 %v271_v50, 16  ;;  %v2351_v13 = vshrl.u32 %v5491_v52, 16  ;;  %v5558_v50 = vld [vmem:[%s7061_s14 + $0xc] sm:$0xe] }
  0x52   : > { %v2334_v3 = vrot.slane %v2333_v56, 4  ;;  %v458_v10 = vor.u32 %v457_v1, %v454_v63  ;;  %v2349_v16 = vsel %vm7093_vm2, %v2344_v7, %v2348_v58  ;;  %v2354_v18 = vshll.u32 %v5491_v52, 16  ;;  %v7335_v5 = vld [vmem:[%s7061_s14 + $0x6c] sm:$0xf] }
  0x53   : > { %v450_v61 = vsel %vm7093_vm2, %v445_v54, %v449_v21  ;;  %v2360_v21 = vshll.u32 %v7304_v60, 16  ;;  %v468_v30 = vor.u32 %v467_v11, %v463_v9  ;;  %v473_v34 = vrot.slane %v471_v12, 5 }
  0x54   : > { %v5300_v2 = vcombine.low %v440_v53, %v450_v61  ;;  %v2339_v15 = vsel %vm7093_vm2, %v2334_v3, %v2338_v44  ;;  %v459_v29 = vrot.slane %v458_v10, 4  ;;  %v2353_v38 = vrot.slane %v2351_v13, 4 }
  0x55   : > { %v5540_v26 = vcombine.low %v2339_v15, %v2349_v16  ;;  %v2356_v39 = vrot.slane %v2354_v18, 5  ;;  %v2362_v40 = vrot.slane %v2360_v21, 5  ;;  %v2364_v42 = vshrl.u32 %v7304_v60, 16  ;;  %v7347_v21 = vld [vmem:[%s7061_s14 + $0x70] sm:$0xf] }
  0x56   : > { %6109 = vmatprep.mubr.bf16.mxu1 %v5300_v2  ;;  %v464_v31 = vsel %vm7093_vm2, %v459_v29, %v463_v9  ;;  %v469_v44 = vrot.slane %v468_v30, 4  ;;  %v2370_v47 = vshll.u32 %v7313_v17, 16  ;;  %v476_v49 = vshrl.u32 %v7317_v25, 16  ;;  %v6912_v9 = vld [vmem:[%s7061_s14 + $0xb4] sm:$0xff]  }
  0x57   : > { %6301 = vmatprep.mubr.bf16.mxu0 %v5540_v26  ;;  %v2357_v52 = vor.u32 %v2356_v39, %v2353_v38  ;;  %v2366_v53 = vrot.slane %v2364_v42, 4  ;;  %v479_v54 = vshll.u32 %v7317_v25, 16  ;;  %v485_v55 = vshll.u32 %v7320_v35, 16 }
  0x58   : > { %v474_v48 = vsel %vm7093_vm2, %v469_v44, %v473_v34  ;;  %v2372_v56 = vrot.slane %v2370_v47, 5  ;;  %v478_v57 = vrot.slane %v476_v49, 4  ;;  %v489_v58 = vshrl.u32 %v7320_v35, 16  ;;  %v7358_v47 = vld [vmem:[%s7061_s14 + $0x78] sm:$0xf] }
  0x59   : > { %v5301_v59 = vcombine.low %v464_v31, %v474_v48  ;;  %v2358_v61 = vrot.slane %v2357_v52, 4  ;;  %v2367_v63 = vor.u32 %v2366_v53, %v2362_v40  ;;  %v481_v1 = vrot.slane %v479_v54, 5  ;;  %v7369_v54 = vld [vmem:[%s7061_s14 + $0x7c] sm:$0xf] }
  0x5a   : > { %v487_v2 = vrot.slane %v485_v55, 5  ;;  %v491_v3 = vrot.slane %v489_v58, 4  ;;  %v495_v7 = vshll.u32 %v272_v43, 16  ;;  %v5574_v10 = vrot.slane %v5558_v50, 9  ;;  %v274_v58 = vld [vmem:[%s7061_s14 + $0x80] sm:$0x1] }
  0x5b   : > { %6110 = vmatmul.mubr.bf16.gmra.mrb[12].mxu1 %v5301_v59  ;;  %v2363_v11 = vsel %vm7093_vm2, %v2358_v61, %v2362_v40  ;;  %v2368_v12 = vrot.slane %v2367_v63, 4  ;;  %v482_v13 = vor.u32 %v481_v1, %v478_v57  ;;  %v2954_v15 = vrot.slane %v7074_v23, 5  ;;  %v273_v40 = vld [vmem:[%s7061_s14 + $0x74] sm:$0x1]  ;;  %v5559_v23 = vld [vmem:[%s7061_s14 + $0x18] sm:$0xe] }
  0x5c   : > { %v492_v16 = vor.u32 %v491_v3, %v487_v2  ;;  %v497_v18 = vrot.slane %v495_v7, 5  ;;  %v500_v26 = vshrl.u32 %v7335_v5, 16  ;;  %v503_v29 = vshll.u32 %v7335_v5, 16 }
  0x5d   : > { %v2373_v30 = vsel %vm7093_vm2, %v2368_v12, %v2372_v56  ;;  %v483_v34 = vrot.slane %v482_v13, 4  ;;  %v2955_v38 = vsel %vm7339_vm5, %v5574_v10, %v2954_v15  ;;  %v2956_v39 = vrot.slane %v2954_v15, 4  ;;  %v5560_v13 = vld [vmem:[%s7061_s14 + $0x24] sm:$0xe] }
  0x5e   : > { %v5541_v42 = vcombine.low %v2363_v11, %v2373_v30  ;;  %v493_v43 = vrot.slane %v492_v16, 4  ;;  %v502_v31 = vrot.slane %v500_v26, 4  ;;  %v505_v44 = vrot.slane %v503_v29, 5  ;;  %v7391_v16 = vld [vmem:[%s7061_s14 + $0x84] sm:$0xf]  ;;  %v6825_v29 = vld [vmem:[%s8854_s1 + $0x188] sm:$0xff]  }
  0x5f   : > { %v488_v49 = vsel %vm7093_vm2, %v483_v34, %v487_v2  ;;  %v2958_v50 = vsel %vm7339_vm5, %v2956_v39, %v2957_v41  ;;  %v509_v52 = vshll.u32 %v7347_v21, 16  ;;  %v513_v53 = vshrl.u32 %v7347_v21, 16 }
  0x60   : > { %6302 = vmatmul.mubr.bf16.gmra.mrb[12].mxu0 %v5541_v42  ;;  %v498_v55 = vsel %vm7093_vm2, %v493_v43, %v497_v18  ;;  %v5606_v48 = vcombine.low %v2955_v38, %v2958_v50  ;;  %v506_v56 = vor.u32 %v505_v44, %v502_v31  ;;  %v519_v57 = vshll.u32 %v273_v40, 16  ;;  %v7399_v40 = vld [vmem:[%s7061_s14 + $0x88] sm:$0xf]  ;;  %v275_v31 = vld [vmem:[%s7061_s14 + $0x8c] sm:$0x1] }
  0x61   : > { %v5302_v59 = vcombine.low %v488_v49, %v498_v55  ;;  %v511_v24 = vrot.slane %v509_v52, 5  ;;  %v515_v61 = vrot.slane %v513_v53, 4  ;;  %v5575_v63 = vrot.slane %v5559_v23, 9 }
  0x62   : > { %6337 = vmatprep.mubr.bf16.mxu0 %v5606_v48  ;;  %v507_v41 = vrot.slane %v506_v56, 4  ;;  %v521_v1 = vrot.slane %v519_v57, 5  ;;  %v2965_v2 = vsel %vm7339_vm5, %v7142_v36, %v2964_v32  ;;  %v524_v3 = vshrl.u32 %v7358_v47, 16 }
  0x63   : > { %6113 = vmatprep.mubr.bf16.mxu1 %v5302_v59  ;;  %v516_v7 = vor.u32 %v515_v61, %v511_v24  ;;  %v2962_v10 = vsel %vm7339_vm5, %v5575_v63, %v2961_v27  ;;  %v527_v11 = vshll.u32 %v7358_v47, 16  ;;  %v533_v12 = vshll.u32 %v7369_v54, 16 }
  0x64   : > { %v512_v8 = vsel %vm7093_vm2, %v507_v41, %v511_v24  ;;  %v5607_v15 = vcombine.low %v2962_v10, %v2965_v2  ;;  %v526_v32 = vrot.slane %v524_v3, 4  ;;  %v537_v36 = vshrl.u32 %v7369_v54, 16  ;;  %v7420_v2 = vld [vmem:[%s7061_s14 + $0x90] sm:$0xf]  ;;  %v7423_v3 = vld [vmem:[%s7061_s14 + $0x94] sm:$0xf] }
  0x65   : > { %v517_v62 = vrot.slane %v516_v7, 4  ;;  %v529_v18 = vrot.slane %v527_v11, 5  ;;  %v535_v26 = vrot.slane %v533_v12, 5  ;;  %v543_v27 = vshll.u32 %v274_v58, 16 }
  0x66   : > { %v539_v30 = vrot.slane %v537_v36, 4  ;;  %v5576_v34 = vrot.slane %v5560_v13, 9  ;;  %v2968_v38 = vrot.slane %v7146_v45, 5  ;;  %v2971_v39 = vrot.slane %v7152_v51, 5  ;;  %v5561_v45 = vld [vmem:[%s7061_s14 + $0x30] sm:$0xe] }
  0x67   : > { %v522_v23 = vsel %vm7093_vm2, %v517_v62, %v521_v1  ;;  %v530_v42 = vor.u32 %v529_v18, %v526_v32  ;;  %v545_v43 = vrot.slane %v543_v27, 5  ;;  %v548_v44 = vshrl.u32 %v7391_v16, 16  ;;  %v276_v62 = vld [vmem:[%s7061_s14 + $0x98] sm:$0x1] }
  0x68   : > { %v5303_v49 = vcombine.low %v512_v8, %v522_v23  ;;  %6338 = vmatmul.mubr.bf16.vlgmr.msra.gmra.mrb[0].mxu0 %v5607_v15  ;;  %v540_v50 = vor.u32 %v539_v30, %v535_v26  ;;  %v2969_v52 = vsel %vm7339_vm5, %v5576_v34, %v2968_v38  ;;  %v2970_v53 = vrot.slane %v2968_v38, 4  ;;  %v6829_v30 = vld [vmem:[%s8854_s1 + $0x198] sm:$0xff]  }
  0x69   : > { %6370 = vmatpush3.bf16.msra.mxu0 %v7282_v6  ;;  %v531_v51 = vrot.slane %v530_v42, 4  ;;  %v550_v55 = vrot.slane %v548_v44, 4  ;;  %v551_v48 = vshll.u32 %v7391_v16, 16  ;;  %v557_v56 = vshll.u32 %v7399_v40, 16  ;;  %v6827_v6 = vld [vmem:[%s8854_s1 + $0x190] sm:$0xff]  }
  0x6a   : > { %6114 = vmatmul.mubr.bf16.gmra.mrb[16].mxu1 %v5303_v49  ;;  %v541_v57 = vrot.slane %v540_v50, 4  ;;  %v2972_v58 = vsel %vm7339_vm5, %v2970_v53, %v2971_v39  ;;  %v561_v59 = vshrl.u32 %v7399_v40, 16  ;;  %v567_v24 = vshll.u32 %v275_v31, 16  ;;  %6371 = vmatprep.subr.bf16.mxu0 %v6825_v29  ;;  %v5562_v38 = vld [vmem:[%s7061_s14 + $0x3c] sm:$0xe] }
  0x6b   : > { %v536_v61 = vsel %vm7093_vm2, %v531_v51, %v535_v26  ;;  %v5608_v63 = vcombine.low %v2969_v52, %v2972_v58  ;;  %v553_v41 = vrot.slane %v551_v48, 5  ;;  %v559_v1 = vrot.slane %v557_v56, 5  ;;  %v7441_v31 = vld [vmem:[%s7061_s14 + $0x9c] sm:$0xf]  ;;  %v7450_v48 = vld [vmem:[%s7061_s14 + $0xa0] sm:$0xf] }
  0x6c   : > { %v546_v7 = vsel %vm7093_vm2, %v541_v57, %v545_v43  ;;  %v563_v10 = vrot.slane %v561_v59, 4  ;;  %v569_v11 = vrot.slane %v567_v24, 5  ;;  %v5577_v12 = vrot.slane %v5561_v45, 9  ;;  %v6833_v56 = vld [vmem:[%s8854_s1 + $0x1a0] sm:$0xff]  }
  0x6d   : > { %v5304_v13 = vcombine.low %v536_v61, %v546_v7  ;;  %6341 = vmatprep.mubr.bf16.mxu0 %v5608_v63  ;;  %v554_v8 = vor.u32 %v553_v41, %v550_v55  ;;  %v2975_v15 = vrot.slane %v7177_v33, 5  ;;  %v2978_v32 = vrot.slane %v7188_v46, 5  ;;  %6372 = vmatpush3.bf16.msra.mxu0 %v6825_v29  ;;  %v277_v61 = vld [vmem:[%s7061_s14 + $0xa4] sm:$0x1] }
  0x6e   : > { %v564_v36 = vor.u32 %v563_v10, %v559_v1  ;;  %v572_v18 = vshrl.u32 %v7420_v2, 16  ;;  %v575_v26 = vshll.u32 %v7420_v2, 16  ;;  %v581_v27 = vshll.u32 %v7423_v3, 16  ;;  %6373 = vmatprep.subr.bf16.mxu0 %v6827_v6 }
  0x6f   : > { %6117 = vmatprep.mubr.bf16.mxu1 %v5304_v13  ;;  %v555_v34 = vrot.slane %v554_v8, 4  ;;  %v2976_v33 = vsel %vm7339_vm5, %v5577_v12, %v2975_v15  ;;  %v2977_v46 = vrot.slane %v2975_v15, 4  ;;  %v585_v29 = vshrl.u32 %v7423_v3, 16  ;;  %v5563_v15 = vld [vmem:[%s7061_s14 + $0x48] sm:$0xe] }
  0x70   : > { %v565_v39 = vrot.slane %v564_v36, 4  ;;  %v574_v23 = vrot.slane %v572_v18, 4  ;;  %v577_v42 = vrot.slane %v575_v26, 5  ;;  %v583_v43 = vrot.slane %v581_v27, 5  ;;  %v7475_v27 = vld [vmem:[%s7061_s14 + $0xa8] sm:$0xf] }
  0x71   : > { %v560_v44 = vsel %vm7093_vm2, %v555_v34, %v559_v1  ;;  %v2979_v49 = vsel %vm7339_vm5, %v2977_v46, %v2978_v32  ;;  %v587_v50 = vrot.slane %v585_v29, 4  ;;  %v591_v52 = vshll.u32 %v276_v62, 16  ;;  %6374 = vmatpush3.bf16.msra.mxu0 %v6827_v6  ;;  %v6837_v32 = vld [vmem:[%s8854_s1 + $0x1a8] sm:$0xff]  }
  0x72   : > { %v570_v53 = vsel %vm7093_vm2, %v565_v39, %v569_v11  ;;  %v5609_v45 = vcombine.low %v2976_v33, %v2979_v49  ;;  %v578_v51 = vor.u32 %v577_v42, %v574_v23  ;;  %v5578_v55 = vrot.slane %v5562_v38, 9  ;;  %6375 = vmatprep.subr.bf16.mxu0 %v6829_v30  ;;  %v7478_v29 = vld [vmem:[%s7061_s14 + $0xac] sm:$0xf] }
  0x73   : > { %v5305_v57 = vcombine.low %v560_v44, %v570_v53  ;;  %v588_v58 = vor.u32 %v587_v50, %v583_v43  ;;  %v593_v59 = vrot.slane %v591_v52, 5  ;;  %v2982_v24 = vrot.slane %v7211_v19, 5  ;;  %v5564_v53 = vld [vmem:[%s7061_s14 + $0x54] sm:$0xe] }
  0x74   : > { %6342 = vmatmul.mubr.bf16.gmra.mrb[4].mxu0 %v5609_v45  ;;  %v579_v6 = vrot.slane %v578_v51, 4  ;;  %v2985_v63 = vrot.slane %v7219_v28, 5  ;;  %v596_v41 = vshrl.u32 %v7441_v31, 16  ;;  %v599_v1 = vshll.u32 %v7441_v31, 16  ;;  %v6841_v45 = vld [vmem:[%s8854_s1 + $0x1b0] sm:$0xff]  }
  0x75   : > { %6118 = vmatmul.mubr.bf16.gmra.mrb[20].mxu1 %v5305_v57  ;;  %v589_v7 = vrot.slane %v588_v58, 4  ;;  %v2983_v10 = vsel %vm7339_vm5, %v5578_v55, %v2982_v24  ;;  %v2984_v11 = vrot.slane %v2982_v24, 4  ;;  %v605_v12 = vshll.u32 %v7450_v48, 16  ;;  %6376 = vmatpush3.bf16.msra.mxu0 %v6829_v30 }
  0x76   : > { %v584_v19 = vsel %vm7093_vm2, %v579_v6, %v583_v43  ;;  %v598_v13 = vrot.slane %v596_v41, 4  ;;  %v601_v28 = vrot.slane %v599_v1, 5  ;;  %v609_v8 = vshrl.u32 %v7450_v48, 16  ;;  %6377 = vmatprep.subr.bf16.mxu0 %v6833_v56  ;;  %v278_v43 = vld [vmem:[%s7061_s14 + $0xb0] sm:$0x1] }
  0x77   : > { %v594_v36 = vsel %vm7093_vm2, %v589_v7, %v593_v59  ;;  %v2986_v62 = vsel %vm7339_vm5, %v2984_v11, %v2985_v63  ;;  %v607_v18 = vrot.slane %v605_v12, 5  ;;  %v615_v26 = vshll.u32 %v277_v61, 16  ;;  %v7498_v41 = vld [vmem:[%s7061_s14 + $0xb4] sm:$0xf]  ;;  %v7503_v12 = vld [vmem:[%s7061_s14 + $0xb8] sm:$0xf] }
  0x78   : > { %v5306_v30 = vcombine.low %v584_v19, %v594_v36  ;;  %v5610_v34 = vcombine.low %v2983_v10, %v2986_v62  ;;  %v602_v33 = vor.u32 %v601_v28, %v598_v13  ;;  %v611_v46 = vrot.slane %v609_v8, 4  ;;  %v279_v19 = vld [vmem:[%s7061_s14 + $0xbc] sm:$0x1] }
  0x79   : > { %v617_v38 = vrot.slane %v615_v26, 5  ;;  %v5579_v39 = vrot.slane %v5563_v15, 9  ;;  %v2989_v23 = vrot.slane %v7246_v14, 5  ;;  %v2992_v42 = vrot.slane %v7252_v22, 5  ;;  %6378 = vmatpush3.bf16.msra.mxu0 %v6833_v56  ;;  %v6845_v13 = vld [vmem:[%s8854_s1 + $0x1b8] sm:$0xff]  }
  0x7a   : > { %6121 = vmatprep.mubr.bf16.mxu1 %v5306_v30  ;;  %6345 = vmatprep.mubr.bf16.mxu0 %v5610_v34  ;;  %v603_v44 = vrot.slane %v602_v33, 4  ;;  %v612_v49 = vor.u32 %v611_v46, %v607_v18  ;;  %v620_v50 = vshrl.u32 %v7475_v27, 16  ;;  %v623_v52 = vshll.u32 %v7475_v27, 16  ;;  %v5565_v30 = vld [vmem:[%s7061_s14 + $0x60] sm:$0xe] }
  0x7b   : > { %v2990_v14 = vsel %vm7339_vm5, %v5579_v39, %v2989_v23  ;;  %v2991_v22 = vrot.slane %v2989_v23, 4  ;;  %v629_v51 = vshll.u32 %v7478_v29, 16  ;;  %v633_v55 = vshrl.u32 %v7478_v29, 16  ;;  %6379 = vmatprep.subr.bf16.mxu0 %v6837_v32  ;;  %v5495_v39 = vld [vmem:[%s7061_s14 + $0x70] sm:$0xf] }
  0x7c   : > { %v608_v56 = vsel %vm7093_vm2, %v603_v44, %v607_v18  ;;  %v613_v57 = vrot.slane %v612_v49, 4  ;;  %v622_v58 = vrot.slane %v620_v50, 4  ;;  %v625_v59 = vrot.slane %v623_v52, 5  ;;  %v7525_v44 = vld [vmem:[%s8854_s1 + $0x1c0] sm:$0xff]  }
  0x7d   : > { %v2993_v24 = vsel %vm7339_vm5, %v2991_v22, %v2992_v42  ;;  %v631_v61 = vrot.slane %v629_v51, 5  ;;  %v635_v6 = vrot.slane %v633_v55, 4  ;;  %v639_v63 = vshll.u32 %v278_v43, 16  ;;  %6380 = vmatpush3.bf16.msra.mxu0 %v6837_v32  ;;  %v5566_v43 = vld [vmem:[%s7061_s14 + $0x6c] sm:$0xe] }
  0x7e   : > { %v618_v1 = vsel %vm7093_vm2, %v613_v57, %v617_v38  ;;  %v5611_v7 = vcombine.low %v2990_v14, %v2993_v24  ;;  %v626_v10 = vor.u32 %v625_v59, %v622_v58  ;;  %v5580_v11 = vrot.slane %v5564_v53, 9  ;;  %6381 = vmatprep.subr.bf16.mxu0 %v6841_v45  ;;  %v5496_v55 = vld [vmem:[%s7061_s14 + $0x74] sm:$0x1]  ;;  %v5567_v24 = vld [vmem:[%s7061_s14 + $0x78] sm:$0xe] }
  0x7f   : > { %v5307_v28 = vcombine.low %v608_v56, %v618_v1  ;;  %v636_v8 = vor.u32 %v635_v6, %v631_v61  ;;  %v641_v15 = vrot.slane %v639_v63, 5  ;;  %v2996_v32 = vrot.slane %v7277_v0, 5 }
  0x80   : > { %6346 = vmatmul.mubr.bf16.gmra.mrb[8].mxu0 %v5611_v7  ;;  %v627_v36 = vrot.slane %v626_v10, 4  ;;  %v2999_v62 = vrot.slane %v7289_v20, 5  ;;  %v644_v18 = vshrl.u32 %v7498_v41, 16  ;;  %v647_v26 = vshll.u32 %v7498_v41, 16 }
  0x81   : > { %6122 = vmatmul.mubr.bf16.gmra.mrb[24].mxu1 %v5307_v28  ;;  %v637_v34 = vrot.slane %v636_v8, 4  ;;  %v2997_v33 = vsel %vm7339_vm5, %v5580_v11, %v2996_v32  ;;  %v2998_v46 = vrot.slane %v2996_v32, 4  ;;  %v653_v38 = vshll.u32 %v7503_v12, 16  ;;  %6382 = vmatpush3.bf16.msra.mxu0 %v6841_v45  ;;  %v7538_v11 = vld [vmem:[%s7061_s14 + $0x7c] sm:$0xf] }
  0x82   : > { %v632_v0 = vsel %vm7093_vm2, %v627_v36, %v631_v61  ;;  %v646_v20 = vrot.slane %v644_v18, 4  ;;  %v649_v23 = vrot.slane %v647_v26, 5  ;;  %v657_v42 = vshrl.u32 %v7503_v12, 16  ;;  %6383 = vmatprep.subr.bf16.mxu0 %v6845_v13  ;;  %v6914_v36 = vld [vmem:[%s7061_s14] sm:$0xf] }
  0x83   : > { %v642_v49 = vsel %vm7093_vm2, %v637_v34, %v641_v15  ;;  %v3000_v50 = vsel %vm7339_vm5, %v2998_v46, %v2999_v62  ;;  %v655_v52 = vrot.slane %v653_v38, 5  ;;  %v663_v53 = vshll.u32 %v279_v19, 16  ;;  %v5501_v15 = vld [vmem:[%s7061_s14 + $0x88] sm:$0xf]  ;;  %v7553_v62 = vld [vmem:[%s7061_s14 + $0x4] sm:$0xf] }
  0x84   : > { %v5308_v45 = vcombine.low %v632_v0, %v642_v49  ;;  %v5612_v14 = vcombine.low %v2997_v33, %v3000_v50  ;;  %v650_v22 = vor.u32 %v649_v23, %v646_v20  ;;  %v659_v51 = vrot.slane %v657_v42, 4  ;;  %v5502_v26 = vld [vmem:[%s7061_s14 + $0x8c] sm:$0x1]  ;;  %v5505_v23 = vld [vmem:[%s7061_s14 + $0x98] sm:$0x1] }
  0x85   : > { %v665_v56 = vrot.slane %v663_v53, 5  ;;  %v5581_v57 = vrot.slane %v5565_v30, 9  ;;  %v3003_v58 = vrot.slane %v7304_v60, 5  ;;  %v3006_v59 = vrot.slane %v7313_v17, 5  ;;  %6384 = vmatpush3.bf16.msra.mxu0 %v6845_v13  ;;  %v7541_v17 = vld [vmem:[%s7061_s14 + $0x80] sm:$0x1] }
  0x86   : > { %6125 = vmatprep.mubr.bf16.mxu1 %v5308_v45  ;;  %6349 = vmatprep.mubr.bf16.mxu0 %v5612_v14  ;;  %v651_v61 = vrot.slane %v650_v22, 4  ;;  %v660_v6 = vor.u32 %v659_v51, %v655_v52  ;;  %v5582_v63 = vrot.slane %v5566_v43, 9  ;;  %v3010_v1 = vrot.slane %v5495_v39, 5  ;;  %v5568_v30 = vld [vmem:[%s7061_s14 + $0x84] sm:$0xe] }
  0x87   : > { %v3004_v7 = vsel %vm7339_vm5, %v5581_v57, %v3003_v58  ;;  %v3005_v10 = vrot.slane %v3003_v58, 4  ;;  %v3013_v60 = vrot.slane %v5496_v55, 5  ;;  %6417 = vmatprep.subr.bf16.mxu0 %v7525_v44  ;;  %v5318_v18 = vcombine.low %v6914_v36, %v7553_v62  ;;  %v5504_v39 = vld [vmem:[%s7061_s14 + $0x94] sm:$0xf]  ;;  %v5569_v42 = vld [vmem:[%s7061_s14 + $0x90] sm:$0xe] }
  0x88   : > { %v656_v19 = vsel %vm7093_vm2, %v651_v61, %v655_v52  ;;  %v661_v13 = vrot.slane %v660_v6, 4  ;;  %v3011_v28 = vsel %vm7339_vm5, %v5582_v63, %v3010_v1  ;;  %v3012_v8 = vrot.slane %v3010_v1, 4  ;;  %v5570_v50 = vld [vmem:[%s7061_s14 + $0x9c] sm:$0xe]  ;;  %v5507_v14 = vld [vmem:[%s7061_s14 + $0xa0] sm:$0xf] }
  0x89   : > { %v3007_v32 = vsel %vm7339_vm5, %v3005_v10, %v3006_v59  ;;  %v5583_v38 = vrot.slane %v5567_v24, 9  ;;  %v3017_v43 = vrot.slane %v7538_v11, 5  ;;  %v3020_v49 = vrot.slane %v7541_v17, 5  ;;  %v5508_v22 = vld [vmem:[%s7061_s14 + $0xa4] sm:$0x1] }
  0x8a   : > { %v666_v34 = vsel %vm7093_vm2, %v661_v13, %v665_v56  ;;  %v5613_v33 = vcombine.low %v3004_v7, %v3007_v32  ;;  %v3014_v46 = vsel %vm7339_vm5, %v3012_v8, %v3013_v60  ;;  %v5584_v52 = vrot.slane %v5568_v30, 9  ;;  %v5510_v59 = vld [vmem:[%s7061_s14 + $0xac] sm:$0xf]  ;;  %v7577_v61 = vld [vmem:[%s7061_s14 + $0x10] sm:$0xf] }
  0x8b   : > { %v5309_v0 = vcombine.low %v656_v19, %v666_v34  ;;  %v5614_v20 = vcombine.low %v3011_v28, %v3014_v46  ;;  %v3024_v53 = vrot.slane %v5501_v15, 5  ;;  %v3027_v45 = vrot.slane %v5502_v26, 5  ;;  %v6916_v24 = vld [vmem:[%s7061_s14 + $0xc] sm:$0xf]  ;;  %v6918_v8 = vld [vmem:[%s7061_s14 + $0x18] sm:$0xf] }
  0x8c   : > { %6350 = vmatmul.mubr.bf16.gmra.mrb[12].mxu0 %v5613_v33  ;;  %v3018_v51 = vsel %vm7339_vm5, %v5583_v38, %v3017_v43  ;;  %v3019_v55 = vrot.slane %v3017_v43, 4  ;;  %v3031_v58 = vrot.slane %v5504_v39, 5  ;;  %v5319_v6 = vcombine.low %v6916_v24, %v7577_v61  ;;  %v6836_v19 = vld [vmem:[%s8854_s1 + $0x88] sm:$0xff]   ;;  %v7589_v15 = vld [vmem:[%s7061_s14 + $0x1c] sm:$0xf] }
  0x8d   : > { %6126 = vmatmul.mubr.bf16.gmra.mrb[28].mxu1 %v5309_v0  ;;  %6353 = vmatprep.mubr.bf16.mxu0 %v5614_v20  ;;  %v3025_v56 = vsel %vm7339_vm5, %v5584_v52, %v3024_v53  ;;  %v3026_v57 = vrot.slane %v3024_v53, 4  ;;  %v5585_v1 = vrot.slane %v5569_v42, 9  ;;  %v3034_v7 = vrot.slane %v5505_v23, 5  ;;  %v5511_v30 = vld [vmem:[%s7061_s14 + $0xb0] sm:$0x1] }
  0x8e   : > { %6145 = vmatprep.mubr.bf16.mxu1 %v5318_v18  ;;  %v3021_v63 = vsel %vm7339_vm5, %v3019_v55, %v3020_v49  ;;  %v3033_v13 = vrot.slane %v3031_v58, 4  ;;  %v5586_v28 = vrot.slane %v5570_v50, 9  ;;  %v5320_v32 = vcombine.low %v6918_v8, %v7589_v15  ;;  %v5571_v34 = vld [vmem:[%s7061_s14 + $0xa8] sm:$0xe]  ;;  %v5513_v33 = vld [vmem:[%s7061_s14 + $0xb8] sm:$0xf] }
  0x8f   : > { %v5615_v10 = vcombine.low %v3018_v51, %v3021_v63  ;;  %v3028_v60 = vsel %vm7339_vm5, %v3026_v57, %v3027_v45  ;;  %v3038_v18 = vrot.slane %v5507_v14, 5  ;;  %v3041_v26 = vrot.slane %v5508_v22, 5  ;;  %v5514_v20 = vld [vmem:[%s7061_s14 + $0xbc] sm:$0x1]  ;;  %v5572_v23 = vld [vmem:[%s7061_s14 + $0xb4] sm:$0xe] }
  0x90   : > { %v5616_v36 = vcombine.low %v3025_v56, %v3028_v60  ;;  %v3045_v38 = vrot.slane %v5510_v59, 5  ;;  %v3032_v39 = vsel %vm7339_vm5, %v5585_v1, %v3031_v58  ;;  %v3035_v0 = vsel %vm7339_vm5, %v3033_v13, %v3034_v7  ;;  %v6840_v50 = vld [vmem:[%s8854_s1 + $0x90] sm:$0xff]   ;;  %v5516_v53 = vld [vmem:[%s7061_s14 + $0xc4] sm:$0xf]  ;;  %v7612_v51 = vld [vmem:[%s7061_s14 + $0x28] sm:$0xf] }
  0x91   : > { %v3040_v46 = vrot.slane %v3038_v18, 4  ;;  %v3039_v42 = vsel %vm7339_vm5, %v5586_v28, %v3038_v18  ;;  %v3052_v49 = vrot.slane %v5513_v33, 5  ;;  %v5587_v52 = vrot.slane %v5571_v34, 9  ;;  %v6920_v22 = vld [vmem:[%s7061_s14 + $0x24] sm:$0xf]  ;;  %v6844_v1 = vld [vmem:[%s8854_s1 + $0x98] sm:$0xff]  }
  0x92   : > { %v5617_v45 = vcombine.low %v3032_v39, %v3035_v0  ;;  %v3047_v14 = vrot.slane %v3045_v38, 4  ;;  %v5321_v55 = vcombine.low %v6920_v22, %v7612_v51  ;;  %v6922_v57 = vld [vmem:[%s7061_s14 + $0x30] sm:$0xf]  ;;  %v7617_v58 = vld [vmem:[%s7061_s14 + $0x34] sm:$0xf]  ;;  %v5588_v24 = vrot.slane %v5572_v23, 9 }
  0x93   : > { %v3042_v43 = vsel %vm7339_vm5, %v3040_v46, %v3041_v26  ;;  %v5322_v59 = vcombine.low %v6922_v57, %v7617_v58  ;;  %v3055_v63 = vrot.slane %v5514_v20, 5  ;;  %v5573_v7 = vld [vmem:[%s7061_s14 + $0xc0] sm:$0xe]  ;;  %v3046_v60 = vsel %vm7339_vm5, %v5587_v52, %v3045_v38  ;;  %v5517_v8 = vld [vmem:[%s7061_s14 + $0xc8] sm:$0x1]  ;;  %v6847_v22 = vld [vmem:[%s7061_s14 + $0x18] sm:$0xff]  }
  0x94   : > { %6354 = vmatmul.mubr.bf16.gmra.mrb[16].mxu0 %v5615_v10  ;;  %v5618_v56 = vcombine.low %v3039_v42, %v3042_v43  ;;  %v3059_v10 = vrot.slane %v5516_v53, 5  ;;  %v3053_v13 = vsel %vm7339_vm5, %v5588_v24, %v3052_v49  ;;  %v5589_v18 = vrot.slane %v5573_v7, 9  ;;  %v6924_v26 = vld [vmem:[%s7061_s14 + $0x3c] sm:$0xf]  ;;  %v6926_v39 = vld [vmem:[%s7061_s14 + $0x48] sm:$0xf] }
  0x95   : > { %6146 = vmatmul.mubr.bf16.vlgmr.msra.gmra.mrb[0].mxu1 %v5319_v6  ;;  %6357 = vmatprep.mubr.bf16.mxu0 %v5616_v36  ;;  %v3054_v6 = vrot.slane %v3052_v49, 4  ;;  %v3062_v38 = vrot.slane %v5517_v8, 5  ;;  %v7643_v0 = vld [vmem:[%s7061_s14 + $0x4c] sm:$0xf]  ;;  %v6861_v49 = vld [vmem:[%s8854_s1 + $0xb0] sm:$0xff]   ;;  %v2412_v52 = vshrl.u32 %v7538_v11, 16 }
  0x96   : > { %6178 = vmatpush3.bf16.msra.mxu1 %v7263_v4  ;;  %6149 = vmatprep.mubr.bf16.mxu1 %v5320_v32  ;;  %v3048_v4 = vrot.slane %v5511_v30, 5  ;;  %v6849_v32 = vld [vmem:[%s8854_s1 + $0xa0] sm:$0xff]   ;;  %v3061_v46 = vrot.slane %v3059_v10, 4  ;;  %v5324_v20 = vcombine.low %v6926_v39, %v7643_v0  ;;  %v6855_v23 = vld [vmem:[%s8854_s1 + $0xa8] sm:$0xff]   ;;  %v3060_v42 = vsel %vm7339_vm5, %v5589_v18, %v3059_v10  ;;  %v6853_v18 = vld [vmem:[%s7061_s14 + $0x30] sm:$0xff]  }
  0x97   : > { %6179 = vmatprep.subr.bf16.mxu1 %v6836_v19  ;;  %v3056_v28 = vsel %vm7339_vm5, %v3054_v6, %v3055_v63  ;;  %v7638_v30 = vld [vmem:[%s7061_s14 + $0x40] sm:$0xf]  ;;  %v7671_v57 = vrot.slane %v2412_v52, 4  ;;  %v6850_v6 = vld [vmem:[%s7061_s14 + $0x24] sm:$0xff]   ;;  %v1322_v7 = vrot.slane %v7577_v61, 5  ;;  %v2418_v8 = vshll.u32 %v7541_v17, 16 }
  0x98   : > { %v5323_v34 = vcombine.low %v6924_v26, %v7638_v30  ;;  %v5620_v33 = vcombine.low %v3053_v13, %v3056_v28  ;;  %v3063_v43 = vsel %vm7339_vm5, %v3061_v46, %v3062_v38  ;;  %v1262_v63 = vld [vmem:[%s7061_s14] sm:$0xe]  ;;  %v1263_v10 = vld [vmem:[%s7061_s14 + $0xc] sm:$0xe]  ;;  %v1329_v13 = vrot.slane %v7589_v15, 5 }
  0x99   : > { %v5621_v53 = vcombine.low %v3060_v42, %v3063_v43  ;;  %v1265_v61 = vld [vmem:[%s7061_s14 + $0x24] sm:$0xe]  ;;  %v5329_v15 = vcombine.low %v7391_v16, %v7399_v40  ;;  %v5330_v26 = vcombine.low %v7420_v2, %v7423_v3  ;;  %v5342_v17 = vrot.slane %v1262_v63, 9  ;;  %v6932_v38 = vld [vmem:[%s7061_s14 + $0x20] sm:$0x1]  ;;  %v6862_v2 = vld [vmem:[%s7061_s14 + $0x54] sm:$0xff]  }
  0x9a   : > { %6180 = vmatpush3.bf16.msra.mxu1 %v6836_v19  ;;  %v3049_v19 = vsel %vm7339_vm5, %v3047_v14, %v3048_v4  ;;  %v7660_v14 = vld [vmem:[%s7061_s14 + $0x58] sm:$0xf]  ;;  %v1331_v46 = vrot.slane %v1329_v13, 4  ;;  %v1332_v39 = vrot.slane %v6932_v38, 5  ;;  %v6933_v43 = vld [vmem:[%s7061_s14 + $0x2c] sm:$0x1] }
  0x9b   : > { %6181 = vmatprep.subr.bf16.mxu1 %v6840_v50  ;;  %v5619_v36 = vcombine.low %v3046_v60, %v3049_v19  ;;  %v7686_v60 = vld [vmem:[%s8854_s1 + $0xc0] sm:$0xff]   ;;  %v1264_v19 = vld [vmem:[%s7061_s14 + $0x18] sm:$0xe]  ;;  %v6936_v38 = vld [vmem:[%s7061_s14 + $0x50] sm:$0x1]  ;;  %v1364_v16 = vrot.slane %v7660_v14, 5 }
  0x9c   : > { %6358 = vmatmul.mubr.bf16.gmra.mrb[20].mxu0 %v5617_v45  ;;  %v6928_v45 = vld [vmem:[%s7061_s14 + $0x54] sm:$0xf]  ;;  %v7809_v40 = vld [vmem:[%s7061_s14 + $0x64] sm:$0xf] }
  0x9d   : > { %6150 = vmatmul.mubr.bf16.gmra.mrb[4].mxu1 %v5321_v55  ;;  %6361 = vmatprep.mubr.bf16.mxu0 %v5618_v56  ;;  %v5325_v4 = vcombine.low %v6928_v45, %v7660_v14  ;;  %v5326_v55 = vcombine.low %v7317_v25, %v7320_v35  ;;  %v6867_v56 = vld [vmem:[%s8854_s1 + $0xb8] sm:$0xff]   ;;  %v6931_v25 = vld [vmem:[%s7061_s14 + $0x14] sm:$0x1]  ;;  %v6865_v3 = vld [vmem:[%s7061_s14 + $0x60] sm:$0xff]  }
  0x9e   : > { %6153 = vmatprep.mubr.bf16.mxu1 %v5322_v59  ;;  %6182 = vmatpush3.bf16.msra.mxu1 %v6840_v50  ;;  %v2408_v50 = vshll.u32 %v7538_v11, 16  ;;  %v7674_v59 = vld [vmem:[%s7061_s14 + $0x8] sm:$0x1]  ;;  %v1325_v35 = vrot.slane %v6931_v25, 5 }
  0x9f   : > { %6183 = vmatprep.subr.bf16.mxu1 %v6844_v1  ;;  %v1318_v24 = vrot.slane %v7674_v59, 5 }
  0xa0   : > { %v7669_v11 = vrot.slane %v2408_v50, 5 }
  0xa2   : > { %6184 = vmatpush3.bf16.msra.mxu1 %v6844_v1  ;;  %v1315_v1 = vrot.slane %v7553_v62, 5  ;;  %v5327_v62 = vcombine.low %v7335_v5, %v7347_v21  ;;  %v5343_v21 = vrot.slane %v1263_v10, 9  ;;  %v5702_v10 = vld [vmem:[%s7061_s14 + $0x18] sm:$0xf] }
  0xa3   : > { %6185 = vmatprep.subr.bf16.mxu1 %v6849_v32 }
  0xa4   : > { %6362 = vmatmul.mubr.bf16.gmra.mrb[24].mxu0 %v5619_v36  ;;  %v5328_v36 = vcombine.low %v7358_v47, %v7369_v54  ;;  %v1317_v5 = vrot.slane %v1315_v1, 4  ;;  %v6857_v47 = vld [vmem:[%s8854_s1 + $0x1c8] sm:$0xff]   ;;  %v5344_v54 = vrot.slane %v1264_v19, 9  ;;  %v7729_v59 = vsel %vm7339_vm5, %v5342_v17, %v1315_v1  ;;  %v5703_v19 = vld [vmem:[%s7061_s14 + $0x1c] sm:$0xf] }
  0xa5   : > { %6154 = vmatmul.mubr.bf16.gmra.mrb[8].mxu1 %v5323_v34  ;;  %6365 = vmatprep.mubr.bf16.mxu0 %v5620_v33  ;;  %v1343_v34 = vrot.slane %v7617_v58, 5  ;;  %v1324_v33 = vrot.slane %v1322_v7, 4  ;;  %v5345_v58 = vrot.slane %v1265_v61, 9  ;;  %v1357_v1 = vrot.slane %v7643_v0, 5  ;;  %v6859_v0 = vld [vmem:[%s7061_s14 + $0x48] sm:$0xff]  }
  0xa6   : > { %6157 = vmatprep.mubr.bf16.mxu1 %v5324_v20  ;;  %6186 = vmatpush3.bf16.msra.mxu1 %v6849_v32  ;;  %v1336_v32 = vrot.slane %v7612_v51, 5  ;;  %v1266_v51 = vld [vmem:[%s7061_s14 + $0x30] sm:$0xe]  ;;  %v5331_v20 = vcombine.low %v7441_v31, %v7450_v48  ;;  %v7737_v25 = vsel %vm7339_vm5, %v1317_v5, %v1318_v24  ;;  %v7745_v63 = vsel %vm7339_vm5, %v5344_v54, %v1329_v13  ;;  %v1268_v13 = vld [vmem:[%s7061_s14 + $0x48] sm:$0xe] }
  0xa7   : > { %6187 = vmatprep.subr.bf16.mxu1 %v6855_v23  ;;  %v5346_v50 = vrot.slane %v1266_v51, 9  ;;  %v1345_v52 = vrot.slane %v1343_v34, 4  ;;  %v3822_v5 = vshrl.u32 %v5702_v10, 16  ;;  %v3835_v51 = vshrl.u32 %v5703_v19, 16  ;;  %v6868_v48 = vld [vmem:[%s7061_s14 + $0x6c] sm:$0xff]  }
  0xa8   : > { %v1338_v42 = vrot.slane %v1336_v32, 4  ;;  %v7757_v24 = vsel %vm7339_vm5, %v5345_v58, %v1336_v32  ;;  %v6935_v32 = vld [vmem:[%s7061_s14 + $0x44] sm:$0x1]  ;;  %v5348_v54 = vrot.slane %v1268_v13, 9  ;;  %v5706_v13 = vld [vmem:[%s7061_s14 + $0x28] sm:$0xf] }
  0xa9   : > { %v7767_v61 = vsel %vm7339_vm5, %v5346_v50, %v1343_v34  ;;  %v1353_v17 = vrot.slane %v6935_v32, 5  ;;  %v5704_v50 = vld [vmem:[%s7061_s14 + $0x20] sm:$0x1]  ;;  %v1270_v32 = vld [vmem:[%s7061_s14 + $0x60] sm:$0xe] }
  0xaa   : > { %6188 = vmatpush3.bf16.msra.mxu1 %v6855_v23  ;;  %v5332_v23 = vcombine.low %v7475_v27, %v7478_v29 }
  0xab   : > { %6189 = vmatprep.subr.bf16.mxu1 %v6861_v49 }
  0xac   : > { %6366 = vmatmul.mubr.bf16.gmra.mrb[28].mxu0 %v5621_v53  ;;  %v6934_v53 = vld [vmem:[%s7061_s14 + $0x38] sm:$0x1] }
  0xad   : > { %6158 = vmatmul.mubr.bf16.gmra.mrb[12].mxu1 %v5325_v4  ;;  %6385 = vmatprep.mubr.bf16.mxu0 %v6847_v22  ;;  %v1346_v45 = vrot.slane %v6934_v53, 5  ;;  %v1267_v4 = vld [vmem:[%s7061_s14 + $0x3c] sm:$0xe]  ;;  %v1350_v22 = vrot.slane %v7638_v30, 5  ;;  %v7733_v30 = vsel %vm7339_vm5, %v5343_v21, %v1322_v7  ;;  %v3825_v21 = vshll.u32 %v5702_v10, 16  ;;  %v6873_v53 = vld [vmem:[%s8854_s1 + $0x1e0] sm:$0xff]  }
  0xae   : > { %6161 = vmatprep.mubr.bf16.mxu1 %v5326_v55  ;;  %6190 = vmatpush3.bf16.msra.mxu1 %v6861_v49  ;;  %v1339_v49 = vrot.slane %v6933_v43, 5  ;;  %v7720_v55 = vrot.slane %v2418_v8, 5  ;;  %v6856_v7 = vld [vmem:[%s7061_s14 + $0x3c] sm:$0xff]   ;;  %v7753_v8 = vsel %vm7339_vm5, %v1331_v46, %v1332_v39  ;;  %v1359_v46 = vrot.slane %v1357_v1, 4  ;;  %v5708_v43 = vld [vmem:[%s7061_s14 + $0x30] sm:$0xf] }
  0xaf   : > { %6191 = vmatprep.subr.bf16.mxu1 %v6867_v56  ;;  %v1360_v39 = vrot.slane %v6936_v38, 5  ;;  %v3824_v10 = vrot.slane %v3822_v5, 4 }
  0xb0   : > { %8876 = vst [vmem:[#allocation2_spill] sm:$0xff] %v7720_v55 }
  0xb2   : > { %6192 = vmatpush3.bf16.msra.mxu1 %v6867_v56  ;;  %v6863_v56 = vld [vmem:[%s8854_s1 + $0x1d0] sm:$0xff]  }
  0xb3   : > { %6225 = vmatprep.subr.bf16.mxu1 %v7686_v60 }
  0xb4   : > { %6386 = vmatmul.mubr.bf16.vlgmr.msra.gmra.mrb[0].mxu0 %v6850_v6  ;;  %v7741_v6 = vsel %vm7339_vm5, %v1324_v33, %v1325_v35  ;;  %v7761_v35 = vsel %vm7339_vm5, %v1338_v42, %v1339_v49  ;;  %v3831_v33 = vshll.u32 %v5703_v19, 16  ;;  %v3827_v19 = vrot.slane %v3825_v21, 5  ;;  %v1271_v21 = vld [vmem:[%s7061_s14 + $0x6c] sm:$0xe] }
  0xb5   : > { %6162 = vmatmul.mubr.bf16.gmra.mrb[16].mxu1 %v5327_v62  ;;  %6418 = vmatpush3.bf16.msra.mxu0 %v7525_v44  ;;  %v5347_v62 = vrot.slane %v1267_v4, 9  ;;  %v5351_v58 = vrot.slane %v1271_v21, 9 }
  0xb6   : > { %6165 = vmatprep.mubr.bf16.mxu1 %v5328_v36  ;;  %6389 = vmatprep.mubr.bf16.mxu0 %v6853_v18  ;;  %v7771_v36 = vsel %vm7339_vm5, %v1345_v52, %v1346_v45  ;;  %v1352_v18 = vrot.slane %v1350_v22, 4  ;;  %v5705_v52 = vld [vmem:[%s7061_s14 + $0x24] sm:$0xf]  ;;  %v3859_v45 = vshrl.u32 %v5706_v13, 16 }
  0xb7   : > { %6419 = vmatprep.subr.bf16.mxu0 %v6857_v47  ;;  %v7788_v49 = vsel %vm7339_vm5, %v5347_v62, %v1350_v22  ;;  %v7805_v22 = vld [vmem:[%s7061_s14 + $0x54] sm:$0xe]  ;;  %v3837_v62 = vrot.slane %v3835_v51, 4  ;;  %v3846_v38 = vshrl.u32 %v5705_v52, 16  ;;  %v3849_v28 = vshll.u32 %v5705_v52, 16 }
  0xb8   : > { %v7802_v4 = vsel %vm7339_vm5, %v1352_v18, %v1353_v17  ;;  %v3841_v17 = vshll.u32 %v5704_v50, 16  ;;  %v5349_v5 = vrot.slane %v7805_v22, 9  ;;  %v6877_v50 = vld [vmem:[%s8854_s1 + $0x1e8] sm:$0xff]   ;;  %v1366_v52 = vrot.slane %v1364_v16, 4 }
  0xb9   : > { %6420 = vmatpush3.bf16.msra.mxu0 %v6857_v47  ;;  %v6869_v47 = vld [vmem:[%s8854_s1 + $0x1d8] sm:$0xff]   ;;  %v3828_v22 = vor.u32 %v3827_v19, %v3824_v10  ;;  %v3848_v34 = vrot.slane %v3846_v38, 4  ;;  %v3851_v44 = vrot.slane %v3849_v28, 5  ;;  %v6941_v10 = vld [vmem:[%s7061_s14 + $0x74] sm:$0x1]  ;;  %v3861_v28 = vrot.slane %v3859_v45, 4 }
  0xba   : > { %6421 = vmatprep.subr.bf16.mxu0 %v6863_v56  ;;  %v7843_v42 = vrot.slane %v3841_v17, 5  ;;  %v1381_v19 = vrot.slane %v6941_v10, 5  ;;  %v3870_v38 = vshrl.u32 %v5708_v43, 16  ;;  %v7868_v27 = vsel %vm7339_vm5, %v5349_v5, %v1364_v16 }
  0xbb   : > { %v3829_v21 = vrot.slane %v3828_v22, 4 }
  0xbc   : > { %6390 = vmatmul.mubr.bf16.gmra.mrb[4].mxu0 %v6856_v7  ;;  %v7815_v7 = vrot.slane %v3831_v33, 5  ;;  %v6939_v33 = vld [vmem:[%s7061_s14 + $0x70] sm:$0xf] }
  0xbd   : > { %6166 = vmatmul.mubr.bf16.gmra.mrb[20].mxu1 %v5329_v15  ;;  %6393 = vmatprep.mubr.bf16.mxu0 %v6859_v0  ;;  %v1371_v15 = vrot.slane %v7809_v40, 5  ;;  %v6938_v0 = vld [vmem:[%s7061_s14 + $0x5c] sm:$0x1]  ;;  %v1378_v51 = vrot.slane %v6939_v33, 5 }
  0xbe   : > { %6169 = vmatprep.mubr.bf16.mxu1 %v5330_v26  ;;  %6422 = vmatpush3.bf16.msra.mxu0 %v6863_v56  ;;  %v1367_v18 = vrot.slane %v6938_v0, 5  ;;  %v7824_v26 = vsel %vm7339_vm5, %v5348_v54, %v1357_v1  ;;  %v7828_v56 = vsel %vm7339_vm5, %v1359_v46, %v1360_v39  ;;  %v6940_v1 = vld [vmem:[%s7061_s14 + $0x68] sm:$0x1]  ;;  %v3855_v0 = vshll.u32 %v5706_v13, 16  ;;  %v6885_v40 = vld [vmem:[%s8854_s1 + $0x1f8] sm:$0xff]  }
  0xbf   : > { %6423 = vmatprep.subr.bf16.mxu0 %v6869_v47  ;;  %v1374_v54 = vrot.slane %v6940_v1, 5  ;;  %v5350_v46 = vrot.slane %v1270_v32, 9  ;;  %v1373_v39 = vrot.slane %v1371_v15, 4  ;;  %v3838_v33 = vor.u32 %v3837_v62, %v7815_v7  ;;  %v5709_v1 = vld [vmem:[%s7061_s14 + $0x34] sm:$0xf] }
  0xc0   : > { %v1380_v32 = vrot.slane %v1378_v51, 4  ;;  %v5707_v62 = vld [vmem:[%s7061_s14 + $0x2c] sm:$0x1]  ;;  %v7855_v17 = vrot.slane %v3855_v0, 5  ;;  %v3879_v13 = vshll.u32 %v5709_v1, 16  ;;  %v3883_v31 = vshrl.u32 %v5709_v1, 16 }
  0xc1   : > { %v3839_v10 = vrot.slane %v3838_v33, 4  ;;  %v7872_v29 = vsel %vm7339_vm5, %v1366_v52, %v1367_v18  ;;  %v7879_v45 = vsel %vm7339_vm5, %v5350_v46, %v1371_v15  ;;  %v7883_v14 = vsel %vm7339_vm5, %v1373_v39, %v1374_v54  ;;  %v1272_v18 = vld [vmem:[%s7061_s14 + $0x78] sm:$0xe] }
  0xc2   : > { %6424 = vmatpush3.bf16.msra.mxu0 %v6869_v47  ;;  %v7887_v16 = vsel %vm7339_vm5, %v5351_v58, %v1378_v51  ;;  %v7897_v15 = vsel %vm7339_vm5, %v1380_v32, %v1381_v19  ;;  %v3862_v5 = vor.u32 %v3861_v28, %v7855_v17  ;;  %v3872_v52 = vrot.slane %v3870_v38, 4  ;;  %v5711_v58 = vld [vmem:[%s7061_s14 + $0x3c] sm:$0xf]  ;;  %v5712_v51 = vld [vmem:[%s7061_s14 + $0x40] sm:$0xf] }
  0xc3   : > { %6425 = vmatprep.subr.bf16.mxu0 %v6873_v53  ;;  %v3834_v0 = vsel %vm7093_vm2, %v3829_v21, %v7815_v7  ;;  %v3844_v46 = vsel %vm7093_vm2, %v3839_v10, %v7843_v42  ;;  %v7908_v39 = vrot.slane %v3879_v13, 5  ;;  %v3885_v22 = vrot.slane %v3883_v31, 4  ;;  %v6943_v19 = vld [vmem:[%s7061_s14 + $0x80] sm:$0x1]  ;;  %v8067_v47 = vld [vmem:[%s7061_s14 + $0x68] sm:$0x1] }
  0xc4   : > { %6394 = vmatmul.mubr.bf16.gmra.mrb[8].mxu0 %v6862_v2  ;;  %v3873_v2 = vshll.u32 %v5708_v43, 16  ;;  %v3865_v43 = vshll.u32 %v5707_v62, 16  ;;  %v5352_v32 = vrot.slane %v1272_v18, 9  ;;  %v1273_v62 = vld [vmem:[%s7061_s14 + $0x84] sm:$0xe]  ;;  %v3894_v28 = vshrl.u32 %v5711_v58, 16 }
  0xc5   : > { %6170 = vmatmul.mubr.bf16.gmra.mrb[24].mxu1 %v5331_v20  ;;  %6397 = vmatprep.mubr.bf16.mxu0 %v6865_v3  ;;  %v6881_v20 = vld [vmem:[%s8854_s1 + $0x1f0] sm:$0xff]   ;;  %v6942_v3 = vld [vmem:[%s7061_s14 + $0x7c] sm:$0xf]  ;;  %v3897_v7 = vshll.u32 %v5711_v58, 16  ;;  %v3903_v38 = vshll.u32 %v5712_v51, 16  ;;  %v8877_v42 = vcombine.low %v7498_v41, %v7503_v12  ;;  %v7919_v13 = vrot.slane %v3862_v5, 4 }
  0xc6   : > { %6173 = vmatprep.mubr.bf16.mxu1 %v5332_v23  ;;  %6426 = vmatpush3.bf16.msra.mxu0 %v6873_v53  ;;  %v3852_v23 = vor.u32 %v3851_v44, %v3848_v34  ;;  %v6870_v53 = vld [vmem:[%s7061_s14 + $0x78] sm:$0xff]   ;;  %v1385_v44 = vrot.slane %v6942_v3, 5  ;;  %v3875_v54 = vrot.slane %v3873_v2, 5  ;;  %v7912_v1 = vrot.slane %v3865_v43, 5  ;;  %v7924_v21 = vld [vmem:[%s8854_s1 + $0x200] sm:$0xff]   ;;  %8885 = vst [vmem:[#allocation5_spill] sm:$0xff] %v8067_v47 }
  0xc7   : > { %6427 = vmatprep.subr.bf16.mxu0 %v6877_v50  ;;  %v5710_v34 = vld [vmem:[%s7061_s14 + $0x38] sm:$0x1]  ;;  %v3907_v2 = vshrl.u32 %v5712_v51, 16  ;;  %v6872_v43 = vld [vmem:[%s7061_s14 + $0x84] sm:$0xff]   ;;  %v3886_v12 = vor.u32 %v3885_v22, %v7908_v39  ;;  %v3899_v58 = vrot.slane %v3897_v7, 5  ;;  %v7946_v51 = vrot.slane %v3903_v38, 5 }
  0xc8   : > { %v7910_v33 = vrot.slane %v3852_v23, 4  ;;  %v1387_v10 = vrot.slane %v1385_v44, 4  ;;  %v3876_v31 = vor.u32 %v3875_v54, %v3872_v52  ;;  %v8878_v23 = vcombine.low %v7729_v59, %v7737_v25  ;;  %v6944_v18 = vld [vmem:[%s7061_s14 + $0x88] sm:$0xf]  ;;  %v5713_v5 = vld [vmem:[%s7061_s14 + $0x44] sm:$0x1] }
  0xc9   : > { %v1392_v3 = vrot.slane %v6944_v18, 5  ;;  %v7937_v59 = vcombine.low %v3834_v0, %v3844_v46  ;;  %v5714_v52 = vld [vmem:[%s7061_s14 + $0x48] sm:$0xf]  ;;  %v3896_v54 = vrot.slane %v3894_v28, 4  ;;  %v3909_v22 = vrot.slane %v3907_v2, 4 }
  0xca   : > { %6428 = vmatpush3.bf16.msra.mxu0 %v6877_v50  ;;  %v1388_v50 = vrot.slane %v6943_v19, 5  ;;  %v6874_v19 = vld [vmem:[%s7061_s14 + $0x90] sm:$0xff]   ;;  %v3858_v0 = vsel %vm7093_vm2, %v7910_v33, %v7855_v17  ;;  %v3877_v46 = vrot.slane %v3876_v31, 4  ;;  %v3868_v28 = vsel %vm7093_vm2, %v7919_v13, %v7912_v1  ;;  %v7968_v33 = vld [vmem:[%s7061_s14 + $0x58] sm:$0xf]  ;;  %v6875_v31 = vld [vmem:[%s8854_s1 + $0xc8] sm:$0xff]  }
  0xcb   : > { %6429 = vmatprep.subr.bf16.mxu0 %v6881_v20  ;;  %v3887_v38 = vrot.slane %v3886_v12, 4  ;;  %v1394_v2 = vrot.slane %v1392_v3, 4  ;;  %v5717_v17 = vld [vmem:[%s7061_s14 + $0x54] sm:$0xf]  ;;  %v3913_v1 = vshll.u32 %v5713_v5, 16  ;;  %v3918_v13 = vshrl.u32 %v5714_v52, 16 }
  0xcc   : > { %6398 = vmatmul.mubr.bf16.gmra.mrb[12].mxu0 %v6868_v48  ;;  %v3889_v48 = vshll.u32 %v5710_v34, 16  ;;  %v7964_v7 = vsel %vm7339_vm5, %v1387_v10, %v1388_v50  ;;  %v3921_v50 = vshll.u32 %v5714_v52, 16  ;;  %v3900_v10 = vor.u32 %v3899_v58, %v3896_v54  ;;  %v6876_v54 = vld [vmem:[%s7061_s14 + $0x9c] sm:$0xff]   ;;  %v6950_v41 = vld [vmem:[%s7061_s14 + $0xac] sm:$0xf] }
  0xcd   : > { %6174 = vmatmul.mubr.bf16.gmra.mrb[28].mxu1 %v8877_v42  ;;  %6401 = vmatprep.mubr.bf16.mxu0 %v6870_v53  ;;  %v5353_v53 = vrot.slane %v1273_v62, 9  ;;  %v6945_v42 = vld [vmem:[%s7061_s14 + $0x8c] sm:$0x1]  ;;  %v3951_v5 = vshll.u32 %v7968_v33, 16  ;;  %v8880_v52 = vcombine.low %v7745_v63, %v7753_v8  ;;  %v8004_v63 = vld [vmem:[%s7061_s14 + $0x50] sm:$0x1] }
  0xce   : > { %6193 = vmatprep.mubr.bf16.mxu1 %v8878_v23  ;;  %6430 = vmatpush3.bf16.msra.mxu0 %v6881_v20  ;;  %v7943_v20 = vsel %vm7339_vm5, %v5352_v32, %v1385_v44  ;;  %v3891_v62 = vrot.slane %v3889_v48, 5  ;;  %v1395_v23 = vrot.slane %v6945_v42, 5  ;;  %v1274_v44 = vld [vmem:[%s7061_s14 + $0x90] sm:$0xe]  ;;  %v7956_v32 = vld [vmem:[%s7061_s14 + $0x4c] sm:$0xf]  ;;  %v3910_v48 = vor.u32 %v3909_v22, %v7946_v51 }
  0xcf   : > { %6431 = vmatprep.subr.bf16.mxu0 %v6885_v40  ;;  %v3927_v12 = vshll.u32 %v7956_v32, 16  ;;  %v3931_v18 = vshrl.u32 %v7956_v32, 16  ;;  %v8879_v42 = vcombine.low %v7733_v30, %v7741_v6  ;;  %v6879_v30 = vld [vmem:[%s8854_s1 + $0xd0] sm:$0xff]   ;;  %v3882_v6 = vsel %vm7093_vm2, %v3877_v46, %v7908_v39  ;;  %v6878_v8 = vld [vmem:[%s7061_s14 + $0xa8] sm:$0xff]   ;;  %v8011_v39 = vld [vmem:[%s7061_s14 + $0x5c] sm:$0x1] }
  0xd0   : > { %v3892_v58 = vsel %vm7093_vm2, %v3887_v38, %v3891_v62  ;;  %v5354_v22 = vrot.slane %v1274_v44, 9  ;;  %v3923_v25 = vrot.slane %v3921_v50, 5  ;;  %8881 = vst [vmem:[#allocation3_spill] sm:$0xff] %v8011_v39  ;;  %v3901_v46 = vrot.slane %v3900_v10, 4 }
  0xd1   : > { %v3911_v62 = vrot.slane %v3910_v48, 4  ;;  %v8013_v38 = vrot.slane %v3927_v12, 5  ;;  %v8015_v34 = vrot.slane %v3951_v5, 5  ;;  %v8020_v50 = vcombine.low %v3858_v0, %v3868_v28  ;;  %v5720_v28 = vld [vmem:[%s7061_s14 + $0x60] sm:$0xf] }
  0xd2   : > { %6432 = vmatpush3.bf16.msra.mxu0 %v6885_v40  ;;  %v7976_v40 = vsel %vm7339_vm5, %v5353_v53, %v1392_v3  ;;  %v3942_v53 = vshrl.u32 %v5717_v17, 16  ;;  %v3945_v3 = vshll.u32 %v5717_v17, 16  ;;  %v6946_v17 = vld [vmem:[%s7061_s14 + $0x94] sm:$0xf]  ;;  %v8024_v48 = vcombine.low %v3882_v6, %v3892_v58 }
  0xd3   : > { %6465 = vmatprep.subr.bf16.mxu0 %v7924_v21  ;;  %v3937_v0 = vshll.u32 %v8004_v63, 16  ;;  %v3906_v6 = vsel %vm7093_vm2, %v3901_v46, %v7946_v51  ;;  %v8884_v46 = vcombine.low %v7767_v61, %v7771_v36 }
  0xd4   : > { %6402 = vmatmul.mubr.bf16.gmra.mrb[16].mxu0 %v6872_v43  ;;  %v3955_v43 = vshrl.u32 %v7968_v33, 16  ;;  %v3944_v44 = vrot.slane %v3942_v53, 4  ;;  %v6947_v53 = vld [vmem:[%s7061_s14 + $0x98] sm:$0x1] }
  0xd5   : > { %6194 = vmatmul.mubr.bf16.vlgmr.msra.gmra.mrb[0].mxu1 %v8879_v42  ;;  %6405 = vmatprep.mubr.bf16.mxu0 %v6874_v19  ;;  %v8007_v19 = vrot.slane %v3913_v1, 5  ;;  %v1399_v42 = vrot.slane %v6946_v17, 5  ;;  %v6948_v17 = vld [vmem:[%s7061_s14 + $0xa0] sm:$0xf]  ;;  %v3939_v36 = vrot.slane %v3937_v0, 5 }
  0xd6   : > { %6226 = vmatpush3.bf16.msra.mxu1 %v7686_v60  ;;  %6197 = vmatprep.mubr.bf16.mxu1 %v8880_v52  ;;  %v8001_v60 = vsel %vm7339_vm5, %v1394_v2, %v1395_v23  ;;  %v3920_v52 = vrot.slane %v3918_v13, 4  ;;  %v3933_v23 = vrot.slane %v3931_v18, 4  ;;  %v3947_v2 = vrot.slane %v3945_v3, 5  ;;  %v6883_v13 = vld [vmem:[%s8854_s1 + $0xd8] sm:$0xff]  }
  0xd7   : > { %6227 = vmatprep.subr.bf16.mxu1 %v6875_v31  ;;  %v3957_v1 = vrot.slane %v3955_v43, 4  ;;  %v1275_v18 = vld [vmem:[%s7061_s14 + $0x9c] sm:$0xe]  ;;  %v1402_v3 = vrot.slane %v6947_v53, 5  ;;  %v8037_v43 = vld [vmem:[%s7061_s14 + $0x64] sm:$0xf] }
  0xd8   : > { %v3924_v5 = vor.u32 %v3923_v25, %v3920_v52  ;;  %8882 = vst [vmem:[#allocation4_spill] sm:$0xff] %v8037_v43  ;;  %v3934_v58 = vor.u32 %v3933_v23, %v8013_v38  ;;  %v1406_v12 = vrot.slane %v6948_v17, 5  ;;  %v8883_v25 = vcombine.low %v7757_v24, %v7761_v35  ;;  %v6880_v23 = vld [vmem:[%s7061_s14 + $0xb4] sm:$0xff]   ;;  %v6886_v24 = vld [vmem:[%s8854_s1 + $0xe0] sm:$0xff]   ;;  %v5723_v17 = vld [vmem:[%s7061_s14 + $0x6c] sm:$0xf] }
  0xd9   : > { %v1401_v52 = vrot.slane %v1399_v42, 4  ;;  %v3948_v53 = vor.u32 %v3947_v2, %v3944_v44  ;;  %v3958_v51 = vor.u32 %v3957_v1, %v8015_v34  ;;  %v3966_v35 = vshrl.u32 %v5720_v28, 16  ;;  %v6949_v2 = vld [vmem:[%s7061_s14 + $0xa4] sm:$0x1] }
  0xda   : > { %6228 = vmatpush3.bf16.msra.mxu1 %v6875_v31  ;;  %v8031_v31 = vsel %vm7339_vm5, %v5354_v22, %v1399_v42  ;;  %v3961_v22 = vshll.u32 %v8011_v39, 16  ;;  %v3979_v42 = vshrl.u32 %v8037_v43, 16  ;;  %v3925_v61 = vrot.slane %v3924_v5, 4  ;;  %v8206_v39 = vld [vmem:[%s7061_s14 + $0x98] sm:$0x1] }
  0xdb   : > { %6229 = vmatprep.subr.bf16.mxu1 %v6879_v30  ;;  %v5355_v44 = vrot.slane %v1275_v18, 9  ;;  %v1409_v1 = vrot.slane %v6949_v2, 5  ;;  %v3949_v5 = vrot.slane %v3948_v53, 4  ;;  %v3959_v18 = vrot.slane %v3958_v51, 4  ;;  %8898 = vst [vmem:[#allocation14_spill] sm:$0xff] %v8206_v39 }
  0xdc   : > { %6406 = vmatmul.mubr.bf16.gmra.mrb[20].mxu0 %v6876_v54  ;;  %v3916_v54 = vsel %vm7093_vm2, %v3911_v62, %v8007_v19  ;;  %v3975_v19 = vshll.u32 %v8037_v43, 16  ;;  %v6882_v62 = vld [vmem:[%s7061_s14 + $0xc0] sm:$0xff]   ;;  %v3963_v10 = vrot.slane %v3961_v22, 5  ;;  %v8073_v43 = vsel %vm7339_vm5, %v1401_v52, %v1402_v3 }
  0xdd   : > { %6198 = vmatmul.mubr.bf16.gmra.mrb[4].mxu1 %v8883_v25  ;;  %6409 = vmatprep.mubr.bf16.mxu0 %v6878_v8  ;;  %v3969_v8 = vshll.u32 %v5720_v28, 16  ;;  %v3935_v25 = vrot.slane %v3934_v58, 4  ;;  %v1413_v28 = vrot.slane %v6950_v41, 5  ;;  %v8069_v55 = vcombine.low %v3906_v6, %v3916_v54  ;;  %v6888_v41 = vld [vmem:[%s8854_s1 + $0xe8] sm:$0xff]  }
  0xde   : > { %6201 = vmatprep.mubr.bf16.mxu1 %v8884_v46  ;;  %6230 = vmatpush3.bf16.msra.mxu1 %v6879_v30  ;;  %v1276_v30 = vld [vmem:[%s7061_s14 + $0xa8] sm:$0xe]  ;;  %v1408_v46 = vrot.slane %v1406_v12, 4  ;;  %v3968_v0 = vrot.slane %v3966_v35, 4  ;;  %v8075_v58 = vrot.slane %v3975_v19, 5  ;;  %v3981_v22 = vrot.slane %v3979_v42, 4 }
  0xdf   : > { %6231 = vmatprep.subr.bf16.mxu1 %v6883_v13  ;;  %v3971_v2 = vrot.slane %v3969_v8, 5  ;;  %v3930_v3 = vsel %vm7093_vm2, %v3925_v61, %v8013_v38  ;;  %v8085_v6 = vsel %vm7339_vm5, %v5355_v44, %v1406_v12  ;;  %v3990_v54 = vshrl.u32 %v5723_v17, 16  ;;  %v6951_v38 = vld [vmem:[%s7061_s14 + $0xb0] sm:$0x1]  ;;  %v1277_v19 = vld [vmem:[%s7061_s14 + $0xb4] sm:$0xe] }
  0xe0   : > { %v3993_v52 = vshll.u32 %v5723_v17, 16  ;;  %v3940_v53 = vsel %vm7093_vm2, %v3935_v25, %v3939_v36  ;;  %v8094_v51 = vsel %vm7339_vm5, %v1408_v46, %v1409_v1  ;;  %v5356_v35 = vrot.slane %v1276_v30, 9  ;;  %v8116_v30 = vld [vmem:[%s7061_s14 + $0x74] sm:$0x1]  ;;  %v6952_v25 = vld [vmem:[%s7061_s14 + $0xb8] sm:$0xf] }
  0xe1   : > { %v1416_v8 = vrot.slane %v6951_v38, 5  ;;  %v8887_v12 = vcombine.low %v7788_v49, %v7802_v4  ;;  %v3954_v42 = vsel %vm7093_vm2, %v3949_v5, %v8015_v34  ;;  %v3964_v61 = vsel %vm7093_vm2, %v3959_v18, %v3963_v10  ;;  %v6884_v4 = vld [vmem:[%s7061_s14 + $0xcc] sm:$0xff]   ;;  %8889 = vst [vmem:[#allocation7_spill] sm:$0xff] %v8116_v30  ;;  %v5729_v38 = vld [vmem:[%s7061_s14 + $0x84] sm:$0xf] }
  0xe2   : > { %6232 = vmatpush3.bf16.msra.mxu1 %v6883_v13  ;;  %v8088_v13 = vld [vmem:[%s7061_s14 + $0x70] sm:$0xf]  ;;  %v1415_v36 = vrot.slane %v1413_v28, 4  ;;  %v3985_v44 = vshll.u32 %v8067_v47, 16  ;;  %v8888_v49 = vcombine.low %v7824_v26, %v7828_v56  ;;  %v3982_v1 = vor.u32 %v3981_v22, %v8075_v58  ;;  %v8133_v22 = vld [vmem:[%s7061_s14 + $0x7c] sm:$0xf] }
  0xe3   : > { %6233 = vmatprep.subr.bf16.mxu1 %v6886_v24  ;;  %8886 = vst [vmem:[#allocation6_spill] sm:$0xff] %v8088_v13  ;;  %v3999_v34 = vshll.u32 %v8088_v13, 16  ;;  %v4003_v10 = vshrl.u32 %v8088_v13, 16  ;;  %v5357_v17 = vrot.slane %v1277_v19, 9  ;;  %v1420_v46 = vrot.slane %v6952_v25, 5  ;;  %8890 = vst [vmem:[#allocation8_spill] sm:$0xff] %v8133_v22 }
  0xe4   : > { %6410 = vmatmul.mubr.bf16.gmra.mrb[24].mxu0 %v6880_v23  ;;  %v6890_v23 = vld [vmem:[%s8854_s1 + $0xf0] sm:$0xff]   ;;  %v3992_v26 = vrot.slane %v3990_v54, 4  ;;  %v3995_v56 = vrot.slane %v3993_v52, 5  ;;  %v8124_v18 = vcombine.low %v3930_v3, %v3940_v53  ;;  %v8136_v19 = vcombine.low %v3954_v42, %v3964_v61  ;;  %v6953_v3 = vld [vmem:[%s7061_s14 + $0xbc] sm:$0x1] }
  0xe5   : > { %6202 = vmatmul.mubr.bf16.gmra.mrb[8].mxu1 %v8887_v12  ;;  %6413 = vmatprep.mubr.bf16.mxu0 %v6882_v62  ;;  %v3972_v62 = vor.u32 %v3971_v2, %v3968_v0  ;;  %v8130_v2 = vsel %vm7339_vm5, %v5356_v35, %v1413_v28  ;;  %v8140_v54 = vsel %vm7339_vm5, %v1415_v36, %v1416_v8  ;;  %v8142_v52 = vrot.slane %v3985_v44, 5  ;;  %v6892_v12 = vld [vmem:[%s8854_s1 + $0xf8] sm:$0xff]   ;;  %v8149_v28 = vld [vmem:[%s7061_s14 + $0x88] sm:$0xf] }
  0xe6   : > { %6205 = vmatprep.mubr.bf16.mxu1 %v8888_v49  ;;  %6234 = vmatpush3.bf16.msra.mxu1 %v6886_v24  ;;  %v5726_v24 = vld [vmem:[%s7061_s14 + $0x78] sm:$0xf]  ;;  %v1423_v53 = vrot.slane %v6953_v3, 5  ;;  %8891 = vst [vmem:[#allocation9_spill] sm:$0xff] %v8149_v28  ;;  %v8153_v42 = vrot.slane %v3982_v1, 4  ;;  %v8155_v61 = vrot.slane %v3999_v34, 5  ;;  %v8159_v36 = vsel %vm7339_vm5, %v5357_v17, %v1420_v46 }
  0xe7   : > { %6235 = vmatprep.subr.bf16.mxu1 %v6888_v41  ;;  %v8151_v35 = vrot.slane %v3972_v62, 4  ;;  %v4005_v8 = vrot.slane %v4003_v10, 4  ;;  %v1422_v44 = vrot.slane %v1420_v46, 4  ;;  %v3996_v49 = vor.u32 %v3995_v56, %v3992_v26  ;;  %v5732_v3 = vld [vmem:[%s7061_s14 + $0x90] sm:$0xf] }
  0xe8   : > { %v4009_v25 = vshll.u32 %v8116_v30, 16  ;;  %v4017_v0 = vshll.u32 %v5726_v24, 16  ;;  %v4023_v62 = vshll.u32 %v8133_v22, 16  ;;  %v4027_v1 = vshrl.u32 %v8133_v22, 16  ;;  %v8166_v34 = vld [vmem:[%s7061_s14 + $0x94] sm:$0xf] }
  0xe9   : > { %8892 = vst [vmem:[#allocation10_spill] sm:$0xff] %v8166_v34  ;;  %v8893_v10 = vcombine.low %v7868_v27, %v7872_v29  ;;  %v4038_v17 = vshrl.u32 %v5729_v38, 16  ;;  %v4041_v46 = vshll.u32 %v5729_v38, 16  ;;  %v4051_v26 = vshrl.u32 %v8149_v28, 16  ;;  %v5735_v38 = vld [vmem:[%s7061_s14 + $0x9c] sm:$0xf] }
  0xea   : > { %6236 = vmatpush3.bf16.msra.mxu1 %v6888_v41  ;;  %v4014_v41 = vshrl.u32 %v5726_v24, 16  ;;  %v8894_v56 = vcombine.low %v7879_v45, %v7883_v14  ;;  %v4006_v29 = vor.u32 %v4005_v8, %v8155_v61  ;;  %v4065_v24 = vshll.u32 %v5732_v3, 16  ;;  %v8188_v45 = vld [vmem:[%s7061_s14 + $0x80] sm:$0x1] }
  0xeb   : > { %6237 = vmatprep.subr.bf16.mxu1 %v6890_v23  ;;  %v8185_v5 = vrot.slane %v4009_v25, 5  ;;  %8895 = vst [vmem:[#allocation11_spill] sm:$0xff] %v8188_v45  ;;  %v4071_v14 = vshll.u32 %v8166_v34, 16  ;;  %v4019_v27 = vrot.slane %v4017_v0, 5  ;;  %v4029_v8 = vrot.slane %v4027_v1, 4 }
  0xec   : > { %6414 = vmatmul.mubr.bf16.gmra.mrb[28].mxu0 %v6884_v4  ;;  %v4047_v4 = vshll.u32 %v8149_v28, 16  ;;  %v8192_v28 = vrot.slane %v4023_v62, 5  ;;  %v8198_v22 = vld [vmem:[%s7061_s14 + $0xa0] sm:$0xf]  ;;  %v4040_v25 = vrot.slane %v4038_v17, 4  ;;  %v4043_v30 = vrot.slane %v4041_v46, 5 }
  0xed   : > { %6206 = vmatmul.mubr.bf16.gmra.mrb[12].mxu1 %v8893_v10  ;;  %6433 = vmatprep.mubr.bf16.mxu0 %v7937_v59  ;;  %v4062_v59 = vshrl.u32 %v5732_v3, 16  ;;  %v8183_v10 = vrot.slane %v3996_v49, 4  ;;  %v8195_v3 = vld [vmem:[%s7061_s14 + $0x8c] sm:$0x1]  ;;  %8897 = vst [vmem:[#allocation13_spill] sm:$0xff] %v8198_v22  ;;  %v4053_v47 = vrot.slane %v4051_v26, 4  ;;  %v8215_v62 = vsel %vm7339_vm5, %v1422_v44, %v1423_v53 }
  0xee   : > { %6209 = vmatprep.mubr.bf16.mxu1 %v8894_v56  ;;  %6238 = vmatpush3.bf16.msra.mxu1 %v6890_v23  ;;  %v4075_v23 = vshrl.u32 %v8166_v34, 16  ;;  %v4016_v56 = vrot.slane %v4014_v41, 4  ;;  %8896 = vst [vmem:[#allocation12_spill] sm:$0xff] %v8195_v3  ;;  %v6889_v49 = vld [vmem:[%s8854_s1 + $0x208] sm:$0xff]   ;;  %v8203_v13 = vrot.slane %v4047_v4, 5  ;;  %v4067_v34 = vrot.slane %v4065_v24, 5 }
  0xef   : > { %6239 = vmatprep.subr.bf16.mxu1 %v6892_v12  ;;  %v5738_v41 = vld [vmem:[%s7061_s14 + $0xa8] sm:$0xf]  ;;  %v4064_v1 = vrot.slane %v4062_v59, 4  ;;  %v8220_v17 = vld [vmem:[%s8854_s1 + $0x100] sm:$0xff]   ;;  %v8223_v46 = vrot.slane %v4071_v14, 5  ;;  %v4086_v26 = vshrl.u32 %v5735_v38, 16  ;;  %v8900_v24 = vcombine.low %v7887_v16, %v7897_v15 }
  0xf0   : > { %8899 = vst [vmem:[#allocation15_spill] sm:$0xff] %v8220_v17  ;;  %v4077_v4 = vrot.slane %v4075_v23, 4  ;;  %v4089_v0 = vshll.u32 %v5735_v38, 16  ;;  %v8226_v53 = vrot.slane %v4006_v29, 4  ;;  %v4095_v44 = vshll.u32 %v8198_v22, 16  ;;  %v6891_v16 = vld [vmem:[%s8854_s1 + $0x210] sm:$0xff]  }
  0xf1   : > { %v4099_v59 = vshrl.u32 %v8198_v22, 16  ;;  %v4020_v14 = vor.u32 %v4019_v27, %v4016_v56  ;;  %v4030_v38 = vor.u32 %v4029_v8, %v8192_v28  ;;  %v4044_v23 = vor.u32 %v4043_v30, %v4040_v25  ;;  %v8238_v29 = vld [vmem:[%s7061_s14 + $0xac] sm:$0xf]  ;;  %v8251_v25 = vld [vmem:[%s7061_s14 + $0xa4] sm:$0x1] }
  0xf2   : > { %6240 = vmatpush3.bf16.msra.mxu1 %v6892_v12  ;;  %v4033_v12 = vshll.u32 %v8188_v45, 16  ;;  %8901 = vst [vmem:[#allocation16_spill] sm:$0xff] %v8238_v29  ;;  %v4054_v15 = vor.u32 %v4053_v47, %v8203_v13  ;;  %v4110_v27 = vshrl.u32 %v5738_v41, 16  ;;  %v4113_v30 = vshll.u32 %v5738_v41, 16 }
  0xf3   : > { %6513 = vmatprep.subr.bf16.mxu1 %v8220_v17  ;;  %v8902_v17 = vcombine.low %v7943_v20, %v7964_v7  ;;  %v4068_v56 = vor.u32 %v4067_v34, %v4064_v1  ;;  %v4078_v8 = vor.u32 %v4077_v4, %v8223_v46  ;;  %v4088_v20 = vrot.slane %v4086_v26, 4 }
  0xf4   : > { %6434 = vmatmul.mubr.bf16.vlgmr.msra.gmra.mrb[0].mxu0 %v8020_v50  ;;  %v4057_v50 = vshll.u32 %v8195_v3, 16  ;;  %v4091_v7 = vrot.slane %v4089_v0, 5  ;;  %v4123_v22 = vshrl.u32 %v8238_v29, 16  ;;  %v4021_v47 = vrot.slane %v4020_v14, 4  ;;  %v6893_v0 = vld [vmem:[%s8854_s1 + $0x218] sm:$0xff]  }
  0xf5   : > { %6210 = vmatmul.mubr.bf16.gmra.mrb[16].mxu1 %v8900_v24  ;;  %6466 = vmatpush3.bf16.msra.mxu0 %v7924_v21  ;;  %v4081_v21 = vshll.u32 %v8206_v39, 16  ;;  %v4119_v24 = vshll.u32 %v8238_v29, 16  ;;  %v4031_v39 = vrot.slane %v4030_v38, 4  ;;  %v4035_v3 = vrot.slane %v4033_v12, 5 }
  0xf6   : > { %6213 = vmatprep.mubr.bf16.mxu1 %v8902_v17  ;;  %6437 = vmatprep.mubr.bf16.mxu0 %v8024_v48  ;;  %v8253_v17 = vrot.slane %v4095_v44, 5  ;;  %v4101_v48 = vrot.slane %v4099_v59, 4  ;;  %v4059_v41 = vrot.slane %v4057_v50, 5  ;;  %v4045_v34 = vrot.slane %v4044_v23, 4 }
  0xf7   : > { %6467 = vmatprep.subr.bf16.mxu0 %v6889_v49  ;;  %v4055_v1 = vrot.slane %v4054_v15, 4  ;;  %v4112_v4 = vrot.slane %v4110_v27, 4  ;;  %v4115_v45 = vrot.slane %v4113_v30, 5  ;;  %v4069_v26 = vrot.slane %v4068_v56, 4  ;;  %v8319_v27 = vld [vmem:[%s7061_s14 + $0xbc] sm:$0x1] }
  0xf8   : > { %v4083_v44 = vrot.slane %v4081_v21, 5  ;;  %v4092_v59 = vor.u32 %v4091_v7, %v4088_v20  ;;  %v4105_v29 = vshll.u32 %v8251_v25, 16  ;;  %v4102_v12 = vor.u32 %v4101_v48, %v8253_v17  ;;  %v8286_v21 = vld [vmem:[%s7061_s14 + $0xb0] sm:$0x1] }
  0xf9   : > { %6468 = vmatpush3.bf16.msra.mxu0 %v6889_v49  ;;  %v4079_v49 = vrot.slane %v4078_v8, 4  ;;  %v8263_v14 = vrot.slane %v4119_v24, 5  ;;  %v4125_v38 = vrot.slane %v4123_v22, 4  ;;  %v8903_v23 = vor.u32 %v7671_v57, %v7669_v11 }
  0xfa   : > { %6469 = vmatprep.subr.bf16.mxu0 %v6891_v16  ;;  %v8904_v15 = vcombine.low %v7976_v40, %v8001_v60  ;;  %v4012_v22 = vsel %vm7093_vm2, %v8226_v53, %v8185_v5  ;;  %v4026_v57 = vsel %vm7093_vm2, %v4021_v47, %v8192_v28  ;;  %v8905_v40 = vcombine.low %v8031_v31, %v8073_v43  ;;  %v6896_v31 = vld [vmem:[%s8854_s1 + $0x220] sm:$0xff]  }
  0xfb   : > { %v8268_v50 = vrot.slane %v8903_v23, 4  ;;  %v4036_v60 = vsel %vm7093_vm2, %v4031_v39, %v4035_v3  ;;  %v4116_v5 = vor.u32 %v4115_v45, %v4112_v4  ;;  %v4060_v28 = vsel %vm7093_vm2, %v4055_v1, %v4059_v41  ;;  %v5794_v41 = vld [vmem:[%s7061_s14 + $0x48] sm:$0xe] }
  0xfc   : > { %6438 = vmatmul.mubr.bf16.gmra.mrb[4].mxu0 %v8069_v55  ;;  %v4002_v55 = vsel %vm7093_vm2, %v8183_v10, %v8155_v61  ;;  %v5741_v61 = vld [vmem:[%s7061_s14 + $0xb4] sm:$0xf]  ;;  %v8298_v10 = vld [vmem:[%s7061_s14 + $0xb8] sm:$0xf]  ;;  %v4074_v39 = vsel %vm7093_vm2, %v4069_v26, %v8223_v46  ;;  %v8308_v43 = vrot.slane %v4092_v59, 4  ;;  %v8310_v3 = vrot.slane %v4105_v29, 5 }
  0xfd   : > { %6214 = vmatmul.mubr.bf16.gmra.mrb[20].mxu1 %v8904_v15  ;;  %6441 = vmatprep.mubr.bf16.mxu0 %v8124_v18  ;;  %v4050_v18 = vsel %vm7093_vm2, %v4045_v34, %v8203_v13  ;;  %v4084_v13 = vsel %vm7093_vm2, %v4079_v49, %v4083_v44  ;;  %v8314_v45 = vrot.slane %v4102_v12, 4  ;;  %v4126_v53 = vor.u32 %v4125_v38, %v8263_v14  ;;  %v5795_v26 = vld [vmem:[%s7061_s14 + $0x54] sm:$0xe] }
  0xfe   : > { %6217 = vmatprep.mubr.bf16.mxu1 %v8905_v40  ;;  %6470 = vmatpush3.bf16.msra.mxu0 %v6891_v16  ;;  %v4129_v16 = vshll.u32 %v8286_v21, 16  ;;  %v8906_v46 = vsel %vm7093_vm2, %v8153_v42, %v8142_v52  ;;  %v8907_v29 = vsel %vm7093_vm2, %v8151_v35, %v8075_v58  ;;  %v4134_v56 = vshrl.u32 %v5741_v61, 16 }
  0xff   : > { %6471 = vmatprep.subr.bf16.mxu0 %v6893_v0  ;;  %v5772_v30 = vcombine.low %v8907_v29, %v8906_v46  ;;  %v4137_v8 = vshll.u32 %v5741_v61, 16  ;;  %v4143_v20 = vshll.u32 %v8298_v10, 16  ;;  %v5388_v7 = vcombine.low %v8130_v2, %v8140_v54  ;;  %v6899_v2 = vld [vmem:[%s8854_s1 + $0x228] sm:$0xff]   ;;  %v5744_v54 = vld [vmem:[%s7061_s14 + $0xc0] sm:$0xf]  ;;  %v8911_v29 = vld [vmem:[#allocation5_spill] sm:$0xff] }
 0x100   : > { %v5389_v48 = vcombine.low %v8159_v36, %v8215_v62  ;;  %v5773_v24 = vcombine.low %v4002_v55, %v4012_v22  ;;  %v8336_v52 = vrot.slane %v4116_v5, 4  ;;  %v5774_v42 = vcombine.low %v4026_v57, %v4036_v60 }
 0x101   : > { %v8338_v58 = vcombine.low %v4050_v18, %v4060_v28  ;;  %v8340_v35 = vcombine.low %v4074_v39, %v4084_v13  ;;  %v4098_v47 = vsel %vm7093_vm2, %v8308_v43, %v8253_v17  ;;  %v4108_v34 = vsel %vm7093_vm2, %v8314_v45, %v8310_v3  ;;  %v5797_v28 = vld [vmem:[%s7061_s14 + $0x6c] sm:$0xe] }
 0x102   : > { %6472 = vmatpush3.bf16.msra.mxu0 %v6893_v0  ;;  %v8356_v1 = vrot.slane %v4126_v53, 4  ;;  %v8358_v4 = vrot.slane %v4129_v16, 5  ;;  %v4147_v0 = vshrl.u32 %v8298_v10, 16  ;;  %v8908_v44 = vcombine.low %v8085_v6, %v8094_v51  ;;  %v6902_v6 = vld [vmem:[%s8854_s1 + $0x230] sm:$0xff]   ;;  %v8380_v51 = vld [vmem:[%s7061_s14 + $0xc4] sm:$0xf] }
 0x103   : > { %6473 = vmatprep.subr.bf16.mxu0 %v6896_v31  ;;  %v8365_v59 = vrot.slane %v4134_v56, 4  ;;  %v8369_v49 = vrot.slane %v4143_v20, 5  ;;  %v4153_v12 = vshll.u32 %v8319_v27, 16  ;;  %v4122_v38 = vsel %vm7093_vm2, %v8336_v52, %v8263_v14  ;;  %v5796_v14 = vld [vmem:[%s7061_s14 + $0x60] sm:$0xe]  ;;  %v8909_v39 = vld [vmem:[#allocation3_spill] sm:$0xff] }
 0x104   : > { %6442 = vmatmul.mubr.bf16.gmra.mrb[8].mxu0 %v8136_v19  ;;  %v8367_v19 = vrot.slane %v4137_v8, 5  ;;  %v4158_v23 = vshrl.u32 %v5744_v54, 16  ;;  %v5810_v15 = vrot.slane %v5794_v41, 9  ;;  %v4621_v55 = vrot.slane %v7956_v32, 5  ;;  %v6894_v13 = vld [vmem:[%s7061_s14 + $0xc] sm:$0xff]   ;;  %v6905_v56 = vld [vmem:[%s8854_s1 + $0x238] sm:$0xff]  }
 0x105   : > { %6218 = vmatmul.mubr.bf16.gmra.mrb[24].mxu1 %v8908_v44  ;;  %6445 = vmatprep.mubr.bf16.mxu0 %v5772_v30  ;;  %v4161_v22 = vshll.u32 %v5744_v54, 16  ;;  %v4624_v57 = vrot.slane %v8004_v63, 5  ;;  %v5811_v40 = vrot.slane %v5795_v26, 9  ;;  %v4628_v60 = vrot.slane %v7968_v33, 5  ;;  %v8910_v16 = vld [vmem:[#allocation4_spill] sm:$0xff]  ;;  %v8912_v52 = vld [vmem:[#allocation6_spill] sm:$0xff] }
 0x106   : > { %6221 = vmatprep.mubr.bf16.mxu1 %v5388_v7  ;;  %6474 = vmatpush3.bf16.msra.mxu0 %v6896_v31  ;;  %v4132_v18 = vsel %vm7093_vm2, %v8356_v1, %v8358_v4  ;;  %v8390_v5 = vrot.slane %v4147_v0, 4  ;;  %v8394_v61 = vsel %vm7339_vm5, %v5810_v15, %v4621_v55  ;;  %v4623_v32 = vrot.slane %v4621_v55, 4  ;;  %v8913_v4 = vld [vmem:[#allocation7_spill] sm:$0xff] }
 0x107   : > { %6475 = vmatprep.subr.bf16.mxu0 %v6899_v2  ;;  %v4167_v31 = vshll.u32 %v8380_v51, 16  ;;  %v8400_v63 = vsel %vm7339_vm5, %v5811_v40, %v4628_v60  ;;  %v4630_v33 = vrot.slane %v4628_v60, 4  ;;  %v4631_v3 = vrot.slane %v8909_v39, 5  ;;  %v8431_v26 = vld [vmem:[%s7061_s14 + $0xc8] sm:$0x1]  ;;  %v6895_v40 = vld [vmem:[%s7061_s14 + $0x18] sm:$0xff]  }
 0x108   : > { %v8406_v45 = vsel %vm7339_vm5, %v4623_v32, %v4624_v57  ;;  %v5812_v53 = vrot.slane %v5796_v14, 9  ;;  %v4635_v46 = vrot.slane %v8910_v16, 5  ;;  %v4638_v30 = vrot.slane %v8911_v29, 5  ;;  %v6897_v39 = vld [vmem:[%s7061_s14 + $0x24] sm:$0xff]  }
 0x109   : > { %v5842_v8 = vcombine.low %v8394_v61, %v8406_v45  ;;  %v8417_v20 = vsel %vm7339_vm5, %v4630_v33, %v4631_v3  ;;  %v5813_v7 = vrot.slane %v5797_v28, 9  ;;  %v4645_v0 = vrot.slane %v8913_v4, 5  ;;  %v8915_v28 = vld [vmem:[#allocation11_spill] sm:$0xff]  ;;  %v5503_v61 = vld [vmem:[%s7061_s14 + $0x90] sm:$0xf] }
 0x10a   : > { %6476 = vmatpush3.bf16.msra.mxu0 %v6899_v2  ;;  %v4642_v2 = vrot.slane %v8912_v52, 5  ;;  %v5843_v54 = vcombine.low %v8400_v63, %v8417_v20  ;;  %v8424_v41 = vsel %vm7339_vm5, %v5812_v53, %v4635_v46  ;;  %v4637_v1 = vrot.slane %v4635_v46, 4  ;;  %v8916_v53 = vld [vmem:[#allocation2_spill] sm:$0xff]  ;;  %v6911_v45 = vld [vmem:[%s7061_s14 + $0xa8] sm:$0xff]  }
 0x10b   : > { %6477 = vmatprep.subr.bf16.mxu0 %v6902_v6  ;;  %v8433_v44 = vrot.slane %v4158_v23, 4  ;;  %v8446_v36 = vcombine.low %v4098_v47, %v4108_v34  ;;  %v4140_v62 = vor.u32 %v8367_v19, %v8365_v59  ;;  %v5798_v23 = vld [vmem:[%s7061_s14 + $0x78] sm:$0xe]  ;;  %v8458_v57 = vrot.slane %v4153_v12, 5  ;;  %v5747_v12 = vld [vmem:[%s7061_s14 + $0xcc] sm:$0xf] }
 0x10c   : > { %6446 = vmatmul.mubr.bf16.gmra.mrb[12].mxu0 %v5773_v24  ;;  %v8435_v24 = vrot.slane %v4161_v22, 5  ;;  %v8439_v15 = vsel %vm7339_vm5, %v5813_v7, %v4642_v2  ;;  %v4644_v55 = vrot.slane %v4642_v2, 4  ;;  %v8456_v22 = vcombine.low %v4122_v38, %v4132_v18  ;;  %v5497_v47 = vld [vmem:[%s7061_s14 + $0x78] sm:$0xf]  ;;  %v8914_v18 = vld [vmem:[#allocation8_spill] sm:$0xff] }
 0x10d   : > { %6222 = vmatmul.mubr.bf16.gmra.mrb[28].mxu1 %v5389_v48  ;;  %6449 = vmatprep.mubr.bf16.mxu0 %v5774_v42  ;;  %v4171_v48 = vshrl.u32 %v8380_v51, 16  ;;  %v8453_v42 = vsel %vm7339_vm5, %v4637_v1, %v4638_v30  ;;  %v4150_v34 = vor.u32 %v8390_v5, %v8369_v49  ;;  %v8469_v59 = vrot.slane %v4167_v31, 5  ;;  %v8483_v31 = vld [vmem:[%s7061_s14 + $0xd0] sm:$0xf]  ;;  %v8917_v1 = vld [vmem:[#allocation9_spill] sm:$0xff] }
 0x10e   : > { %6241 = vmatprep.mubr.bf16.mxu1 %v6894_v13  ;;  %6478 = vmatpush3.bf16.msra.mxu0 %v6902_v6  ;;  %v5844_v17 = vcombine.low %v8424_v41, %v8453_v42  ;;  %v8464_v43 = vsel %vm7339_vm5, %v4644_v55, %v4645_v0  ;;  %v4177_v19 = vshll.u32 %v8431_v26, 16  ;;  %v5799_v6 = vld [vmem:[%s7061_s14 + $0x84] sm:$0xe]  ;;  %v4164_v60 = vor.u32 %v8435_v24, %v8433_v44  ;;  %v8918_v24 = vld [vmem:[#allocation12_spill] sm:$0xff]  ;;  %v6975_v63 = vld [vmem:[%s7061_s14 + $0x8c] sm:$0x1] }
 0x10f   : > { %6479 = vmatprep.subr.bf16.mxu0 %v6905_v56  ;;  %v5845_v38 = vcombine.low %v8439_v15, %v8464_v43  ;;  %v5814_v14 = vrot.slane %v5798_v23, 9  ;;  %v4649_v32 = vrot.slane %v8914_v18, 5  ;;  %v4652_v33 = vrot.slane %v8915_v28, 5 }
 0x110   : > { %v4173_v5 = vrot.slane %v4171_v48, 4  ;;  %v2399_v3 = vshrl.u32 %v5497_v47, 16  ;;  %v2402_v13 = vshll.u32 %v5497_v47, 16  ;;  %v2421_v16 = vsel %vm7093_vm2, %v8268_v50, %v8916_v53 }
 0x111   : > { %v4182_v46 = vshrl.u32 %v5747_v12, 16  ;;  %v8491_v29 = vsel %vm7339_vm5, %v5814_v14, %v4649_v32  ;;  %v4651_v30 = vrot.slane %v4649_v32, 4  ;;  %v5815_v7 = vrot.slane %v5799_v6, 9  ;;  %v6955_v6 = vld [vmem:[%s8854_s1 + $0x108] sm:$0xff]  }
 0x112   : > { %6480 = vmatpush3.bf16.msra.mxu0 %v6905_v56  ;;  %v4185_v52 = vshll.u32 %v5747_v12, 16  ;;  %v2401_v2 = vrot.slane %v2399_v3, 4  ;;  %v2404_v56 = vrot.slane %v2402_v13, 5  ;;  %v4656_v4 = vrot.slane %v8917_v1, 5  ;;  %v5800_v12 = vld [vmem:[%s7061_s14 + $0x90] sm:$0xe] }
 0x113   : > { %v4191_v50 = vshll.u32 %v8483_v31, 16  ;;  %v4195_v0 = vshrl.u32 %v8483_v31, 16  ;;  %v8500_v44 = vsel %vm7339_vm5, %v4651_v30, %v4652_v33  ;;  %v4659_v55 = vrot.slane %v8918_v24, 5  ;;  %v6898_v3 = vld [vmem:[%s7061_s14 + $0x30] sm:$0xff]  }
 0x114   : > { %6450 = vmatmul.mubr.bf16.gmra.mrb[16].mxu0 %v8338_v58  ;;  %v8919_v58 = vld [vmem:[#allocation15_spill] sm:$0xff]  ;;  %v4174_v48 = vor.u32 %v4173_v5, %v8469_v59  ;;  %v2405_v23 = vor.u32 %v2404_v56, %v2401_v2  ;;  %v4658_v47 = vrot.slane %v4656_v4, 4  ;;  %v4151_v14 = vrot.slane %v4150_v34, 4  ;;  %v8521_v13 = vld [vmem:[%s7061_s14 + $0xd4] sm:$0x1]  ;;  %v8920_v2 = vld [vmem:[#allocation10_spill] sm:$0xff] }
 0x115   : > { %6242 = vmatmul.mubr.bf16.vlgmr.msra.gmra.mrb[0].mxu1 %v6895_v40  ;;  %6453 = vmatprep.mubr.bf16.mxu0 %v8340_v35  ;;  %v5846_v35 = vcombine.low %v8491_v29, %v8500_v44  ;;  %v4141_v40 = vrot.slane %v4140_v62, 4  ;;  %v4179_v18 = vrot.slane %v4177_v19, 5  ;;  %v8513_v32 = vsel %vm7339_vm5, %v5815_v7, %v4656_v4  ;;  %v6900_v19 = vld [vmem:[%s7061_s14 + $0x3c] sm:$0xff]   ;;  %v6956_v1 = vld [vmem:[%s8854_s1 + $0x110] sm:$0xff]  }
 0x116   : > { %6521 = vmatpush3.bf16.msra.mxu1 %v8919_v58  ;;  %6245 = vmatprep.mubr.bf16.mxu1 %v6897_v39  ;;  %v4184_v28 = vrot.slane %v4182_v46, 4  ;;  %v4187_v33 = vrot.slane %v4185_v52, 5  ;;  %v2406_v39 = vrot.slane %v2405_v23, 4  ;;  %v8517_v5 = vsel %vm7339_vm5, %v4658_v47, %v4659_v55  ;;  %v6957_v47 = vld [vmem:[%s7061_s14 + $0x1c] sm:$0xf] }
 0x117   : > { %6514 = vmatprep.subr.bf16.mxu1 %v6955_v6  ;;  %v8523_v53 = vrot.slane %v4191_v50, 5  ;;  %v4197_v30 = vrot.slane %v4195_v0, 4  ;;  %v5847_v62 = vcombine.low %v8513_v32, %v8517_v5  ;;  %v5816_v34 = vrot.slane %v5800_v12, 9 }
 0x118   : > { %v4165_v7 = vrot.slane %v4164_v60, 4  ;;  %v4175_v46 = vrot.slane %v4174_v48, 4  ;;  %v2411_v52 = vsel %vm7093_vm2, %v2406_v39, %v7669_v11  ;;  %v4663_v56 = vrot.slane %v8920_v2, 5  ;;  %v8921_v11 = vld [vmem:[#allocation14_spill] sm:$0xff]  ;;  %v6901_v39 = vld [vmem:[%s7061_s14 + $0x48] sm:$0xff]  }
 0x119   : > { %v4146_v4 = vsel %vm7093_vm2, %v4141_v40, %v8369_v49  ;;  %v4156_v60 = vsel %vm7093_vm2, %v4151_v14, %v8458_v57  ;;  %v8541_v50 = vcombine.low %v2411_v52, %v2421_v16  ;;  %v4666_v0 = vrot.slane %v8921_v11, 5  ;;  %v5790_v57 = vld [vmem:[%s7061_s14 + $0x18] sm:$0xe]  ;;  %v5801_v16 = vld [vmem:[%s7061_s14 + $0x9c] sm:$0xe] }
 0x11a   : > { %6522 = vmatpush3.bf16.msra.mxu1 %v6955_v6  ;;  %v4188_v24 = vor.u32 %v4187_v33, %v4184_v28  ;;  %v4201_v55 = vshll.u32 %v8521_v13, 16  ;;  %v8548_v58 = vsel %vm7339_vm5, %v5816_v34, %v4663_v56  ;;  %v4665_v48 = vrot.slane %v4663_v56, 4  ;;  %v6958_v40 = vld [vmem:[%s8854_s1 + $0x118] sm:$0xff]   ;;  %v6959_v2 = vld [vmem:[%s7061_s14 + $0x20] sm:$0x1] }
 0x11b   : > { %6515 = vmatprep.subr.bf16.mxu1 %v6956_v1  ;;  %v4198_v49 = vor.u32 %v4197_v30, %v8523_v53  ;;  %v4180_v23 = vsel %vm7093_vm2, %v4175_v46, %v4179_v18  ;;  %v4593_v12 = vrot.slane %v6957_v47, 5  ;;  %v5779_v6 = vcombine.low %v4146_v4, %v4156_v60  ;;  %v8922_v34 = vld [vmem:[#allocation13_spill] sm:$0xff]  ;;  %v5802_v11 = vld [vmem:[%s7061_s14 + $0xa8] sm:$0xe] }
 0x11c   : > { %6454 = vmatmul.mubr.bf16.gmra.mrb[20].mxu0 %v8446_v36  ;;  %v4170_v36 = vsel %vm7093_vm2, %v4165_v7, %v8469_v59  ;;  %v4189_v14 = vrot.slane %v4188_v24, 4  ;;  %v4203_v28 = vrot.slane %v4201_v55, 5  ;;  %v5806_v18 = vrot.slane %v5790_v57, 9  ;;  %v6903_v46 = vld [vmem:[%s7061_s14 + $0x54] sm:$0xff]   ;;  %v5791_v55 = vld [vmem:[%s7061_s14 + $0x24] sm:$0xe] }
 0x11d   : > { %6246 = vmatmul.mubr.bf16.gmra.mrb[4].mxu1 %v6898_v3  ;;  %6457 = vmatprep.mubr.bf16.mxu0 %v8456_v22  ;;  %v8562_v22 = vsel %vm7339_vm5, %v4665_v48, %v4666_v0  ;;  %v5817_v33 = vrot.slane %v5801_v16, 9  ;;  %v5780_v3 = vcombine.low %v4170_v36, %v4180_v23  ;;  %v4199_v30 = vrot.slane %v4198_v49, 4  ;;  %v6961_v48 = vld [vmem:[%s7061_s14 + $0x28] sm:$0xf]  ;;  %v6962_v36 = vld [vmem:[%s7061_s14 + $0x34] sm:$0xf] }
 0x11e   : > { %6249 = vmatprep.mubr.bf16.mxu1 %v6900_v19  ;;  %6523 = vmatpush3.bf16.msra.mxu1 %v6956_v1  ;;  %v5848_v59 = vcombine.low %v8548_v58, %v8562_v22  ;;  %v4670_v19 = vrot.slane %v8922_v34, 5  ;;  %v4673_v7 = vrot.slane %v8251_v25, 5  ;;  %v4595_v52 = vrot.slane %v4593_v12, 4  ;;  %v6960_v1 = vld [vmem:[%s8854_s1 + $0x120] sm:$0xff]  }
 0x11f   : > { %6516 = vmatprep.subr.bf16.mxu1 %v6958_v40  ;;  %v4596_v56 = vrot.slane %v6959_v2, 5  ;;  %v4594_v25 = vsel %vm7339_vm5, %v5806_v18, %v4593_v12  ;;  %v4194_v0 = vsel %vm7093_vm2, %v4189_v14, %v8523_v53  ;;  %v4204_v24 = vsel %vm7093_vm2, %v4199_v30, %v4203_v28  ;;  %v5792_v12 = vld [vmem:[%s7061_s14 + $0x30] sm:$0xe]  ;;  %v6904_v30 = vld [vmem:[%s7061_s14 + $0x60] sm:$0xff]  }
 0x120   : > { %v8579_v4 = vsel %vm7339_vm5, %v5817_v33, %v4670_v19  ;;  %v4672_v60 = vrot.slane %v4670_v19, 4  ;;  %v4600_v49 = vrot.slane %v6961_v48, 5  ;;  %v4607_v23 = vrot.slane %v6962_v36, 5  ;;  %v6964_v33 = vld [vmem:[%s7061_s14 + $0x2c] sm:$0x1] }
 0x121   : > { %v4597_v16 = vsel %vm7339_vm5, %v4595_v52, %v4596_v56  ;;  %v5818_v47 = vrot.slane %v5802_v11, 9  ;;  %v5781_v28 = vcombine.low %v4194_v0, %v4204_v24  ;;  %v5807_v18 = vrot.slane %v5791_v55, 9  ;;  %v6906_v52 = vld [vmem:[%s7061_s14 + $0x6c] sm:$0xff]   ;;  %v5803_v11 = vld [vmem:[%s7061_s14 + $0xb4] sm:$0xe] }
 0x122   : > { %6524 = vmatpush3.bf16.msra.mxu1 %v6958_v40  ;;  %v8593_v57 = vsel %vm7339_vm5, %v4672_v60, %v4673_v7  ;;  %v8923_v40 = vld [vmem:[#allocation16_spill] sm:$0xff]  ;;  %v5838_v34 = vcombine.low %v4594_v25, %v4597_v16  ;;  %v4602_v19 = vrot.slane %v4600_v49, 4  ;;  %v5808_v2 = vrot.slane %v5792_v12, 9  ;;  %v5793_v0 = vld [vmem:[%s7061_s14 + $0x3c] sm:$0xe] }
 0x123   : > { %6517 = vmatprep.subr.bf16.mxu1 %v6960_v1  ;;  %v5849_v53 = vcombine.low %v8579_v4, %v8593_v57  ;;  %v4677_v14 = vrot.slane %v8923_v40, 5  ;;  %v4609_v56 = vrot.slane %v4607_v23, 4  ;;  %v6966_v24 = vld [vmem:[%s7061_s14 + $0x40] sm:$0xf]  ;;  %v4601_v48 = vsel %vm7339_vm5, %v5807_v18, %v4600_v49  ;;  %v6968_v18 = vld [vmem:[%s7061_s14 + $0x44] sm:$0x1] }
 0x124   : > { %6458 = vmatmul.mubr.bf16.gmra.mrb[24].mxu0 %v5779_v6  ;;  %v6963_v6 = vld [vmem:[%s8854_s1 + $0x128] sm:$0xff]   ;;  %v4614_v55 = vrot.slane %v6966_v24, 5  ;;  %v4684_v12 = vrot.slane %v8298_v10, 5  ;;  %v4608_v49 = vsel %vm7339_vm5, %v5808_v2, %v4607_v23  ;;  %v6969_v10 = vld [vmem:[%s8854_s1 + $0x138] sm:$0xff]   ;;  %v5804_v23 = vld [vmem:[%s7061_s14 + $0xc0] sm:$0xe] }
 0x125   : > { %6250 = vmatmul.mubr.bf16.gmra.mrb[8].mxu1 %v6901_v39  ;;  %6461 = vmatprep.mubr.bf16.mxu0 %v5780_v3  ;;  %v4603_v39 = vrot.slane %v6964_v33, 5  ;;  %v4680_v3 = vrot.slane %v8286_v21, 5  ;;  %v8610_v7 = vsel %vm7339_vm5, %v5818_v47, %v4677_v14  ;;  %v6967_v21 = vld [vmem:[%s8854_s1 + $0x130] sm:$0xff]   ;;  %v5819_v47 = vrot.slane %v5803_v11, 9 }
 0x126   : > { %6253 = vmatprep.mubr.bf16.mxu1 %v6903_v46  ;;  %6525 = vmatpush3.bf16.msra.mxu1 %v6960_v1  ;;  %v4679_v46 = vrot.slane %v4677_v14, 4  ;;  %v6965_v1 = vld [vmem:[%s7061_s14 + $0x38] sm:$0x1]  ;;  %v5809_v14 = vrot.slane %v5793_v0, 9  ;;  %v4617_v33 = vrot.slane %v6968_v18, 5  ;;  %v4691_v11 = vrot.slane %v8380_v51, 5 }
 0x127   : > { %6518 = vmatprep.subr.bf16.mxu1 %v6963_v6  ;;  %v4610_v60 = vrot.slane %v6965_v1, 5  ;;  %v4604_v36 = vsel %vm7339_vm5, %v4602_v19, %v4603_v39  ;;  %v4686_v39 = vrot.slane %v4684_v12, 4  ;;  %v5494_v19 = vld [vmem:[%s7061_s14 + $0x6c] sm:$0xf]  ;;  %v6909_v18 = vld [vmem:[%s7061_s14 + $0x90] sm:$0xff]   ;;  %v2442_v20 = vshll.u32 %v6975_v63, 16 }
 0x128   : > { %v8622_v25 = vsel %vm7339_vm5, %v4679_v46, %v4680_v3  ;;  %v5839_v3 = vcombine.low %v4601_v48, %v4604_v36  ;;  %v4615_v1 = vsel %vm7339_vm5, %v5809_v14, %v4614_v55  ;;  %v2375_v0 = vshrl.u32 %v5494_v19, 16  ;;  %v5805_v51 = vld [vmem:[%s7061_s14 + $0xcc] sm:$0xe] }
 0x129   : > { %v5850_v16 = vcombine.low %v8610_v7, %v8622_v25  ;;  %v4611_v40 = vsel %vm7339_vm5, %v4609_v56, %v4610_v60  ;;  %v5820_v56 = vrot.slane %v5804_v23, 9  ;;  %v2378_v24 = vshll.u32 %v5494_v19, 16 }
 0x12a   : > { %6526 = vmatpush3.bf16.msra.mxu1 %v6963_v6  ;;  %v4687_v6 = vrot.slane %v8319_v27, 5  ;;  %v8642_v27 = vsel %vm7339_vm5, %v5819_v47, %v4684_v12  ;;  %v4694_v36 = vrot.slane %v8431_v26, 5  ;;  %v4693_v12 = vrot.slane %v4691_v11, 4 }
 0x12b   : > { %6519 = vmatprep.subr.bf16.mxu1 %v6967_v21  ;;  %v2380_v26 = vrot.slane %v2378_v24, 5  ;;  %v4701_v23 = vrot.slane %v8521_v13, 5 }
 0x12c   : > { %6462 = vmatmul.mubr.bf16.gmra.mrb[28].mxu0 %v5781_v28  ;;  %v4616_v28 = vrot.slane %v4614_v55, 4  ;;  %v8649_v46 = vsel %vm7339_vm5, %v4686_v39, %v4687_v6  ;;  %v8663_v55 = vsel %vm7339_vm5, %v5820_v56, %v4691_v11  ;;  %v4698_v39 = vrot.slane %v8483_v31, 5  ;;  %v6971_v56 = vld [vmem:[%s7061_s14 + $0x74] sm:$0x1] }
 0x12d   : > { %6254 = vmatmul.mubr.bf16.gmra.mrb[12].mxu1 %v6904_v30  ;;  %6481 = vmatprep.mubr.bf16.mxu0 %v5838_v34  ;;  %v6907_v30 = vld [vmem:[%s7061_s14 + $0x78] sm:$0xff]   ;;  %v5840_v34 = vcombine.low %v4608_v49, %v4611_v40  ;;  %v5851_v2 = vcombine.low %v8642_v27, %v8649_v46  ;;  %v8668_v49 = vsel %vm7339_vm5, %v4693_v12, %v4694_v36  ;;  %v2377_v40 = vrot.slane %v2375_v0, 4  ;;  %v6972_v0 = vld [vmem:[%s7061_s14 + $0x88] sm:$0xf] }
 0x12e   : > { %6257 = vmatprep.mubr.bf16.mxu1 %v6906_v52  ;;  %6527 = vmatpush3.bf16.msra.mxu1 %v6967_v21  ;;  %v6908_v52 = vld [vmem:[%s7061_s14 + $0x84] sm:$0xff]   ;;  %v4618_v60 = vsel %vm7339_vm5, %v4616_v28, %v4617_v33  ;;  %v6970_v21 = vld [vmem:[%s7061_s14 + $0x70] sm:$0xf]  ;;  %v5852_v28 = vcombine.low %v8663_v55, %v8668_v49  ;;  %v4700_v19 = vrot.slane %v4698_v39, 4  ;;  %v2432_v24 = vshll.u32 %v6972_v0, 16 }
 0x12f   : > { %6520 = vmatprep.subr.bf16.mxu1 %v6969_v10  ;;  %v2384_v48 = vshll.u32 %v6970_v21, 16  ;;  %v2388_v47 = vshrl.u32 %v6970_v21, 16  ;;  %v5841_v6 = vcombine.low %v4615_v1, %v4618_v60  ;;  %v2394_v1 = vshll.u32 %v6971_v56, 16 }
 0x130   : > { %v8690_v11 = vsel %vm7339_vm5, %v4700_v19, %v4701_v23  ;;  %v2436_v21 = vshrl.u32 %v6972_v0, 16  ;;  %v6974_v19 = vld [vmem:[%s7061_s14 + $0xa0] sm:$0xf] }
 0x131   : > { %v8670_v14 = vrot.slane %v2384_v48, 5  ;;  %v2390_v33 = vrot.slane %v2388_v47, 4  ;;  %v2484_v56 = vshrl.u32 %v6974_v19, 16 }
 0x132   : > { %6528 = vmatpush3.bf16.msra.mxu1 %v6969_v10  ;;  %v5821_v10 = vrot.slane %v5805_v51, 9 }
 0x133   : > { %v2391_v31 = vor.u32 %v2390_v33, %v8670_v14  ;;  %v2450_v33 = vshll.u32 %v5503_v61, 16 }
 0x134   : > { %6482 = vmatmul.mubr.bf16.vlgmr.msra.gmra.mrb[0].mxu0 %v5839_v3  ;;  %v6910_v3 = vld [vmem:[%s7061_s14 + $0x9c] sm:$0xff]  }
 0x135   : > { %6258 = vmatmul.mubr.bf16.gmra.mrb[16].mxu1 %v6907_v30  ;;  %6485 = vmatprep.mubr.bf16.mxu0 %v5840_v34  ;;  %v5500_v30 = vld [vmem:[%s7061_s14 + $0x84] sm:$0xf]  ;;  %v8681_v34 = vsel %vm7339_vm5, %v5821_v10, %v4698_v39  ;;  %v2392_v47 = vrot.slane %v2391_v31, 4  ;;  %v6973_v10 = vld [vmem:[%s7061_s14 + $0x94] sm:$0xf]  ;;  %v2452_v0 = vrot.slane %v2450_v33, 5 }
 0x136   : > { %6261 = vmatprep.mubr.bf16.mxu1 %v6908_v52  ;;  %v2381_v52 = vor.u32 %v2380_v26, %v2377_v40  ;;  %v2423_v13 = vshrl.u32 %v5500_v30, 16  ;;  %v2426_v60 = vshll.u32 %v5500_v30, 16  ;;  %v5853_v48 = vcombine.low %v8681_v34, %v8690_v11 }
 0x137   : > { %v8699_v40 = vrot.slane %v2432_v24, 5  ;;  %v2438_v26 = vrot.slane %v2436_v21, 4  ;;  %v2456_v39 = vshll.u32 %v6973_v10, 16  ;;  %v2460_v23 = vshrl.u32 %v6973_v10, 16  ;;  %v6977_v10 = vld [vmem:[%s7061_s14 + $0xa4] sm:$0x1] }
 0x138   : > { %v2382_v36 = vrot.slane %v2381_v52, 4  ;;  %v2425_v12 = vrot.slane %v2423_v13, 4  ;;  %v2428_v51 = vrot.slane %v2426_v60, 5  ;;  %v2480_v52 = vshll.u32 %v6974_v19, 16  ;;  %v6978_v19 = vld [vmem:[%s7061_s14 + $0xac] sm:$0xf] }
 0x139   : > { %v2439_v13 = vor.u32 %v2438_v26, %v8699_v40  ;;  %v8716_v41 = vrot.slane %v2456_v39, 5  ;;  %v2462_v42 = vrot.slane %v2460_v23, 4  ;;  %v2486_v21 = vrot.slane %v2484_v56, 4  ;;  %v5512_v23 = vld [vmem:[%s7061_s14 + $0xb4] sm:$0xf] }
 0x13a   : > { %v2490_v39 = vshll.u32 %v6977_v10, 16  ;;  %v2508_v15 = vshrl.u32 %v6978_v19, 16  ;;  %v2522_v63 = vshll.u32 %v5512_v23, 16 }
 0x13b   : > { %v2463_v26 = vor.u32 %v2462_v42, %v8716_v41 }
 0x13c   : > { %6486 = vmatmul.mubr.bf16.gmra.mrb[4].mxu0 %v5841_v6  ;;  %v5506_v6 = vld [vmem:[%s7061_s14 + $0x9c] sm:$0xf] }
 0x13d   : > { %6262 = vmatmul.mubr.bf16.gmra.mrb[20].mxu1 %v6909_v18  ;;  %6489 = vmatprep.mubr.bf16.mxu0 %v5842_v8  ;;  %v2396_v8 = vrot.slane %v2394_v1, 5  ;;  %v2447_v18 = vshrl.u32 %v5503_v61, 16  ;;  %v2474_v30 = vshll.u32 %v5506_v6, 16  ;;  %v2387_v1 = vsel %vm7093_vm2, %v2382_v36, %v8670_v14  ;;  %v6913_v61 = vld [vmem:[%s7061_s14 + $0xc0] sm:$0xff]  }
 0x13e   : > { %6265 = vmatprep.mubr.bf16.mxu1 %v6910_v3  ;;  %v2471_v3 = vshrl.u32 %v5506_v6, 16  ;;  %v8718_v14 = vrot.slane %v2480_v52, 5  ;;  %v2504_v52 = vshll.u32 %v6978_v19, 16 }
 0x13f   : > { %v2397_v31 = vsel %vm7093_vm2, %v2392_v47, %v2396_v8  ;;  %v2449_v60 = vrot.slane %v2447_v18, 4  ;;  %v2476_v24 = vrot.slane %v2474_v30, 5  ;;  %v2444_v8 = vrot.slane %v2442_v20, 5  ;;  %v6979_v20 = vld [vmem:[%s7061_s14 + $0xb8] sm:$0xf] }
 0x140   : > { %v2440_v47 = vrot.slane %v2439_v13, 4  ;;  %v2487_v33 = vor.u32 %v2486_v21, %v8718_v14  ;;  %v2528_v29 = vshll.u32 %v6979_v20, 16  ;;  %v2532_v44 = vshrl.u32 %v6979_v20, 16 }
 0x142   : > { %v2488_v13 = vrot.slane %v2487_v33, 4 }
 0x144   : > { %6490 = vmatmul.mubr.bf16.gmra.mrb[8].mxu0 %v5843_v54  ;;  %v2429_v54 = vor.u32 %v2428_v51, %v2425_v12  ;;  %v2453_v12 = vor.u32 %v2452_v0, %v2449_v60  ;;  %v6976_v51 = vld [vmem:[%s7061_s14 + $0x98] sm:$0x1]  ;;  %v2492_v60 = vrot.slane %v2490_v39, 5 }
 0x145   : > { %6266 = vmatmul.mubr.bf16.gmra.mrb[24].mxu1 %v6911_v45  ;;  %6493 = vmatprep.mubr.bf16.mxu0 %v5844_v17  ;;  %v2473_v17 = vrot.slane %v2471_v3, 4  ;;  %v5542_v45 = vcombine.low %v2387_v1, %v2397_v31  ;;  %v2466_v6 = vshll.u32 %v6976_v51, 16  ;;  %v2519_v31 = vshrl.u32 %v5512_v23, 16 }
 0x146   : > { %6269 = vmatprep.mubr.bf16.mxu1 %v6912_v9  ;;  %v2430_v36 = vrot.slane %v2429_v54, 4  ;;  %v5509_v9 = vld [vmem:[%s7061_s14 + $0xa8] sm:$0xf]  ;;  %v2454_v56 = vrot.slane %v2453_v12, 4  ;;  %v2493_v32 = vsel %vm7093_vm2, %v2488_v13, %v2492_v60 }
 0x147   : > { %v2477_v18 = vor.u32 %v2476_v24, %v2473_v17  ;;  %v2495_v3 = vshrl.u32 %v5509_v9, 16  ;;  %v2498_v30 = vshll.u32 %v5509_v9, 16  ;;  %v2468_v1 = vrot.slane %v2466_v6, 5 }
 0x148   : > { %v2435_v43 = vsel %vm7093_vm2, %v2430_v36, %v8699_v40  ;;  %v2506_v17 = vrot.slane %v2504_v52, 5  ;;  %v2510_v24 = vrot.slane %v2508_v15, 4  ;;  %v2521_v21 = vrot.slane %v2519_v31, 4  ;;  %v5515_v36 = vld [vmem:[%s7061_s14 + $0xc0] sm:$0xf] }
 0x149   : > { %v2478_v54 = vrot.slane %v2477_v18, 4  ;;  %v2497_v0 = vrot.slane %v2495_v3, 4  ;;  %v2500_v42 = vrot.slane %v2498_v30, 5  ;;  %v2543_v9 = vshrl.u32 %v5515_v36, 16  ;;  %v6981_v18 = vld [vmem:[%s7061_s14 + $0xc4] sm:$0xf] }
 0x14a   : > { %v2552_v33 = vshll.u32 %v6981_v18, 16 }
 0x14b   : > { %v2483_v51 = vsel %vm7093_vm2, %v2478_v54, %v8718_v14  ;;  %v2501_v5 = vor.u32 %v2500_v42, %v2497_v0  ;;  %v2556_v14 = vshrl.u32 %v6981_v18, 16  ;;  %v2545_v19 = vrot.slane %v2543_v9, 4 }
 0x14c   : > { %6494 = vmatmul.mubr.bf16.gmra.mrb[12].mxu0 %v5845_v38  ;;  %v2445_v38 = vsel %vm7093_vm2, %v2440_v47, %v2444_v8  ;;  %v2534_v8 = vrot.slane %v2532_v44, 4  ;;  %v2459_v47 = vsel %vm7093_vm2, %v2454_v56, %v8716_v41  ;;  %v6980_v41 = vld [vmem:[%s7061_s14 + $0xb0] sm:$0x1]  ;;  %v5546_v58 = vcombine.low %v2483_v51, %v2493_v32  ;;  %v6983_v44 = vld [vmem:[%s7061_s14 + $0xc8] sm:$0x1] }
 0x14d   : > { %6270 = vmatmul.mubr.bf16.gmra.mrb[28].mxu1 %v6913_v61  ;;  %6497 = vmatprep.mubr.bf16.mxu0 %v5846_v35  ;;  %v2464_v35 = vrot.slane %v2463_v26, 4  ;;  %v5544_v40 = vcombine.low %v2435_v43, %v2445_v38  ;;  %v2524_v61 = vrot.slane %v2522_v63, 5  ;;  %v2514_v6 = vshll.u32 %v6980_v41, 16 }
 0x14e   : > { %6305 = vmatprep.mubr.bf16.mxu1 %v5542_v45  ;;  %v2530_v45 = vrot.slane %v2528_v29, 5  ;;  %v2546_v26 = vshll.u32 %v5515_v36, 16  ;;  %v2502_v22 = vrot.slane %v2501_v5, 4  ;;  %v2554_v15 = vrot.slane %v2552_v33, 5 }
 0x14f   : > { %v2469_v12 = vsel %vm7093_vm2, %v2464_v35, %v2468_v1  ;;  %v2525_v10 = vor.u32 %v2524_v61, %v2521_v21  ;;  %v2516_v30 = vrot.slane %v2514_v6, 5  ;;  %v2558_v43 = vrot.slane %v2556_v14, 4 }
 0x150   : > { %v2535_v39 = vor.u32 %v2534_v8, %v2530_v45  ;;  %v5545_v3 = vcombine.low %v2459_v47, %v2469_v12  ;;  %v2548_v52 = vrot.slane %v2546_v26, 5  ;;  %v2507_v31 = vsel %vm7093_vm2, %v2502_v22, %v2506_v17 }
 0x151   : > { %v2526_v38 = vrot.slane %v2525_v10, 4  ;;  %v2559_v29 = vor.u32 %v2558_v43, %v2554_v15  ;;  %v2562_v35 = vshll.u32 %v6983_v44, 16 }
 0x152   : > { %v2536_v56 = vrot.slane %v2535_v39, 4  ;;  %v2549_v20 = vor.u32 %v2548_v52, %v2545_v19 }
 0x153   : > { %v2531_v4 = vsel %vm7093_vm2, %v2526_v38, %v2530_v45  ;;  %v2564_v54 = vrot.slane %v2562_v35, 5 }
 0x154   : > { %6498 = vmatmul.mubr.bf16.gmra.mrb[16].mxu0 %v5847_v62  ;;  %v2511_v62 = vor.u32 %v2510_v24, %v2506_v17  ;;  %v2550_v25 = vrot.slane %v2549_v20, 4 }
 0x155   : > { %6306 = vmatmul.mubr.bf16.vlgmr.msra.gmra.mrb[16].mxu1 %v8541_v50  ;;  %6501 = vmatprep.mubr.bf16.mxu0 %v5848_v59  ;;  %v6982_v50 = vld [vmem:[%s7061_s14 + $0xbc] sm:$0x1]  ;;  %s5864_s14 = sshll.u32 %s8925_s16, 8 }
 0x156   : > { %6309 = vmatprep.mubr.bf16.mxu1 %v5544_v40  ;;  %v2538_v23 = vshll.u32 %v6982_v50, 16  ;;  %v2512_v59 = vrot.slane %v2511_v62, 4  ;;  %v2555_v13 = vsel %vm7093_vm2, %v2550_v25, %v2554_v15  ;;  %s8803_s21 = scalar_lea.vmem %s8855_s2, %s5864_s14 }
 0x158   : > { %v2540_v1 = vrot.slane %v2538_v23, 5  ;;  %v2517_v63 = vsel %vm7093_vm2, %v2512_v59, %v2516_v30 }
 0x15a   : > { %v2541_v57 = vsel %vm7093_vm2, %v2536_v56, %v2540_v1 }
 0x15b   : > { %v5548_v7 = vcombine.low %v2531_v4, %v2541_v57 }
 0x15c   : > { %6502 = vmatmul.mubr.bf16.gmra.mrb[20].mxu0 %v5849_v53  ;;  %v5547_v53 = vcombine.low %v2507_v31, %v2517_v63 }
 0x15d   : > { %6310 = vmatmul.mubr.bf16.gmra.mrb[20].mxu1 %v5545_v3  ;;  %6505 = vmatprep.mubr.bf16.mxu0 %v5850_v16  ;;  %v2560_v16 = vrot.slane %v2559_v29, 4 }
 0x15e   : > { %6313 = vmatprep.mubr.bf16.mxu1 %v5546_v58 }
 0x15f   : > { %v2565_v60 = vsel %vm7093_vm2, %v2560_v16, %v2564_v54 }
 0x160   : > { %v5549_v0 = vcombine.low %v2555_v13, %v2565_v60 }
 0x164   : > { %6506 = vmatmul.mubr.bf16.gmra.mrb[24].mxu0 %v5851_v2 }
 0x165   : > { %6314 = vmatmul.mubr.bf16.gmra.mrb[24].mxu1 %v5547_v53  ;;  %6509 = vmatprep.mubr.bf16.mxu0 %v5852_v28 }
 0x166   : > { %6317 = vmatprep.mubr.bf16.mxu1 %v5548_v7 }
 0x16c   : > { %6510 = vmatmul.mubr.bf16.gmra.mrb[28].mxu0 %v5853_v48 }
 0x16d   : > { %6318 = vmatmul.mubr.bf16.gmra.mrb[28].mxu1 %v5549_v0 }
 0x1e8   : > { %v6243_v27 = vpop.f32.mrb[0].mxu1 }
 0x1e9   : > { %v1975_v46 = vpop.f32.mrb[1].mxu1 }
 0x1ea   : > { %v6244_v2 = vpop.f32.mrb[2].mxu1 }
 0x1eb   : > { %v1978_v42 = vpop.f32.mrb[3].mxu1 }
 0x1f0   : > { %v6247_v55 = vpop.f32.mrb[4].mxu1 }
 0x1f1   : > { %v1991_v49 = vpop.f32.mrb[5].mxu1 }
 0x1f2   : > { %v6248_v28 = vpop.f32.mrb[6].mxu1 }
 0x1f3   : > { %v1994_v17 = vpop.f32.mrb[7].mxu1 }
 0x1f8   : > { %v6251_v24 = vpop.f32.mrb[8].mxu1 }
 0x1f9   : > { %v2007_v40 = vpop.f32.mrb[9].mxu1 }
 0x1fa   : > { %v6252_v21 = vpop.f32.mrb[10].mxu1 }
 0x1fb   : > { %v8789_v37 = vpop.f32.mrb[11].mxu1 }
 0x200   : > { %v8791_v61 = vpop.f32.mrb[12].mxu1 }
 0x201   : > { %v8793_v45 = vpop.f32.mrb[13].mxu1 }
 0x202   : > { %v8795_v34 = vpop.f32.mrb[14].mxu1 }
 0x203   : > { %v8797_v11 = vpop.f32.mrb[15].mxu1 }
 0x207   : > { %v6483_v48 = vpop.f32.mrb[0].mxu0 }
 0x208   : > { %v6529_v8 = vadd.f32 %v6483_v48, %v6243_v27  ;;  %v4866_v36 = vpop.f32.mrb[1].mxu0 }
 0x209   : > { %v6530_v47 = vadd.f32 %v4866_v36, %v1975_v46  ;;  %v6484_v12 = vpop.f32.mrb[2].mxu0 }
 0x20a   : > { %5027 = vst [vmem:[%s8803_s21 + $0x10] sm:$0xff] %v6529_v8  ;;  %v6531_v51 = vadd.f32 %v6484_v12, %v6244_v2  ;;  %v4869_v32 = vpop.f32.mrb[3].mxu0  ;;  %v5097_v9 = vmul.f32 %v6529_v8, %v6529_v8 }
 0x20b   : > { %5025 = vst [vmem:[%s8803_s21] sm:$0xff] %v6530_v47  ;;  %v6532_v5 = vadd.f32 %v4869_v32, %v1978_v42  ;;  %v5095_v62 = vmul.f32 %v6530_v47, %v6530_v47 }
 0x20c   : > { %5028 = vst [vmem:[%s8803_s21 + $0x18] sm:$0xff] %v6531_v51  ;;  %v5098_v39 = vmul.f32 %v6531_v51, %v6531_v51 }
 0x20d   : > { %5026 = vst [vmem:[%s8803_s21 + $0x8] sm:$0xff] %v6532_v5  ;;  %v5057_v41 = vadd.f32 %v6532_v5, %v6530_v47  ;;  %v5096_v6 = vmul.f32 %v6532_v5, %v6532_v5 }
 0x20f   : > { %v5058_v26 = vadd.f32 %v6529_v8, %v5057_v41  ;;  %v5127_v18 = vadd.f32 %v5096_v6, %v5095_v62  ;;  %v6487_v33 = vpop.f32.mrb[4].mxu0 }
 0x210   : > { %v6533_v14 = vadd.f32 %v6487_v33, %v6247_v55  ;;  %v4882_v10 = vpop.f32.mrb[5].mxu0 }
 0x211   : > { %v5128_v50 = vadd.f32 %v5127_v18, %v5097_v9  ;;  %v6534_v23 = vadd.f32 %v4882_v10, %v1991_v49  ;;  %v5059_v3 = vadd.f32 %v6531_v51, %v5058_v26  ;;  %v6488_v58 = vpop.f32.mrb[6].mxu0 }
 0x212   : > { %5031 = vst [vmem:[%s8803_s21 + $0x30] sm:$0xff] %v6533_v14  ;;  %v6535_v22 = vadd.f32 %v6488_v58, %v6248_v28  ;;  %v4885_v59 = vpop.f32.mrb[7].mxu0  ;;  %v5101_v1 = vmul.f32 %v6533_v14, %v6533_v14 }
 0x213   : > { %5029 = vst [vmem:[%s8803_s21 + $0x20] sm:$0xff] %v6534_v23  ;;  %v5060_v30 = vadd.f32 %v6534_v23, %v5059_v3  ;;  %v5099_v19 = vmul.f32 %v6534_v23, %v6534_v23  ;;  %v5129_v52 = vadd.f32 %v5128_v50, %v5098_v39  ;;  %v6536_v15 = vadd.f32 %v4885_v59, %v1994_v17 }
 0x214   : > { %5032 = vst [vmem:[%s8803_s21 + $0x38] sm:$0xff] %v6535_v22  ;;  %v5102_v35 = vmul.f32 %v6535_v22, %v6535_v22 }
 0x215   : > { %v5130_v43 = vadd.f32 %v5129_v52, %v5099_v19  ;;  %5030 = vst [vmem:[%s8803_s21 + $0x28] sm:$0xff] %v6536_v15  ;;  %v5061_v38 = vadd.f32 %v6536_v15, %v5060_v30  ;;  %v5100_v56 = vmul.f32 %v6536_v15, %v6536_v15 }
 0x217   : > { %v5062_v31 = vadd.f32 %v6533_v14, %v5061_v38  ;;  %v5131_v63 = vadd.f32 %v5130_v43, %v5100_v56  ;;  %v6491_v20 = vpop.f32.mrb[8].mxu0 }
 0x218   : > { %v6537_v29 = vadd.f32 %v6491_v20, %v6251_v24  ;;  %v4898_v44 = vpop.f32.mrb[9].mxu0 }
 0x219   : > { %v5132_v4 = vadd.f32 %v5131_v63, %v5101_v1  ;;  %v6538_v57 = vadd.f32 %v4898_v44, %v2007_v40  ;;  %v5063_v53 = vadd.f32 %v6535_v22, %v5062_v31  ;;  %v6492_v7 = vpop.f32.mrb[10].mxu0 }
 0x21a   : > { %5035 = vst [vmem:[%s8803_s21 + $0x50] sm:$0xff] %v6537_v29  ;;  %v6539_v25 = vadd.f32 %v6492_v7, %v6252_v21  ;;  %v4901_v16 = vpop.f32.mrb[11].mxu0  ;;  %v5105_v42 = vmul.f32 %v6537_v29, %v6537_v29 }
 0x21b   : > { %5033 = vst [vmem:[%s8803_s21 + $0x40] sm:$0xff] %v6538_v57  ;;  %v5064_v54 = vadd.f32 %v6538_v57, %v5063_v53  ;;  %v5103_v13 = vmul.f32 %v6538_v57, %v6538_v57  ;;  %v5133_v60 = vadd.f32 %v5132_v4, %v5102_v35  ;;  %v6540_v0 = vadd.f32 %v4901_v16, %v8789_v37 }
 0x21c   : > { %5036 = vst [vmem:[%s8803_s21 + $0x58] sm:$0xff] %v6539_v25  ;;  %v5106_v40 = vmul.f32 %v6539_v25, %v6539_v25 }
 0x21d   : > { %v5134_v27 = vadd.f32 %v5133_v60, %v5103_v13  ;;  %5034 = vst [vmem:[%s8803_s21 + $0x48] sm:$0xff] %v6540_v0  ;;  %v5065_v46 = vadd.f32 %v6540_v0, %v5064_v54  ;;  %v5104_v2 = vmul.f32 %v6540_v0, %v6540_v0 }
 0x21f   : > { %v5066_v55 = vadd.f32 %v6537_v29, %v5065_v46  ;;  %v5135_v49 = vadd.f32 %v5134_v27, %v5104_v2  ;;  %v6495_v28 = vpop.f32.mrb[12].mxu0 }
 0x220   : > { %v6541_v17 = vadd.f32 %v6495_v28, %v8791_v61  ;;  %v4914_v24 = vpop.f32.mrb[13].mxu0 }
 0x221   : > { %v5136_v21 = vadd.f32 %v5135_v49, %v5105_v42  ;;  %v6542_v37 = vadd.f32 %v4914_v24, %v8793_v45  ;;  %v5067_v48 = vadd.f32 %v6539_v25, %v5066_v55  ;;  %v6496_v8 = vpop.f32.mrb[14].mxu0 }
 0x222   : > { %5039 = vst [vmem:[%s8803_s21 + $0x70] sm:$0xff] %v6541_v17  ;;  %v6543_v36 = vadd.f32 %v6496_v8, %v8795_v34  ;;  %v4917_v47 = vpop.f32.mrb[15].mxu0  ;;  %v5109_v6 = vmul.f32 %v6541_v17, %v6541_v17 }
 0x223   : > { %5037 = vst [vmem:[%s8803_s21 + $0x60] sm:$0xff] %v6542_v37  ;;  %v5068_v12 = vadd.f32 %v6542_v37, %v5067_v48  ;;  %v5107_v51 = vmul.f32 %v6542_v37, %v6542_v37  ;;  %v5137_v32 = vadd.f32 %v5136_v21, %v5106_v40  ;;  %v6544_v5 = vadd.f32 %v4917_v47, %v8797_v11 }
 0x224   : > { %5040 = vst [vmem:[%s8803_s21 + $0x78] sm:$0xff] %v6543_v36  ;;  %v5110_v33 = vmul.f32 %v6543_v36, %v6543_v36 }
 0x225   : > { %v5138_v61 = vadd.f32 %v5137_v32, %v5107_v51  ;;  %5038 = vst [vmem:[%s8803_s21 + $0x68] sm:$0xff] %v6544_v5  ;;  %v5069_v62 = vadd.f32 %v6544_v5, %v5068_v12  ;;  %v5108_v41 = vmul.f32 %v6544_v5, %v6544_v5 }
 0x227   : > { %v5070_v45 = vadd.f32 %v6541_v17, %v5069_v62  ;;  %v5139_v9 = vadd.f32 %v5138_v61, %v5108_v41  ;;  %v6499_v26 = vpop.f32.mrb[16].mxu0 }
 0x228   : > { %v6307_v18 = vpop.f32.mrb[16].mxu1  ;;  %v4930_v34 = vpop.f32.mrb[17].mxu0 }
 0x229   : > { %v5140_v14 = vadd.f32 %v5139_v9, %v5109_v6  ;;  %v6545_v10 = vadd.f32 %v6499_v26, %v6307_v18  ;;  %v2793_v39 = vpop.f32.mrb[17].mxu1  ;;  %v5071_v11 = vadd.f32 %v6543_v36, %v5070_v45  ;;  %v6500_v50 = vpop.f32.mrb[18].mxu0 }
 0x22a   : > { %v6546_v23 = vadd.f32 %v4930_v34, %v2793_v39  ;;  %v6308_v3 = vpop.f32.mrb[18].mxu1  ;;  %v4933_v58 = vpop.f32.mrb[19].mxu0 }
 0x22b   : > { %5043 = vst [vmem:[%s8803_s21 + $0x90] sm:$0xff] %v6545_v10  ;;  %v5141_v22 = vadd.f32 %v5140_v14, %v5110_v33  ;;  %v6547_v59 = vadd.f32 %v6500_v50, %v6308_v3  ;;  %v2796_v30 = vpop.f32.mrb[19].mxu1  ;;  %v5113_v31 = vmul.f32 %v6545_v10, %v6545_v10 }
 0x22c   : > { %5041 = vst [vmem:[%s8803_s21 + $0x80] sm:$0xff] %v6546_v23  ;;  %v5072_v19 = vadd.f32 %v6546_v23, %v5071_v11  ;;  %v5111_v52 = vmul.f32 %v6546_v23, %v6546_v23  ;;  %v6548_v15 = vadd.f32 %v4933_v58, %v2796_v30 }
 0x22d   : > { %5044 = vst [vmem:[%s8803_s21 + $0x98] sm:$0xff] %v6547_v59  ;;  %v5114_v53 = vmul.f32 %v6547_v59, %v6547_v59 }
 0x22e   : > { %v5142_v43 = vadd.f32 %v5141_v22, %v5111_v52  ;;  %5042 = vst [vmem:[%s8803_s21 + $0x88] sm:$0xff] %v6548_v15  ;;  %v5073_v38 = vadd.f32 %v6548_v15, %v5072_v19  ;;  %v5112_v56 = vmul.f32 %v6548_v15, %v6548_v15 }
 0x22f   : > { %v6503_v1 = vpop.f32.mrb[20].mxu0 }
 0x230   : > { %v5074_v63 = vadd.f32 %v6545_v10, %v5073_v38  ;;  %v5143_v20 = vadd.f32 %v5142_v43, %v5112_v56  ;;  %v6311_v29 = vpop.f32.mrb[20].mxu1  ;;  %v4946_v44 = vpop.f32.mrb[21].mxu0 }
 0x231   : > { %v6549_v35 = vadd.f32 %v6503_v1, %v6311_v29  ;;  %v2809_v4 = vpop.f32.mrb[21].mxu1  ;;  %v6504_v57 = vpop.f32.mrb[22].mxu0 }
 0x232   : > { %v5144_v7 = vadd.f32 %v5143_v20, %v5113_v31  ;;  %v6550_v25 = vadd.f32 %v4946_v44, %v2809_v4  ;;  %v5075_v16 = vadd.f32 %v6547_v59, %v5074_v63  ;;  %v6312_v54 = vpop.f32.mrb[22].mxu1  ;;  %v4949_v13 = vpop.f32.mrb[23].mxu0 }
 0x233   : > { %5047 = vst [vmem:[%s8803_s21 + $0xb0] sm:$0xff] %v6549_v35  ;;  %v6551_v60 = vadd.f32 %v6504_v57, %v6312_v54  ;;  %v2812_v0 = vpop.f32.mrb[23].mxu1  ;;  %v5117_v24 = vmul.f32 %v6549_v35, %v6549_v35 }
 0x234   : > { %5045 = vst [vmem:[%s8803_s21 + $0xa0] sm:$0xff] %v6550_v25  ;;  %v5076_v27 = vadd.f32 %v6550_v25, %v5075_v16  ;;  %v5115_v46 = vmul.f32 %v6550_v25, %v6550_v25  ;;  %v5145_v2 = vadd.f32 %v5144_v7, %v5114_v53  ;;  %v6552_v42 = vadd.f32 %v4949_v13, %v2812_v0 }
 0x235   : > { %5048 = vst [vmem:[%s8803_s21 + $0xb8] sm:$0xff] %v6551_v60  ;;  %v5118_v12 = vmul.f32 %v6551_v60, %v6551_v60 }
 0x236   : > { %v5146_v55 = vadd.f32 %v5145_v2, %v5115_v46  ;;  %5046 = vst [vmem:[%s8803_s21 + $0xa8] sm:$0xff] %v6552_v42  ;;  %v5077_v49 = vadd.f32 %v6552_v42, %v5076_v27  ;;  %v5116_v28 = vmul.f32 %v6552_v42, %v6552_v42 }
 0x237   : > { %v6507_v17 = vpop.f32.mrb[24].mxu0 }
 0x238   : > { %v5078_v40 = vadd.f32 %v6549_v35, %v5077_v49  ;;  %v5147_v21 = vadd.f32 %v5146_v55, %v5116_v28  ;;  %v6315_v37 = vpop.f32.mrb[24].mxu1  ;;  %v4962_v48 = vpop.f32.mrb[25].mxu0 }
 0x239   : > { %v6553_v8 = vadd.f32 %v6507_v17, %v6315_v37  ;;  %v2825_v36 = vpop.f32.mrb[25].mxu1  ;;  %v6508_v47 = vpop.f32.mrb[26].mxu0 }
 0x23a   : > { %v5148_v51 = vadd.f32 %v5147_v21, %v5117_v24  ;;  %v6554_v32 = vadd.f32 %v4962_v48, %v2825_v36  ;;  %v5079_v5 = vadd.f32 %v6551_v60, %v5078_v40  ;;  %v6316_v61 = vpop.f32.mrb[26].mxu1  ;;  %v4965_v62 = vpop.f32.mrb[27].mxu0 }
 0x23b   : > { %5051 = vst [vmem:[%s8803_s21 + $0xd0] sm:$0xff] %v6553_v8  ;;  %v6555_v41 = vadd.f32 %v6508_v47, %v6316_v61  ;;  %v2828_v6 = vpop.f32.mrb[27].mxu1  ;;  %v5121_v39 = vmul.f32 %v6553_v8, %v6553_v8 }
 0x23c   : > { %5049 = vst [vmem:[%s8803_s21 + $0xc0] sm:$0xff] %v6554_v32  ;;  %v5080_v45 = vadd.f32 %v6554_v32, %v5079_v5  ;;  %v5119_v9 = vmul.f32 %v6554_v32, %v6554_v32  ;;  %v5149_v26 = vadd.f32 %v5148_v51, %v5118_v12  ;;  %v6556_v18 = vadd.f32 %v4965_v62, %v2828_v6 }
 0x23d   : > { %5052 = vst [vmem:[%s8803_s21 + $0xd8] sm:$0xff] %v6555_v41  ;;  %v5122_v30 = vmul.f32 %v6555_v41, %v6555_v41 }
 0x23e   : > { %v5150_v34 = vadd.f32 %v5149_v26, %v5119_v9  ;;  %5050 = vst [vmem:[%s8803_s21 + $0xc8] sm:$0xff] %v6556_v18  ;;  %v5081_v33 = vadd.f32 %v6556_v18, %v5080_v45  ;;  %v5120_v14 = vmul.f32 %v6556_v18, %v6556_v18 }
 0x23f   : > { %v6511_v10 = vpop.f32.mrb[28].mxu0 }
 0x240   : > { %v5082_v11 = vadd.f32 %v6553_v8, %v5081_v33  ;;  %v5151_v50 = vadd.f32 %v5150_v34, %v5120_v14  ;;  %v6319_v23 = vpop.f32.mrb[28].mxu1  ;;  %v4978_v3 = vpop.f32.mrb[29].mxu0 }
 0x241   : > { %v6557_v58 = vadd.f32 %v6511_v10, %v6319_v23  ;;  %v2841_v22 = vpop.f32.mrb[29].mxu1  ;;  %v6512_v59 = vpop.f32.mrb[30].mxu0 }
 0x242   : > { %v5152_v19 = vadd.f32 %v5151_v50, %v5121_v39  ;;  %v6558_v52 = vadd.f32 %v4978_v3, %v2841_v22  ;;  %v5083_v15 = vadd.f32 %v6555_v41, %v5082_v11  ;;  %v6320_v43 = vpop.f32.mrb[30].mxu1  ;;  %v4981_v38 = vpop.f32.mrb[31].mxu0 }
 0x243   : > { %5055 = vst [vmem:[%s8803_s21 + $0xf0] sm:$0xff] %v6557_v58  ;;  %v6559_v56 = vadd.f32 %v6512_v59, %v6320_v43  ;;  %v2844_v1 = vpop.f32.mrb[31].mxu1  ;;  %v5125_v57 = vmul.f32 %v6557_v58, %v6557_v58 }
 0x244   : > { %5053 = vst [vmem:[%s8803_s21 + $0xe0] sm:$0xff] %v6558_v52  ;;  %v5084_v31 = vadd.f32 %v6558_v52, %v5083_v15  ;;  %v5123_v63 = vmul.f32 %v6558_v52, %v6558_v52  ;;  %v5153_v20 = vadd.f32 %v5152_v19, %v5122_v30  ;;  %v6560_v29 = vadd.f32 %v4981_v38, %v2844_v1 }
 0x245   : > { %5056 = vst [vmem:[%s8803_s21 + $0xf8] sm:$0xff] %v6559_v56  ;;  %v5126_v25 = vmul.f32 %v6559_v56, %v6559_v56 }
 0x246   : > { %v5154_v44 = vadd.f32 %v5153_v20, %v5123_v63  ;;  %5054 = vst [vmem:[%s8803_s21 + $0xe8] sm:$0xff] %v6560_v29  ;;  %v5085_v35 = vadd.f32 %v6560_v29, %v5084_v31  ;;  %v5124_v4 = vmul.f32 %v6560_v29, %v6560_v29 }
 0x248   : > { %v5086_v53 = vadd.f32 %v6557_v58, %v5085_v35  ;;  %v5155_v7 = vadd.f32 %v5154_v44, %v5124_v4 }
 0x24a   : > { %v5087_v16 = vadd.f32 %v6559_v56, %v5086_v53  ;;  %v5156_v54 = vadd.f32 %v5155_v7, %v5125_v57 }
 0x24c   : > { %v5088_v13 = vrot.slane %v5087_v16, 4  ;;  %v5157_v60 = vadd.f32 %v5156_v54, %v5126_v25 }
 0x24e   : > { %v5089_v0 = vadd.f32 %v5088_v13, %v5087_v16  ;;  %v5158_v27 = vrot.slane %v5157_v60, 4 }
 0x250   : > { %v5090_v46 = vrot.slane %v5089_v0, 2  ;;  %v5159_v2 = vadd.f32 %v5158_v27, %v5157_v60 }
 0x252   : > { %v5091_v42 = vadd.f32 %v5090_v46, %v5089_v0  ;;  %v5160_v55 = vrot.slane %v5159_v2, 2 }
 0x254   : > { %v5092_v49 = vrot.slane %v5091_v42, 1  ;;  %v5161_v28 = vadd.f32 %v5160_v55, %v5159_v2 }
 0x256   : > { %v5093_v17 = vadd.f32 %v5092_v49, %v5091_v42  ;;  %v5162_v24 = vrot.slane %v5161_v28, 1 }
 0x258   : > { %5094 = vst [vmem:[%s211_s24] sm:$0x1] %v5093_v17  ;;  %v5163_v40 = vadd.f32 %v5162_v24, %v5161_v28 }
 0x25a   : > { %5164 = vst [vmem:[%s214_s27] sm:$0x1] %v5163_v40 }
 0x25b PF: > { %s15_s15 = sadd.s32 1, %s6990_s15  }
 0x25c   : > { %p12_p4 = scmp.ge.s32.totalorder %s15_s15, 4  }
 0x25e   :  { %14 = sbr.rel (!%p12_p4) target bundleno = 1 (0x1), region = 92 }

// kernel: unet_forward.28
= control target key start
LH: loop header
LB: loop body
LE: loop exit
PB: predicated region body
PF: predicated region fallthrough
CT: control target
= control target key end

     0   :  { %s2473_s15 = smov 0   ;;  %s2899_s0 = inlined_call_operand.vmem [shape: bf16[2,6,10,128], index: 0, kind: input, shape index: {}]   ;;  %s2900_s1 = inlined_call_operand.vmem [shape: bf16[3,3,128,128], index: 1, kind: input, shape index: {}]   ;;  %s2901_s2 = inlined_call_operand.vmem [shape: f32[2,4,8,128], index: 2, kind: output, shape index: {0}]   ;;  %s2902_s3 = inlined_call_operand.vmem [shape: f32[2,1,128], index: 3, kind: output, shape index: {1}]   ;;  %s2903_s4 = inlined_call_operand.vmem [shape: f32[2,1,128], index: 4, kind: output, shape index: {2}]  }
   0x1 LB: > { %s1778_s16 = sadd.s32 4294967295, %s2446_s15   ;;  %p1782_p0 = scmp.ge.s32.totalorder %s2446_s15, 1  ;;  %s2446_s15 = sphi %s2473_s15, %s15_s15  }
   0x2   : > { %p167_p1 = scmp.lt.s32.totalorder %s2446_s15, 3 }
   0x4   : > { %p168_p2 = pnand %p1782_p0, %p167_p1 }
   0x5   : > { %v2362_v0 = vld [vmem:[%s2900_s1 + $0x40] sm:$0xff] (!%p168_p2)   ;;  %p199_p3 = scmp.lt.s32.totalorder (!%p168_p2), %s1778_s16, 1  ;;  %v2364_v2 = vld [vmem:[%s2900_s1 + $0x48] sm:$0xff] (!%p168_p2)   ;;  %v2366_v4 = vld [vmem:[%s2900_s1 + $0x50] sm:$0xff] (!%p168_p2)   ;;  %vm240_vm0 = vsmask.f32 (!%p168_p2), 3328 }
   0x6   : > { %171 = sbr.rel (%p168_p2) target bundleno = 410 (0x19a), region = 28  ;;  %v2363_v1 = vld [vmem:[%s2900_s1 + $0x100] sm:$0xff] (!%p168_p2)   ;;  %2141 = vmatprep.subr.bf16.mxu1 (!%p168_p2), %v2362_v0  ;;  %v2365_v3 = vld [vmem:[%s2900_s1 + $0x108] sm:$0xff] (!%p168_p2)   ;;  %v2367_v5 = vld [vmem:[%s2900_s1 + $0x110] sm:$0xff] (!%p168_p2)   ;;  %vm241_vm1 = vsmask.f32 (!%p168_p2), 7440 }
   0x7   : > { %2221 = vmatprep.subr.bf16.mxu0 (!%p168_p2), %v2363_v1  ;;  %2142 = vmatpush3.bf16.msra.mxu1 (!%p168_p2), %v2362_v0  ;;  %v2368_v6 = vld [vmem:[%s2900_s1 + $0x58] sm:$0xff] (!%p168_p2)   ;;  %v2370_v8 = vld [vmem:[%s2900_s1 + $0x60] sm:$0xff] (!%p168_p2)   ;;  %v2372_v10 = vld [vmem:[%s2900_s1 + $0x68] sm:$0xff] (!%p168_p2)   ;;  %vm542_vm3 = vcmask (!%p168_p2), 1042432   ;;  %vm543_vm4 = vcmask (!%p168_p2), 1046532  }
   0x8   : > { %2222 = vmatpush3.bf16.msra.mxu0 (!%p168_p2), %v2363_v1  ;;  %2143 = vmatprep.subr.bf16.mxu1 (!%p168_p2), %v2364_v2  ;;  %v2369_v7 = vld [vmem:[%s2900_s1 + $0x118] sm:$0xff] (!%p168_p2)   ;;  %v2371_v9 = vld [vmem:[%s2900_s1 + $0x120] sm:$0xff] (!%p168_p2)   ;;  %v2373_v14 = vld [vmem:[%s2900_s1 + $0x128] sm:$0xff] (!%p168_p2)  }
   0x9   : > { %2223 = vmatprep.subr.bf16.mxu0 (!%p168_p2), %v2365_v3  ;;  %v2374_v22 = vld [vmem:[%s2900_s1 + $0x70] sm:$0xff] (!%p168_p2)   ;;  %v2376_v37 = vld [vmem:[%s2900_s1 + $0x78] sm:$0xff] (!%p168_p2)   ;;  %vm2562_vm2 = vmor (!%p168_p2), %vm240_vm0, %vm241_vm1 }
   0xa   : > { %v2375_v23 = vld [vmem:[%s2900_s1 + $0x130] sm:$0xff] (!%p168_p2)   ;;  %v2377_v47 = vld [vmem:[%s2900_s1 + $0x138] sm:$0xff] (!%p168_p2)   ;;  %v2378_v63 = vld [vmem:[%s2900_s1] sm:$0xff] (!%p168_p2)  }
   0xb   : > { %2144 = vmatpush3.bf16.msra.mxu1 (!%p168_p2), %v2364_v2  ;;  %v2594_v1 = vld [vmem:[%s2900_s1 + $0x140] sm:$0xff] (!%p168_p2)   ;;  %vm2635_vm5 = vmor (!%p168_p2), %vm542_vm3, %vm543_vm4  ;;  %v2433_v38 = vld [vmem:[%s2900_s1 + $0x208] sm:$0xff] (!%p168_p2)  }
   0xc   : > { %2224 = vmatpush3.bf16.msra.mxu0 (!%p168_p2), %v2365_v3  ;;  %2145 = vmatprep.subr.bf16.mxu1 (!%p168_p2), %v2366_v4 }
   0xd   : > { %s2909_s16 = smov (!%p199_p3, %s1778_s16), 1  ;;  %2225 = vmatprep.subr.bf16.mxu0 %v2367_v5 }
   0xe   : > { %s2353_s7 = smul.u32 48, %s2909_s16  ;;  %s211_s5 = scalar_lea.vmem %s2902_s3, %s2909_s16 }
   0xf   : > { %2146 = vmatpush3.bf16.msra.mxu1 %v2366_v4  ;;  %s214_s8 = scalar_lea.vmem %s2903_s4, %s2909_s16 }
  0x10   : > { %2226 = vmatpush3.bf16.msra.mxu0 %v2367_v5  ;;  %2147 = vmatprep.subr.bf16.mxu1 %v2368_v6  ;;  %s2517_s14 = scalar_lea.vmem %s2899_s0, %s2353_s7 }
  0x11   : > { %2227 = vmatprep.subr.bf16.mxu0 %v2369_v7  ;;  %v2523_v11 = vld [vmem:[%s2517_s14] sm:$0xf]  ;;  %v2526_v12 = vld [vmem:[%s2517_s14 + $0x8] sm:$0xf]  ;;  %v2529_v13 = vld [vmem:[%s2517_s14 + $0x4] sm:$0x1] }
  0x12   : > { %v2535_v15 = vld [vmem:[%s2517_s14 + $0xc] sm:$0x1]  ;;  %v244_v16 = vshrl.u32 %v2523_v11, 16  ;;  %v247_v17 = vshll.u32 %v2523_v11, 16  ;;  %v253_v18 = vshll.u32 %v2529_v13, 16  ;;  %v258_v19 = vshrl.u32 %v2526_v12, 16 }
  0x13   : > { %2148 = vmatpush3.bf16.msra.mxu1 %v2368_v6  ;;  %v261_v20 = vshll.u32 %v2526_v12, 16  ;;  %v267_v21 = vshll.u32 %v2535_v15, 16  ;;  %v1882_v30 = vld [vmem:[%s2517_s14 + $0x8] sm:$0xf]  ;;  %v2551_v31 = vld [vmem:[%s2517_s14 + $0xc] sm:$0x1] }
  0x14   : > { %2228 = vmatpush3.bf16.msra.mxu0 %v2369_v7  ;;  %2149 = vmatprep.subr.bf16.mxu1 %v2370_v8  ;;  %v246_v24 = vrot.slane %v244_v16, 4  ;;  %v249_v25 = vrot.slane %v247_v17, 5  ;;  %v255_v26 = vrot.slane %v253_v18, 5  ;;  %v260_v27 = vrot.slane %v258_v19, 4  ;;  %v1884_v33 = vld [vmem:[%s2517_s14 + $0x10] sm:$0xf] }
  0x15   : > { %2229 = vmatprep.subr.bf16.mxu0 %v2371_v9  ;;  %v263_v28 = vrot.slane %v261_v20, 5  ;;  %v269_v29 = vrot.slane %v267_v21, 5  ;;  %v2555_v34 = vld [vmem:[%s2517_s14 + $0x14] sm:$0x1]  ;;  %v831_v35 = vshrl.u32 %v1882_v30, 16  ;;  %v834_v36 = vshll.u32 %v1882_v30, 16 }
  0x16   : > { %v250_v32 = vor.u32 %v249_v25, %v246_v24  ;;  %v840_v40 = vshll.u32 %v2551_v31, 16  ;;  %v845_v41 = vshrl.u32 %v1884_v33, 16  ;;  %v848_v42 = vshll.u32 %v1884_v33, 16  ;;  %v2572_v51 = vld [vmem:[%s2517_s14 + $0x10] sm:$0xf] }
  0x17   : > { %2150 = vmatpush3.bf16.msra.mxu1 %v2370_v8  ;;  %v264_v39 = vor.u32 %v263_v28, %v260_v27  ;;  %v833_v44 = vrot.slane %v831_v35, 4  ;;  %v836_v45 = vrot.slane %v834_v36, 5  ;;  %v854_v46 = vshll.u32 %v2555_v34, 16  ;;  %v2577_v55 = vld [vmem:[%s2517_s14 + $0x18] sm:$0xf] }
  0x18   : > { %2230 = vmatpush3.bf16.msra.mxu0 %v2371_v9  ;;  %2151 = vmatprep.subr.bf16.mxu1 %v2372_v10  ;;  %v251_v43 = vrot.slane %v250_v32, 4  ;;  %v847_v49 = vrot.slane %v845_v41, 4  ;;  %v850_v50 = vrot.slane %v848_v42, 5  ;;  %v842_v54 = vrot.slane %v840_v40, 5  ;;  %v2580_v56 = vld [vmem:[%s2517_s14 + $0x14] sm:$0x1] }
  0x19   : > { %2231 = vmatprep.subr.bf16.mxu0 %v2373_v14  ;;  %v265_v48 = vrot.slane %v264_v39, 4  ;;  %v837_v53 = vor.u32 %v836_v45, %v833_v44  ;;  %v856_v59 = vrot.slane %v854_v46, 5  ;;  %v2585_v60 = vld [vmem:[%s2517_s14 + $0x1c] sm:$0x1]  ;;  %v272_v61 = vshrl.u32 %v2572_v51, 16 }
  0x1a   : > { %v256_v52 = vsel %vm2562_vm2, %v251_v43, %v255_v26  ;;  %v851_v58 = vor.u32 %v850_v50, %v847_v49  ;;  %v275_v2 = vshll.u32 %v2572_v51, 16  ;;  %v281_v3 = vshll.u32 %v2580_v56, 16  ;;  %v1886_v8 = vld [vmem:[%s2517_s14 + $0x18] sm:$0xf]  ;;  %v2605_v16 = vld [vmem:[%s2517_s14 + $0x1c] sm:$0x1] }
  0x1b   : > { %2152 = vmatpush3.bf16.msra.mxu1 %v2372_v10  ;;  %v270_v57 = vsel %vm2562_vm2, %v265_v48, %v269_v29  ;;  %v838_v0 = vrot.slane %v837_v53, 4  ;;  %v274_v5 = vrot.slane %v272_v61, 4  ;;  %v286_v6 = vshrl.u32 %v2577_v55, 16  ;;  %v1888_v17 = vld [vmem:[%s2517_s14 + $0x20] sm:$0xf]  ;;  %v2380_v43 = vld [vmem:[%s2900_s1 + $0x8] sm:$0xff]  }
  0x1c   : > { %2232 = vmatpush3.bf16.msra.mxu0 %v2373_v14  ;;  %2153 = vmatprep.subr.bf16.mxu1 %v2374_v22  ;;  %v1802_v62 = vcombine.low %v256_v52, %v270_v57  ;;  %v852_v4 = vrot.slane %v851_v58, 4  ;;  %v289_v7 = vshll.u32 %v2577_v55, 16  ;;  %v277_v10 = vrot.slane %v275_v2, 5  ;;  %v2611_v21 = vld [vmem:[%s2517_s14 + $0x24] sm:$0x1]  ;;  %v2381_v58 = vld [vmem:[%s2900_s1 + $0x148] sm:$0xff]  }
  0x1d   : > { %2233 = vmatprep.subr.bf16.mxu0 %v2375_v23  ;;  %v843_v9 = vsel %vm2562_vm2, %v838_v0, %v842_v54  ;;  %v295_v14 = vshll.u32 %v2585_v60, 16  ;;  %v288_v19 = vrot.slane %v286_v6, 4  ;;  %v283_v24 = vrot.slane %v281_v3, 5  ;;  %v2383_v0 = vld [vmem:[%s2900_s1 + $0x150] sm:$0xff]   ;;  %v1916_v2 = vld [vmem:[%s2517_s14 + $0x8] sm:$0xe] }
  0x1e   : > { %2157 = vmatprep.mubr.bf16.mxu1 %v1802_v62  ;;  %v857_v18 = vsel %vm2562_vm2, %v852_v4, %v856_v59  ;;  %v291_v20 = vrot.slane %v289_v7, 5  ;;  %v859_v27 = vshrl.u32 %v1886_v8, 16  ;;  %v862_v28 = vshll.u32 %v1886_v8, 16  ;;  %v2384_v62 = vld [vmem:[%s2900_s1 + $0x18] sm:$0xff]   ;;  %v1917_v3 = vld [vmem:[%s2517_s14 + $0x10] sm:$0xe] }
  0x1f   : > { %2154 = vmatpush3.bf16.msra.mxu1 %v2374_v22  ;;  %v1906_v22 = vcombine.low %v843_v9, %v857_v18  ;;  %v297_v25 = vrot.slane %v295_v14, 5  ;;  %v868_v29 = vshll.u32 %v2605_v16, 16  ;;  %v873_v32 = vshrl.u32 %v1888_v17, 16  ;;  %v2388_v8 = vld [vmem:[%s2900_s1 + $0x28] sm:$0xff]   ;;  %v2387_v9 = vld [vmem:[%s2900_s1 + $0x160] sm:$0xff]  }
  0x20   : > { %2234 = vmatpush3.bf16.msra.mxu0 %v2375_v23  ;;  %2155 = vmatprep.subr.bf16.mxu1 %v2376_v37  ;;  %v278_v23 = vor.u32 %v277_v10, %v274_v5  ;;  %v292_v26 = vor.u32 %v291_v20, %v288_v19  ;;  %v876_v33 = vshll.u32 %v1888_v17, 16  ;;  %v882_v35 = vshll.u32 %v2611_v21, 16  ;;  %v2390_v10 = vld [vmem:[%s2900_s1 + $0x30] sm:$0xff]   ;;  %v2389_v17 = vld [vmem:[%s2900_s1 + $0x168] sm:$0xff]  }
  0x21   : > { %2235 = vmatprep.subr.bf16.mxu0 %v2377_v47  ;;  %2237 = vmatprep.mubr.bf16.mxu0 %v1906_v22  ;;  %v864_v39 = vrot.slane %v862_v28, 5  ;;  %v875_v41 = vrot.slane %v873_v32, 4  ;;  %v1812_v44 = vcombine.low %v2523_v11, %v2526_v12  ;;  %v2382_v12 = vld [vmem:[%s2900_s1 + $0x10] sm:$0xff]   ;;  %v1026_v61 = vrot.slane %v2551_v31, 5  ;;  %v2386_v31 = vld [vmem:[%s2900_s1 + $0x20] sm:$0xff]  }
  0x22   : > { %v279_v30 = vrot.slane %v278_v23, 4  ;;  %v293_v36 = vrot.slane %v292_v26, 4  ;;  %v878_v42 = vrot.slane %v876_v33, 5  ;;  %v884_v48 = vrot.slane %v882_v35, 5  ;;  %v2391_v22 = vld [vmem:[%s2900_s1 + $0x170] sm:$0xff]  }
  0x23   : > { %2156 = vmatpush3.bf16.msra.mxu1 %v2376_v37  ;;  %v861_v37 = vrot.slane %v859_v27, 4  ;;  %v1920_v4 = vrot.slane %v1916_v2, 9  ;;  %v1921_v5 = vrot.slane %v1917_v3, 9  ;;  %v547_v14 = vrot.slane %v2529_v13, 5  ;;  %v2392_v13 = vld [vmem:[%s2900_s1 + $0x38] sm:$0xff]   ;;  %v2408_v2 = vld [vmem:[%s2900_s1 + $0xb0] sm:$0xff]  }
  0x24   : > { %2236 = vmatpush3.bf16.msra.mxu0 %v2377_v47  ;;  %2161 = vmatprep.subr.bf16.mxu1 %v2378_v63  ;;  %v284_v40 = vsel %vm2562_vm2, %v279_v30, %v283_v24  ;;  %v298_v45 = vsel %vm2562_vm2, %v293_v36, %v297_v25  ;;  %v870_v47 = vrot.slane %v868_v29, 5  ;;  %v879_v50 = vor.u32 %v878_v42, %v875_v41  ;;  %v1918_v23 = vld [vmem:[%s2517_s14 + $0x18] sm:$0xe]  ;;  %v1919_v24 = vld [vmem:[%s2517_s14 + $0x20] sm:$0xe]  ;;  %v2407_v3 = vld [vmem:[%s2900_s1 + $0x1a8] sm:$0xff]  }
  0x25   : > { %2241 = vmatprep.subr.bf16.mxu0 %v2594_v1  ;;  %v865_v46 = vor.u32 %v864_v39, %v861_v37  ;;  %v1803_v49 = vcombine.low %v284_v40, %v298_v45  ;;  %v551_v18 = vrot.slane %v2535_v15, 5  ;;  %v555_v19 = vrot.slane %v2580_v56, 5  ;;  %v2395_v56 = vld [vmem:[%s2900_s1 + $0x80] sm:$0xff]   ;;  %v531_v26 = vld [vmem:[%s2517_s14 + $0x8] sm:$0xe] }
  0x26   : > { %v880_v53 = vrot.slane %v879_v50, 4  ;;  %v1034_v20 = vrot.slane %v2605_v16, 5  ;;  %v1038_v15 = vrot.slane %v2611_v21, 5  ;;  %v530_v16 = vld [vmem:[%s2517_s14] sm:$0xe]  ;;  %v1922_v25 = vrot.slane %v1918_v23, 9 }
  0x27   : > { %v866_v52 = vrot.slane %v865_v46, 4  ;;  %2158 = vmatmul.mubr.bf16.vlgmr.msra.gmra.mrb[0].mxu1 %v1803_v49  ;;  %v1822_v27 = vrot.slane %v530_v16, 9  ;;  %v1923_v28 = vrot.slane %v1919_v24, 9  ;;  %v1823_v29 = vrot.slane %v531_v26, 9  ;;  %v2393_v21 = vld [vmem:[%s2900_s1 + $0x178] sm:$0xff]  }
  0x28   : > { %2162 = vmatpush3.bf16.msra.mxu1 %v2378_v63  ;;  %2177 = vmatprep.mubr.bf16.mxu1 %v1812_v44  ;;  %v885_v11 = vsel %vm2562_vm2, %v880_v53, %v884_v48  ;;  %v1030_v63 = vrot.slane %v2555_v34, 5  ;;  %v2385_v34 = vld [vmem:[%s2900_s1 + $0x158] sm:$0xff]   ;;  %v559_v30 = vrot.slane %v2585_v60, 5  ;;  %v1813_v33 = vcombine.low %v2572_v51, %v2577_v55  ;;  %v532_v36 = vld [vmem:[%s2517_s14 + $0x10] sm:$0xe]  ;;  %v2398_v51 = vld [vmem:[%s2900_s1 + $0x88] sm:$0xff]  }
  0x29   : > { %v871_v54 = vsel %vm2562_vm2, %v866_v52, %v870_v47  ;;  %2163 = vmatprep.subr.bf16.mxu1 %v2380_v43  ;;  %v548_v32 = vsel %vm2635_vm5, %v1822_v27, %v547_v14  ;;  %v552_v35 = vsel %vm2635_vm5, %v1823_v29, %v551_v18  ;;  %v533_v37 = vld [vmem:[%s2517_s14 + $0x18] sm:$0xe]  ;;  %v1824_v40 = vrot.slane %v532_v36, 9  ;;  %v2396_v55 = vld [vmem:[%s2900_s1 + $0x180] sm:$0xff]   ;;  %v2399_v47 = vld [vmem:[%s2900_s1 + $0x188] sm:$0xff]  }
  0x2a   : > { %v1907_v57 = vcombine.low %v871_v54, %v885_v11  ;;  %v1031_v6 = vsel %vm2635_vm5, %v1921_v5, %v1030_v63  ;;  %v1842_v39 = vcombine.low %v548_v32, %v552_v35  ;;  %v1825_v60 = vrot.slane %v533_v37, 9  ;;  %v2400_v48 = vld [vmem:[%s2900_s1 + $0x90] sm:$0xff]   ;;  %v2402_v50 = vld [vmem:[%s2900_s1 + $0x98] sm:$0xff]   ;;  %v2404_v53 = vld [vmem:[%s2900_s1 + $0xa0] sm:$0xff]  }
  0x2b   : > { %v1035_v41 = vsel %vm2635_vm5, %v1922_v25, %v1034_v20  ;;  %v1039_v42 = vsel %vm2635_vm5, %v1923_v28, %v1038_v15  ;;  %v2413_v49 = vld [vmem:[%s2517_s14 + $0x10] ss:$8 sps:$4 sm:$0xff]   ;;  %v2406_v11 = vld [vmem:[%s2900_s1 + $0xa8] sm:$0xff]   ;;  %v2759_v5 = vld [vmem:[%s2517_s14 + $0x1c] sm:$0x1] }
  0x2c   : > { %2238 = vmatmul.mubr.bf16.vlgmr.msra.gmra.mrb[0].mxu0 %v1907_v57  ;;  %2164 = vmatpush3.bf16.msra.mxu1 %v2380_v43  ;;  %v2714_v43 = vsel %vm2635_vm5, %v1824_v40, %v555_v19  ;;  %v2718_v44 = vsel %vm2635_vm5, %v1825_v60, %v559_v30  ;;  %v1941_v46 = vcombine.low %v1035_v41, %v1039_v42  ;;  %v2401_v52 = vld [vmem:[%s2900_s1 + $0x190] sm:$0xff]   ;;  %v2403_v54 = vld [vmem:[%s2900_s1 + $0x198] sm:$0xff]   ;;  %v2405_v57 = vld [vmem:[%s2900_s1 + $0x1a0] sm:$0xff]  }
  0x2d   : > { %2242 = vmatpush3.bf16.msra.mxu0 %v2594_v1  ;;  %2165 = vmatprep.subr.bf16.mxu1 %v2382_v12  ;;  %v1027_v1 = vsel %vm2635_vm5, %v1920_v4, %v1026_v61  ;;  %v1843_v45 = vcombine.low %v2714_v43, %v2718_v44  ;;  %v2756_v4 = vld [vmem:[%s2517_s14 + $0x14] sm:$0x1]  ;;  %v2412_v18 = vld [vmem:[%s2900_s1 + $0xc0] sm:$0xff]   ;;  %v2411_v19 = vld [vmem:[%s2900_s1 + $0x1b8] sm:$0xff]  }
  0x2e   : > { %2243 = vmatprep.subr.bf16.mxu0 %v2381_v58  ;;  %v1940_v7 = vcombine.low %v1027_v1, %v1031_v6  ;;  %v2430_v24 = vld [vmem:[%s2517_s14 + $0x8] ss:$8 sps:$4 sm:$0xff]   ;;  %v2420_v30 = vld [vmem:[%s2900_s1 + $0xd8] sm:$0xff]   ;;  %v2422_v32 = vld [vmem:[%s2900_s1 + $0xe0] sm:$0xff]  }
  0x2f   : > { %v2416_v15 = vld [vmem:[%s2900_s1 + $0xc8] sm:$0xff]   ;;  %v2418_v27 = vld [vmem:[%s2900_s1 + $0xd0] sm:$0xff]   ;;  %v1984_v35 = vld [vmem:[%s2517_s14 + $0x20] sm:$0xf] }
  0x30   : > { %2166 = vmatpush3.bf16.msra.mxu1 %v2382_v12  ;;  %2257 = vmatprep.mubr.bf16.mxu0 %v1940_v7  ;;  %v1980_v12 = vld [vmem:[%s2517_s14 + $0x10] sm:$0xf]  ;;  %v2410_v7 = vld [vmem:[%s2900_s1 + $0xb8] sm:$0xff]   ;;  %v2415_v26 = vld [vmem:[%s2517_s14 + $0x20] ss:$8 sps:$4 sm:$0xff]   ;;  %v1341_v40 = vshll.u32 %v1984_v35, 16 }
  0x31   : > { %2244 = vmatpush3.bf16.msra.mxu0 %v2381_v58  ;;  %2167 = vmatprep.subr.bf16.mxu1 %v2384_v62  ;;  %v1982_v58 = vld [vmem:[%s2517_s14 + $0x18] sm:$0xf]  ;;  %v1310_v61 = vshrl.u32 %v1980_v12, 16  ;;  %v2417_v28 = vld [vmem:[%s2900_s1 + $0x1c8] sm:$0xff]   ;;  %v2423_v42 = vld [vmem:[%s2900_s1 + $0x1e0] sm:$0xff]  }
  0x32   : > { %2245 = vmatprep.subr.bf16.mxu0 %v2383_v0  ;;  %v1324_v63 = vshrl.u32 %v1982_v58, 16  ;;  %v1986_v36 = vld [vmem:[%s2517_s14 + $0x28] sm:$0xf]  ;;  %v1343_v43 = vrot.slane %v1341_v40, 5 }
  0x33   : > { %v2424_v37 = vld [vmem:[%s2900_s1 + $0xe8] sm:$0xff]   ;;  %v1352_v60 = vshrl.u32 %v1986_v36, 16  ;;  %v1355_v41 = vshll.u32 %v1986_v36, 16 }
  0x34   : > { %2168 = vmatpush3.bf16.msra.mxu1 %v2384_v62  ;;  %v1313_v62 = vshll.u32 %v1980_v12, 16  ;;  %v1326_v1 = vrot.slane %v1324_v63, 4  ;;  %v2014_v12 = vld [vmem:[%s2517_s14 + $0x10] sm:$0xe] }
  0x35   : > { %2246 = vmatpush3.bf16.msra.mxu0 %v2383_v0  ;;  %2169 = vmatprep.subr.bf16.mxu1 %v2386_v31  ;;  %v1327_v0 = vshll.u32 %v1982_v58, 16  ;;  %v1354_v44 = vrot.slane %v1352_v60, 4 }
  0x36   : > { %2247 = vmatprep.subr.bf16.mxu0 %v2385_v34 }
  0x37   : > { %v1329_v6 = vrot.slane %v1327_v0, 5  ;;  %v2429_v0 = vld [vmem:[%s2900_s1 + $0x1f8] sm:$0xff]  }
  0x38   : > { %2170 = vmatpush3.bf16.msra.mxu1 %v2386_v31  ;;  %v1312_v31 = vrot.slane %v1310_v61, 4 }
  0x39   : > { %2248 = vmatpush3.bf16.msra.mxu0 %v2385_v34  ;;  %2171 = vmatprep.subr.bf16.mxu1 %v2388_v8  ;;  %v1315_v34 = vrot.slane %v1313_v62, 5 }
  0x3a   : > { %2249 = vmatprep.subr.bf16.mxu0 %v2387_v9 }
  0x3b   : > { %v1316_v14 = vor.u32 %v1315_v34, %v1312_v31  ;;  %v1509_v34 = vrot.slane %v2759_v5, 5 }
  0x3c   : > { %2172 = vmatpush3.bf16.msra.mxu1 %v2388_v8  ;;  %v2409_v8 = vld [vmem:[%s2900_s1 + $0x1b0] sm:$0xff]  }
  0x3d   : > { %2250 = vmatpush3.bf16.msra.mxu0 %v2387_v9  ;;  %2173 = vmatprep.subr.bf16.mxu1 %v2390_v10  ;;  %v1319_v9 = vshll.u32 %v2756_v4, 16  ;;  %v1317_v20 = vrot.slane %v1316_v14, 4  ;;  %v2434_v14 = vld [vmem:[%s2900_s1 + $0x210] sm:$0xff]  }
  0x3e   : > { %2251 = vmatprep.subr.bf16.mxu0 %v2389_v17 }
  0x40   : > { %2174 = vmatpush3.bf16.msra.mxu1 %v2390_v10  ;;  %v1333_v10 = vshll.u32 %v2759_v5, 16 }
  0x41   : > { %2252 = vmatpush3.bf16.msra.mxu0 %v2389_v17  ;;  %2175 = vmatprep.subr.bf16.mxu1 %v2392_v13  ;;  %v1330_v17 = vor.u32 %v1329_v6, %v1326_v1  ;;  %v2431_v1 = vld [vmem:[%s2517_s14 + $0x18] ss:$8 sps:$4 sm:$0xff]  }
  0x42   : > { %2253 = vmatprep.subr.bf16.mxu0 %v2391_v22  ;;  %v1335_v23 = vrot.slane %v1333_v10, 5 }
  0x44   : > { %2176 = vmatpush3.bf16.msra.mxu1 %v2392_v13  ;;  %v1331_v13 = vrot.slane %v1330_v17, 4  ;;  %v2435_v17 = vld [vmem:[%s2900_s1 + $0x218] sm:$0xff]  }
  0x45   : > { %2254 = vmatpush3.bf16.msra.mxu0 %v2391_v22  ;;  %2181 = vmatprep.subr.bf16.mxu1 %v2395_v56  ;;  %v1321_v22 = vrot.slane %v1319_v9, 5 }
  0x46   : > { %2255 = vmatprep.subr.bf16.mxu0 %v2393_v21  ;;  %v1336_v25 = vsel %vm2562_vm2, %v1331_v13, %v1335_v23  ;;  %v2017_v13 = vld [vmem:[%s2517_s14 + $0x28] sm:$0xe] }
  0x47   : > { %2178 = vmatmul.mubr.bf16.vlgmr.msra.gmra.mrb[0].mxu1 %v1813_v33  ;;  %v1322_v16 = vsel %vm2562_vm2, %v1317_v20, %v1321_v22  ;;  %v2421_v33 = vld [vmem:[%s2900_s1 + $0x1d8] sm:$0xff]   ;;  %v2438_v20 = vld [vmem:[%s2900_s1 + $0x230] sm:$0xff]   ;;  %v2016_v22 = vld [vmem:[%s2517_s14 + $0x20] sm:$0xe] }
  0x48   : > { %2182 = vmatpush3.bf16.msra.mxu1 %v2395_v56  ;;  %2197 = vmatprep.mubr.bf16.mxu1 %v1842_v39  ;;  %v2414_v56 = vld [vmem:[%s2900_s1 + $0x1c0] sm:$0xff]   ;;  %v2004_v29 = vcombine.low %v1322_v16, %v1336_v25  ;;  %v1338_v39 = vshrl.u32 %v1984_v35, 16  ;;  %v2020_v23 = vrot.slane %v2016_v22, 9  ;;  %v2439_v16 = vld [vmem:[%s2900_s1 + $0x238] sm:$0xff]  }
  0x49   : > { %2256 = vmatpush3.bf16.msra.mxu0 %v2393_v21  ;;  %2183 = vmatprep.subr.bf16.mxu1 %v2398_v51  ;;  %v2419_v21 = vld [vmem:[%s2900_s1 + $0x1d0] sm:$0xff]  }
  0x4a   : > { %2261 = vmatprep.subr.bf16.mxu0 %v2396_v55 }
  0x4c   : > { %2258 = vmatmul.mubr.bf16.vlgmr.msra.gmra.mrb[0].mxu0 %v1941_v46  ;;  %2184 = vmatpush3.bf16.msra.mxu1 %v2398_v51  ;;  %v2426_v51 = vld [vmem:[%s2900_s1 + $0xf0] sm:$0xff]   ;;  %v2425_v46 = vld [vmem:[%s2900_s1 + $0x1e8] sm:$0xff]  }
  0x4d   : > { %2262 = vmatpush3.bf16.msra.mxu0 %v2396_v55  ;;  %2185 = vmatprep.subr.bf16.mxu1 %v2400_v48  ;;  %v1340_v55 = vrot.slane %v1338_v39, 4 }
  0x4e   : > { %2263 = vmatprep.subr.bf16.mxu0 %v2399_v47  ;;  %2277 = vmatprep.mubr.bf16.mxu0 %v2413_v49  ;;  %v2428_v49 = vld [vmem:[%s2900_s1 + $0xf8] sm:$0xff]  }
  0x50   : > { %2186 = vmatpush3.bf16.msra.mxu1 %v2400_v48  ;;  %v2826_v48 = vld [vmem:[%s2517_s14 + $0x2c] sm:$0x1] }
  0x51   : > { %2264 = vmatpush3.bf16.msra.mxu0 %v2399_v47  ;;  %2187 = vmatprep.subr.bf16.mxu1 %v2402_v50  ;;  %v2823_v47 = vld [vmem:[%s2517_s14 + $0x24] sm:$0x1] }
  0x52   : > { %2265 = vmatprep.subr.bf16.mxu0 %v2401_v52 }
  0x54   : > { %2188 = vmatpush3.bf16.msra.mxu1 %v2402_v50  ;;  %v1344_v50 = vor.u32 %v1343_v43, %v1340_v55 }
  0x55   : > { %2266 = vmatpush3.bf16.msra.mxu0 %v2401_v52  ;;  %2189 = vmatprep.subr.bf16.mxu1 %v2404_v53  ;;  %v1347_v52 = vshll.u32 %v2823_v47, 16 }
  0x56   : > { %2267 = vmatprep.subr.bf16.mxu0 %v2403_v54  ;;  %v1345_v58 = vrot.slane %v1344_v50, 4 }
  0x57   : > { %v1349_v61 = vrot.slane %v1347_v52, 5 }
  0x58   : > { %2190 = vmatpush3.bf16.msra.mxu1 %v2404_v53 }
  0x59   : > { %2268 = vmatpush3.bf16.msra.mxu0 %v2403_v54  ;;  %2191 = vmatprep.subr.bf16.mxu1 %v2406_v11  ;;  %v1361_v54 = vshll.u32 %v2826_v48, 16  ;;  %v1350_v6 = vsel %vm2562_vm2, %v1345_v58, %v1349_v61 }
  0x5a   : > { %2269 = vmatprep.subr.bf16.mxu0 %v2405_v57 }
  0x5b   : > { %v1363_v63 = vrot.slane %v1361_v54, 5 }
  0x5c   : > { %2192 = vmatpush3.bf16.msra.mxu1 %v2406_v11  ;;  %v2427_v11 = vld [vmem:[%s2900_s1 + $0x1f0] sm:$0xff]  }
  0x5d   : > { %2270 = vmatpush3.bf16.msra.mxu0 %v2405_v57  ;;  %2193 = vmatprep.subr.bf16.mxu1 %v2408_v2  ;;  %v2015_v57 = vld [vmem:[%s2517_s14 + $0x18] sm:$0xe]  ;;  %s2050_s14 = sshll.u32 %s2909_s16, 5 }
  0x5e   : > { %2271 = vmatprep.subr.bf16.mxu0 %v2407_v3  ;;  %v2019_v31 = vrot.slane %v2015_v57, 9  ;;  %s208_s28 = scalar_lea.vmem %s2901_s2, %s2050_s14 }
  0x60   : > { %2194 = vmatpush3.bf16.msra.mxu1 %v2408_v2  ;;  %v2018_v2 = vrot.slane %v2014_v12, 9  ;;  %v1510_v5 = vsel %vm2635_vm5, %v2019_v31, %v1509_v34 }
  0x61   : > { %2272 = vmatpush3.bf16.msra.mxu0 %v2407_v3  ;;  %2195 = vmatprep.subr.bf16.mxu1 %v2410_v7  ;;  %v1505_v3 = vrot.slane %v2756_v4, 5 }
  0x62   : > { %2273 = vmatprep.subr.bf16.mxu0 %v2409_v8 }
  0x63   : > { %v1506_v4 = vsel %vm2635_vm5, %v2018_v2, %v1505_v3 }
  0x64   : > { %2196 = vmatpush3.bf16.msra.mxu1 %v2410_v7  ;;  %v2038_v10 = vcombine.low %v1506_v4, %v1510_v5 }
  0x65   : > { %2274 = vmatpush3.bf16.msra.mxu0 %v2409_v8  ;;  %2201 = vmatprep.subr.bf16.mxu1 %v2412_v18  ;;  %v2432_v8 = vld [vmem:[%s2900_s1 + $0x200] sm:$0xff]  }
  0x66   : > { %2275 = vmatprep.subr.bf16.mxu0 %v2411_v19 }
  0x67   : > { %2198 = vmatmul.mubr.bf16.vlgmr.msra.gmra.mrb[0].mxu1 %v1843_v45  ;;  %v1357_v45 = vrot.slane %v1355_v41, 5 }
  0x68   : > { %2202 = vmatpush3.bf16.msra.mxu1 %v2412_v18  ;;  %2217 = vmatprep.mubr.bf16.mxu1 %v2430_v24  ;;  %v2436_v18 = vld [vmem:[%s2900_s1 + $0x220] sm:$0xff]   ;;  %v1513_v24 = vrot.slane %v2823_v47, 5 }
  0x69   : > { %2276 = vmatpush3.bf16.msra.mxu0 %v2411_v19  ;;  %2203 = vmatprep.subr.bf16.mxu1 %v2416_v15  ;;  %v1358_v53 = vor.u32 %v1357_v45, %v1354_v44  ;;  %v2437_v19 = vld [vmem:[%s2900_s1 + $0x228] sm:$0xff]  }
  0x6a   : > { %2281 = vmatprep.subr.bf16.mxu0 %v2414_v56  ;;  %v1514_v25 = vsel %vm2635_vm5, %v2020_v23, %v1513_v24 }
  0x6b   : > { %v1359_v62 = vrot.slane %v1358_v53, 4 }
  0x6c   : > { %2278 = vmatmul.mubr.bf16.vlgmr.msra.gmra.mrb[0].mxu0 %v2415_v26  ;;  %2204 = vmatpush3.bf16.msra.mxu1 %v2416_v15  ;;  %v2021_v15 = vrot.slane %v2017_v13, 9 }
  0x6d   : > { %2282 = vmatpush3.bf16.msra.mxu0 %v2414_v56  ;;  %2205 = vmatprep.subr.bf16.mxu1 %v2418_v27  ;;  %v1364_v7 = vsel %vm2562_vm2, %v1359_v62, %v1363_v63  ;;  %v1517_v56 = vrot.slane %v2826_v48, 5 }
  0x6e   : > { %2283 = vmatprep.subr.bf16.mxu0 %v2417_v28  ;;  %2297 = vmatprep.mubr.bf16.mxu0 %v2004_v29  ;;  %v2005_v9 = vcombine.low %v1350_v6, %v1364_v7 }
  0x6f   : > { %v1518_v26 = vsel %vm2635_vm5, %v2021_v15, %v1517_v56 }
  0x70   : > { %2206 = vmatpush3.bf16.msra.mxu1 %v2418_v27  ;;  %v2039_v27 = vcombine.low %v1514_v25, %v1518_v26 }
  0x71   : > { %2284 = vmatpush3.bf16.msra.mxu0 %v2417_v28  ;;  %2207 = vmatprep.subr.bf16.mxu1 %v2420_v30 }
  0x72   : > { %2285 = vmatprep.subr.bf16.mxu0 %v2419_v21 }
  0x74   : > { %2208 = vmatpush3.bf16.msra.mxu1 %v2420_v30 }
  0x75   : > { %2286 = vmatpush3.bf16.msra.mxu0 %v2419_v21  ;;  %2209 = vmatprep.subr.bf16.mxu1 %v2422_v32 }
  0x76   : > { %2287 = vmatprep.subr.bf16.mxu0 %v2421_v33 }
  0x78   : > { %2210 = vmatpush3.bf16.msra.mxu1 %v2422_v32 }
  0x79   : > { %2288 = vmatpush3.bf16.msra.mxu0 %v2421_v33  ;;  %2211 = vmatprep.subr.bf16.mxu1 %v2424_v37 }
  0x7a   : > { %2289 = vmatprep.subr.bf16.mxu0 %v2423_v42 }
  0x7c   : > { %2212 = vmatpush3.bf16.msra.mxu1 %v2424_v37 }
  0x7d   : > { %2290 = vmatpush3.bf16.msra.mxu0 %v2423_v42  ;;  %2213 = vmatprep.subr.bf16.mxu1 %v2426_v51 }
  0x7e   : > { %2291 = vmatprep.subr.bf16.mxu0 %v2425_v46 }
  0x80   : > { %2214 = vmatpush3.bf16.msra.mxu1 %v2426_v51 }
  0x81   : > { %2292 = vmatpush3.bf16.msra.mxu0 %v2425_v46  ;;  %2215 = vmatprep.subr.bf16.mxu1 %v2428_v49 }
  0x82   : > { %2293 = vmatprep.subr.bf16.mxu0 %v2427_v11 }
  0x84   : > { %2216 = vmatpush3.bf16.msra.mxu1 %v2428_v49 }
  0x85   : > { %2294 = vmatpush3.bf16.msra.mxu0 %v2427_v11 }
  0x86   : > { %2295 = vmatprep.subr.bf16.mxu0 %v2429_v0 }
  0x87   : > { %2218 = vmatmul.mubr.bf16.vlgmr.msra.gmra.mrb[0].mxu1 %v2431_v1 }
  0x89   : > { %2296 = vmatpush3.bf16.msra.mxu0 %v2429_v0 }
  0x8a   : > { %2301 = vmatprep.subr.bf16.mxu0 %v2432_v8 }
  0x8c   : > { %2298 = vmatmul.mubr.bf16.vlgmr.msra.gmra.mrb[0].mxu0 %v2005_v9 }
  0x8d   : > { %2302 = vmatpush3.bf16.msra.mxu0 %v2432_v8  ;;  %2317 = vmatprep.mubr.bf16.mxu0 %v2038_v10 }
  0x8e   : > { %2303 = vmatprep.subr.bf16.mxu0 %v2433_v38 }
  0x91   : > { %2304 = vmatpush3.bf16.msra.mxu0 %v2433_v38 }
  0x92   : > { %2305 = vmatprep.subr.bf16.mxu0 %v2434_v14 }
  0x95   : > { %2306 = vmatpush3.bf16.msra.mxu0 %v2434_v14 }
  0x96   : > { %2307 = vmatprep.subr.bf16.mxu0 %v2435_v17 }
  0x99   : > { %2308 = vmatpush3.bf16.msra.mxu0 %v2435_v17 }
  0x9a   : > { %2309 = vmatprep.subr.bf16.mxu0 %v2436_v18 }
  0x9d   : > { %2310 = vmatpush3.bf16.msra.mxu0 %v2436_v18 }
  0x9e   : > { %2311 = vmatprep.subr.bf16.mxu0 %v2437_v19 }
  0xa1   : > { %2312 = vmatpush3.bf16.msra.mxu0 %v2437_v19 }
  0xa2   : > { %2313 = vmatprep.subr.bf16.mxu0 %v2438_v20 }
  0xa5   : > { %2314 = vmatpush3.bf16.msra.mxu0 %v2438_v20 }
  0xa6   : > { %2315 = vmatprep.subr.bf16.mxu0 %v2439_v16 }
  0xa9   : > { %2316 = vmatpush3.bf16.msra.mxu0 %v2439_v16 }
  0xac   : > { %2318 = vmatmul.mubr.bf16.vlgmr.msra.gmra.mrb[0].mxu0 %v2039_v27 }
 0x15a   : > { %v2219_v28 = vpop.f32.mrb[0].mxu1 }
 0x15b   : > { %v803_v29 = vpop.f32.mrb[1].mxu1 }
 0x15c   : > { %v2220_v30 = vpop.f32.mrb[2].mxu1 }
 0x15d   : > { %v806_v21 = vpop.f32.mrb[3].mxu1 }
 0x17f   : > { %v2319_v32 = vpop.f32.mrb[0].mxu0 }
 0x180   : > { %v2321_v33 = vadd.f32 %v2319_v32, %v2219_v28  ;;  %v1626_v35 = vpop.f32.mrb[1].mxu0 }
 0x181   : > { %v2322_v36 = vadd.f32 %v1626_v35, %v803_v29  ;;  %v2320_v37 = vpop.f32.mrb[2].mxu0 }
 0x182   : > { %1647 = vst [vmem:[%s208_s28 + $0x10] sm:$0xff] %v2321_v33  ;;  %v2323_v59 = vadd.f32 %v2320_v37, %v2220_v30  ;;  %v1629_v39 = vpop.f32.mrb[3].mxu0  ;;  %v1661_v51 = vmul.f32 %v2321_v33, %v2321_v33 }
 0x183   : > { %1645 = vst [vmem:[%s208_s28] sm:$0xff] %v2322_v36  ;;  %v2324_v40 = vadd.f32 %v1629_v39, %v806_v21  ;;  %v1659_v60 = vmul.f32 %v2322_v36, %v2322_v36 }
 0x184   : > { %1648 = vst [vmem:[%s208_s28 + $0x18] sm:$0xff] %v2323_v59  ;;  %v1662_v44 = vmul.f32 %v2323_v59, %v2323_v59 }
 0x185   : > { %1646 = vst [vmem:[%s208_s28 + $0x8] sm:$0xff] %v2324_v40  ;;  %v1649_v41 = vadd.f32 %v2324_v40, %v2322_v36  ;;  %v1660_v42 = vmul.f32 %v2324_v40, %v2324_v40 }
 0x187   : > { %v1650_v55 = vadd.f32 %v2321_v33, %v1649_v41  ;;  %v1663_v43 = vadd.f32 %v1660_v42, %v1659_v60 }
 0x189   : > { %v1651_v45 = vadd.f32 %v2323_v59, %v1650_v55  ;;  %v1664_v46 = vadd.f32 %v1663_v43, %v1661_v51 }
 0x18b   : > { %v1652_v47 = vrot.slane %v1651_v45, 4  ;;  %v1665_v48 = vadd.f32 %v1664_v46, %v1662_v44 }
 0x18d   : > { %v1653_v49 = vadd.f32 %v1652_v47, %v1651_v45  ;;  %v1666_v50 = vrot.slane %v1665_v48, 4 }
 0x18f   : > { %v1654_v52 = vrot.slane %v1653_v49, 2  ;;  %v1667_v53 = vadd.f32 %v1666_v50, %v1665_v48 }
 0x191   : > { %v1655_v54 = vadd.f32 %v1654_v52, %v1653_v49  ;;  %v1668_v11 = vrot.slane %v1667_v53, 2 }
 0x193   : > { %v1656_v12 = vrot.slane %v1655_v54, 1  ;;  %v1669_v57 = vadd.f32 %v1668_v11, %v1667_v53 }
 0x195   : > { %v1657_v58 = vadd.f32 %v1656_v12, %v1655_v54  ;;  %v1670_v61 = vrot.slane %v1669_v57, 1 }
 0x197   : > { %1658 = vst [vmem:[%s211_s5] sm:$0x1] %v1657_v58  ;;  %v1671_v62 = vadd.f32 %v1670_v61, %v1669_v57 }
 0x199   : > { %1672 = vst [vmem:[%s214_s8] sm:$0x1] %v1671_v62 }
 0x19a PF: > { %s15_s15 = sadd.s32 1, %s2446_s15  }
 0x19b   : > { %p12_p4 = scmp.ge.s32.totalorder %s15_s15, 4  }
 0x19d   :  { %14 = sbr.rel (!%p12_p4) target bundleno = 1 (0x1), region = 92 }

</bundles_post_ra>
